<compile_context>
chip_gen: v6e
topology: v6e:2x2x1
jax: 0.10.0
libtpu: 0.0.40
codegen_flags: <defaults>
</compile_context>

<pallas_src>
import functools

import jax
import jax.numpy as jnp
from jax.experimental import pallas as pl
from jax.experimental.pallas import tpu as pltpu

LANE = 128


def _round_up(x, m):
    return ((x + m - 1) // m) * m


def _pad_to(a, size, axis):
    if a.shape[axis] == size:
        return a
    pads = [(0, 0)] * a.ndim
    pads[axis] = (0, size - a.shape[axis])
    return jnp.pad(a, pads)


def _apply_act(x, act):
    if act == "silu":
        return x * jax.nn.sigmoid(x)
    if act == "sigmoid":
        return jax.nn.sigmoid(x)
    return x


# ----------------------- generation-aware knobs ------------------------------

@functools.lru_cache(maxsize=None)
def _num_tensorcores():
    """2 TensorCores only on v7x; v5e/v6e are single-TC."""
    try:
        kind = jax.devices()[0].device_kind.lower()
    except Exception:
        return 1
    return 2 if "v7" in kind else 1


@functools.lru_cache(maxsize=None)
def _vmem_limit():
    """Scoped-VMEM budget: ~3/4 of physical VMEM, clamped to [32, 96] MiB."""
    try:
        cap = int(pltpu.get_tpu_info().vmem_capacity_bytes)
    except Exception:
        cap = 64 * 1024 * 1024           # conservative (v7x physical)
    return max(32 * 1024 * 1024, min(cap * 3 // 4, 96 * 1024 * 1024))


def _pick_tm(M):
    """Matmul M-tile: one step on single-TC chips, >=2 parallel steps on v7x."""
    if M > 1024:
        return 512
    if _num_tensorcores() >= 2 and M >= 256:
        return _round_up(-(-M // 2), 8)
    return max(8, _round_up(M, 8))


# --------------------- kernel 1: tiled matmul + bias + act -------------------

def _matmul_kernel(x_ref, w_ref, b_ref, o_ref, *, act):
    acc = jnp.dot(x_ref[...], w_ref[...], preferred_element_type=jnp.float32)
    acc = acc + b_ref[...]
    o_ref[...] = _apply_act(acc, act).astype(o_ref.dtype)


def matmul_bias_act(x, w, b, act="none", out_dtype=jnp.bfloat16):
    """[M,K] @ [K,N] + bias + activation.  M-tiled, ragged tail zero-padded."""
    M, K = x.shape
    _, N = w.shape
    tm = _pick_tm(M)
    Mp = _round_up(M, tm)
    if Mp != M:
        x = _pad_to(x, Mp, 0)
    b2 = b.reshape(1, N).astype(jnp.float32)
    out = pl.pallas_call(
        functools.partial(_matmul_kernel, act=act),
        out_shape=jax.ShapeDtypeStruct((Mp, N), out_dtype),
        grid=(Mp // tm,),
        in_specs=[
            pl.BlockSpec((tm, K), lambda i: (i, 0)),
            pl.BlockSpec((K, N), lambda i: (0, 0)),
            pl.BlockSpec((1, N), lambda i: (0, 0)),
        ],
        out_specs=pl.BlockSpec((tm, N), lambda i: (i, 0)),
        compiler_params=pltpu.CompilerParams(
            dimension_semantics=("parallel",),
            vmem_limit_bytes=_vmem_limit()),
    )(x, w, b2)
    return out[:M] if Mp != M else out


# ---- kernel 2: fused MBConv: expand + dw3x3 + SiLU + GAP + SE + proj + res --

def _mbconv_kernel(y_ref, exp_w_ref, exp_b_ref, dw_w_ref, dw_b_ref,
                   se1_w_ref, se1_b_ref, se2_w_ref, se2_b_ref, se_mask_ref,
                   proj_w_ref, proj_b_ref, o_ref, pad_ref, *, H, W):
    HW = H * W
    C = pad_ref.shape[-1]                                   # midp (expanded, padded)

    # ---- expand 1x1 (MXU) + folded BN + SiLU ----
    y = y_ref[0]                                            # [HW, C0p] bf16
    h = jnp.dot(y, exp_w_ref[...], preferred_element_type=jnp.float32)
    h = h + exp_b_ref[...]
    h = h * jax.nn.sigmoid(h)                               # SiLU, f32 [HW, C]

    # ---- build halo-padded slab in VMEM (no XLA pad / HBM round-trip) ----
    pad_ref[...] = jnp.zeros_like(pad_ref)
    pad_ref[1:H + 1, 1:W + 1, :] = h.reshape(H, W, C).astype(pad_ref.dtype)

    # ---- depthwise 3x3 + bias + SiLU (f32 accumulate) ----
    # Only 3 sublane-shifted slices (one per kw); the kh shift is a free
    # leading-dim slice.  Taps stay bf16 until the FMA.
    wdw = dw_w_ref[...].astype(jnp.float32)                 # [9, C]
    acc = jnp.zeros((H, W, C), jnp.float32)
    for kw in range(3):
        slab = pad_ref[:, kw:kw + W, :]                     # [H+2, W, C] bf16
        for kh in range(3):
            tap = slab[kh:kh + H].astype(jnp.float32)       # [H, W, C]
            widx = kh * 3 + kw
            acc = acc + tap * wdw[widx:widx + 1, :]
    acc = acc + dw_b_ref[...]
    act = acc * jax.nn.sigmoid(acc)                         # SiLU [H, W, C]
    act2 = act.reshape(HW, C)

    # ---- global average pool + SE MLP (tiny, rides the VPU/MXU slack) ----
    gap = jnp.mean(act2, axis=0, keepdims=True)             # [1, C] f32
    s = jnp.dot(gap.astype(jnp.bfloat16), se1_w_ref[...],
                preferred_element_type=jnp.float32) + se1_b_ref[...]
    s = s * jax.nn.sigmoid(s)                               # SiLU
    s = jnp.dot(s.astype(jnp.bfloat16), se2_w_ref[...],
                preferred_element_type=jnp.float32) + se2_b_ref[...]
    gate = jax.nn.sigmoid(s) * se_mask_ref[...]             # mask padded lanes

    # ---- SE scale + 1x1 projection (MXU) + residual (no activation) ----
    hs = (act2 * gate).astype(jnp.bfloat16)                 # [HW, C] bf16
    out = jnp.dot(hs, proj_w_ref[...], preferred_element_type=jnp.float32)
    out = out + proj_b_ref[...] + y.astype(jnp.float32)
    o_ref[0] = out.astype(o_ref.dtype)


def mbconv_block(y, H, W, p):
    """y: [N, HW, C0p] bf16 (stem output = residual) -> [N, HW, C0p] bf16."""
    N, HW, C0p = y.shape
    midp = p["exp_w"].shape[1]
    sep = p["se1_w"].shape[1]
    kern = functools.partial(_mbconv_kernel, H=H, W=W)
    return pl.pallas_call(
        kern,
        out_shape=jax.ShapeDtypeStruct((N, HW, C0p), jnp.bfloat16),
        grid=(N,),
        in_specs=[
            pl.BlockSpec((1, HW, C0p), lambda n: (n, 0, 0)),
            pl.BlockSpec((C0p, midp), lambda n: (0, 0)),
            pl.BlockSpec((1, midp), lambda n: (0, 0)),
            pl.BlockSpec((9, midp), lambda n: (0, 0)),
            pl.BlockSpec((1, midp), lambda n: (0, 0)),
            pl.BlockSpec((midp, sep), lambda n: (0, 0)),
            pl.BlockSpec((1, sep), lambda n: (0, 0)),
            pl.BlockSpec((sep, midp), lambda n: (0, 0)),
            pl.BlockSpec((1, midp), lambda n: (0, 0)),
            pl.BlockSpec((1, midp), lambda n: (0, 0)),      # SE lane mask
            pl.BlockSpec((midp, C0p), lambda n: (0, 0)),
            pl.BlockSpec((1, C0p), lambda n: (0, 0)),
        ],
        out_specs=pl.BlockSpec((1, HW, C0p), lambda n: (n, 0, 0)),
        scratch_shapes=[pltpu.VMEM((H + 2, W + 2, midp), jnp.bfloat16)],
        compiler_params=pltpu.CompilerParams(
            dimension_semantics=("parallel",),
            vmem_limit_bytes=_vmem_limit()),
    )(y,
      p["exp_w"], p["exp_b"].reshape(1, midp).astype(jnp.float32),
      p["dw_w"], p["dw_b"].reshape(1, midp).astype(jnp.float32),
      p["se1_w"], p["se1_b"].reshape(1, sep).astype(jnp.float32),
      p["se2_w"], p["se2_b"].reshape(1, midp).astype(jnp.float32),
      p["se_mask"].reshape(1, midp).astype(jnp.float32),
      p["proj_w"], p["proj_b"].reshape(1, C0p).astype(jnp.float32))


# ------- kernel 3: head 1x1 conv + SiLU + global avg pool + classifier -------

def _head_kernel(x_ref, hw_ref, hb_ref, fw_ref, fb_ref, o_ref, *, N, HW):
    C0 = x_ref.shape[-1]
    Ch = hw_ref.shape[-1]
    x = x_ref[...].reshape(N * HW, C0)                      # whole batch: M = N*HW
    y = jnp.dot(x, hw_ref[...], preferred_element_type=jnp.float32)
    y = y + hb_ref[...]
    y = y * jax.nn.sigmoid(y)                               # SiLU, stays in VMEM
    pooled = jnp.mean(y.reshape(N, HW, Ch), axis=1)         # [N, Ch] per-image GAP
    logits = jnp.dot(pooled.astype(jnp.bfloat16), fw_ref[...],
                     preferred_element_type=jnp.float32)
    o_ref[...] = (logits + fb_ref[...]).astype(o_ref.dtype)


def head_pool_classify(x, head_w, head_b, fc_w, fc_b):
    """x: [N, HW, C0p] bf16 -> padded logits [N, ncls_pad] f32 (one grid step).

    Whole batch in a single step keeps the MXU M-dim >= N*HW; fine for small N.
    """
    N, HW, C0 = x.shape
    Ch = head_w.shape[1]
    ncls = fc_w.shape[1]
    kern = functools.partial(_head_kernel, N=N, HW=HW)
    return pl.pallas_call(
        kern,
        out_shape=jax.ShapeDtypeStruct((N, ncls), jnp.float32),
        grid=(1,),
        in_specs=[
            pl.BlockSpec((N, HW, C0), lambda i: (0, 0, 0)),
            pl.BlockSpec((C0, Ch), lambda i: (0, 0)),
            pl.BlockSpec((1, Ch), lambda i: (0, 0)),
            pl.BlockSpec((Ch, ncls), lambda i: (0, 0)),
            pl.BlockSpec((1, ncls), lambda i: (0, 0)),
        ],
        out_specs=pl.BlockSpec((N, ncls), lambda i: (0, 0)),
        compiler_params=pltpu.CompilerParams(
            dimension_semantics=("arbitrary",),
            vmem_limit_bytes=_vmem_limit()),
    )(x, head_w, head_b.reshape(1, Ch).astype(jnp.float32),
      fc_w, fc_b.reshape(1, ncls).astype(jnp.float32))


# --------------------------------- JAX glue ----------------------------------

def extract_patches_3x3(x, stride):
    """x: [N, H, W, C] (bf16) -> [N, Ho, Wo, 9, C] (3x3, padding=1).  Stem only.

    TODO(synk): fuse the stem im2col+matmul into a Pallas kernel using the same
    VMEM-halo/shift trick as the MBConv dwconv (strided taps).
    """
    N, H, W, C = x.shape
    xp = jnp.pad(x, ((0, 0), (1, 1), (1, 1), (0, 0)))
    Ho = (H + 2 - 3) // stride + 1
    Wo = (W + 2 - 3) // stride + 1
    taps = []
    for kh in range(3):
        for kw in range(3):
            sl = jax.lax.slice(
                xp,
                (0, kh, kw, 0),
                (N, kh + (Ho - 1) * stride + 1, kw + (Wo - 1) * stride + 1, C),
                (1, stride, stride, 1))
            taps.append(sl)
    return jnp.stack(taps, axis=3)


def _fold_bn(w, gamma, beta, mean, var, eps=1e-5):
    scale = gamma / jnp.sqrt(var + eps)     # output channels on w's last axis
    return w * scale, beta - mean * scale


def init_params(key, cin=3, c0=16, expand=4, se_ratio=0.25, chead=64, nclass=10):
    keys = jax.random.split(key, 8)
    mid = c0 * expand
    se = max(1, int(c0 * se_ratio))
    c0p = _round_up(c0, LANE)
    midp = _round_up(mid, LANE)
    sep = _round_up(se, 8)
    cheadp = _round_up(chead, LANE)
    nclsp = _round_up(nclass, LANE)
    # NOTE: at real B2 channel widths on v6e/v7x, pad K/N to multiples of 256
    # (256-wide MXU); 128 is right for these miniature widths and for v5e.

    def conv_bn(k, kin, kout, kout_p):
        kw_, kg_ = jax.random.split(k)
        w = 0.05 * jax.random.normal(kw_, (kin, kout), jnp.float32)
        gamma = 1.0 + 0.01 * jax.random.normal(kg_, (kout,), jnp.float32)
        beta = jnp.zeros((kout,), jnp.float32)
        mean = jnp.zeros((kout,), jnp.float32)
        var = jnp.ones((kout,), jnp.float32)
        w, b = _fold_bn(w, gamma, beta, mean, var)
        # zero-pad output channels to a lane-dense width
        return _pad_to(w, kout_p, 1).astype(jnp.bfloat16), _pad_to(b, kout_p, 0)

    p = {}
    p["stem_w"], p["stem_b"] = conv_bn(keys[0], 9 * cin, c0, c0p)       # 3x3 s2
    w, b = conv_bn(keys[1], c0, mid, midp)                              # 1x1 expand
    p["exp_w"], p["exp_b"] = _pad_to(w, c0p, 0), b
    p["dw_w"], p["dw_b"] = conv_bn(keys[2], 9, mid, midp)               # dw 3x3
    p["se1_w"] = _pad_to(_pad_to(
        0.05 * jax.random.normal(keys[3], (mid, se), jnp.float32), sep, 1),
        midp, 0).astype(jnp.bfloat16)
    p["se1_b"] = jnp.zeros((sep,), jnp.float32)
    p["se2_w"] = _pad_to(_pad_to(
        0.05 * jax.random.normal(keys[4], (se, mid), jnp.float32), midp, 1),
        sep, 0).astype(jnp.bfloat16)
    p["se2_b"] = jnp.zeros((midp,), jnp.float32)
    # explicit SE-gate mask for padded lanes (sigmoid(0)=0.5 would otherwise
    # rely on the zero-padded-weight invariant downstream)
    p["se_mask"] = (jnp.arange(midp) < mid).astype(jnp.float32)
    w, b = conv_bn(keys[5], mid, c0, c0p)                               # 1x1 project
    p["proj_w"], p["proj_b"] = _pad_to(w, midp, 0), b
    w, b = conv_bn(keys[6], c0, chead, cheadp)                          # 1x1 head
    p["head_w"], p["head_b"] = _pad_to(w, c0p, 0), b
    p["fc_w"] = _pad_to(_pad_to(
        0.05 * jax.random.normal(keys[7], (chead, nclass), jnp.float32),
        nclsp, 1), cheadp, 0).astype(jnp.bfloat16)
    p["fc_b"] = jnp.zeros((nclsp,), jnp.float32)
    return p


def effnetb2_forward(x_nchw, params, nclass=10):
    # NCHW -> NHWC, cast to bf16 before the transpose / im2col (halves copies)
    x = jnp.transpose(x_nchw.astype(jnp.bfloat16), (0, 2, 3, 1))
    N, H, W, Cin = x.shape

    # ---- stem: conv3x3 s2 + folded BN + SiLU (bf16 im2col + MXU matmul) ----
    pat = extract_patches_3x3(x, stride=2)                   # [N,Ho,Wo,9,Cin] bf16
    _, Ho, Wo, _, _ = pat.shape
    P = N * Ho * Wo
    y = matmul_bias_act(pat.reshape(P, 9 * Cin),
                        params["stem_w"], params["stem_b"], act="silu")
    C0p = params["stem_w"].shape[1]
    HW = Ho * Wo
    y3 = y.reshape(N, HW, C0p)                               # residual source

    # ---- fused MBConv: expand -> dw3x3 -> SiLU -> GAP -> SE -> proj -> +res ----
    out = mbconv_block(y3, Ho, Wo, params)                   # [N, HW, C0p] bf16

    # ---- head 1x1 + SiLU + global avg pool + classifier (fused, 1 step) ----
    logits_p = head_pool_classify(out, params["head_w"], params["head_b"],
                                  params["fc_w"], params["fc_b"])
    return logits_p[:, :nclass]                              # [N, nclass] f32


if __name__ == "__main__":
    key = jax.random.PRNGKey(0)
    k_x, k_p = jax.random.split(key)
    # Small NCHW input consistent with an image classifier forward.
    x = jax.random.normal(k_x, (2, 3, 32, 32), jnp.float32)
    params = init_params(k_p)
    fwd = jax.jit(effnetb2_forward)
    logits = fwd(x, params)
    jax.block_until_ready(logits)
    assert logits.shape == (2, 10) and logits.dtype == jnp.float32
    print("KERNEL_OK")
</pallas_src>

<mosaic_0001>
module attributes {stable_mosaic.version = 11 : i64} {
  func.func @_matmul_kernel(%arg0: i32, %arg1: memref<512x27xbf16, #tpu.memory_space<vmem>>, %arg2: memref<27x128xbf16, #tpu.memory_space<vmem>>, %arg3: memref<1x128xf32, #tpu.memory_space<vmem>>, %arg4: memref<512x128xbf16, #tpu.memory_space<vmem>>) attributes {dimension_semantics = [#tpu.dimension_semantics<parallel>], iteration_bounds = array<i64: 1>, scalar_prefetch = 0 : i64, scratch_operands = 0 : i64, tpu.core_type = #tpu.core_type<tc>, window_params = [{transform_indices = @transform_0, window_bounds = array<i64: 512, 27>}, {pipeline_mode = #tpu.pipeline_mode<synchronous>, transform_indices = @transform_1, window_bounds = array<i64: 27, 128>}, {pipeline_mode = #tpu.pipeline_mode<synchronous>, transform_indices = @transform_2, window_bounds = array<i64: 1, 128>}, {transform_indices = @transform_3, window_bounds = array<i64: 512, 128>}]} {
    %c0 = arith.constant 0 : index
    %c0_0 = arith.constant 0 : index
    %0 = vector.load %arg1[%c0, %c0_0] : memref<512x27xbf16, #tpu.memory_space<vmem>>, vector<512x27xbf16>
    %c0_1 = arith.constant 0 : index
    %c0_2 = arith.constant 0 : index
    %1 = vector.load %arg2[%c0_1, %c0_2] : memref<27x128xbf16, #tpu.memory_space<vmem>>, vector<27x128xbf16>
    %cst = arith.constant dense<0.000000e+00> : vector<512x128xf32>
    %2 = tpu.matmul %0, %1, %cst {dimension_numbers = #tpu.dot_dimension_numbers<[1], [0], [0], [1], [0, 0, 1, 1], [], []>} : vector<512x27xbf16>, vector<27x128xbf16>, vector<512x128xf32> -> vector<512x128xf32>
    %c0_3 = arith.constant 0 : index
    %c0_4 = arith.constant 0 : index
    %3 = vector.load %arg3[%c0_3, %c0_4] : memref<1x128xf32, #tpu.memory_space<vmem>>, vector<1x128xf32>
    %4 = vector.broadcast %3 : vector<1x128xf32> to vector<512x128xf32>
    %5 = arith.addf %2, %4 : vector<512x128xf32>
    %6 = arith.negf %5 : vector<512x128xf32>
    %7 = math.exp %6 : vector<512x128xf32>
    %cst_5 = arith.constant 1.000000e+00 : f32
    %8 = vector.broadcast %cst_5 : f32 to vector<512x128xf32>
    %9 = arith.addf %8, %7 : vector<512x128xf32>
    %10 = arith.divf %8, %9 : vector<512x128xf32>
    %11 = arith.mulf %5, %10 : vector<512x128xf32>
    %12 = arith.truncf %11 : vector<512x128xf32> to vector<512x128xbf16>
    %c0_6 = arith.constant 0 : index
    %c0_7 = arith.constant 0 : index
    %13 = vector.load %arg4[%c0_6, %c0_7] : memref<512x128xbf16, #tpu.memory_space<vmem>>, vector<512x128xbf16>
    tpu.vector_store %arg4[%c0_6, %c0_7], %12 {strides = array<i32>} : memref<512x128xbf16, #tpu.memory_space<vmem>>, vector<512x128xbf16>,
    return
  }
  func.func @transform_0(%arg0: i32) -> (i32, i32) {
    %c0_i32 = arith.constant 0 : i32
    %c0_i32_0 = arith.constant 0 : i32
    return %arg0, %c0_i32 : i32, i32
  }
  func.func @transform_1(%arg0: i32) -> (i32, i32) {
    %c0_i32 = arith.constant 0 : i32
    %c0_i32_0 = arith.constant 0 : i32
    %c0_i32_1 = arith.constant 0 : i32
    return %c0_i32, %c0_i32_0 : i32, i32
  }
  func.func @transform_2(%arg0: i32) -> (i32, i32) {
    %c0_i32 = arith.constant 0 : i32
    %c0_i32_0 = arith.constant 0 : i32
    %c0_i32_1 = arith.constant 0 : i32
    return %c0_i32, %c0_i32_0 : i32, i32
  }
  func.func @transform_3(%arg0: i32) -> (i32, i32) {
    %c0_i32 = arith.constant 0 : i32
    %c0_i32_0 = arith.constant 0 : i32
    return %arg0, %c0_i32 : i32, i32
  }
}

module attributes {stable_mosaic.version = 11 : i64} {
  func.func @_head_kernel(%arg0: i32, %arg1: memref<2x256x128xbf16, #tpu.memory_space<vmem>>, %arg2: memref<128x128xbf16, #tpu.memory_space<vmem>>, %arg3: memref<1x128xf32, #tpu.memory_space<vmem>>, %arg4: memref<128x128xbf16, #tpu.memory_space<vmem>>, %arg5: memref<1x128xf32, #tpu.memory_space<vmem>>, %arg6: memref<2x128xf32, #tpu.memory_space<vmem>>) attributes {dimension_semantics = [#tpu.dimension_semantics<arbitrary>], iteration_bounds = array<i64: 1>, scalar_prefetch = 0 : i64, scratch_operands = 0 : i64, tpu.core_type = #tpu.core_type<tc>, window_params = [{pipeline_mode = #tpu.pipeline_mode<synchronous>, transform_indices = @transform_0, window_bounds = array<i64: 2, 256, 128>}, {pipeline_mode = #tpu.pipeline_mode<synchronous>, transform_indices = @transform_1, window_bounds = array<i64: 128, 128>}, {pipeline_mode = #tpu.pipeline_mode<synchronous>, transform_indices = @transform_2, window_bounds = array<i64: 1, 128>}, {pipeline_mode = #tpu.pipeline_mode<synchronous>, transform_indices = @transform_3, window_bounds = array<i64: 128, 128>}, {pipeline_mode = #tpu.pipeline_mode<synchronous>, transform_indices = @transform_4, window_bounds = array<i64: 1, 128>}, {pipeline_mode = #tpu.pipeline_mode<synchronous>, transform_indices = @transform_5, window_bounds = array<i64: 2, 128>}]} {
    %c0 = arith.constant 0 : index
    %c0_0 = arith.constant 0 : index
    %c0_1 = arith.constant 0 : index
    %0 = vector.load %arg1[%c0, %c0_0, %c0_1] : memref<2x256x128xbf16, #tpu.memory_space<vmem>>, vector<2x256x128xbf16>
    %1 = vector.shape_cast %0 : vector<2x256x128xbf16> to vector<512x128xbf16>
    %c0_2 = arith.constant 0 : index
    %c0_3 = arith.constant 0 : index
    %2 = vector.load %arg2[%c0_2, %c0_3] : memref<128x128xbf16, #tpu.memory_space<vmem>>, vector<128x128xbf16>
    %cst = arith.constant dense<0.000000e+00> : vector<512x128xf32>
    %3 = tpu.matmul %1, %2, %cst {dimension_numbers = #tpu.dot_dimension_numbers<[1], [0], [0], [1], [0, 0, 1, 1], [], []>} : vector<512x128xbf16>, vector<128x128xbf16>, vector<512x128xf32> -> vector<512x128xf32>
    %c0_4 = arith.constant 0 : index
    %c0_5 = arith.constant 0 : index
    %4 = vector.load %arg3[%c0_4, %c0_5] : memref<1x128xf32, #tpu.memory_space<vmem>>, vector<1x128xf32>
    %5 = vector.broadcast %4 : vector<1x128xf32> to vector<512x128xf32>
    %6 = arith.addf %3, %5 : vector<512x128xf32>
    %7 = arith.negf %6 : vector<512x128xf32>
    %8 = math.exp %7 : vector<512x128xf32>
    %cst_6 = arith.constant 1.000000e+00 : f32
    %9 = vector.broadcast %cst_6 : f32 to vector<512x128xf32>
    %10 = arith.addf %9, %8 : vector<512x128xf32>
    %11 = arith.divf %9, %10 : vector<512x128xf32>
    %12 = arith.mulf %6, %11 : vector<512x128xf32>
    %13 = vector.shape_cast %12 : vector<512x128xf32> to vector<2x256x128xf32>
    %cst_7 = arith.constant dense<0.000000e+00> : vector<2x128xf32>
    %14 = vector.multi_reduction <add>, %13, %cst_7 [1] : vector<2x256x128xf32> to vector<2x128xf32>
    %cst_8 = arith.constant 2.560000e+02 : f32
    %15 = vector.broadcast %cst_8 : f32 to vector<2x128xf32>
    %16 = arith.divf %14, %15 : vector<2x128xf32>
    %17 = arith.truncf %16 : vector<2x128xf32> to vector<2x128xbf16>
    %c0_9 = arith.constant 0 : index
    %c0_10 = arith.constant 0 : index
    %18 = vector.load %arg4[%c0_9, %c0_10] : memref<128x128xbf16, #tpu.memory_space<vmem>>, vector<128x128xbf16>
    %cst_11 = arith.constant dense<0.000000e+00> : vector<2x128xf32>
    %19 = tpu.matmul %17, %18, %cst_11 {dimension_numbers = #tpu.dot_dimension_numbers<[1], [0], [0], [1], [0, 0, 1, 1], [], []>} : vector<2x128xbf16>, vector<128x128xbf16>, vector<2x128xf32> -> vector<2x128xf32>
    %c0_12 = arith.constant 0 : index
    %c0_13 = arith.constant 0 : index
    %20 = vector.load %arg5[%c0_12, %c0_13] : memref<1x128xf32, #tpu.memory_space<vmem>>, vector<1x128xf32>
    %21 = vector.broadcast %20 : vector<1x128xf32> to vector<2x128xf32>
    %22 = arith.addf %19, %21 : vector<2x128xf32>
    %c0_14 = arith.constant 0 : index
    %c0_15 = arith.constant 0 : index
    %23 = vector.load %arg6[%c0_14, %c0_15] : memref<2x128xf32, #tpu.memory_space<vmem>>, vector<2x128xf32>
    tpu.vector_store %arg6[%c0_14, %c0_15], %22 {strides = array<i32>} : memref<2x128xf32, #tpu.memory_space<vmem>>, vector<2x128xf32>,
    return
  }
  func.func @transform_0(%arg0: i32) -> (i32, i32, i32) {
    %c0_i32 = arith.constant 0 : i32
    %c0_i32_0 = arith.constant 0 : i32
    %c0_i32_1 = arith.constant 0 : i32
    %c0_i32_2 = arith.constant 0 : i32
    return %c0_i32, %c0_i32_0, %c0_i32_1 : i32, i32, i32
  }
  func.func @transform_1(%arg0: i32) -> (i32, i32) {
    %c0_i32 = arith.constant 0 : i32
    %c0_i32_0 = arith.constant 0 : i32
    %c0_i32_1 = arith.constant 0 : i32
    return %c0_i32, %c0_i32_0 : i32, i32
  }
  func.func @transform_2(%arg0: i32) -> (i32, i32) {
    %c0_i32 = arith.constant 0 : i32
    %c0_i32_0 = arith.constant 0 : i32
    %c0_i32_1 = arith.constant 0 : i32
    return %c0_i32, %c0_i32_0 : i32, i32
  }
  func.func @transform_3(%arg0: i32) -> (i32, i32) {
    %c0_i32 = arith.constant 0 : i32
    %c0_i32_0 = arith.constant 0 : i32
    %c0_i32_1 = arith.constant 0 : i32
    return %c0_i32, %c0_i32_0 : i32, i32
  }
  func.func @transform_4(%arg0: i32) -> (i32, i32) {
    %c0_i32 = arith.constant 0 : i32
    %c0_i32_0 = arith.constant 0 : i32
    %c0_i32_1 = arith.constant 0 : i32
    return %c0_i32, %c0_i32_0 : i32, i32
  }
  func.func @transform_5(%arg0: i32) -> (i32, i32) {
    %c0_i32 = arith.constant 0 : i32
    %c0_i32_0 = arith.constant 0 : i32
    %c0_i32_1 = arith.constant 0 : i32
    return %c0_i32, %c0_i32_0 : i32, i32
  }
}

module attributes {stable_mosaic.version = 11 : i64} {
  func.func @_mbconv_kernel(%arg0: i32, %arg1: memref<1x256x128xbf16, #tpu.memory_space<vmem>>, %arg2: memref<128x128xbf16, #tpu.memory_space<vmem>>, %arg3: memref<1x128xf32, #tpu.memory_space<vmem>>, %arg4: memref<9x128xbf16, #tpu.memory_space<vmem>>, %arg5: memref<1x128xf32, #tpu.memory_space<vmem>>, %arg6: memref<128x8xbf16, #tpu.memory_space<vmem>>, %arg7: memref<1x8xf32, #tpu.memory_space<vmem>>, %arg8: memref<8x128xbf16, #tpu.memory_space<vmem>>, %arg9: memref<1x128xf32, #tpu.memory_space<vmem>>, %arg10: memref<1x128xf32, #tpu.memory_space<vmem>>, %arg11: memref<128x128xbf16, #tpu.memory_space<vmem>>, %arg12: memref<1x128xf32, #tpu.memory_space<vmem>>, %arg13: memref<1x256x128xbf16, #tpu.memory_space<vmem>>, %arg14: memref<18x18x128xbf16, #tpu.memory_space<vmem>>) attributes {dimension_semantics = [#tpu.dimension_semantics<parallel>], iteration_bounds = array<i64: 2>, scalar_prefetch = 0 : i64, scratch_operands = 1 : i64, tpu.core_type = #tpu.core_type<tc>, window_params = [{transform_indices = @transform_0, window_bounds = array<i64: 1, 256, 128>}, {pipeline_mode = #tpu.pipeline_mode<synchronous>, transform_indices = @transform_1, window_bounds = array<i64: 128, 128>}, {pipeline_mode = #tpu.pipeline_mode<synchronous>, transform_indices = @transform_2, window_bounds = array<i64: 1, 128>}, {pipeline_mode = #tpu.pipeline_mode<synchronous>, transform_indices = @transform_3, window_bounds = array<i64: 9, 128>}, {pipeline_mode = #tpu.pipeline_mode<synchronous>, transform_indices = @transform_4, window_bounds = array<i64: 1, 128>}, {pipeline_mode = #tpu.pipeline_mode<synchronous>, transform_indices = @transform_5, window_bounds = array<i64: 128, 8>}, {pipeline_mode = #tpu.pipeline_mode<synchronous>, transform_indices = @transform_6, window_bounds = array<i64: 1, 8>}, {pipeline_mode = #tpu.pipeline_mode<synchronous>, transform_indices = @transform_7, window_bounds = array<i64: 8, 128>}, {pipeline_mode = #tpu.pipeline_mode<synchronous>, transform_indices = @transform_8, window_bounds = array<i64: 1, 128>}, {pipeline_mode = #tpu.pipeline_mode<synchronous>, transform_indices = @transform_9, window_bounds = array<i64: 1, 128>}, {pipeline_mode = #tpu.pipeline_mode<synchronous>, transform_indices = @transform_10, window_bounds = array<i64: 128, 128>}, {pipeline_mode = #tpu.pipeline_mode<synchronous>, transform_indices = @transform_11, window_bounds = array<i64: 1, 128>}, {transform_indices = @transform_12, window_bounds = array<i64: 1, 256, 128>}]} {
    %c0 = arith.constant 0 : index
    %c0_0 = arith.constant 0 : index
    %c0_1 = arith.constant 0 : index
    %0 = vector.load %arg1[%c0, %c0_0, %c0_1] : memref<1x256x128xbf16, #tpu.memory_space<vmem>>, vector<1x256x128xbf16>
    %1 = vector.shape_cast %0 : vector<1x256x128xbf16> to vector<256x128xbf16>
    %c0_2 = arith.constant 0 : index
    %c0_3 = arith.constant 0 : index
    %2 = vector.load %arg2[%c0_2, %c0_3] : memref<128x128xbf16, #tpu.memory_space<vmem>>, vector<128x128xbf16>
    %cst = arith.constant dense<0.000000e+00> : vector<256x128xf32>
    %3 = tpu.matmul %1, %2, %cst {dimension_numbers = #tpu.dot_dimension_numbers<[1], [0], [0], [1], [0, 0, 1, 1], [], []>} : vector<256x128xbf16>, vector<128x128xbf16>, vector<256x128xf32> -> vector<256x128xf32>
    %c0_4 = arith.constant 0 : index
    %c0_5 = arith.constant 0 : index
    %4 = vector.load %arg3[%c0_4, %c0_5] : memref<1x128xf32, #tpu.memory_space<vmem>>, vector<1x128xf32>
    %5 = vector.broadcast %4 : vector<1x128xf32> to vector<256x128xf32>
    %6 = arith.addf %3, %5 : vector<256x128xf32>
    %7 = arith.negf %6 : vector<256x128xf32>
    %8 = math.exp %7 : vector<256x128xf32>
    %cst_6 = arith.constant 1.000000e+00 : f32
    %9 = vector.broadcast %cst_6 : f32 to vector<256x128xf32>
    %10 = arith.addf %9, %8 : vector<256x128xf32>
    %11 = arith.divf %9, %10 : vector<256x128xf32>
    %12 = arith.mulf %6, %11 : vector<256x128xf32>
    %cst_7 = arith.constant 0.000000e+00 : bf16
    %13 = vector.broadcast %cst_7 : bf16 to vector<18x18x128xbf16>
    %c0_8 = arith.constant 0 : index
    %c0_9 = arith.constant 0 : index
    %c0_10 = arith.constant 0 : index
    %14 = vector.load %arg14[%c0_8, %c0_9, %c0_10] : memref<18x18x128xbf16, #tpu.memory_space<vmem>>, vector<18x18x128xbf16>
    tpu.vector_store %arg14[%c0_8, %c0_9, %c0_10], %13 {strides = array<i32>} : memref<18x18x128xbf16, #tpu.memory_space<vmem>>, vector<18x18x128xbf16>,
    %15 = vector.shape_cast %12 : vector<256x128xf32> to vector<16x16x128xf32>
    %16 = arith.truncf %15 : vector<16x16x128xf32> to vector<16x16x128xbf16>
    %c1 = arith.constant 1 : index
    %c1_11 = arith.constant 1 : index
    %c0_12 = arith.constant 0 : index
    %17 = vector.load %arg14[%c1, %c1_11, %c0_12] : memref<18x18x128xbf16, #tpu.memory_space<vmem>>, vector<16x16x128xbf16>
    tpu.vector_store %arg14[%c1, %c1_11, %c0_12], %16 {strides = array<i32>} : memref<18x18x128xbf16, #tpu.memory_space<vmem>>, vector<16x16x128xbf16>,
    %c0_13 = arith.constant 0 : index
    %c0_14 = arith.constant 0 : index
    %18 = vector.load %arg4[%c0_13, %c0_14] : memref<9x128xbf16, #tpu.memory_space<vmem>>, vector<9x128xbf16>
    %19 = arith.extf %18 : vector<9x128xbf16> to vector<9x128xf32>
    %cst_15 = arith.constant 0.000000e+00 : f32
    %20 = vector.broadcast %cst_15 : f32 to vector<16x16x128xf32>
    %c0_16 = arith.constant 0 : index
    %c0_17 = arith.constant 0 : index
    %c0_18 = arith.constant 0 : index
    %21 = vector.load %arg14[%c0_16, %c0_17, %c0_18] : memref<18x18x128xbf16, #tpu.memory_space<vmem>>, vector<18x16x128xbf16>
    %22 = vector.extract_strided_slice %21 {offsets = [0, 0, 0], sizes = [16, 16, 128], strides = [1, 1, 1]} : vector<18x16x128xbf16> to vector<16x16x128xbf16>
    %23 = arith.extf %22 : vector<16x16x128xbf16> to vector<16x16x128xf32>
    %24 = vector.extract_strided_slice %19 {offsets = [0, 0], sizes = [1, 128], strides = [1, 1]} : vector<9x128xf32> to vector<1x128xf32>
    %25 = vector.shape_cast %24 : vector<1x128xf32> to vector<1x1x128xf32>
    %26 = vector.broadcast %25 : vector<1x1x128xf32> to vector<16x16x128xf32>
    %27 = arith.mulf %23, %26 : vector<16x16x128xf32>
    %28 = arith.addf %20, %27 : vector<16x16x128xf32>
    %29 = vector.extract_strided_slice %21 {offsets = [1, 0, 0], sizes = [16, 16, 128], strides = [1, 1, 1]} : vector<18x16x128xbf16> to vector<16x16x128xbf16>
    %30 = arith.extf %29 : vector<16x16x128xbf16> to vector<16x16x128xf32>
    %31 = vector.extract_strided_slice %19 {offsets = [3, 0], sizes = [1, 128], strides = [1, 1]} : vector<9x128xf32> to vector<1x128xf32>
    %32 = vector.shape_cast %31 : vector<1x128xf32> to vector<1x1x128xf32>
    %33 = vector.broadcast %32 : vector<1x1x128xf32> to vector<16x16x128xf32>
    %34 = arith.mulf %30, %33 : vector<16x16x128xf32>
    %35 = arith.addf %28, %34 : vector<16x16x128xf32>
    %36 = vector.extract_strided_slice %21 {offsets = [2, 0, 0], sizes = [16, 16, 128], strides = [1, 1, 1]} : vector<18x16x128xbf16> to vector<16x16x128xbf16>
    %37 = arith.extf %36 : vector<16x16x128xbf16> to vector<16x16x128xf32>
    %38 = vector.extract_strided_slice %19 {offsets = [6, 0], sizes = [1, 128], strides = [1, 1]} : vector<9x128xf32> to vector<1x128xf32>
    %39 = vector.shape_cast %38 : vector<1x128xf32> to vector<1x1x128xf32>
    %40 = vector.broadcast %39 : vector<1x1x128xf32> to vector<16x16x128xf32>
    %41 = arith.mulf %37, %40 : vector<16x16x128xf32>
    %42 = arith.addf %35, %41 : vector<16x16x128xf32>
    %c0_19 = arith.constant 0 : index
    %c1_20 = arith.constant 1 : index
    %c0_21 = arith.constant 0 : index
    %43 = vector.load %arg14[%c0_19, %c1_20, %c0_21] : memref<18x18x128xbf16, #tpu.memory_space<vmem>>, vector<18x16x128xbf16>
    %44 = vector.extract_strided_slice %43 {offsets = [0, 0, 0], sizes = [16, 16, 128], strides = [1, 1, 1]} : vector<18x16x128xbf16> to vector<16x16x128xbf16>
    %45 = arith.extf %44 : vector<16x16x128xbf16> to vector<16x16x128xf32>
    %46 = vector.extract_strided_slice %19 {offsets = [1, 0], sizes = [1, 128], strides = [1, 1]} : vector<9x128xf32> to vector<1x128xf32>
    %47 = vector.shape_cast %46 : vector<1x128xf32> to vector<1x1x128xf32>
    %48 = vector.broadcast %47 : vector<1x1x128xf32> to vector<16x16x128xf32>
    %49 = arith.mulf %45, %48 : vector<16x16x128xf32>
    %50 = arith.addf %42, %49 : vector<16x16x128xf32>
    %51 = vector.extract_strided_slice %43 {offsets = [1, 0, 0], sizes = [16, 16, 128], strides = [1, 1, 1]} : vector<18x16x128xbf16> to vector<16x16x128xbf16>
    %52 = arith.extf %51 : vector<16x16x128xbf16> to vector<16x16x128xf32>
    %53 = vector.extract_strided_slice %19 {offsets = [4, 0], sizes = [1, 128], strides = [1, 1]} : vector<9x128xf32> to vector<1x128xf32>
    %54 = vector.shape_cast %53 : vector<1x128xf32> to vector<1x1x128xf32>
    %55 = vector.broadcast %54 : vector<1x1x128xf32> to vector<16x16x128xf32>
    %56 = arith.mulf %52, %55 : vector<16x16x128xf32>
    %57 = arith.addf %50, %56 : vector<16x16x128xf32>
    %58 = vector.extract_strided_slice %43 {offsets = [2, 0, 0], sizes = [16, 16, 128], strides = [1, 1, 1]} : vector<18x16x128xbf16> to vector<16x16x128xbf16>
    %59 = arith.extf %58 : vector<16x16x128xbf16> to vector<16x16x128xf32>
    %60 = vector.extract_strided_slice %19 {offsets = [7, 0], sizes = [1, 128], strides = [1, 1]} : vector<9x128xf32> to vector<1x128xf32>
    %61 = vector.shape_cast %60 : vector<1x128xf32> to vector<1x1x128xf32>
    %62 = vector.broadcast %61 : vector<1x1x128xf32> to vector<16x16x128xf32>
    %63 = arith.mulf %59, %62 : vector<16x16x128xf32>
    %64 = arith.addf %57, %63 : vector<16x16x128xf32>
    %c0_22 = arith.constant 0 : index
    %c2 = arith.constant 2 : index
    %c0_23 = arith.constant 0 : index
    %65 = vector.load %arg14[%c0_22, %c2, %c0_23] : memref<18x18x128xbf16, #tpu.memory_space<vmem>>, vector<18x16x128xbf16>
    %66 = vector.extract_strided_slice %65 {offsets = [0, 0, 0], sizes = [16, 16, 128], strides = [1, 1, 1]} : vector<18x16x128xbf16> to vector<16x16x128xbf16>
    %67 = arith.extf %66 : vector<16x16x128xbf16> to vector<16x16x128xf32>
    %68 = vector.extract_strided_slice %19 {offsets = [2, 0], sizes = [1, 128], strides = [1, 1]} : vector<9x128xf32> to vector<1x128xf32>
    %69 = vector.shape_cast %68 : vector<1x128xf32> to vector<1x1x128xf32>
    %70 = vector.broadcast %69 : vector<1x1x128xf32> to vector<16x16x128xf32>
    %71 = arith.mulf %67, %70 : vector<16x16x128xf32>
    %72 = arith.addf %64, %71 : vector<16x16x128xf32>
    %73 = vector.extract_strided_slice %65 {offsets = [1, 0, 0], sizes = [16, 16, 128], strides = [1, 1, 1]} : vector<18x16x128xbf16> to vector<16x16x128xbf16>
    %74 = arith.extf %73 : vector<16x16x128xbf16> to vector<16x16x128xf32>
    %75 = vector.extract_strided_slice %19 {offsets = [5, 0], sizes = [1, 128], strides = [1, 1]} : vector<9x128xf32> to vector<1x128xf32>
    %76 = vector.shape_cast %75 : vector<1x128xf32> to vector<1x1x128xf32>
    %77 = vector.broadcast %76 : vector<1x1x128xf32> to vector<16x16x128xf32>
    %78 = arith.mulf %74, %77 : vector<16x16x128xf32>
    %79 = arith.addf %72, %78 : vector<16x16x128xf32>
    %80 = vector.extract_strided_slice %65 {offsets = [2, 0, 0], sizes = [16, 16, 128], strides = [1, 1, 1]} : vector<18x16x128xbf16> to vector<16x16x128xbf16>
    %81 = arith.extf %80 : vector<16x16x128xbf16> to vector<16x16x128xf32>
    %82 = vector.extract_strided_slice %19 {offsets = [8, 0], sizes = [1, 128], strides = [1, 1]} : vector<9x128xf32> to vector<1x128xf32>
    %83 = vector.shape_cast %82 : vector<1x128xf32> to vector<1x1x128xf32>
    %84 = vector.broadcast %83 : vector<1x1x128xf32> to vector<16x16x128xf32>
    %85 = arith.mulf %81, %84 : vector<16x16x128xf32>
    %86 = arith.addf %79, %85 : vector<16x16x128xf32>
    %c0_24 = arith.constant 0 : index
    %c0_25 = arith.constant 0 : index
    %87 = vector.load %arg5[%c0_24, %c0_25] : memref<1x128xf32, #tpu.memory_space<vmem>>, vector<1x128xf32>
    %88 = vector.shape_cast %87 : vector<1x128xf32> to vector<1x1x128xf32>
    %89 = vector.broadcast %88 : vector<1x1x128xf32> to vector<16x16x128xf32>
    %90 = arith.addf %86, %89 : vector<16x16x128xf32>
    %91 = arith.negf %90 : vector<16x16x128xf32>
    %92 = math.exp %91 : vector<16x16x128xf32>
    %cst_26 = arith.constant 1.000000e+00 : f32
    %93 = vector.broadcast %cst_26 : f32 to vector<16x16x128xf32>
    %94 = arith.addf %93, %92 : vector<16x16x128xf32>
    %95 = arith.divf %93, %94 : vector<16x16x128xf32>
    %96 = arith.mulf %90, %95 : vector<16x16x128xf32>
    %97 = vector.shape_cast %96 : vector<16x16x128xf32> to vector<256x128xf32>
    %cst_27 = arith.constant dense<0.000000e+00> : vector<128xf32>
    %98 = vector.multi_reduction <add>, %97, %cst_27 [0] : vector<256x128xf32> to vector<128xf32>
    %99 = vector.shape_cast %98 : vector<128xf32> to vector<1x128xf32>
    %cst_28 = arith.constant 2.560000e+02 : f32
    %100 = vector.broadcast %cst_28 : f32 to vector<1x128xf32>
    %101 = arith.divf %99, %100 : vector<1x128xf32>
    %102 = arith.truncf %101 : vector<1x128xf32> to vector<1x128xbf16>
    %c0_29 = arith.constant 0 : index
    %c0_30 = arith.constant 0 : index
    %103 = vector.load %arg6[%c0_29, %c0_30] : memref<128x8xbf16, #tpu.memory_space<vmem>>, vector<128x8xbf16>
    %cst_31 = arith.constant dense<0.000000e+00> : vector<1x8xf32>
    %104 = tpu.matmul %102, %103, %cst_31 {dimension_numbers = #tpu.dot_dimension_numbers<[1], [0], [0], [1], [0, 0, 1, 1], [], []>} : vector<1x128xbf16>, vector<128x8xbf16>, vector<1x8xf32> -> vector<1x8xf32>
    %c0_32 = arith.constant 0 : index
    %c0_33 = arith.constant 0 : index
    %105 = vector.load %arg7[%c0_32, %c0_33] : memref<1x8xf32, #tpu.memory_space<vmem>>, vector<1x8xf32>
    %106 = arith.addf %104, %105 : vector<1x8xf32>
    %107 = arith.negf %106 : vector<1x8xf32>
    %108 = math.exp %107 : vector<1x8xf32>
    %cst_34 = arith.constant 1.000000e+00 : f32
    %109 = vector.broadcast %cst_34 : f32 to vector<1x8xf32>
    %110 = arith.addf %109, %108 : vector<1x8xf32>
    %111 = arith.divf %109, %110 : vector<1x8xf32>
    %112 = arith.mulf %106, %111 : vector<1x8xf32>
    %113 = arith.truncf %112 : vector<1x8xf32> to vector<1x8xbf16>
    %c0_35 = arith.constant 0 : index
    %c0_36 = arith.constant 0 : index
    %114 = vector.load %arg8[%c0_35, %c0_36] : memref<8x128xbf16, #tpu.memory_space<vmem>>, vector<8x128xbf16>
    %cst_37 = arith.constant dense<0.000000e+00> : vector<1x128xf32>
    %115 = tpu.matmul %113, %114, %cst_37 {dimension_numbers = #tpu.dot_dimension_numbers<[1], [0], [0], [1], [0, 0, 1, 1], [], []>} : vector<1x8xbf16>, vector<8x128xbf16>, vector<1x128xf32> -> vector<1x128xf32>
    %c0_38 = arith.constant 0 : index
    %c0_39 = arith.constant 0 : index
    %116 = vector.load %arg9[%c0_38, %c0_39] : memref<1x128xf32, #tpu.memory_space<vmem>>, vector<1x128xf32>
    %117 = arith.addf %115, %116 : vector<1x128xf32>
    %118 = arith.negf %117 : vector<1x128xf32>
    %119 = math.exp %118 : vector<1x128xf32>
    %cst_40 = arith.constant 1.000000e+00 : f32
    %120 = vector.broadcast %cst_40 : f32 to vector<1x128xf32>
    %121 = arith.addf %120, %119 : vector<1x128xf32>
    %122 = arith.divf %120, %121 : vector<1x128xf32>
    %c0_41 = arith.constant 0 : index
    %c0_42 = arith.constant 0 : index
    %123 = vector.load %arg10[%c0_41, %c0_42] : memref<1x128xf32, #tpu.memory_space<vmem>>, vector<1x128xf32>
    %124 = arith.mulf %122, %123 : vector<1x128xf32>
    %125 = vector.broadcast %124 : vector<1x128xf32> to vector<256x128xf32>
    %126 = arith.mulf %97, %125 : vector<256x128xf32>
    %127 = arith.truncf %126 : vector<256x128xf32> to vector<256x128xbf16>
    %c0_43 = arith.constant 0 : index
    %c0_44 = arith.constant 0 : index
    %128 = vector.load %arg11[%c0_43, %c0_44] : memref<128x128xbf16, #tpu.memory_space<vmem>>, vector<128x128xbf16>
    %cst_45 = arith.constant dense<0.000000e+00> : vector<256x128xf32>
    %129 = tpu.matmul %127, %128, %cst_45 {dimension_numbers = #tpu.dot_dimension_numbers<[1], [0], [0], [1], [0, 0, 1, 1], [], []>} : vector<256x128xbf16>, vector<128x128xbf16>, vector<256x128xf32> -> vector<256x128xf32>
    %c0_46 = arith.constant 0 : index
    %c0_47 = arith.constant 0 : index
    %130 = vector.load %arg12[%c0_46, %c0_47] : memref<1x128xf32, #tpu.memory_space<vmem>>, vector<1x128xf32>
    %131 = vector.broadcast %130 : vector<1x128xf32> to vector<256x128xf32>
    %132 = arith.addf %129, %131 : vector<256x128xf32>
    %133 = arith.extf %1 : vector<256x128xbf16> to vector<256x128xf32>
    %134 = arith.addf %132, %133 : vector<256x128xf32>
    %135 = arith.truncf %134 : vector<256x128xf32> to vector<256x128xbf16>
    %c0_48 = arith.constant 0 : index
    %c0_49 = arith.constant 0 : index
    %c0_50 = arith.constant 0 : index
    %136 = vector.load %arg13[%c0_48, %c0_49, %c0_50] : memref<1x256x128xbf16, #tpu.memory_space<vmem>>, vector<1x256x128xbf16>
    %137 = vector.shape_cast %136 : vector<1x256x128xbf16> to vector<256x128xbf16>
    %138 = vector.shape_cast %135 : vector<256x128xbf16> to vector<1x256x128xbf16>
    tpu.vector_store %arg13[%c0_48, %c0_49, %c0_50], %138 {strides = array<i32>} : memref<1x256x128xbf16, #tpu.memory_space<vmem>>, vector<1x256x128xbf16>,
    return
  }
  func.func @transform_0(%arg0: i32) -> (i32, i32, i32) {
    %c0_i32 = arith.constant 0 : i32
    %c0_i32_0 = arith.constant 0 : i32
    %c0_i32_1 = arith.constant 0 : i32
    return %arg0, %c0_i32, %c0_i32_0 : i32, i32, i32
  }
  func.func @transform_1(%arg0: i32) -> (i32, i32) {
    %c0_i32 = arith.constant 0 : i32
    %c0_i32_0 = arith.constant 0 : i32
    %c0_i32_1 = arith.constant 0 : i32
    return %c0_i32, %c0_i32_0 : i32, i32
  }
  func.func @transform_2(%arg0: i32) -> (i32, i32) {
    %c0_i32 = arith.constant 0 : i32
    %c0_i32_0 = arith.constant 0 : i32
    %c0_i32_1 = arith.constant 0 : i32
    return %c0_i32, %c0_i32_0 : i32, i32
  }
  func.func @transform_3(%arg0: i32) -> (i32, i32) {
    %c0_i32 = arith.constant 0 : i32
    %c0_i32_0 = arith.constant 0 : i32
    %c0_i32_1 = arith.constant 0 : i32
    return %c0_i32, %c0_i32_0 : i32, i32
  }
  func.func @transform_4(%arg0: i32) -> (i32, i32) {
    %c0_i32 = arith.constant 0 : i32
    %c0_i32_0 = arith.constant 0 : i32
    %c0_i32_1 = arith.constant 0 : i32
    return %c0_i32, %c0_i32_0 : i32, i32
  }
  func.func @transform_5(%arg0: i32) -> (i32, i32) {
    %c0_i32 = arith.constant 0 : i32
    %c0_i32_0 = arith.constant 0 : i32
    %c0_i32_1 = arith.constant 0 : i32
    return %c0_i32, %c0_i32_0 : i32, i32
  }
  func.func @transform_6(%arg0: i32) -> (i32, i32) {
    %c0_i32 = arith.constant 0 : i32
    %c0_i32_0 = arith.constant 0 : i32
    %c0_i32_1 = arith.constant 0 : i32
    return %c0_i32, %c0_i32_0 : i32, i32
  }
  func.func @transform_7(%arg0: i32) -> (i32, i32) {
    %c0_i32 = arith.constant 0 : i32
    %c0_i32_0 = arith.constant 0 : i32
    %c0_i32_1 = arith.constant 0 : i32
    return %c0_i32, %c0_i32_0 : i32, i32
  }
  func.func @transform_8(%arg0: i32) -> (i32, i32) {
    %c0_i32 = arith.constant 0 : i32
    %c0_i32_0 = arith.constant 0 : i32
    %c0_i32_1 = arith.constant 0 : i32
    return %c0_i32, %c0_i32_0 : i32, i32
  }
  func.func @transform_9(%arg0: i32) -> (i32, i32) {
    %c0_i32 = arith.constant 0 : i32
    %c0_i32_0 = arith.constant 0 : i32
    %c0_i32_1 = arith.constant 0 : i32
    return %c0_i32, %c0_i32_0 : i32, i32
  }
  func.func @transform_10(%arg0: i32) -> (i32, i32) {
    %c0_i32 = arith.constant 0 : i32
    %c0_i32_0 = arith.constant 0 : i32
    %c0_i32_1 = arith.constant 0 : i32
    return %c0_i32, %c0_i32_0 : i32, i32
  }
  func.func @transform_11(%arg0: i32) -> (i32, i32) {
    %c0_i32 = arith.constant 0 : i32
    %c0_i32_0 = arith.constant 0 : i32
    %c0_i32_1 = arith.constant 0 : i32
    return %c0_i32, %c0_i32_0 : i32, i32
  }
  func.func @transform_12(%arg0: i32) -> (i32, i32, i32) {
    %c0_i32 = arith.constant 0 : i32
    %c0_i32_0 = arith.constant 0 : i32
    %c0_i32_1 = arith.constant 0 : i32
    return %arg0, %c0_i32, %c0_i32_0 : i32, i32, i32
  }
}

</mosaic_0001>

<bundles_post_ra>
// kernel: effnetb2_forward.5
= control target key start
LH: loop header
LB: loop body
LE: loop exit
PB: predicated region body
PF: predicated region fallthrough
CT: control target
= control target key end

     0   :  { %s2499_s0 = inlined_call_operand.vmem [shape: bf16[2,256,128], index: 0, kind: input, shape index: {}]   ;;  %s2500_s1 = inlined_call_operand.vmem [shape: bf16[128,128], index: 1, kind: input, shape index: {}]   ;;  %s2501_s2 = inlined_call_operand.vmem [shape: f32[1,128], index: 2, kind: input, shape index: {}]   ;;  %s2502_s3 = inlined_call_operand.vmem [shape: bf16[128,128], index: 3, kind: input, shape index: {}]   ;;  %s2503_s4 = inlined_call_operand.vmem [shape: f32[1,128], index: 4, kind: input, shape index: {}]   ;;  %s2504_s5 = inlined_call_operand.hbm [shape: f32[2,128], index: 5, kind: output, shape index: {}]  }
   0x1   :  { %v1581_v0 = vld [vmem:[%s2500_s1 + $0x38] sm:$0xff]   ;;  %v1582_v1 = vld [vmem:[%s2500_s1 + $0x30] sm:$0xff]   ;;  %v1583_v2 = vld [vmem:[%s2500_s1 + $0x28] sm:$0xff]  }
   0x2   :  { %1462 = vmatprep.subr.bf16.mxu0 %v1581_v0  ;;  %1562 = vmatprep.subr.bf16.mxu1 %v1581_v0  ;;  %v1584_v3 = vld [vmem:[%s2500_s1 + $0x20] sm:$0xff]   ;;  %v1585_v5 = vld [vmem:[%s2500_s1 + $0x18] sm:$0xff]   ;;  %v1586_v6 = vld [vmem:[%s2500_s1 + $0x10] sm:$0xff]  }
   0x3   :  { %1463 = vmatpush3.bf16.msra.mxu0 %v1581_v0  ;;  %1570 = vmatpush3.bf16.msra.mxu1 %v1581_v0  ;;  %v1589_v4 = vld [vmem:[%s2499_s0] sm:$0xff]   ;;  %v1599_v7 = vld [vmem:[%s2499_s0 + $0x90] sm:$0xff]   ;;  %v1587_v8 = vld [vmem:[%s2500_s1 + $0x8] sm:$0xff]  }
   0x4   :  { %1464 = vmatprep.subr.bf16.mxu0 %v1582_v1  ;;  %1563 = vmatprep.subr.bf16.mxu1 %v1582_v1  ;;  %v1588_v9 = vld [vmem:[%s2500_s1] sm:$0xff]   ;;  %v1590_v10 = vld [vmem:[%s2499_s0 + $0x8] sm:$0xff]   ;;  %v1591_v11 = vld [vmem:[%s2499_s0 + $0x10] sm:$0xff]  }
   0x5   :  { %1478 = vmatprep.mubr.bf16.mxu0 %v1589_v4  ;;  %1514 = vmatprep.mubr.bf16.mxu1 %v1599_v7  ;;  %v1600_v12 = vld [vmem:[%s2499_s0 + $0x98] sm:$0xff]   ;;  %v1603_v13 = vld [vmem:[%s2499_s0 + $0xa0] sm:$0xff]   ;;  %v1604_v16 = vld [vmem:[%s2499_s0 + $0xa8] sm:$0xff]  }
   0x6   :  { %v1592_v14 = vld [vmem:[%s2499_s0 + $0x18] sm:$0xff]   ;;  %v1593_v15 = vld [vmem:[%s2499_s0 + $0x20] sm:$0xff]   ;;  %v1607_v17 = vld [vmem:[%s2499_s0 + $0xb0] sm:$0xff]  }
   0x7   :  { %1465 = vmatpush3.bf16.msra.mxu0 %v1582_v1  ;;  %1571 = vmatpush3.bf16.msra.mxu1 %v1582_v1 }
   0x8   :  { %1466 = vmatprep.subr.bf16.mxu0 %v1583_v2  ;;  %1564 = vmatprep.subr.bf16.mxu1 %v1583_v2 }
   0xb   :  { %1467 = vmatpush3.bf16.msra.mxu0 %v1583_v2  ;;  %1572 = vmatpush3.bf16.msra.mxu1 %v1583_v2 }
   0xc   :  { %1468 = vmatprep.subr.bf16.mxu0 %v1584_v3  ;;  %1565 = vmatprep.subr.bf16.mxu1 %v1584_v3 }
   0xf   :  { %1469 = vmatpush3.bf16.msra.mxu0 %v1584_v3  ;;  %1573 = vmatpush3.bf16.msra.mxu1 %v1584_v3 }
  0x10   :  { %1470 = vmatprep.subr.bf16.mxu0 %v1585_v5  ;;  %1566 = vmatprep.subr.bf16.mxu1 %v1585_v5 }
  0x13   :  { %1471 = vmatpush3.bf16.msra.mxu0 %v1585_v5  ;;  %1574 = vmatpush3.bf16.msra.mxu1 %v1585_v5 }
  0x14   :  { %1472 = vmatprep.subr.bf16.mxu0 %v1586_v6  ;;  %1567 = vmatprep.subr.bf16.mxu1 %v1586_v6 }
  0x17   :  { %1473 = vmatpush3.bf16.msra.mxu0 %v1586_v6  ;;  %1575 = vmatpush3.bf16.msra.mxu1 %v1586_v6 }
  0x18   :  { %1474 = vmatprep.subr.bf16.mxu0 %v1587_v8  ;;  %1568 = vmatprep.subr.bf16.mxu1 %v1587_v8 }
  0x1b   :  { %1475 = vmatpush3.bf16.msra.mxu0 %v1587_v8  ;;  %1576 = vmatpush3.bf16.msra.mxu1 %v1587_v8 }
  0x1c   :  { %1476 = vmatprep.subr.bf16.mxu0 %v1588_v9  ;;  %1569 = vmatprep.subr.bf16.mxu1 %v1588_v9 }
  0x1f   :  { %1477 = vmatpush3.bf16.msra.mxu0 %v1588_v9  ;;  %1577 = vmatpush3.bf16.msra.mxu1 %v1588_v9 }
  0x22   :  { %1479 = vmatmul.mubr.bf16.vlgmr.msra.gmra.mxu0 %v1590_v10  ;;  %1515 = vmatmul.mubr.bf16.vlgmr.msra.gmra.mxu1 %v1600_v12 }
  0x23   :  { %1482 = vmatprep.mubr.bf16.mxu0 %v1591_v11  ;;  %1518 = vmatprep.mubr.bf16.mxu1 %v1603_v13 }
  0x2a   :  { %1483 = vmatmul.mubr.bf16.gmra.mxu0 %v1592_v14  ;;  %1519 = vmatmul.mubr.bf16.gmra.mxu1 %v1604_v16 }
  0x2b   :  { %1486 = vmatprep.mubr.bf16.mxu0 %v1593_v15  ;;  %1522 = vmatprep.mubr.bf16.mxu1 %v1607_v17 }
  0x2c   :  { %10 = vsyncpa [#allocation3], 0  ;;  %v1594_v18 = vld [vmem:[%s2499_s0 + $0x28] sm:$0xff]   ;;  %v1608_v19 = vld [vmem:[%s2499_s0 + $0xb8] sm:$0xff]   ;;  %vm1909_vm0 = vmmov 0   ;;  %vm1192_vm1 = vcmask 1041409  }
  0x2d   :  { %v1595_v20 = vld [vmem:[%s2499_s0 + $0x30] sm:$0xff]   ;;  %v1611_v21 = vld [vmem:[%s2499_s0 + $0xc0] sm:$0xff]   ;;  %v1596_v22 = vld [vmem:[%s2499_s0 + $0x38] sm:$0xff]   ;;  %s1910_s14 = smov [#allocation2]  }
  0x2e   :  { %v1612_v23 = vld [vmem:[%s2499_s0 + $0xc8] sm:$0xff]   ;;  %v1597_v24 = vld [vmem:[%s2499_s0 + $0x40] sm:$0xff]   ;;  %v1615_v25 = vld [vmem:[%s2499_s0 + $0xd0] sm:$0xff]   ;;  %s1291_s15 = sshll.u32 %s1910_s14, 4  ;;  %s1292_s15 = int_to_ptr.vmem [resolvable:$true] %s1291_s15 }
  0x2f   :  { %v1598_v26 = vld [vmem:[%s2499_s0 + $0x48] sm:$0xff]   ;;  %v1616_v27 = vld [vmem:[%s2499_s0 + $0xd8] sm:$0xff]   ;;  %v1601_v28 = vld [vmem:[%s2499_s0 + $0x50] sm:$0xff]   ;;  %s1886_s16 = scalar_lea.vmem %s1292_s15, 32  ;;  %p1891_p1 = scmp.lt.s32.totalorder %s1292_s15, %s1292_s15 }
  0x30   :  { %v1617_v29 = vld [vmem:[%s2499_s0 + $0xe0] sm:$0xff]   ;;  %v1602_v30 = vld [vmem:[%s2499_s0 + $0x58] sm:$0xff]   ;;  %v1618_v31 = vld [vmem:[%s2499_s0 + $0xe8] sm:$0xff]   ;;  %p1887_p0 = scmp.ne.s32.totalorder %s1292_s15, %s1886_s16  ;;  %p1892_p2 = scmp.lt.s32.totalorder %s1886_s16, %s1886_s16 }
  0x31   :  { %v1605_v32 = vld [vmem:[%s2499_s0 + $0x60] sm:$0xff]   ;;  %v1619_v33 = vld [vmem:[%s2499_s0 + $0xf0] sm:$0xff]   ;;  %v1606_v34 = vld [vmem:[%s2499_s0 + $0x68] sm:$0xff]  }
  0x32   :  { %1487 = vmatmul.mubr.bf16.gmra.mxu0 %v1594_v18  ;;  %1523 = vmatmul.mubr.bf16.gmra.mxu1 %v1608_v19  ;;  %v1620_v35 = vld [vmem:[%s2499_s0 + $0xf8] sm:$0xff]   ;;  %v1609_v36 = vld [vmem:[%s2499_s0 + $0x70] sm:$0xff]   ;;  %v1613_v38 = vld [vmem:[%s2499_s0 + $0x80] sm:$0xff]   ;;  %p1893_p3 = por %p1892_p2, %p1891_p1 }
  0x33   :  { %1490 = vmatprep.mubr.bf16.mxu0 %v1595_v20  ;;  %1526 = vmatprep.mubr.bf16.mxu1 %v1611_v21  ;;  %v1610_v37 = vld [vmem:[%s2499_s0 + $0x78] sm:$0xff]   ;;  %v1614_v39 = vld [vmem:[%s2499_s0 + $0x88] sm:$0xff]   ;;  %v2064_v40 = vld [vmem:[%s2501_s2] ss:$0 sm:$0xff] }
  0x34   :  { %p1894_p4 = pnand %p1893_p3, %p1887_p0 }
  0x3a   :  { %1491 = vmatmul.mubr.bf16.gmra.mxu0 %v1596_v22  ;;  %1527 = vmatmul.mubr.bf16.gmra.mxu1 %v1612_v23 }
  0x3b   :  { %1494 = vmatprep.mubr.bf16.mxu0 %v1597_v24  ;;  %1530 = vmatprep.mubr.bf16.mxu1 %v1615_v25 }
  0x42   :  { %1495 = vmatmul.mubr.bf16.gmra.mxu0 %v1598_v26  ;;  %1531 = vmatmul.mubr.bf16.gmra.mxu1 %v1616_v27 }
  0x43   :  { %1498 = vmatprep.mubr.bf16.mxu0 %v1601_v28  ;;  %1534 = vmatprep.mubr.bf16.mxu1 %v1617_v29 }
  0x4a   :  { %1499 = vmatmul.mubr.bf16.gmra.mxu0 %v1602_v30  ;;  %1535 = vmatmul.mubr.bf16.gmra.mxu1 %v1618_v31 }
  0x4b   :  { %1502 = vmatprep.mubr.bf16.mxu0 %v1605_v32  ;;  %1538 = vmatprep.mubr.bf16.mxu1 %v1619_v33 }
  0x52   :  { %1503 = vmatmul.mubr.bf16.gmra.mxu0 %v1606_v34  ;;  %1539 = vmatmul.mubr.bf16.gmra.mxu1 %v1620_v35 }
  0x53   :  { %1506 = vmatprep.mubr.bf16.mxu0 %v1609_v36 }
  0x5a   :  { %1507 = vmatmul.mubr.bf16.gmra.mxu0 %v1610_v37 }
  0x5b   :  { %1510 = vmatprep.mubr.bf16.mxu0 %v1613_v38 }
  0x62   :  { %1511 = vmatmul.mubr.bf16.gmra.mxu0 %v1614_v39 }
  0xe2   :  { %v1480_v41 = vpop.f32.mrf.mxu0 }
  0xe3   :  { %v2067_v42 = vadd.f32 %v1480_v41, %v2064_v40 }
  0xe4   :  { %v383_v43 = vpop.f32.mrf.mxu0 }
  0xe5   :  { %v1342_v44 = vmul.f32 -1.442695, %v2067_v42  ;;  %v2071_v45 = vadd.f32 %v2064_v40, %v383_v43 }
  0xe6   :  { %v1481_v46 = vpop.f32.mrf.mxu0 }
  0xe7   :  { %1629 = vpow2.f32 %v1342_v44  ;;  %v1340_v47 = vmul.f32 -1.442695, %v2071_v45  ;;  %v2075_v48 = vadd.f32 %v1481_v46, %v2064_v40 }
  0xe8   :  { %v386_v49 = vpop.f32.mrf.mxu0 }
  0xe9   :  { %1631 = vpow2.f32 %v1340_v47  ;;  %v1343_v50 = vmul.f32 -1.442695, %v2075_v48  ;;  %v2079_v51 = vadd.f32 %v2064_v40, %v386_v49  ;;  %v2133_v49 = vpop.f32.mrf.mxu1 }
  0xea   :  { %v1484_v52 = vpop.f32.mrf.mxu0 }
  0xeb   :  { %1633 = vpow2.f32 %v1343_v50  ;;  %v1341_v53 = vmul.f32 -1.442695, %v2079_v51  ;;  %v2083_v54 = vadd.f32 %v1484_v52, %v2064_v40 }
  0xec   :  { %v399_v55 = vpop.f32.mrf.mxu0 }
  0xed   :  { %1635 = vpow2.f32 %v1341_v53  ;;  %v1346_v56 = vmul.f32 -1.442695, %v2083_v54  ;;  %v2087_v57 = vadd.f32 %v2064_v40, %v399_v55 }
  0xee   :  { %v1485_v58 = vpop.f32.mrf.mxu0 }
  0xef   :  { %1637 = vpow2.f32 %v1346_v56  ;;  %v1344_v59 = vmul.f32 -1.442695, %v2087_v57  ;;  %v2091_v60 = vadd.f32 %v1485_v58, %v2064_v40 }
  0xf0   :  { %v402_v61 = vpop.f32.mrf.mxu0 }
  0xf1   :  { %1639 = vpow2.f32 %v1344_v59  ;;  %v1347_v62 = vmul.f32 -1.442695, %v2091_v60  ;;  %v2095_v63 = vadd.f32 %v2064_v40, %v402_v61 }
  0xf2   :  { %v1488_v0 = vpop.f32.mrf.mxu0 }
  0xf3   :  { %1641 = vpow2.f32 %v1347_v62  ;;  %v1345_v1 = vmul.f32 -1.442695, %v2095_v63  ;;  %v2099_v2 = vadd.f32 %v1488_v0, %v2064_v40 }
  0xf4   :  { %v1630_v3 = vpop.eup %1629  ;;  %v415_v4 = vpop.f32.mrf.mxu0 }
  0xf5   :  { %v832_v5 = vadd.f32 1.0, %v1630_v3  ;;  %1643 = vpow2.f32 %v1345_v1  ;;  %v1350_v6 = vmul.f32 -1.442695, %v2099_v2  ;;  %v2103_v7 = vadd.f32 %v2064_v40, %v415_v4  ;;  %v2143_v3 = vpop.f32.mrf.mxu1 }
  0xf6   :  { %v1632_v8 = vpop.eup %1631  ;;  %v1489_v9 = vpop.f32.mrf.mxu0 }
  0xf7   :  { %1645 = vrcp.f32 %v832_v5  ;;  %v830_v10 = vadd.f32 1.0, %v1632_v8  ;;  %v1348_v11 = vmul.f32 -1.442695, %v2103_v7  ;;  %v2107_v12 = vadd.f32 %v1489_v9, %v2064_v40 }
  0xf8   :  { %v1634_v13 = vpop.eup %1633  ;;  %1647 = vpow2.f32 %v1350_v6  ;;  %v418_v14 = vpop.f32.mrf.mxu0 }
  0xf9   :  { %1649 = vrcp.f32 %v830_v10  ;;  %v833_v15 = vadd.f32 1.0, %v1634_v13  ;;  %v1351_v16 = vmul.f32 -1.442695, %v2107_v12  ;;  %v2111_v17 = vadd.f32 %v2064_v40, %v418_v14 }
  0xfa   :  { %v1636_v18 = vpop.eup %1635  ;;  %1651 = vpow2.f32 %v1348_v11  ;;  %v1492_v19 = vpop.f32.mrf.mxu0 }
  0xfb   :  { %1653 = vrcp.f32 %v833_v15  ;;  %v831_v20 = vadd.f32 1.0, %v1636_v18  ;;  %v1349_v21 = vmul.f32 -1.442695, %v2111_v17  ;;  %v2115_v22 = vadd.f32 %v1492_v19, %v2064_v40  ;;  %v2151_v19 = vpop.f32.mrf.mxu1 }
  0xfc   :  { %v1638_v23 = vpop.eup %1637  ;;  %1655 = vpow2.f32 %v1351_v16  ;;  %v431_v24 = vpop.f32.mrf.mxu0 }
  0xfd   :  { %1657 = vrcp.f32 %v831_v20  ;;  %v836_v25 = vadd.f32 1.0, %v1638_v23  ;;  %v1354_v26 = vmul.f32 -1.442695, %v2115_v22  ;;  %v2119_v27 = vadd.f32 %v2064_v40, %v431_v24 }
  0xfe   :  { %v1640_v28 = vpop.eup %1639  ;;  %1659 = vpow2.f32 %v1349_v21  ;;  %v1493_v29 = vpop.f32.mrf.mxu0 }
  0xff   :  { %1661 = vrcp.f32 %v836_v25  ;;  %v834_v30 = vadd.f32 1.0, %v1640_v28  ;;  %v1352_v31 = vmul.f32 -1.442695, %v2119_v27  ;;  %v2123_v32 = vadd.f32 %v1493_v29, %v2064_v40 }
 0x100   :  { %v1642_v33 = vpop.eup %1641  ;;  %1663 = vpow2.f32 %v1354_v26  ;;  %v434_v34 = vpop.f32.mrf.mxu0 }
 0x101   :  { %1665 = vrcp.f32 %v834_v30  ;;  %v837_v35 = vadd.f32 1.0, %v1642_v33  ;;  %v1355_v36 = vmul.f32 -1.442695, %v2123_v32  ;;  %v2127_v37 = vadd.f32 %v2064_v40, %v434_v34  ;;  %v2159_v34 = vpop.f32.mrf.mxu1 }
 0x102   :  { %v1644_v38 = vpop.eup %1643  ;;  %1667 = vpow2.f32 %v1352_v31  ;;  %v1496_v39 = vpop.f32.mrf.mxu0 }
 0x103   :  { %1669 = vrcp.f32 %v837_v35  ;;  %v835_v41 = vadd.f32 1.0, %v1644_v38  ;;  %v1353_v43 = vmul.f32 -1.442695, %v2127_v37  ;;  %v2131_v44 = vadd.f32 %v1496_v39, %v2064_v40 }
 0x104   :  { %v1646_v46 = vpop.eup %1645  ;;  %1671 = vpow2.f32 %v1355_v36  ;;  %v447_v47 = vpop.f32.mrf.mxu0 }
 0x105   :  { %v1648_v50 = vpop.eup %1647  ;;  %1673 = vrcp.f32 %v835_v41  ;;  %v2136_v52 = vadd.f32 %v2064_v40, %v447_v47  ;;  %v1358_v58 = vmul.f32 -1.442695, %v2131_v44  ;;  %v1024_v23 = vmul.f32 %v1646_v46, %v2067_v42 }
 0x106   :  { %v1650_v53 = vpop.eup %1649  ;;  %1675 = vpow2.f32 %v1353_v43  ;;  %v1497_v55 = vpop.f32.mrf.mxu0  ;;  %v840_v0 = vadd.f32 1.0, %v1648_v50 }
 0x107   :  { %v1652_v56 = vpop.eup %1651  ;;  %v1356_v59 = vmul.f32 -1.442695, %v2136_v52  ;;  %v2141_v61 = vadd.f32 %v1497_v55, %v2064_v40  ;;  %v1022_v13 = vmul.f32 %v1650_v53, %v2071_v45 }
 0x108   :  { %v1654_v62 = vpop.eup %1653  ;;  %v838_v1 = vadd.f32 1.0, %v1652_v56  ;;  %v450_v4 = vpop.f32.mrf.mxu0 }
 0x109   :  { %v1656_v5 = vpop.eup %1655  ;;  %1677 = vpow2.f32 %v1356_v59  ;;  %v1359_v6 = vmul.f32 -1.442695, %v2141_v61  ;;  %v2147_v8 = vadd.f32 %v2064_v40, %v450_v4 }
 0x10a   :  { %v1658_v9 = vpop.eup %1657  ;;  %1679 = vrcp.f32 %v838_v1  ;;  %v1500_v10 = vpop.f32.mrf.mxu0  ;;  %v841_v16 = vadd.f32 1.0, %v1656_v5 }
 0x10b   :  { %v1660_v11 = vpop.eup %1659  ;;  %v1023_v14 = vmul.f32 %v1658_v9, %v2079_v51  ;;  %1681 = vpow2.f32 %v1358_v58  ;;  %v1357_v25 = vmul.f32 -1.442695, %v2147_v8  ;;  %v1025_v51 = vmul.f32 %v1654_v62, %v2075_v48  ;;  %v2167_v58 = vpop.f32.mrf.mxu1 }
 0x10c   :  { %v1662_v15 = vpop.eup %1661  ;;  %1683 = vrcp.f32 %v840_v0  ;;  %v839_v18 = vadd.f32 1.0, %v1660_v11  ;;  %v463_v20 = vpop.f32.mrf.mxu0  ;;  %v2157_v33 = vadd.f32 %v1500_v10, %v2064_v40 }
 0x10d   :  { %v1664_v21 = vpop.eup %1663  ;;  %v1086_v24 = vadd.f32 %v1023_v14, %v1022_v13  ;;  %1685 = vpow2.f32 %v1359_v6  ;;  %v2163_v48 = vadd.f32 %v2064_v40, %v463_v20  ;;  %v2178_v11 = vpop.f32.mrf.mxu1 }
 0x10e   :  { %v1666_v26 = vpop.eup %1665  ;;  %1687 = vrcp.f32 %v839_v18  ;;  %v1501_v45 = vpop.f32.mrf.mxu0  ;;  %v844_v39 = vadd.f32 1.0, %v1664_v21  ;;  %v1362_v56 = vmul.f32 -1.442695, %v2157_v33 }
 0x10f   :  { %v1668_v28 = vpop.eup %1667  ;;  %v1087_v29 = vadd.f32 %v1086_v24, %v1024_v23  ;;  %1689 = vrcp.f32 %v841_v16  ;;  %v1026_v36 = vmul.f32 %v1666_v26, %v2087_v57  ;;  %v1028_v57 = vmul.f32 %v1662_v15, %v2083_v54 }
 0x110   :  { %v1670_v30 = vpop.eup %1669  ;;  %v842_v31 = vadd.f32 1.0, %v1668_v28  ;;  %v466_v42 = vpop.f32.mrf.mxu0  ;;  %1691 = vpow2.f32 %v1357_v25  ;;  %v2171_v62 = vadd.f32 %v1501_v45, %v2064_v40 }
 0x111   :  { %v1672_v35 = vpop.eup %1671  ;;  %v1088_v38 = vadd.f32 %v1087_v29, %v1025_v51  ;;  %v1029_v4 = vmul.f32 %v1670_v30, %v2091_v60  ;;  %v2176_v10 = vadd.f32 %v2064_v40, %v466_v42  ;;  %v2187_v45 = vpop.f32.mrf.mxu1 }
 0x112   :  { %v1674_v41 = vpop.eup %1673  ;;  %1693 = vrcp.f32 %v842_v31  ;;  %v1504_v43 = vpop.f32.mrf.mxu0  ;;  %v845_v53 = vadd.f32 1.0, %v1672_v35  ;;  %v1363_v60 = vmul.f32 -1.442695, %v2171_v62 }
 0x113   :  { %v1676_v46 = vpop.eup %1675  ;;  %v1089_v47 = vadd.f32 %v1088_v38, %v1026_v36  ;;  %v1027_v50 = vmul.f32 %v1674_v41, %v2095_v63  ;;  %1695 = vrcp.f32 %v844_v39  ;;  %v1360_v63 = vmul.f32 -1.442695, %v2163_v48 }
 0x114   :  { %v843_v55 = vadd.f32 1.0, %v1676_v46  ;;  %v479_v0 = vpop.f32.mrf.mxu0  ;;  %v1361_v23 = vmul.f32 -1.442695, %v2176_v10  ;;  %v2184_v24 = vadd.f32 %v1504_v43, %v2064_v40  ;;  %v2198_v43 = vpop.f32.mrf.mxu1 }
 0x115   :  { %v1090_v59 = vadd.f32 %v1089_v47, %v1027_v50 }
 0x116   :  { %v1678_v1 = vpop.eup %1677  ;;  %1697 = vrcp.f32 %v843_v55  ;;  %v1505_v16 = vpop.f32.mrf.mxu0  ;;  %v1366_v38 = vmul.f32 -1.442695, %v2184_v24 }
 0x117   :  { %v1680_v5 = vpop.eup %1679  ;;  %v1091_v6 = vadd.f32 %v1090_v59, %v1028_v57  ;;  %1699 = vrcp.f32 %v845_v53  ;;  %v846_v9 = vadd.f32 1.0, %v1678_v1  ;;  %v2207_v1 = vpop.f32.mrf.mxu1 }
 0x118   :  { %v1682_v54 = vpop.eup %1681  ;;  %1701 = vpow2.f32 %v1362_v56  ;;  %v1030_v14 = vmul.f32 %v1680_v5, %v2103_v7  ;;  %v2190_v7 = vadd.f32 %v2064_v40, %v479_v0  ;;  %v482_v51 = vpop.f32.mrf.mxu0 }
 0x119   :  { %v1684_v13 = vpop.eup %1683  ;;  %v1092_v15 = vadd.f32 %v1091_v6, %v1029_v4  ;;  %1703 = vrcp.f32 %v846_v9  ;;  %v848_v26 = vadd.f32 1.0, %v1682_v54 }
 0x11a   :  { %v1686_v18 = vpop.eup %1685  ;;  %1705 = vpow2.f32 %v1360_v63  ;;  %v1032_v30 = vmul.f32 %v1684_v13, %v2099_v2  ;;  %v1364_v46 = vmul.f32 -1.442695, %v2190_v7  ;;  %v2202_v2 = vadd.f32 %v2064_v40, %v482_v51  ;;  %v1508_v47 = vpop.f32.mrf.mxu0 }
 0x11b   :  { %v1688_v20 = vpop.eup %1687  ;;  %v1093_v21 = vadd.f32 %v1092_v15, %v1030_v14  ;;  %1707 = vpow2.f32 %v1363_v60  ;;  %v849_v42 = vadd.f32 1.0, %v1686_v18  ;;  %v2212_v60 = vpop.f32.mrf.mxu1 }
 0x11c   :  { %v1031_v25 = vmul.f32 %v1688_v20, %v2111_v17  ;;  %v1690_v28 = vpop.eup %1689  ;;  %1709 = vpow2.f32 %v1361_v23  ;;  %v2195_v17 = vadd.f32 %v1505_v16, %v2064_v40  ;;  %v1365_v63 = vmul.f32 -1.442695, %v2202_v2  ;;  %v495_v5 = vpop.f32.mrf.mxu0  ;;  %v1621_v16 = vld [vmem:[%s2502_s3 + $0x38] sm:$0xff]  }
 0x11d   :  { %v1692_v29 = vpop.eup %1691  ;;  %v1033_v39 = vmul.f32 %v1690_v28, %v2107_v12  ;;  %1711 = vrcp.f32 %v848_v26  ;;  %v2224_v28 = vpop.f32.mrf.mxu1 }
 0x11e   :  { %v1094_v31 = vadd.f32 %v1093_v21, %v1031_v25  ;;  %v847_v36 = vadd.f32 1.0, %v1692_v29  ;;  %v1367_v12 = vmul.f32 -1.442695, %v2195_v17  ;;  %v1509_v23 = vpop.f32.mrf.mxu0  ;;  %v1908_v29 = vmov 0.0  }
 0x11f   :  { %v1694_v35 = vpop.eup %1693  ;;  %1542 = vmatprep.subr.bf16.mxu1 %v1908_v29  ;;  %1558 = vmatprep.mubr.msk.bf16.mxu1 %vm1909_vm0, %v1908_v29 }
 0x120   :  { %v1095_v41 = vadd.f32 %v1094_v31, %v1032_v30  ;;  %1713 = vrcp.f32 %v847_v36  ;;  %v1696_v50 = vpop.eup %1695  ;;  %v1034_v53 = vmul.f32 %v1694_v35, %v2119_v27  ;;  %1543 = vmatpush3.bf16.msra.mxu1 %v1621_v16  ;;  %v498_v36 = vpop.f32.mrf.mxu0 }
 0x121   :  { %1715 = vrcp.f32 %v849_v42  ;;  %v1036_v27 = vmul.f32 %v1696_v50, %v2115_v22  ;;  %1544 = vmatprep.subr.bf16.mxu1 %v1908_v29  ;;  %v2237_v50 = vadd.f32 %v1509_v23, %v2064_v40 }
 0x122   :  { %v1096_v55 = vadd.f32 %v1095_v41, %v1033_v39  ;;  %1717 = vpow2.f32 %v1366_v38 }
 0x123   :  { %v1698_v56 = vpop.eup %1697  ;;  %1719 = vpow2.f32 %v1364_v46 }
 0x124   :  { %v1700_v57 = vpop.eup %1699  ;;  %v1097_v59 = vadd.f32 %v1096_v55, %v1034_v53  ;;  %v1035_v0 = vmul.f32 %v1698_v56, %v2127_v37  ;;  %1721 = vpow2.f32 %v1367_v12  ;;  %v2215_v37 = vadd.f32 %v2064_v40, %v495_v5 }
 0x125   :  { %v1702_v4 = vpop.eup %1701  ;;  %v1037_v13 = vmul.f32 %v1700_v57, %v2123_v32  ;;  %1723 = vpow2.f32 %v1365_v63  ;;  %v2222_v32 = vadd.f32 %v1508_v47, %v2064_v40  ;;  %v2234_v47 = vpop.f32.mrf.mxu1  ;;  %v2244_v57 = vadd.f32 %v2064_v40, %v498_v36 }
 0x126   :  { %v1704_v6 = vpop.eup %1703  ;;  %v1098_v9 = vadd.f32 %v1097_v59, %v1035_v0  ;;  %v852_v21 = vadd.f32 1.0, %v1702_v4  ;;  %v1368_v51 = vmul.f32 -1.442695, %v2215_v37  ;;  %v1512_v59 = vpop.f32.mrf.mxu0  ;;  %v2278_v36 = vadd.f32 %v2064_v40, %v2143_v3 }
 0x127   :  { %v1706_v54 = vpop.eup %1705  ;;  %v1038_v22 = vmul.f32 %v1704_v6, %v2136_v52  ;;  %v1622_v52 = vld [vmem:[%s2502_s3 + $0x30] sm:$0xff]   ;;  %v1370_v41 = vmul.f32 -1.442695, %v2222_v32  ;;  %v2248_v5 = vpop.f32.mrf.mxu1  ;;  %v1371_v6 = vmul.f32 -1.442695, %v2237_v50 }
 0x128   :  { %v1099_v14 = vadd.f32 %v1098_v9, %v1036_v27  ;;  %v850_v15 = vadd.f32 1.0, %v1706_v54  ;;  %v1708_v18 = vpop.eup %1707  ;;  %1545 = vmatpush3.bf16.msra.mxu1 %v1622_v52  ;;  %v1624_v9 = vld [vmem:[%s2502_s3 + $0x20] sm:$0xff]   ;;  %v1626_v52 = vld [vmem:[%s2502_s3 + $0x10] sm:$0xff]  }
 0x129   :  { %v1710_v25 = vpop.eup %1709  ;;  %v853_v31 = vadd.f32 1.0, %v1708_v18  ;;  %1546 = vmatprep.subr.bf16.mxu1 %v1908_v29 }
 0x12a   :  { %v1100_v20 = vadd.f32 %v1099_v14, %v1037_v13  ;;  %1725 = vrcp.f32 %v850_v15  ;;  %v1712_v30 = vpop.eup %1711  ;;  %v851_v42 = vadd.f32 1.0, %v1710_v25  ;;  %v1369_v13 = vmul.f32 -1.442695, %v2244_v57  ;;  %v511_v14 = vpop.f32.mrf.mxu0 }
 0x12b   :  { %1727 = vrcp.f32 %v852_v21  ;;  %v1040_v55 = vmul.f32 %v1712_v30, %v2131_v44  ;;  %v2270_v30 = vadd.f32 %v2064_v40, %v511_v14 }
 0x12c   :  { %v1101_v26 = vadd.f32 %v1100_v20, %v1038_v22  ;;  %1729 = vrcp.f32 %v851_v42  ;;  %v2257_v22 = vpop.f32.mrf.mxu1  ;;  %v1625_v20 = vld [vmem:[%s2502_s3 + $0x18] sm:$0xff]   ;;  %v1513_v23 = vpop.f32.mrf.mxu0 }
 0x12d   :  { %v1714_v35 = vpop.eup %1713  ;;  %1731 = vpow2.f32 %v1368_v51 }
 0x12e   :  { %v1716_v38 = vpop.eup %1715  ;;  %v1039_v39 = vmul.f32 %v1714_v35, %v2147_v8  ;;  %1733 = vrcp.f32 %v853_v31  ;;  %v1623_v8 = vld [vmem:[%s2502_s3 + $0x28] sm:$0xff]   ;;  %v2267_v51 = vpop.f32.mrf.mxu1 }
 0x12f   :  { %v1718_v46 = vpop.eup %1717  ;;  %v1041_v0 = vmul.f32 %v1716_v38, %v2141_v61  ;;  %1735 = vpow2.f32 %v1370_v41  ;;  %1547 = vmatpush3.bf16.msra.mxu1 %v1623_v8  ;;  %v1372_v8 = vmul.f32 -1.442695, %v2270_v30 }
 0x130   :  { %v1720_v53 = vpop.eup %1719  ;;  %v1102_v56 = vadd.f32 %v1101_v26, %v1039_v39  ;;  %v856_v63 = vadd.f32 1.0, %v1718_v46  ;;  %1548 = vmatprep.subr.bf16.mxu1 %v1908_v29  ;;  %v514_v39 = vpop.f32.mrf.mxu0 }
 0x131   :  { %v854_v12 = vadd.f32 1.0, %v1720_v53  ;;  %v1722_v44 = vpop.eup %1721 }
 0x132   :  { %v1103_v4 = vadd.f32 %v1102_v56, %v1040_v55  ;;  %v1724_v54 = vpop.eup %1723  ;;  %v857_v15 = vadd.f32 1.0, %v1722_v44  ;;  %v2286_v56 = vpop.f32.mrf.mxu1 }
 0x133   :  { %1737 = vrcp.f32 %v854_v12  ;;  %v855_v16 = vadd.f32 1.0, %v1724_v54  ;;  %1549 = vmatpush3.bf16.msra.mxu1 %v1624_v9  ;;  %v2306_v9 = vadd.f32 %v2133_v49, %v2064_v40 }
 0x134   :  { %v1104_v27 = vadd.f32 %v1103_v4, %v1041_v0  ;;  %1739 = vrcp.f32 %v856_v63  ;;  %1550 = vmatprep.subr.bf16.mxu1 %v1908_v29  ;;  %v2291_v0 = vadd.f32 %v2064_v40, %v514_v39  ;;  %v1376_v4 = vmul.f32 -1.442695, %v2278_v36 }
 0x135   :  { %1741 = vpow2.f32 %v1371_v6  ;;  %v2299_v63 = vadd.f32 %v2064_v40, %v2159_v34 }
 0x136   :  { %1743 = vrcp.f32 %v855_v16  ;;  %v2316_v16 = vadd.f32 %v2151_v19, %v2064_v40  ;;  %v2326_v19 = vadd.f32 %v2064_v40, %v2178_v11  ;;  %v2337_v11 = vadd.f32 %v2167_v58, %v2064_v40 }
 0x137   :  { %v1726_v61 = vpop.eup %1725  ;;  %1745 = vpow2.f32 %v1369_v13  ;;  %1551 = vmatpush3.bf16.msra.mxu1 %v1625_v20  ;;  %v2308_v13 = vpop.f32.mrf.mxu1 }
 0x138   :  { %v1042_v18 = vmul.f32 %v1726_v61, %v2163_v48  ;;  %v1728_v25 = vpop.eup %1727  ;;  %1747 = vrcp.f32 %v857_v15  ;;  %v2265_v48 = vadd.f32 %v1512_v59, %v2064_v40  ;;  %1552 = vmatprep.subr.bf16.mxu1 %v1908_v29  ;;  %v1373_v61 = vmul.f32 -1.442695, %v2291_v0 }
 0x139   :  { %v1730_v26 = vpop.eup %1729  ;;  %v1044_v41 = vmul.f32 %v1728_v25, %v2157_v33  ;;  %v1627_v33 = vld [vmem:[%s2502_s3 + $0x8] sm:$0xff]  }
 0x13a   :  { %v1105_v21 = vadd.f32 %v1104_v27, %v1042_v18  ;;  %v1732_v31 = vpop.eup %1731  ;;  %v1043_v42 = vmul.f32 %v1730_v26, %v2176_v10  ;;  %v1374_v53 = vmul.f32 -1.442695, %v2265_v48  ;;  %v2284_v10 = vadd.f32 %v1513_v23, %v2064_v40 }
 0x13b   :  { %v1734_v35 = vpop.eup %1733  ;;  %v858_v38 = vadd.f32 1.0, %v1732_v31  ;;  %1553 = vmatpush3.bf16.msra.mxu1 %v1626_v52  ;;  %v1377_v18 = vmul.f32 -1.442695, %v2299_v63  ;;  %v1378_v23 = vmul.f32 -1.442695, %v2306_v9  ;;  %v2322_v31 = vpop.f32.mrf.mxu1  ;;  %v2332_v52 = vadd.f32 %v2064_v40, %v2198_v43 }
 0x13c   :  { %v1106_v46 = vadd.f32 %v1105_v21, %v1043_v42  ;;  %v1736_v55 = vpop.eup %1735  ;;  %v1045_v12 = vmul.f32 %v1734_v35, %v2171_v62  ;;  %1554 = vmatprep.subr.bf16.mxu1 %v1908_v29  ;;  %v1375_v6 = vmul.f32 -1.442695, %v2284_v10 }
 0x13d   :  { %1749 = vrcp.f32 %v858_v38  ;;  %v860_v54 = vadd.f32 1.0, %v1736_v55 }
 0x13e   :  { %v1107_v59 = vadd.f32 %v1106_v46, %v1044_v41  ;;  %1751 = vpow2.f32 %v1374_v53  ;;  %v1380_v41 = vmul.f32 -1.442695, %v2326_v19  ;;  %v2344_v46 = vadd.f32 %v2187_v45, %v2064_v40 }
 0x13f   :  { %1753 = vpow2.f32 %v1372_v8  ;;  %1555 = vmatpush3.bf16.msra.mxu1 %v1627_v33  ;;  %v1381_v53 = vmul.f32 -1.442695, %v2332_v52  ;;  %v1382_v8 = vmul.f32 -1.442695, %v2337_v11 }
 0x140   :  { %v1738_v3 = vpop.eup %1737  ;;  %v1108_v62 = vadd.f32 %v1107_v59, %v1045_v12  ;;  %1755 = vpow2.f32 %v1376_v4  ;;  %1556 = vmatprep.subr.bf16.mxu1 %v1908_v29  ;;  %v1383_v45 = vmul.f32 -1.442695, %v2344_v46 }
 0x141   :  { %v1046_v44 = vmul.f32 %v1738_v3, %v2190_v7  ;;  %v1740_v27 = vpop.eup %1739  ;;  %v1628_v7 = vld [vmem:[%s2502_s3] sm:$0xff]   ;;  %1757 = vpow2.f32 %v1375_v6 }
 0x142   :  { %v1742_v14 = vpop.eup %1741  ;;  %1759 = vrcp.f32 %v860_v54  ;;  %v1048_v29 = vmul.f32 %v1740_v27, %v2184_v24  ;;  %v2339_v24 = vpop.f32.mrf.mxu1 }
 0x143   :  { %v1109_v34 = vadd.f32 %v1108_v62, %v1046_v44  ;;  %v1744_v15 = vpop.eup %1743  ;;  %v861_v25 = vadd.f32 1.0, %v1742_v14  ;;  %1761 = vpow2.f32 %v1373_v61  ;;  %1557 = vmatpush3.bf16.msra.mxu1 %v1628_v7  ;;  %v2363_v62 = vadd.f32 %v2207_v1, %v2064_v40 }
 0x144   :  { %v1746_v49 = vpop.eup %1745  ;;  %v1047_v20 = vmul.f32 %v1744_v15, %v2202_v2  ;;  %v1379_v2 = vmul.f32 -1.442695, %v2316_v16  ;;  %v2353_v12 = vpop.f32.mrf.mxu1 }
 0x145   :  { %v1748_v21 = vpop.eup %1747  ;;  %v859_v26 = vadd.f32 1.0, %v1746_v49  ;;  %v1386_v1 = vmul.f32 -1.442695, %v2363_v62 }
 0x146   :  { %v1110_v42 = vadd.f32 %v1109_v34, %v1047_v20  ;;  %v1049_v35 = vmul.f32 %v1748_v21, %v2195_v17  ;;  %v2348_v17 = vadd.f32 %v2064_v40, %v2212_v60  ;;  %v2359_v60 = vadd.f32 %v2064_v40, %v2234_v47  ;;  %v2365_v27 = vpop.f32.mrf.mxu1 }
 0x147   :  { %1763 = vrcp.f32 %v859_v26  ;;  %v2369_v47 = vadd.f32 %v2224_v28, %v2064_v40 }
 0x148   :  { %1765 = vpow2.f32 %v1377_v18  ;;  %v1111_v38 = vadd.f32 %v1110_v42, %v1048_v29  ;;  %v1384_v33 = vmul.f32 -1.442695, %v2348_v17  ;;  %v1385_v34 = vmul.f32 -1.442695, %v2359_v60  ;;  %v2378_v21 = vpop.f32.mrf.mxu1 }
 0x149   :  { %1767 = vrcp.f32 %v861_v25  ;;  %v2375_v18 = vadd.f32 %v2064_v40, %v2257_v22  ;;  %v1387_v26 = vmul.f32 -1.442695, %v2369_v47  ;;  %v2384_v22 = vadd.f32 %v2248_v5, %v2064_v40 }
 0x14a   :  { %v1750_v39 = vpop.eup %1749  ;;  %1769 = vpow2.f32 %v1378_v23  ;;  %v1112_v43 = vadd.f32 %v1111_v38, %v1049_v35 }
 0x14b   :  { %1771 = vpow2.f32 %v1379_v2  ;;  %v1050_v58 = vmul.f32 %v1750_v39, %v2215_v37  ;;  %v1752_v55 = vpop.eup %1751  ;;  %v1388_v39 = vmul.f32 -1.442695, %v2375_v18 }
 0x14c   :  { %v1754_v59 = vpop.eup %1753  ;;  %1773 = vpow2.f32 %v1380_v41  ;;  %v864_v6 = vadd.f32 1.0, %v1752_v55 }
 0x14d   :  { %v1113_v3 = vadd.f32 %v1112_v43, %v1050_v58  ;;  %v1756_v4 = vpop.eup %1755  ;;  %1775 = vpow2.f32 %v1381_v53  ;;  %v862_v37 = vadd.f32 1.0, %v1754_v59 }
 0x14e   :  { %v1758_v44 = vpop.eup %1757  ;;  %1777 = vpow2.f32 %v1382_v8  ;;  %v866_v23 = vadd.f32 1.0, %v1756_v4  ;;  %v1390_v8 = vmul.f32 -1.442695, %v2384_v22 }
 0x14f   :  { %v1760_v54 = vpop.eup %1759  ;;  %1779 = vpow2.f32 %v1383_v45  ;;  %v865_v7 = vadd.f32 1.0, %v1758_v44 }
 0x150   :  { %v1762_v14 = vpop.eup %1761  ;;  %1781 = vpow2.f32 %v1384_v33  ;;  %v1052_v29 = vmul.f32 %v1760_v54, %v2222_v32  ;;  %v2392_v32 = vpop.f32.mrf.mxu1  ;;  %v2404_v33 = vadd.f32 %v2064_v40, %v2322_v31 }
 0x151   :  { %1783 = vrcp.f32 %v862_v37  ;;  %v863_v15 = vadd.f32 1.0, %v1762_v14 }
 0x152   :  { %1785 = vrcp.f32 %v864_v6  ;;  %v2409_v6 = vadd.f32 %v2064_v40, %v2353_v12  ;;  %v2420_v12 = vadd.f32 %v2339_v24, %v2064_v40 }
 0x153   :  { %1787 = vrcp.f32 %v863_v15 }
 0x154   :  { %v1764_v61 = vpop.eup %1763  ;;  %1789 = vpow2.f32 %v1385_v34  ;;  %v2413_v34 = vadd.f32 %v2308_v13, %v2064_v40 }
 0x155   :  { %v1766_v49 = vpop.eup %1765  ;;  %v1051_v20 = vmul.f32 %v1764_v61, %v2244_v57  ;;  %v2388_v57 = vadd.f32 %v2064_v40, %v2286_v56  ;;  %1791 = vrcp.f32 %v865_v7  ;;  %v2398_v56 = vadd.f32 %v2267_v51, %v2064_v40 }
 0x156   :  { %v1768_v28 = vpop.eup %1767  ;;  %v867_v35 = vadd.f32 1.0, %v1766_v49  ;;  %1793 = vpow2.f32 %v1386_v1  ;;  %v1392_v7 = vmul.f32 -1.442695, %v2404_v33 }
 0x157   :  { %v1770_v25 = vpop.eup %1769  ;;  %v1114_v42 = vadd.f32 %v1113_v3, %v1051_v20  ;;  %v1053_v38 = vmul.f32 %v1768_v28, %v2237_v50  ;;  %1795 = vrcp.f32 %v866_v23  ;;  %v1389_v55 = vmul.f32 -1.442695, %v2388_v57  ;;  %v610_v3 = vpop.f32.mrf.mxu1 }
 0x158   :  { %v1772_v2 = vpop.eup %1771  ;;  %v868_v43 = vadd.f32 1.0, %v1770_v25  ;;  %1797 = vpow2.f32 %v1387_v26  ;;  %v1391_v51 = vmul.f32 -1.442695, %v2398_v56  ;;  %v1393_v28 = vmul.f32 -1.442695, %v2409_v6 }
 0x159   :  { %v1115_v41 = vadd.f32 %v1114_v42, %v1052_v29  ;;  %v1774_v58 = vpop.eup %1773  ;;  %v869_v53 = vadd.f32 1.0, %v1772_v2  ;;  %1799 = vrcp.f32 %v867_v35  ;;  %v2415_v31 = vpop.f32.mrf.mxu1  ;;  %v1394_v26 = vmul.f32 -1.442695, %v2413_v34 }
 0x15a   :  { %v1776_v50 = vpop.eup %1775  ;;  %1801 = vpow2.f32 %v1388_v39  ;;  %v870_v45 = vadd.f32 1.0, %v1774_v58  ;;  %v2429_v35 = vadd.f32 %v2064_v40, %v2378_v21  ;;  %v2434_v58 = vadd.f32 %v2064_v40, %v610_v3  ;;  %v1885_v3 = vld [vmem:[%s2501_s2] ss:$0 sm:$0xff] }
 0x15b   :  { %v2394_v5 = vadd.f32 %v1115_v41, %v1053_v38  ;;  %v1778_v59 = vpop.eup %1777  ;;  %1803 = vrcp.f32 %v868_v43  ;;  %v871_v44 = vadd.f32 1.0, %v1776_v50  ;;  %v623_v29 = vpop.f32.mrf.mxu1  ;;  %v1395_v38 = vmul.f32 -1.442695, %v2420_v12 }
 0x15c   :  { %v1780_v4 = vpop.eup %1779  ;;  %1805 = vrcp.f32 %v869_v53  ;;  %v872_v14 = vadd.f32 1.0, %v1778_v59  ;;  %v2438_v21 = vadd.f32 %v2365_v27, %v2064_v40 }
 0x15d   :  { %v1782_v37 = vpop.eup %1781  ;;  %1807 = vpow2.f32 %v1389_v55  ;;  %v873_v49 = vadd.f32 1.0, %v1780_v4  ;;  %v1541_v55 = vpop.f32.mrf.mxu1 }
 0x15e   :  { %v1784_v54 = vpop.eup %1783  ;;  %1809 = vpow2.f32 %v1390_v8  ;;  %v874_v25 = vadd.f32 1.0, %v1782_v37 }
 0x15f   :  { %v1786_v61 = vpop.eup %1785  ;;  %1811 = vrcp.f32 %v870_v45  ;;  %v1054_v20 = vmul.f32 %v1784_v54, %v2270_v30 }
 0x160   :  { %v1788_v15 = vpop.eup %1787  ;;  %1813 = vpow2.f32 %v1391_v51  ;;  %v1056_v2 = vmul.f32 %v1786_v61, %v2265_v48  ;;  %v2446_v51 = vadd.f32 %v1885_v3, %v2392_v32  ;;  %v626_v61 = vpop.f32.mrf.mxu1  ;;  %v2452_v32 = vadd.f32 %v1885_v3, %v623_v29 }
 0x161   :  { %v1790_v1 = vpop.eup %1789  ;;  %1815 = vrcp.f32 %v871_v44  ;;  %v1055_v13 = vmul.f32 %v1788_v15, %v2291_v0 }
 0x162   :  { %v1792_v23 = vpop.eup %1791  ;;  %1817 = vrcp.f32 %v872_v14  ;;  %v875_v0 = vadd.f32 1.0, %v1790_v1  ;;  %v1398_v14 = vmul.f32 -1.442695, %v2438_v21 }
 0x163   :  { %v1794_v42 = vpop.eup %1793  ;;  %1819 = vpow2.f32 %v1392_v7  ;;  %v1123_v24 = vadd.f32 %v1055_v13, %v1054_v20  ;;  %v1057_v41 = vmul.f32 %v1792_v23, %v2284_v10  ;;  %v1396_v10 = vmul.f32 -1.442695, %v2429_v35 }
 0x164   :  { %v1796_v30 = vpop.eup %1795  ;;  %1821 = vrcp.f32 %v873_v49  ;;  %v876_v53 = vadd.f32 1.0, %v1794_v42  ;;  %v1399_v20 = vmul.f32 -1.442695, %v2446_v51 }
 0x165   :  { %v1798_v39 = vpop.eup %1797  ;;  %v1124_v43 = vadd.f32 %v1123_v24, %v1056_v2  ;;  %1823 = vpow2.f32 %v1393_v28  ;;  %v1058_v8 = vmul.f32 %v1796_v30, %v2278_v36  ;;  %v1397_v36 = vmul.f32 -1.442695, %v2434_v58 }
 0x166   :  { %v1800_v48 = vpop.eup %1799  ;;  %1825 = vrcp.f32 %v874_v25  ;;  %v877_v4 = vadd.f32 1.0, %v1798_v39  ;;  %v2456_v25 = vadd.f32 %v1885_v3, %v626_v61 }
 0x167   :  { %v1802_v50 = vpop.eup %1801  ;;  %1827 = vpow2.f32 %v1394_v26  ;;  %v1125_v59 = vadd.f32 %v1124_v43, %v1057_v41  ;;  %v1059_v27 = vmul.f32 %v1800_v48, %v2299_v63 }
 0x168   :  { %v1804_v45 = vpop.eup %1803  ;;  %1829 = vrcp.f32 %v875_v0  ;;  %v878_v54 = vadd.f32 1.0, %v1802_v50 }
 0x169   :  { %v1806_v40 = vpop.eup %1805  ;;  %v1126_v37 = vadd.f32 %v1125_v59, %v1058_v8  ;;  %1831 = vpow2.f32 %v1395_v38  ;;  %v1060_v15 = vmul.f32 %v1804_v45, %v2306_v9  ;;  %v2459_v9 = vadd.f32 %v1885_v3, %v2415_v31 }
 0x16a   :  { %v1808_v44 = vpop.eup %1807  ;;  %1833 = vrcp.f32 %v876_v53  ;;  %v1061_v63 = vmul.f32 %v1806_v40, %v2316_v16  ;;  %v1400_v16 = vmul.f32 -1.442695, %v2452_v32  ;;  %v2463_v38 = vadd.f32 %v1885_v3, %v1541_v55 }
 0x16b   :  { %v1810_v7 = vpop.eup %1809  ;;  %v1127_v49 = vadd.f32 %v1126_v37, %v1059_v27  ;;  %1835 = vpow2.f32 %v1396_v10  ;;  %v879_v28 = vadd.f32 1.0, %v1808_v44  ;;  %v1401_v31 = vmul.f32 -1.442695, %v2456_v25 }
 0x16c   :  { %v1812_v1 = vpop.eup %1811  ;;  %1837 = vrcp.f32 %v877_v4  ;;  %v880_v42 = vadd.f32 1.0, %v1810_v7  ;;  %v1403_v55 = vmul.f32 -1.442695, %v2463_v38 }
 0x16d   :  { %v1814_v13 = vpop.eup %1813  ;;  %v1128_v23 = vadd.f32 %v1127_v49, %v1060_v15  ;;  %1839 = vpow2.f32 %v1397_v36  ;;  %v1062_v2 = vmul.f32 %v1812_v1, %v2326_v19  ;;  %v1402_v19 = vmul.f32 -1.442695, %v2459_v9 }
 0x16e   :  { %v1816_v26 = vpop.eup %1815  ;;  %1841 = vrcp.f32 %v878_v54  ;;  %v881_v0 = vadd.f32 1.0, %v1814_v13 }
 0x16f   :  { %v1818_v29 = vpop.eup %1817  ;;  %v1129_v24 = vadd.f32 %v1128_v23, %v1061_v63  ;;  %1843 = vpow2.f32 %v1398_v14  ;;  %v1063_v41 = vmul.f32 %v1816_v26, %v2332_v52 }
 0x170   :  { %v1820_v30 = vpop.eup %1819  ;;  %1845 = vpow2.f32 %v1399_v20  ;;  %v1064_v50 = vmul.f32 %v1818_v29, %v2337_v11 }
 0x171   :  { %v1822_v39 = vpop.eup %1821  ;;  %1847 = vrcp.f32 %v879_v28  ;;  %v1130_v43 = vadd.f32 %v1129_v24, %v1062_v2  ;;  %v882_v8 = vadd.f32 1.0, %v1820_v30 }
 0x172   :  { %v1824_v48 = vpop.eup %1823  ;;  %1849 = vrcp.f32 %v880_v42  ;;  %v1065_v52 = vmul.f32 %v1822_v39, %v2344_v46 }
 0x173   :  { %v1826_v53 = vpop.eup %1825  ;;  %v1131_v59 = vadd.f32 %v1130_v43, %v1063_v41  ;;  %1851 = vpow2.f32 %v1400_v16  ;;  %v883_v3 = vadd.f32 1.0, %v1824_v48 }
 0x174   :  { %v1828_v10 = vpop.eup %1827  ;;  %1853 = vrcp.f32 %v881_v0  ;;  %v1066_v37 = vmul.f32 %v1826_v53, %v2348_v17 }
 0x175   :  { %v1830_v45 = vpop.eup %1829  ;;  %v1132_v4 = vadd.f32 %v1131_v59, %v1064_v50  ;;  %1855 = vpow2.f32 %v1401_v31  ;;  %v884_v36 = vadd.f32 1.0, %v1828_v10 }
 0x176   :  { %v1832_v40 = vpop.eup %1831  ;;  %1857 = vpow2.f32 %v1402_v19  ;;  %v1067_v14 = vmul.f32 %v1830_v45, %v2359_v60 }
 0x177   :  { %v1834_v27 = vpop.eup %1833  ;;  %1859 = vrcp.f32 %v882_v8  ;;  %v1133_v11 = vadd.f32 %v1132_v4, %v1065_v52  ;;  %v885_v61 = vadd.f32 1.0, %v1832_v40 }
 0x178   :  { %v1836_v44 = vpop.eup %1835  ;;  %1861 = vpow2.f32 %v1403_v55  ;;  %v1068_v49 = vmul.f32 %v1834_v27, %v2363_v62 }
 0x179   :  { %v1838_v54 = vpop.eup %1837  ;;  %1863 = vrcp.f32 %v883_v3  ;;  %v1134_v7 = vadd.f32 %v1133_v11, %v1066_v37  ;;  %v886_v63 = vadd.f32 1.0, %v1836_v44 }
 0x17a   :  { %v1840_v46 = vpop.eup %1839  ;;  %1865 = vrcp.f32 %v884_v36  ;;  %v1069_v13 = vmul.f32 %v1838_v54, %v2369_v47 }
 0x17b   :  { %v1842_v15 = vpop.eup %1841  ;;  %v1135_v1 = vadd.f32 %v1134_v7, %v1067_v14  ;;  %1867 = vrcp.f32 %v885_v61  ;;  %v887_v23 = vadd.f32 1.0, %v1840_v46 }
 0x17c   :  { %v1844_v20 = vpop.eup %1843  ;;  %v1070_v60 = vmul.f32 %v1842_v15, %v2375_v18  ;;  %1869 = vrcp.f32 %v886_v63 }
 0x17d   :  { %v1846_v17 = vpop.eup %1845  ;;  %v1136_v28 = vadd.f32 %v1135_v1, %v1068_v49  ;;  %v888_v2 = vadd.f32 1.0, %v1844_v20  ;;  %1871 = vrcp.f32 %v887_v23 }
 0x17e   :  { %v1848_v26 = vpop.eup %1847  ;;  %v889_v0 = vadd.f32 1.0, %v1846_v17 }
 0x17f   :  { %v1850_v42 = vpop.eup %1849  ;;  %v1137_v29 = vadd.f32 %v1136_v28, %v1069_v13  ;;  %v1071_v62 = vmul.f32 %v1848_v26, %v2388_v57  ;;  %1873 = vrcp.f32 %v888_v2 }
 0x180   :  { %v1852_v24 = vpop.eup %1851  ;;  %v1072_v47 = vmul.f32 %v1850_v42, %v2384_v22  ;;  %1875 = vrcp.f32 %v889_v0 }
 0x181   :  { %v1854_v16 = vpop.eup %1853  ;;  %v1138_v30 = vadd.f32 %v1137_v29, %v1070_v60  ;;  %v890_v31 = vadd.f32 1.0, %v1852_v24 }
 0x182   :  { %v1856_v39 = vpop.eup %1855  ;;  %v1073_v18 = vmul.f32 %v1854_v16, %v2398_v56 }
 0x183   :  { %v1858_v41 = vpop.eup %1857  ;;  %v1139_v43 = vadd.f32 %v1138_v30, %v1071_v62  ;;  %v891_v50 = vadd.f32 1.0, %v1856_v39  ;;  %1877 = vrcp.f32 %v890_v31 }
 0x184   :  { %v1860_v48 = vpop.eup %1859  ;;  %v892_v10 = vadd.f32 1.0, %v1858_v41 }
 0x185   :  { %v1862_v19 = vpop.eup %1861  ;;  %v1140_v53 = vadd.f32 %v1139_v43, %v1072_v47  ;;  %v1074_v57 = vmul.f32 %v1860_v48, %v2404_v33  ;;  %1879 = vrcp.f32 %v891_v50 }
 0x186   :  { %v1864_v8 = vpop.eup %1863  ;;  %v893_v52 = vadd.f32 1.0, %v1862_v19  ;;  %1881 = vrcp.f32 %v892_v10 }
 0x187   :  { %v1141_v59 = vadd.f32 %v1140_v53, %v1073_v18  ;;  %v1866_v55 = vpop.eup %1865  ;;  %v1075_v45 = vmul.f32 %v1864_v8, %v2409_v6  ;;  %v1117_v6 = vrot.slane %v2394_v5, 4 }
 0x188   :  { %v1868_v4 = vpop.eup %1867  ;;  %v1076_v3 = vmul.f32 %v1866_v55, %v2413_v34  ;;  %1883 = vrcp.f32 %v893_v52 }
 0x189   :  { %v1142_v22 = vadd.f32 %v1141_v59, %v1074_v57  ;;  %v1870_v56 = vpop.eup %1869  ;;  %v1077_v27 = vmul.f32 %v1868_v4, %v2420_v12  ;;  %v1118_v15 = vadd.f32 %v1117_v6, %v2394_v5 }
 0x18a   :  { %v1872_v33 = vpop.eup %1871  ;;  %v1078_v36 = vmul.f32 %v1870_v56, %v2429_v35 }
 0x18b   :  { %v1143_v40 = vadd.f32 %v1142_v22, %v1075_v45  ;;  %v1079_v14 = vmul.f32 %v1872_v33, %v2434_v58  ;;  %v1119_v17 = vrot.slane %v1118_v15, 2 }
 0x18c   :  { %v1874_v44 = vpop.eup %1873 }
 0x18d   :  { %v1144_v37 = vadd.f32 %v1143_v40, %v1076_v3  ;;  %v1876_v61 = vpop.eup %1875  ;;  %v1080_v34 = vmul.f32 %v1874_v44, %v2438_v21  ;;  %v1120_v26 = vadd.f32 %v1119_v17, %v1118_v15 }
 0x18e   :  { %v1081_v12 = vmul.f32 %v1876_v61, %v2446_v51 }
 0x18f   :  { %v1145_v11 = vadd.f32 %v1144_v37, %v1077_v27  ;;  %v1121_v51 = vrot.slane %v1120_v26, 1 }
 0x190   :  { %v1878_v46 = vpop.eup %1877 }
 0x191   :  { %v1146_v54 = vadd.f32 %v1145_v11, %v1078_v36  ;;  %v1082_v35 = vmul.f32 %v1878_v46, %v2452_v32  ;;  %v1122_v24 = vadd.f32 %v1121_v51, %v1120_v26 }
 0x192   :  { %v1880_v1 = vpop.eup %1879 }
 0x193   :  { %v1147_v7 = vadd.f32 %v1146_v54, %v1079_v14  ;;  %v1882_v20 = vpop.eup %1881  ;;  %v1083_v28 = vmul.f32 %v1880_v1, %v2456_v25  ;;  %v1161_v62 = vmul.f32 0.00390625, %v1122_v24 }
 0x194   :  { %v1084_v23 = vmul.f32 %v1882_v20, %v2459_v9 }
 0x195   :  { %v1148_v49 = vadd.f32 %v1147_v7, %v1080_v34  ;;  %v1884_v58 = vpop.eup %1883  ;;  %v1163_v39 = vpack.c.bf16 %v1161_v62, %v1161_v62 }
 0x196   :  { %v1085_v42 = vmul.f32 %v1884_v58, %v2463_v38  ;;  %v1404_v38 = vld [vmem:[%s2503_s4] ss:$0 sm:$0xff] }
 0x197   :  { %v1149_v63 = vadd.f32 %v1148_v49, %v1081_v12  ;;  %v1190_v9 = vunpack.c.l.b16 %v1163_v39 }
 0x199   :  { %v1150_v13 = vadd.f32 %v1149_v63, %v1082_v35 }
 0x19b   :  { %v1151_v21 = vadd.f32 %v1150_v13, %v1083_v28 }
 0x19d   :  { %v1152_v5 = vadd.f32 %v1151_v21, %v1084_v23 }
 0x19f   :  { %v1153_v60 = vadd.f32 %v1152_v5, %v1085_v42 }
 0x1a1   :  { %v1154_v29 = vrot.slane %v1153_v60, 4 }
 0x1a3   :  { %v1155_v2 = vadd.f32 %v1154_v29, %v1153_v60 }
 0x1a5   :  { %v1156_v32 = vrot.slane %v1155_v2, 2 }
 0x1a7   :  { %v1157_v16 = vadd.f32 %v1156_v32, %v1155_v2 }
 0x1a9   :  { %v1158_v30 = vrot.slane %v1157_v16, 1 }
 0x1ab   :  { %v1159_v0 = vadd.f32 %v1158_v30, %v1157_v16 }
 0x1ad   :  { %v1162_v25 = vmul.f32 0.00390625, %v1159_v0 }
 0x1af   :  { %v1164_v41 = vpack.c.bf16 %v1162_v25, %v1162_v25 }
 0x1b1   :  { %v1191_v47 = vunpack.c.l.b16 %v1164_v41 }
 0x1b3   :  { %v1193_v43 = vsel %vm1192_vm1, %v1191_v47, %v1190_v9 }
 0x1b4   :  { %v1194_v31 = vpack.c.b16 %v1193_v43, %v1193_v43 }
 0x1b6   :  { %1559 = vmatmul.mubr.bf16.vlgmr.msra.gmra.mxu1 %v1194_v31 }
 0x276   :  { %v1278_v48 = vpop.f32.mrf.mxu1 }
 0x277   :  { %v1279_v19 = vadd.f32 %v1404_v38, %v1278_v48 }
 0x278   :  { %v1560_v18 = vpop.f32.mrf.mxu1 }
 0x279   :  { %1284 = vst [vmem:[#allocation2] sm:$0x3] %v1279_v19 }
 0x27a   :  { %v1281_v53 = vpop.f32.mrf.mxu1 }
 0x27b   :  { %1897 = shalt.err (!%p1894_p4)
}
 0x27c   :  { %1294 = dma.vmem_to_hbm [thread:$0]  %s1292_s15, 32, %s2504_s5, [#allocation3]   ;;  %v1561_v50 = vpop.f32.mrf.mxu1 }
 0x27d   :  { %1906 = dma.done.wait [#allocation3], 32  }
 0x27e   :  { %1907 = vsyncadd [#allocation3], 4294967264 }
 0x27f   :  { %1298 = vsyncpa [#allocation3], 1 }

// kernel: effnetb2_forward.3
= control target key start
LH: loop header
LB: loop body
LE: loop exit
PB: predicated region body
PF: predicated region fallthrough
CT: control target
= control target key end

     0   :  { %vm358_vm0 = vcmask 1044480   ;;  %vm359_vm1 = vcmask 1045504   ;;  %v2273_v1 = vmov 65535   ;;  %vm261_vm2 = vcmask 220160   ;;  %s2867_s1 = inlined_call_operand.vmem [shape: bf16[27,128], index: 1, kind: input, shape index: {}]   ;;  %s2868_s0 = inlined_call_operand.vmem [shape: bf16[512,27], index: 0, kind: input, shape index: {}]   ;;  %s2869_s2 = inlined_call_operand.vmem [shape: f32[1,128], index: 2, kind: input, shape index: {}]   ;;  %s2870_s3 = inlined_call_operand.vmem [shape: bf16[512,128], index: 3, kind: output, shape index: {}]  }
   0x1   :  { %v1983_v0 = vld [vmem:[%s2867_s1 + $0x8] sm:$0x3f]   ;;  %v360_v2 = vsel %vm358_vm0, 4294967295, %v2273_v1  ;;  %v1985_v4 = vld [vmem:[%s2868_s0] sm:$0xff]   ;;  %v1989_v10 = vld [vmem:[%s2868_s0 + $0x10] sm:$0xff]  }
   0x2   :  { %v361_v3 = vsel %vm359_vm1, %v360_v2, 0  ;;  %v1984_v6 = vld [vmem:[%s2867_s1] sm:$0xff]   ;;  %1914 = vmatprep.mubr.msk.bf16.mxu0 %vm261_vm2, %v1985_v4  ;;  %v1987_v8 = vld [vmem:[%s2868_s0 + $0x8] sm:$0xff]   ;;  %v1990_v11 = vld [vmem:[%s2868_s0 + $0x90] sm:$0xff]  }
   0x3   :  { %v363_v5 = vand.u32 %v1983_v0, %v361_v3  ;;  %v1986_v7 = vld [vmem:[%s2868_s0 + $0x80] sm:$0xff]   ;;  %v1988_v9 = vld [vmem:[%s2868_s0 + $0x88] sm:$0xff]   ;;  %v1991_v12 = vld [vmem:[%s2868_s0 + $0x18] sm:$0xff]  }
   0x4   :  { %1946 = vmatprep.mubr.msk.bf16.mxu1 %vm261_vm2, %v1986_v7  ;;  %v1992_v13 = vld [vmem:[%s2868_s0 + $0x98] sm:$0xff]   ;;  %v1993_v14 = vld [vmem:[%s2868_s0 + $0x20] sm:$0xff]   ;;  %v1995_v16 = vld [vmem:[%s2868_s0 + $0x28] sm:$0xff]  }
   0x5   :  { %1910 = vmatprep.subr.bf16.mxu0 %v363_v5  ;;  %1978 = vmatprep.subr.bf16.mxu1 %v363_v5  ;;  %v1994_v15 = vld [vmem:[%s2868_s0 + $0xa0] sm:$0xff]   ;;  %v1996_v17 = vld [vmem:[%s2868_s0 + $0xa8] sm:$0xff]   ;;  %v1997_v18 = vld [vmem:[%s2868_s0 + $0x30] sm:$0xff]  }
   0x6   :  { %1911 = vmatpush3.bf16.msra.mxu0 %v363_v5  ;;  %1980 = vmatpush3.bf16.msra.mxu1 %v363_v5  ;;  %v1998_v19 = vld [vmem:[%s2868_s0 + $0xb0] sm:$0xff]   ;;  %v1999_v20 = vld [vmem:[%s2868_s0 + $0x38] sm:$0xff]   ;;  %v2001_v22 = vld [vmem:[%s2868_s0 + $0x40] sm:$0xff]  }
   0x7   :  { %1912 = vmatprep.subr.bf16.mxu0 %v1984_v6  ;;  %1979 = vmatprep.subr.bf16.mxu1 %v1984_v6  ;;  %v2000_v21 = vld [vmem:[%s2868_s0 + $0xb8] sm:$0xff]   ;;  %v2002_v23 = vld [vmem:[%s2868_s0 + $0xc0] sm:$0xff]   ;;  %v2003_v24 = vld [vmem:[%s2868_s0 + $0x48] sm:$0xff]  }
   0x8   :  { %v2004_v25 = vld [vmem:[%s2868_s0 + $0xc8] sm:$0xff]   ;;  %v2005_v26 = vld [vmem:[%s2868_s0 + $0x50] sm:$0xff]   ;;  %v2007_v28 = vld [vmem:[%s2868_s0 + $0x58] sm:$0xff]  }
   0x9   :  { %v2006_v27 = vld [vmem:[%s2868_s0 + $0xd0] sm:$0xff]   ;;  %v2008_v29 = vld [vmem:[%s2868_s0 + $0xd8] sm:$0xff]   ;;  %v2009_v30 = vld [vmem:[%s2868_s0 + $0x60] sm:$0xff]  }
   0xa   :  { %1913 = vmatpush3.bf16.msra.mxu0 %v1984_v6  ;;  %1981 = vmatpush3.bf16.msra.mxu1 %v1984_v6  ;;  %v2010_v31 = vld [vmem:[%s2868_s0 + $0xe0] sm:$0xff]   ;;  %v2011_v32 = vld [vmem:[%s2868_s0 + $0x68] sm:$0xff]   ;;  %v2013_v34 = vld [vmem:[%s2868_s0 + $0x70] sm:$0xff]  }
   0xb   :  { %v2012_v33 = vld [vmem:[%s2868_s0 + $0xe8] sm:$0xff]   ;;  %v2014_v35 = vld [vmem:[%s2868_s0 + $0xf0] sm:$0xff]   ;;  %v2015_v36 = vld [vmem:[%s2868_s0 + $0x78] sm:$0xff]  }
   0xc   :  { %v2016_v37 = vld [vmem:[%s2868_s0 + $0xf8] sm:$0xff]   ;;  %v2431_v38 = vld [vmem:[%s2869_s2] ss:$0 sm:$0xff] }
   0xd   :  { %1915 = vmatmul.mubr.msk.bf16.vlgmr.msra.gmra.mxu0 %vm261_vm2, %v1987_v8  ;;  %1947 = vmatmul.mubr.msk.bf16.vlgmr.msra.gmra.mxu1 %vm261_vm2, %v1988_v9 }
   0xe   :  { %1918 = vmatprep.mubr.msk.bf16.mxu0 %vm261_vm2, %v1989_v10  ;;  %1950 = vmatprep.mubr.msk.bf16.mxu1 %vm261_vm2, %v1990_v11 }
  0x15   :  { %1919 = vmatmul.mubr.msk.bf16.gmra.mxu0 %vm261_vm2, %v1991_v12  ;;  %1951 = vmatmul.mubr.msk.bf16.gmra.mxu1 %vm261_vm2, %v1992_v13 }
  0x16   :  { %1922 = vmatprep.mubr.msk.bf16.mxu0 %vm261_vm2, %v1993_v14  ;;  %1954 = vmatprep.mubr.msk.bf16.mxu1 %vm261_vm2, %v1994_v15 }
  0x1d   :  { %1923 = vmatmul.mubr.msk.bf16.gmra.mxu0 %vm261_vm2, %v1995_v16  ;;  %1955 = vmatmul.mubr.msk.bf16.gmra.mxu1 %vm261_vm2, %v1996_v17 }
  0x1e   :  { %1926 = vmatprep.mubr.msk.bf16.mxu0 %vm261_vm2, %v1997_v18  ;;  %1958 = vmatprep.mubr.msk.bf16.mxu1 %vm261_vm2, %v1998_v19 }
  0x25   :  { %1927 = vmatmul.mubr.msk.bf16.gmra.mxu0 %vm261_vm2, %v1999_v20  ;;  %1959 = vmatmul.mubr.msk.bf16.gmra.mxu1 %vm261_vm2, %v2000_v21 }
  0x26   :  { %1930 = vmatprep.mubr.msk.bf16.mxu0 %vm261_vm2, %v2001_v22  ;;  %1962 = vmatprep.mubr.msk.bf16.mxu1 %vm261_vm2, %v2002_v23 }
  0x2d   :  { %1931 = vmatmul.mubr.msk.bf16.gmra.mxu0 %vm261_vm2, %v2003_v24  ;;  %1963 = vmatmul.mubr.msk.bf16.gmra.mxu1 %vm261_vm2, %v2004_v25 }
  0x2e   :  { %1934 = vmatprep.mubr.msk.bf16.mxu0 %vm261_vm2, %v2005_v26  ;;  %1966 = vmatprep.mubr.msk.bf16.mxu1 %vm261_vm2, %v2006_v27 }
  0x35   :  { %1935 = vmatmul.mubr.msk.bf16.gmra.mxu0 %vm261_vm2, %v2007_v28  ;;  %1967 = vmatmul.mubr.msk.bf16.gmra.mxu1 %vm261_vm2, %v2008_v29 }
  0x36   :  { %1938 = vmatprep.mubr.msk.bf16.mxu0 %vm261_vm2, %v2009_v30  ;;  %1970 = vmatprep.mubr.msk.bf16.mxu1 %vm261_vm2, %v2010_v31 }
  0x3d   :  { %1939 = vmatmul.mubr.msk.bf16.gmra.mxu0 %vm261_vm2, %v2011_v32  ;;  %1971 = vmatmul.mubr.msk.bf16.gmra.mxu1 %vm261_vm2, %v2012_v33 }
  0x3e   :  { %1942 = vmatprep.mubr.msk.bf16.mxu0 %vm261_vm2, %v2013_v34  ;;  %1974 = vmatprep.mubr.msk.bf16.mxu1 %vm261_vm2, %v2014_v35 }
  0x45   :  { %1943 = vmatmul.mubr.msk.bf16.gmra.mxu0 %vm261_vm2, %v2015_v36  ;;  %1975 = vmatmul.mubr.msk.bf16.gmra.mxu1 %vm261_vm2, %v2016_v37 }
  0xcd   :  { %v1916_v39 = vpop.f32.mrf.mxu0  ;;  %v1948_v40 = vpop.f32.mrf.mxu1 }
  0xce   :  { %v2434_v41 = vadd.f32 %v1916_v39, %v2431_v38  ;;  %v2437_v42 = vadd.f32 %v1948_v40, %v2431_v38 }
  0xcf   :  { %v399_v43 = vpop.f32.mrf.mxu0  ;;  %v527_v44 = vpop.f32.mrf.mxu1 }
  0xd0   :  { %v1495_v45 = vmul.f32 -1.442695, %v2434_v41  ;;  %v1527_v46 = vmul.f32 -1.442695, %v2437_v42  ;;  %v2442_v47 = vadd.f32 %v2431_v38, %v399_v43  ;;  %v2445_v48 = vadd.f32 %v2431_v38, %v527_v44 }
  0xd1   :  { %v1917_v49 = vpop.f32.mrf.mxu0  ;;  %v1949_v50 = vpop.f32.mrf.mxu1 }
  0xd2   :  { %2017 = vpow2.f32 %v1495_v45  ;;  %v1493_v51 = vmul.f32 -1.442695, %v2442_v47  ;;  %v1525_v52 = vmul.f32 -1.442695, %v2445_v48  ;;  %v2450_v53 = vadd.f32 %v1917_v49, %v2431_v38 }
  0xd3   :  { %2019 = vpow2.f32 %v1527_v46  ;;  %v2453_v54 = vadd.f32 %v1949_v50, %v2431_v38  ;;  %v402_v55 = vpop.f32.mrf.mxu0  ;;  %v530_v56 = vpop.f32.mrf.mxu1 }
  0xd4   :  { %2021 = vpow2.f32 %v1493_v51  ;;  %v1496_v57 = vmul.f32 -1.442695, %v2450_v53  ;;  %v2457_v58 = vadd.f32 %v2431_v38, %v402_v55  ;;  %v2460_v59 = vadd.f32 %v2431_v38, %v530_v56 }
  0xd5   :  { %2023 = vpow2.f32 %v1525_v52  ;;  %v1528_v60 = vmul.f32 -1.442695, %v2453_v54  ;;  %v1920_v61 = vpop.f32.mrf.mxu0  ;;  %v1952_v62 = vpop.f32.mrf.mxu1 }
  0xd6   :  { %2025 = vpow2.f32 %v1496_v57  ;;  %v1494_v63 = vmul.f32 -1.442695, %v2457_v58  ;;  %v1526_v0 = vmul.f32 -1.442695, %v2460_v59  ;;  %v2466_v1 = vadd.f32 %v1920_v61, %v2431_v38 }
  0xd7   :  { %2027 = vpow2.f32 %v1528_v60  ;;  %v2469_v2 = vadd.f32 %v1952_v62, %v2431_v38  ;;  %v415_v3 = vpop.f32.mrf.mxu0  ;;  %v543_v4 = vpop.f32.mrf.mxu1 }
  0xd8   :  { %2029 = vpow2.f32 %v1494_v63  ;;  %v1499_v5 = vmul.f32 -1.442695, %v2466_v1  ;;  %v2473_v6 = vadd.f32 %v2431_v38, %v415_v3  ;;  %v2476_v7 = vadd.f32 %v2431_v38, %v543_v4 }
  0xd9   :  { %2031 = vpow2.f32 %v1526_v0  ;;  %v1531_v8 = vmul.f32 -1.442695, %v2469_v2  ;;  %v1921_v9 = vpop.f32.mrf.mxu0  ;;  %v1953_v10 = vpop.f32.mrf.mxu1 }
  0xda   :  { %2033 = vpow2.f32 %v1499_v5  ;;  %v1497_v11 = vmul.f32 -1.442695, %v2473_v6  ;;  %v1529_v12 = vmul.f32 -1.442695, %v2476_v7  ;;  %v2482_v13 = vadd.f32 %v1921_v9, %v2431_v38 }
  0xdb   :  { %2035 = vpow2.f32 %v1531_v8  ;;  %v2485_v14 = vadd.f32 %v1953_v10, %v2431_v38  ;;  %v418_v15 = vpop.f32.mrf.mxu0  ;;  %v546_v16 = vpop.f32.mrf.mxu1 }
  0xdc   :  { %2037 = vpow2.f32 %v1497_v11  ;;  %v1500_v17 = vmul.f32 -1.442695, %v2482_v13  ;;  %v2489_v18 = vadd.f32 %v2431_v38, %v418_v15  ;;  %v2492_v19 = vadd.f32 %v2431_v38, %v546_v16 }
  0xdd   :  { %2039 = vpow2.f32 %v1529_v12  ;;  %v1532_v20 = vmul.f32 -1.442695, %v2485_v14  ;;  %v1924_v21 = vpop.f32.mrf.mxu0  ;;  %v1956_v22 = vpop.f32.mrf.mxu1 }
  0xde   :  { %2041 = vpow2.f32 %v1500_v17  ;;  %v1498_v23 = vmul.f32 -1.442695, %v2489_v18  ;;  %v1530_v24 = vmul.f32 -1.442695, %v2492_v19  ;;  %v2498_v55 = vadd.f32 %v1924_v21, %v2431_v38 }
  0xdf   :  { %v2018_v25 = vpop.eup %2017  ;;  %2043 = vpow2.f32 %v1532_v20  ;;  %v431_v26 = vpop.f32.mrf.mxu0  ;;  %v2501_v3 = vadd.f32 %v1956_v22, %v2431_v38 }
  0xe0   :  { %v559_v27 = vpop.f32.mrf.mxu1  ;;  %v2020_v28 = vpop.eup %2019  ;;  %v848_v29 = vadd.f32 1.0, %v2018_v25  ;;  %2045 = vpow2.f32 %v1498_v23  ;;  %v1503_v9 = vmul.f32 -1.442695, %v2498_v55  ;;  %v2505_v10 = vadd.f32 %v2431_v38, %v431_v26 }
  0xe1   :  { %v2022_v30 = vpop.eup %2021  ;;  %v880_v31 = vadd.f32 1.0, %v2020_v28  ;;  %2047 = vpow2.f32 %v1530_v24  ;;  %v1925_v32 = vpop.f32.mrf.mxu0  ;;  %v2508_v15 = vadd.f32 %v2431_v38, %v559_v27 }
  0xe2   :  { %v2024_v33 = vpop.eup %2023  ;;  %2049 = vrcp.f32 %v848_v29  ;;  %v846_v34 = vadd.f32 1.0, %v2022_v30  ;;  %v1957_v35 = vpop.f32.mrf.mxu1  ;;  %v2511_v16 = vadd.f32 %v1925_v32, %v2431_v38 }
  0xe3   :  { %v2026_v36 = vpop.eup %2025  ;;  %2051 = vrcp.f32 %v880_v31  ;;  %v878_v37 = vadd.f32 1.0, %v2024_v33  ;;  %v434_v45 = vpop.f32.mrf.mxu0  ;;  %v2514_v21 = vadd.f32 %v1957_v35, %v2431_v38  ;;  %v1535_v31 = vmul.f32 -1.442695, %v2501_v3 }
  0xe4   :  { %v2028_v39 = vpop.eup %2027  ;;  %2053 = vrcp.f32 %v846_v34  ;;  %v849_v40 = vadd.f32 1.0, %v2026_v36  ;;  %v562_v50 = vpop.f32.mrf.mxu1  ;;  %v2517_v22 = vadd.f32 %v2431_v38, %v434_v45  ;;  %v1501_v34 = vmul.f32 -1.442695, %v2505_v10 }
  0xe5   :  { %v2030_v43 = vpop.eup %2029  ;;  %2055 = vrcp.f32 %v878_v37  ;;  %v881_v44 = vadd.f32 1.0, %v2028_v39  ;;  %v1928_v62 = vpop.f32.mrf.mxu0  ;;  %v2520_v26 = vadd.f32 %v2431_v38, %v562_v50  ;;  %v1533_v36 = vmul.f32 -1.442695, %v2508_v15 }
  0xe6   :  { %v2032_v46 = vpop.eup %2031  ;;  %2057 = vrcp.f32 %v849_v40  ;;  %v847_v49 = vadd.f32 1.0, %v2030_v43  ;;  %v1960_v4 = vpop.f32.mrf.mxu1  ;;  %v2523_v27 = vadd.f32 %v1928_v62, %v2431_v38  ;;  %v1504_v37 = vmul.f32 -1.442695, %v2511_v16 }
  0xe7   :  { %v2034_v51 = vpop.eup %2033  ;;  %2059 = vrcp.f32 %v881_v44  ;;  %v879_v52 = vadd.f32 1.0, %v2032_v46  ;;  %v447_v23 = vpop.f32.mrf.mxu0  ;;  %v2527_v32 = vadd.f32 %v1960_v4, %v2431_v38  ;;  %v1536_v39 = vmul.f32 -1.442695, %v2514_v21 }
  0xe8   :  { %v2036_v56 = vpop.eup %2035  ;;  %2061 = vrcp.f32 %v847_v49  ;;  %v852_v57 = vadd.f32 1.0, %v2034_v51  ;;  %v575_v28 = vpop.f32.mrf.mxu1  ;;  %v1502_v44 = vmul.f32 -1.442695, %v2517_v22  ;;  %v1534_v45 = vmul.f32 -1.442695, %v2520_v26 }
  0xe9   :  { %v2038_v60 = vpop.eup %2037  ;;  %2063 = vrcp.f32 %v879_v52  ;;  %v884_v61 = vadd.f32 1.0, %v2036_v56  ;;  %v1929_v40 = vpop.f32.mrf.mxu0  ;;  %v1507_v46 = vmul.f32 -1.442695, %v2523_v27  ;;  %v1539_v51 = vmul.f32 -1.442695, %v2527_v32 }
  0xea   :  { %v2040_v63 = vpop.eup %2039  ;;  %2065 = vrcp.f32 %v852_v57  ;;  %v850_v0 = vadd.f32 1.0, %v2038_v60  ;;  %v1961_v49 = vpop.f32.mrf.mxu1  ;;  %v2538_v52 = vadd.f32 %v2431_v38, %v447_v23  ;;  %v2541_v56 = vadd.f32 %v2431_v38, %v575_v28 }
  0xeb   :  { %v2042_v5 = vpop.eup %2041  ;;  %2067 = vrcp.f32 %v884_v61  ;;  %v882_v8 = vadd.f32 1.0, %v2040_v63  ;;  %v2546_v62 = vadd.f32 %v1929_v40, %v2431_v38 }
  0xec   :  { %v2044_v11 = vpop.eup %2043  ;;  %2069 = vrcp.f32 %v850_v0  ;;  %v853_v12 = vadd.f32 1.0, %v2042_v5  ;;  %v2551_v5 = vadd.f32 %v1961_v49, %v2431_v38 }
  0xed   :  { %v2046_v17 = vpop.eup %2045  ;;  %2071 = vrcp.f32 %v882_v8  ;;  %v885_v20 = vadd.f32 1.0, %v2044_v11  ;;  %v450_v8 = vpop.f32.mrf.mxu0 }
  0xee   :  { %v2048_v24 = vpop.eup %2047  ;;  %2073 = vrcp.f32 %v853_v12  ;;  %v851_v25 = vadd.f32 1.0, %v2046_v17  ;;  %v578_v12 = vpop.f32.mrf.mxu1 }
  0xef   :  { %v2050_v29 = vpop.eup %2049  ;;  %2075 = vrcp.f32 %v885_v20  ;;  %v883_v30 = vadd.f32 1.0, %v2048_v24  ;;  %v2569_v28 = vadd.f32 %v2431_v38, %v578_v12 }
  0xf0   :  { %v2052_v33 = vpop.eup %2051  ;;  %2077 = vrcp.f32 %v851_v25  ;;  %v1040_v60 = vmul.f32 %v2050_v29, %v2434_v41  ;;  %v2571_v29 = vpop.f32.mrf.mxu0 }
  0xf1   :  { %v2054_v35 = vpop.eup %2053  ;;  %2079 = vrcp.f32 %v883_v30  ;;  %v1072_v0 = vmul.f32 %v2052_v33, %v2437_v42  ;;  %v2577_v33 = vpop.f32.mrf.mxu1 }
  0xf2   :  { %v2056_v43 = vpop.eup %2055  ;;  %2081 = vpow2.f32 %v1503_v9  ;;  %v1038_v11 = vmul.f32 %v2054_v35, %v2442_v47  ;;  %v1505_v47 = vmul.f32 -1.442695, %v2538_v52  ;;  %v1540_v35 = vmul.f32 -1.442695, %v2551_v5  ;;  %v2589_v49 = vpop.f32.mrf.mxu0 }
  0xf3   :  { %v2058_v50 = vpop.eup %2057  ;;  %2083 = vpow2.f32 %v1535_v31  ;;  %v1070_v20 = vmul.f32 %v2056_v43, %v2445_v48  ;;  %v1508_v31 = vmul.f32 -1.442695, %v2546_v62 }
  0xf4   :  { %v2060_v57 = vpop.eup %2059  ;;  %v1041_v61 = vmul.f32 %v2058_v50, %v2450_v53  ;;  %2085 = vpow2.f32 %v1501_v34 }
  0xf5   :  { %v2062_v63 = vpop.eup %2061  ;;  %v1073_v4 = vmul.f32 %v2060_v57, %v2453_v54  ;;  %2087 = vpow2.f32 %v1533_v36 }
  0xf6   :  { %v2064_v9 = vpop.eup %2063  ;;  %v1693_v41 = vpack.c.bf16 %v1041_v61, %v1040_v60  ;;  %v1039_v53 = vmul.f32 %v2062_v63, %v2457_v58  ;;  %2089 = vpow2.f32 %v1504_v37  ;;  %v2562_v58 = vadd.f32 %v2431_v38, %v450_v8 }
  0xf7   :  { %v2066_v17 = vpop.eup %2065  ;;  %v1773_v23 = vpack.c.bf16 %v1073_v4, %v1072_v0  ;;  %v1071_v42 = vmul.f32 %v2064_v9, %v2460_v59  ;;  %2091 = vpow2.f32 %v1536_v39  ;;  %v1537_v59 = vmul.f32 -1.442695, %v2541_v56 }
  0xf8   :  { %v2068_v54 = vpop.eup %2067  ;;  %1845 = vst [vmem:[%s2870_s3 + $0x8] sm:$0xff] %v1693_v41   ;;  %v1688_v24 = vpack.c.bf16 %v1039_v53, %v1038_v11  ;;  %2093 = vpow2.f32 %v1502_v44  ;;  %v1044_v37 = vmul.f32 %v2066_v17, %v2466_v1  ;;  %v1506_v40 = vmul.f32 -1.442695, %v2562_v58 }
  0xf9   :  { %v2070_v25 = vpop.eup %2069  ;;  %1861 = vst [vmem:[%s2870_s3 + $0x88] sm:$0xff] %v1773_v23   ;;  %v1768_v48 = vpack.c.bf16 %v1071_v42, %v1070_v20  ;;  %2095 = vpow2.f32 %v1534_v45  ;;  %v1076_v44 = vmul.f32 %v2068_v54, %v2469_v2 }
  0xfa   :  { %v2072_v30 = vpop.eup %2071  ;;  %1689 = vst [vmem:[%s2870_s3] sm:$0xff] %v1688_v24   ;;  %2097 = vpow2.f32 %v1507_v46  ;;  %v1538_v46 = vmul.f32 -1.442695, %v2569_v28 }
  0xfb   :  { %v2074_v34 = vpop.eup %2073  ;;  %1860 = vst [vmem:[%s2870_s3 + $0x80] sm:$0xff] %v1768_v48   ;;  %2099 = vpow2.f32 %v1539_v51  ;;  %v1042_v51 = vmul.f32 %v2070_v25, %v2473_v6  ;;  %v1074_v61 = vmul.f32 %v2072_v30, %v2476_v7  ;;  %v1933_v7 = vpop.f32.mrf.mxu0 }
  0xfc   :  { %v2076_v36 = vpop.eup %2075  ;;  %v1045_v39 = vmul.f32 %v2074_v34, %v2482_v13  ;;  %2101 = vpow2.f32 %v1505_v47  ;;  %v591_v13 = vpop.f32.mrf.mxu1 }
  0xfd   :  { %v2078_v43 = vpop.eup %2077  ;;  %v1077_v45 = vmul.f32 %v2076_v36, %v2485_v14  ;;  %2103 = vpow2.f32 %v1537_v59  ;;  %v466_v42 = vpop.f32.mrf.mxu0  ;;  %v2609_v59 = vadd.f32 %v2571_v29, %v2431_v38 }
  0xfe   :  { %v2080_v50 = vpop.eup %2079  ;;  %v1703_v57 = vpack.c.bf16 %v1045_v39, %v1044_v37  ;;  %v1043_v1 = vmul.f32 %v2078_v43, %v2489_v18  ;;  %2105 = vpow2.f32 %v1508_v31  ;;  %v1965_v11 = vpop.f32.mrf.mxu1 }
  0xff   :  { %v2082_v60 = vpop.eup %2081  ;;  %v1783_v63 = vpack.c.bf16 %v1077_v45, %v1076_v44  ;;  %v1075_v2 = vmul.f32 %v2080_v50, %v2492_v19  ;;  %2107 = vpow2.f32 %v1540_v35  ;;  %v1936_v36 = vpop.f32.mrf.mxu0  ;;  %v1511_v29 = vmul.f32 -1.442695, %v2609_v59 }
 0x100   :  { %v2084_v14 = vpop.eup %2083  ;;  %1847 = vst [vmem:[%s2870_s3 + $0x18] sm:$0xff] %v1703_v57   ;;  %v1698_v0 = vpack.c.bf16 %v1043_v1, %v1042_v51  ;;  %v856_v4 = vadd.f32 1.0, %v2082_v60  ;;  %2109 = vpow2.f32 %v1506_v40  ;;  %v594_v47 = vpop.f32.mrf.mxu1  ;;  %v2613_v40 = vadd.f32 %v2577_v33, %v2431_v38 }
 0x101   :  { %v2086_v6 = vpop.eup %2085  ;;  %1863 = vst [vmem:[%s2870_s3 + $0x98] sm:$0xff] %v1783_v63   ;;  %v1778_v18 = vpack.c.bf16 %v1075_v2, %v1074_v61  ;;  %v888_v8 = vadd.f32 1.0, %v2084_v14  ;;  %2111 = vpow2.f32 %v1538_v46  ;;  %v2618_v46 = vadd.f32 %v2431_v38, %v2589_v49  ;;  %v479_v49 = vpop.f32.mrf.mxu0 }
 0x102   :  { %v2088_v9 = vpop.eup %2087  ;;  %1846 = vst [vmem:[%s2870_s3 + $0x10] sm:$0xff] %v1698_v0   ;;  %2113 = vrcp.f32 %v856_v4  ;;  %v854_v19 = vadd.f32 1.0, %v2086_v6  ;;  %v1968_v43 = vpop.f32.mrf.mxu1  ;;  %v2621_v57 = vadd.f32 %v2431_v38, %v591_v13  ;;  %v2624_v1 = vadd.f32 %v1933_v7, %v2431_v38 }
 0x103   :  { %v2090_v41 = vpop.eup %2089  ;;  %1862 = vst [vmem:[%s2870_s3 + $0x90] sm:$0xff] %v1778_v18   ;;  %2115 = vrcp.f32 %v888_v8  ;;  %v886_v53 = vadd.f32 1.0, %v2088_v9  ;;  %v2627_v61 = vadd.f32 %v1965_v11, %v2431_v38  ;;  %v2630_v63 = vadd.f32 %v2431_v38, %v466_v42 }
 0x104   :  { %v2092_v12 = vpop.eup %2091  ;;  %2117 = vrcp.f32 %v854_v19  ;;  %v857_v17 = vadd.f32 1.0, %v2090_v41  ;;  %v2633_v0 = vadd.f32 %v2431_v38, %v594_v47  ;;  %v2636_v13 = vadd.f32 %v1936_v36, %v2431_v38  ;;  %v607_v4 = vpop.f32.mrf.mxu1 }
 0x105   :  { %v2094_v20 = vpop.eup %2093  ;;  %2119 = vrcp.f32 %v886_v53  ;;  %v889_v23 = vadd.f32 1.0, %v2092_v12  ;;  %v1543_v8 = vmul.f32 -1.442695, %v2613_v40  ;;  %v2640_v7 = vadd.f32 %v1968_v43, %v2431_v38 }
 0x106   :  { %v2096_v54 = vpop.eup %2095  ;;  %2121 = vrcp.f32 %v857_v17  ;;  %v855_v24 = vadd.f32 1.0, %v2094_v20  ;;  %v1509_v19 = vmul.f32 -1.442695, %v2618_v46  ;;  %v1541_v41 = vmul.f32 -1.442695, %v2621_v57  ;;  %v1937_v17 = vpop.f32.mrf.mxu0 }
 0x107   :  { %v2098_v25 = vpop.eup %2097  ;;  %2123 = vrcp.f32 %v889_v23  ;;  %v887_v48 = vadd.f32 1.0, %v2096_v54  ;;  %v1512_v53 = vmul.f32 -1.442695, %v2624_v1  ;;  %v1544_v12 = vmul.f32 -1.442695, %v2627_v61 }
 0x108   :  { %v2100_v30 = vpop.eup %2099  ;;  %2125 = vrcp.f32 %v855_v24  ;;  %v860_v31 = vadd.f32 1.0, %v2098_v25  ;;  %v1510_v23 = vmul.f32 -1.442695, %v2630_v63  ;;  %v1542_v42 = vmul.f32 -1.442695, %v2633_v0  ;;  %v1969_v24 = vpop.f32.mrf.mxu1 }
 0x109   :  { %v2102_v34 = vpop.eup %2101  ;;  %2127 = vrcp.f32 %v887_v48  ;;  %v892_v35 = vadd.f32 1.0, %v2100_v30  ;;  %v1515_v54 = vmul.f32 -1.442695, %v2636_v13  ;;  %v1547_v25 = vmul.f32 -1.442695, %v2640_v7 }
 0x10a   :  { %v2104_v37 = vpop.eup %2103  ;;  %2129 = vrcp.f32 %v860_v31  ;;  %v858_v39 = vadd.f32 1.0, %v2102_v34  ;;  %v2651_v48 = vadd.f32 %v2431_v38, %v479_v49  ;;  %v2654_v30 = vadd.f32 %v2431_v38, %v607_v4 }
 0x10b   :  { %v2106_v44 = vpop.eup %2105  ;;  %2131 = vrcp.f32 %v892_v35  ;;  %v890_v45 = vadd.f32 1.0, %v2104_v37  ;;  %v2659_v36 = vadd.f32 %v1937_v17, %v2431_v38 }
 0x10c   :  { %v2108_v50 = vpop.eup %2107  ;;  %2133 = vrcp.f32 %v858_v39  ;;  %v861_v51 = vadd.f32 1.0, %v2106_v44  ;;  %v2664_v44 = vadd.f32 %v1969_v24, %v2431_v38 }
 0x10d   :  { %v2110_v33 = vpop.eup %2109  ;;  %2135 = vrcp.f32 %v890_v45  ;;  %v893_v60 = vadd.f32 1.0, %v2108_v50  ;;  %v482_v45 = vpop.f32.mrf.mxu0 }
 0x10e   :  { %v2112_v2 = vpop.eup %2111  ;;  %2137 = vrcp.f32 %v861_v51  ;;  %v859_v14 = vadd.f32 1.0, %v2110_v33  ;;  %v610_v51 = vpop.f32.mrf.mxu1 }
 0x10f   :  { %v2114_v6 = vpop.eup %2113  ;;  %2139 = vrcp.f32 %v893_v60  ;;  %v891_v18 = vadd.f32 1.0, %v2112_v2  ;;  %v2682_v4 = vadd.f32 %v2431_v38, %v610_v51 }
 0x110   :  { %v2116_v9 = vpop.eup %2115  ;;  %2141 = vrcp.f32 %v859_v14  ;;  %v1048_v34 = vmul.f32 %v2114_v6, %v2498_v55  ;;  %v2684_v6 = vpop.f32.mrf.mxu0 }
 0x111   :  { %v2118_v11 = vpop.eup %2117  ;;  %2143 = vrcp.f32 %v891_v18  ;;  %v1080_v39 = vmul.f32 %v2116_v9, %v2501_v3  ;;  %v2690_v9 = vpop.f32.mrf.mxu1 }
 0x112   :  { %v2120_v20 = vpop.eup %2119  ;;  %2145 = vpow2.f32 %v1511_v29  ;;  %v1046_v50 = vmul.f32 %v2118_v11, %v2505_v10  ;;  %v1513_v10 = vmul.f32 -1.442695, %v2651_v48  ;;  %v1548_v11 = vmul.f32 -1.442695, %v2664_v44  ;;  %v2702_v24 = vpop.f32.mrf.mxu0 }
 0x113   :  { %v2122_v47 = vpop.eup %2121  ;;  %2147 = vpow2.f32 %v1543_v8  ;;  %v1078_v60 = vmul.f32 %v2120_v20, %v2508_v15  ;;  %v1516_v8 = vmul.f32 -1.442695, %v2659_v36 }
 0x114   :  { %v2124_v31 = vpop.eup %2123  ;;  %v1049_v35 = vmul.f32 %v2122_v47, %v2511_v16  ;;  %2149 = vpow2.f32 %v1509_v19 }
 0x115   :  { %v2126_v37 = vpop.eup %2125  ;;  %v1081_v43 = vmul.f32 %v2124_v31, %v2514_v21  ;;  %2151 = vpow2.f32 %v1541_v41 }
 0x116   :  { %v2128_v29 = vpop.eup %2127  ;;  %v1713_v55 = vpack.c.bf16 %v1049_v35, %v1048_v34  ;;  %v1047_v16 = vmul.f32 %v2126_v37, %v2517_v22  ;;  %2153 = vpow2.f32 %v1512_v53  ;;  %v2675_v22 = vadd.f32 %v2431_v38, %v482_v45 }
 0x117   :  { %v2130_v33 = vpop.eup %2129  ;;  %v1793_v49 = vpack.c.bf16 %v1081_v43, %v1080_v39  ;;  %v1079_v3 = vmul.f32 %v2128_v29, %v2520_v26  ;;  %2155 = vpow2.f32 %v1544_v12  ;;  %v1545_v26 = vmul.f32 -1.442695, %v2654_v30 }
 0x118   :  { %v2132_v21 = vpop.eup %2131  ;;  %1849 = vst [vmem:[%s2870_s3 + $0x28] sm:$0xff] %v1713_v55   ;;  %v1708_v2 = vpack.c.bf16 %v1047_v16, %v1046_v50  ;;  %2157 = vpow2.f32 %v1510_v23  ;;  %v1052_v53 = vmul.f32 %v2130_v33, %v2523_v27  ;;  %v1514_v17 = vmul.f32 -1.442695, %v2675_v22 }
 0x119   :  { %v2134_v14 = vpop.eup %2133  ;;  %1865 = vst [vmem:[%s2870_s3 + $0xa8] sm:$0xff] %v1793_v49   ;;  %v1788_v15 = vpack.c.bf16 %v1079_v3, %v1078_v60  ;;  %2159 = vpow2.f32 %v1542_v42  ;;  %v1084_v23 = vmul.f32 %v2132_v21, %v2527_v32 }
 0x11a   :  { %v2136_v18 = vpop.eup %2135  ;;  %1848 = vst [vmem:[%s2870_s3 + $0x20] sm:$0xff] %v1708_v2   ;;  %2161 = vpow2.f32 %v1515_v54  ;;  %v1546_v54 = vmul.f32 -1.442695, %v2682_v4 }
 0x11b   :  { %v2138_v19 = vpop.eup %2137  ;;  %1864 = vst [vmem:[%s2870_s3 + $0xa0] sm:$0xff] %v1788_v15   ;;  %2163 = vpow2.f32 %v1547_v25  ;;  %v1050_v25 = vmul.f32 %v2134_v14, %v2538_v52  ;;  %v1082_v35 = vmul.f32 %v2136_v18, %v2541_v56  ;;  %v1941_v56 = vpop.f32.mrf.mxu0 }
 0x11c   :  { %v2140_v41 = vpop.eup %2139  ;;  %v1053_v12 = vmul.f32 %v2138_v19, %v2546_v62  ;;  %2165 = vpow2.f32 %v1513_v10  ;;  %v623_v62 = vpop.f32.mrf.mxu1 }
 0x11d   :  { %v2142_v20 = vpop.eup %2141  ;;  %v1085_v42 = vmul.f32 %v2140_v41, %v2551_v5  ;;  %2167 = vpow2.f32 %v1545_v26  ;;  %v498_v3 = vpop.f32.mrf.mxu0  ;;  %v2722_v26 = vadd.f32 %v2684_v6, %v2431_v38 }
 0x11e   :  { %v2144_v47 = vpop.eup %2143  ;;  %v1723_v31 = vpack.c.bf16 %v1053_v12, %v1052_v53  ;;  %v1051_v27 = vmul.f32 %v2142_v20, %v2562_v58  ;;  %2169 = vpow2.f32 %v1516_v8  ;;  %v1973_v50 = vpop.f32.mrf.mxu1 }
 0x11f   :  { %v2146_v34 = vpop.eup %2145  ;;  %v1803_v37 = vpack.c.bf16 %v1085_v42, %v1084_v23  ;;  %v1083_v32 = vmul.f32 %v2144_v47, %v2569_v28  ;;  %2171 = vpow2.f32 %v1548_v11  ;;  %v1944_v41 = vpop.f32.mrf.mxu0  ;;  %v1519_v6 = vmul.f32 -1.442695, %v2722_v26 }
 0x120   :  { %v2148_v5 = vpop.eup %2147  ;;  %1851 = vst [vmem:[%s2870_s3 + $0x38] sm:$0xff] %v1723_v31   ;;  %v1718_v39 = vpack.c.bf16 %v1051_v27, %v1050_v25  ;;  %v864_v43 = vadd.f32 1.0, %v2146_v34  ;;  %2173 = vpow2.f32 %v1514_v17  ;;  %v626_v10 = vpop.f32.mrf.mxu1  ;;  %v2726_v17 = vadd.f32 %v2690_v9, %v2431_v38 }
 0x121   :  { %v2150_v52 = vpop.eup %2149  ;;  %1867 = vst [vmem:[%s2870_s3 + $0xb8] sm:$0xff] %v1803_v37   ;;  %v1798_v58 = vpack.c.bf16 %v1083_v32, %v1082_v35  ;;  %v896_v45 = vadd.f32 1.0, %v2148_v5  ;;  %2175 = vpow2.f32 %v1546_v54  ;;  %v2731_v54 = vadd.f32 %v2431_v38, %v2702_v24  ;;  %v511_v24 = vpop.f32.mrf.mxu0 }
 0x122   :  { %v2152_v29 = vpop.eup %2151  ;;  %1850 = vst [vmem:[%s2870_s3 + $0x30] sm:$0xff] %v1718_v39   ;;  %2177 = vrcp.f32 %v864_v43  ;;  %v862_v28 = vadd.f32 1.0, %v2150_v52  ;;  %v1976_v20 = vpop.f32.mrf.mxu1  ;;  %v2734_v31 = vadd.f32 %v2431_v38, %v623_v62  ;;  %v2737_v27 = vadd.f32 %v1941_v56, %v2431_v38 }
 0x123   :  { %v2154_v55 = vpop.eup %2153  ;;  %1866 = vst [vmem:[%s2870_s3 + $0xb0] sm:$0xff] %v1798_v58   ;;  %2179 = vrcp.f32 %v896_v45  ;;  %v894_v16 = vadd.f32 1.0, %v2152_v29  ;;  %v2740_v35 = vadd.f32 %v1973_v50, %v2431_v38  ;;  %v2743_v37 = vadd.f32 %v2431_v38, %v498_v3 }
 0x124   :  { %v2156_v51 = vpop.eup %2155  ;;  %2181 = vrcp.f32 %v862_v28  ;;  %v865_v33 = vadd.f32 1.0, %v2154_v55  ;;  %v2746_v39 = vadd.f32 %v2431_v38, %v626_v10  ;;  %v2749_v62 = vadd.f32 %v1944_v41, %v2431_v38  ;;  %v639_v43 = vpop.f32.mrf.mxu1 }
 0x125   :  { %v2158_v60 = vpop.eup %2157  ;;  %2183 = vrcp.f32 %v894_v16  ;;  %v897_v49 = vadd.f32 1.0, %v2156_v51  ;;  %v1551_v45 = vmul.f32 -1.442695, %v2726_v17  ;;  %v2753_v56 = vadd.f32 %v1976_v20, %v2431_v38 }
 0x126   :  { %v2160_v21 = vpop.eup %2159  ;;  %2185 = vrcp.f32 %v865_v33  ;;  %v863_v2 = vadd.f32 1.0, %v2158_v60  ;;  %v1517_v28 = vmul.f32 -1.442695, %v2731_v54  ;;  %v1549_v55 = vmul.f32 -1.442695, %v2734_v31  ;;  %v1945_v33 = vpop.f32.mrf.mxu0 }
 0x127   :  { %v2162_v14 = vpop.eup %2161  ;;  %2187 = vrcp.f32 %v897_v49  ;;  %v895_v15 = vadd.f32 1.0, %v2160_v21  ;;  %v1520_v16 = vmul.f32 -1.442695, %v2737_v27  ;;  %v1552_v51 = vmul.f32 -1.442695, %v2740_v35 }
 0x128   :  { %v2164_v18 = vpop.eup %2163  ;;  %2189 = vrcp.f32 %v863_v2  ;;  %v868_v8 = vadd.f32 1.0, %v2162_v14  ;;  %v1518_v49 = vmul.f32 -1.442695, %v2743_v37  ;;  %v1550_v3 = vmul.f32 -1.442695, %v2746_v39  ;;  %v1977_v2 = vpop.f32.mrf.mxu1 }
 0x129   :  { %v2166_v19 = vpop.eup %2165  ;;  %2191 = vrcp.f32 %v895_v15  ;;  %v900_v11 = vadd.f32 1.0, %v2164_v18  ;;  %v1523_v21 = vmul.f32 -1.442695, %v2749_v62  ;;  %v1555_v14 = vmul.f32 -1.442695, %v2753_v56 }
 0x12a   :  { %v2168_v53 = vpop.eup %2167  ;;  %2193 = vrcp.f32 %v868_v8  ;;  %v866_v12 = vadd.f32 1.0, %v2166_v19  ;;  %v2764_v15 = vadd.f32 %v2431_v38, %v511_v24  ;;  %v2767_v18 = vadd.f32 %v2431_v38, %v639_v43 }
 0x12b   :  { %v2170_v23 = vpop.eup %2169  ;;  %2195 = vrcp.f32 %v900_v11  ;;  %v898_v42 = vadd.f32 1.0, %v2168_v53  ;;  %v2772_v41 = vadd.f32 %v1945_v33, %v2431_v38 }
 0x12c   :  { %v2172_v47 = vpop.eup %2171  ;;  %2197 = vrcp.f32 %v866_v12  ;;  %v869_v25 = vadd.f32 1.0, %v2170_v23  ;;  %v2777_v23 = vadd.f32 %v1977_v2, %v2431_v38 }
 0x12d   :  { %v2174_v9 = vpop.eup %2173  ;;  %2199 = vrcp.f32 %v898_v42  ;;  %v901_v34 = vadd.f32 1.0, %v2172_v47  ;;  %v514_v42 = vpop.f32.mrf.mxu0 }
 0x12e   :  { %v2176_v32 = vpop.eup %2175  ;;  %2201 = vrcp.f32 %v869_v25  ;;  %v867_v5 = vadd.f32 1.0, %v2174_v9  ;;  %v642_v25 = vpop.f32.mrf.mxu1 }
 0x12f   :  { %v2178_v52 = vpop.eup %2177  ;;  %2203 = vrcp.f32 %v901_v34  ;;  %v899_v58 = vadd.f32 1.0, %v2176_v32  ;;  %v2795_v43 = vadd.f32 %v2431_v38, %v642_v25 }
 0x130   :  { %v2180_v29 = vpop.eup %2179  ;;  %2205 = vrcp.f32 %v867_v5  ;;  %v1056_v19 = vmul.f32 %v2178_v52, %v2609_v59 }
 0x131   :  { %v2182_v50 = vpop.eup %2181  ;;  %2207 = vrcp.f32 %v899_v58  ;;  %v1088_v12 = vmul.f32 %v2180_v29, %v2613_v40  ;;  %v1524_v58 = vmul.f32 -1.442695, %v2772_v41  ;;  %v1556_v29 = vmul.f32 -1.442695, %v2777_v23 }
 0x132   :  { %v2184_v60 = vpop.eup %2183  ;;  %2209 = vpow2.f32 %v1519_v6  ;;  %v1054_v47 = vmul.f32 %v2182_v50, %v2618_v46  ;;  %v1521_v46 = vmul.f32 -1.442695, %v2764_v15 }
 0x133   :  { %v2186_v10 = vpop.eup %2185  ;;  %2211 = vpow2.f32 %v1551_v45  ;;  %v1086_v34 = vmul.f32 %v2184_v60, %v2621_v57  ;;  %v1554_v60 = vmul.f32 -1.442695, %v2795_v43 }
 0x134   :  { %v2188_v8 = vpop.eup %2187  ;;  %v1057_v11 = vmul.f32 %v2186_v10, %v2624_v1  ;;  %2213 = vpow2.f32 %v1517_v28 }
 0x135   :  { %v2190_v53 = vpop.eup %2189  ;;  %v1089_v20 = vmul.f32 %v2188_v8, %v2627_v61  ;;  %2215 = vpow2.f32 %v1549_v55 }
 0x136   :  { %v2192_v6 = vpop.eup %2191  ;;  %v1733_v59 = vpack.c.bf16 %v1057_v11, %v1056_v19  ;;  %v1055_v1 = vmul.f32 %v2190_v53, %v2630_v63  ;;  %2217 = vpow2.f32 %v1520_v16  ;;  %v2788_v63 = vadd.f32 %v2431_v38, %v514_v42 }
 0x137   :  { %v2194_v9 = vpop.eup %2193  ;;  %v1813_v24 = vpack.c.bf16 %v1089_v20, %v1088_v12  ;;  %v1087_v40 = vmul.f32 %v2192_v6, %v2633_v0  ;;  %2219 = vpow2.f32 %v1552_v51  ;;  %v1553_v0 = vmul.f32 -1.442695, %v2767_v18 }
 0x138   :  { %v2196_v61 = vpop.eup %2195  ;;  %1853 = vst [vmem:[%s2870_s3 + $0x48] sm:$0xff] %v1733_v59   ;;  %v1728_v32 = vpack.c.bf16 %v1055_v1, %v1054_v47  ;;  %2221 = vpow2.f32 %v1518_v49  ;;  %v1060_v38 = vmul.f32 %v2194_v9, %v2636_v13  ;;  %v1522_v55 = vmul.f32 -1.442695, %v2788_v63 }
 0x139   :  { %v2198_v5 = vpop.eup %2197  ;;  %1869 = vst [vmem:[%s2870_s3 + $0xc8] sm:$0xff] %v1813_v24   ;;  %v1808_v57 = vpack.c.bf16 %v1087_v40, %v1086_v34  ;;  %2223 = vpow2.f32 %v1550_v3  ;;  %v1092_v51 = vmul.f32 %v2196_v61, %v2640_v7 }
 0x13a   :  { %v2200_v52 = vpop.eup %2199  ;;  %1852 = vst [vmem:[%s2870_s3 + $0x40] sm:$0xff] %v1728_v32   ;;  %2225 = vpow2.f32 %v1523_v21  ;;  %v1058_v3 = vmul.f32 %v2198_v5, %v2651_v48 }
 0x13b   :  { %v2202_v45 = vpop.eup %2201  ;;  %1868 = vst [vmem:[%s2870_s3 + $0xc0] sm:$0xff] %v1808_v57   ;;  %2227 = vpow2.f32 %v1555_v14 }
 0x13c   :  { %v2204_v28 = vpop.eup %2203  ;;  %v1061_v50 = vmul.f32 %v2202_v45, %v2659_v36  ;;  %2229 = vpow2.f32 %v1521_v46  ;;  %v1090_v36 = vmul.f32 %v2200_v52, %v2654_v30 }
 0x13d   :  { %v2206_v16 = vpop.eup %2205  ;;  %v1093_v33 = vmul.f32 %v2204_v28, %v2664_v44  ;;  %2231 = vpow2.f32 %v1553_v0 }
 0x13e   :  { %v2208_v49 = vpop.eup %2207  ;;  %v1743_v21 = vpack.c.bf16 %v1061_v50, %v1060_v38  ;;  %v1059_v2 = vmul.f32 %v2206_v16, %v2675_v22  ;;  %2233 = vpow2.f32 %v1524_v58 }
 0x13f   :  { %v2210_v13 = vpop.eup %2209  ;;  %v1823_v10 = vpack.c.bf16 %v1093_v33, %v1092_v51  ;;  %v1091_v14 = vmul.f32 %v2208_v49, %v2682_v4  ;;  %2235 = vpow2.f32 %v1556_v29 }
 0x140   :  { %v2212_v7 = vpop.eup %2211  ;;  %1855 = vst [vmem:[%s2870_s3 + $0x58] sm:$0xff] %v1743_v21   ;;  %v1738_v44 = vpack.c.bf16 %v1059_v2, %v1058_v3  ;;  %v872_v8 = vadd.f32 1.0, %v2210_v13  ;;  %2237 = vpow2.f32 %v1522_v55 }
 0x141   :  { %v2214_v48 = vpop.eup %2213  ;;  %1871 = vst [vmem:[%s2870_s3 + $0xd8] sm:$0xff] %v1823_v10   ;;  %v1818_v22 = vpack.c.bf16 %v1091_v14, %v1090_v36  ;;  %v904_v19 = vadd.f32 1.0, %v2212_v7  ;;  %2239 = vpow2.f32 %v1554_v60 }
 0x142   :  { %v2216_v30 = vpop.eup %2215  ;;  %1854 = vst [vmem:[%s2870_s3 + $0x50] sm:$0xff] %v1738_v44   ;;  %2241 = vrcp.f32 %v872_v8  ;;  %v870_v4 = vadd.f32 1.0, %v2214_v48 }
 0x143   :  { %v2218_v11 = vpop.eup %2217  ;;  %1870 = vst [vmem:[%s2870_s3 + $0xd0] sm:$0xff] %v1818_v22   ;;  %2243 = vrcp.f32 %v904_v19  ;;  %v902_v53 = vadd.f32 1.0, %v2216_v30 }
 0x144   :  { %v2220_v12 = vpop.eup %2219  ;;  %2245 = vrcp.f32 %v870_v4  ;;  %v873_v20 = vadd.f32 1.0, %v2218_v11 }
 0x145   :  { %v2222_v42 = vpop.eup %2221  ;;  %2247 = vrcp.f32 %v902_v53  ;;  %v905_v6 = vadd.f32 1.0, %v2220_v12 }
 0x146   :  { %v2224_v47 = vpop.eup %2223  ;;  %2249 = vrcp.f32 %v873_v20  ;;  %v871_v59 = vadd.f32 1.0, %v2222_v42 }
 0x147   :  { %v2226_v1 = vpop.eup %2225  ;;  %2251 = vrcp.f32 %v905_v6  ;;  %v903_v25 = vadd.f32 1.0, %v2224_v47 }
 0x148   :  { %v2228_v9 = vpop.eup %2227  ;;  %2253 = vrcp.f32 %v871_v59  ;;  %v876_v34 = vadd.f32 1.0, %v2226_v1 }
 0x149   :  { %v2230_v24 = vpop.eup %2229  ;;  %2255 = vrcp.f32 %v903_v25  ;;  %v908_v40 = vadd.f32 1.0, %v2228_v9 }
 0x14a   :  { %v2232_v61 = vpop.eup %2231  ;;  %2257 = vrcp.f32 %v876_v34  ;;  %v874_v32 = vadd.f32 1.0, %v2230_v24 }
 0x14b   :  { %v2234_v46 = vpop.eup %2233  ;;  %2259 = vrcp.f32 %v908_v40  ;;  %v906_v5 = vadd.f32 1.0, %v2232_v61 }
 0x14c   :  { %v2236_v57 = vpop.eup %2235  ;;  %2261 = vrcp.f32 %v874_v32  ;;  %v877_v0 = vadd.f32 1.0, %v2234_v46 }
 0x14d   :  { %v2238_v52 = vpop.eup %2237  ;;  %2263 = vrcp.f32 %v906_v5  ;;  %v909_v58 = vadd.f32 1.0, %v2236_v57 }
 0x14e   :  { %v2240_v45 = vpop.eup %2239  ;;  %2265 = vrcp.f32 %v877_v0  ;;  %v875_v29 = vadd.f32 1.0, %v2238_v52 }
 0x14f   :  { %v2242_v28 = vpop.eup %2241  ;;  %2267 = vrcp.f32 %v909_v58  ;;  %v907_v38 = vadd.f32 1.0, %v2240_v45 }
 0x150   :  { %v2244_v50 = vpop.eup %2243  ;;  %2269 = vrcp.f32 %v875_v29  ;;  %v1064_v60 = vmul.f32 %v2242_v28, %v2722_v26 }
 0x151   :  { %v2246_v55 = vpop.eup %2245  ;;  %2271 = vrcp.f32 %v907_v38  ;;  %v1096_v21 = vmul.f32 %v2244_v50, %v2726_v17 }
 0x152   :  { %v2248_v16 = vpop.eup %2247  ;;  %v1062_v36 = vmul.f32 %v2246_v55, %v2731_v54 }
 0x153   :  { %v2250_v51 = vpop.eup %2249  ;;  %v1094_v44 = vmul.f32 %v2248_v16, %v2734_v31 }
 0x154   :  { %v2252_v33 = vpop.eup %2251  ;;  %v1065_v49 = vmul.f32 %v2250_v51, %v2737_v27 }
 0x155   :  { %v2254_v3 = vpop.eup %2253  ;;  %v1097_v2 = vmul.f32 %v2252_v33, %v2740_v35 }
 0x156   :  { %v2256_v13 = vpop.eup %2255  ;;  %v1753_v10 = vpack.c.bf16 %v1065_v49, %v1064_v60  ;;  %v1063_v14 = vmul.f32 %v2254_v3, %v2743_v37 }
 0x157   :  { %v2258_v7 = vpop.eup %2257  ;;  %v1833_v8 = vpack.c.bf16 %v1097_v2, %v1096_v21  ;;  %v1095_v48 = vmul.f32 %v2256_v13, %v2746_v39 }
 0x158   :  { %v2260_v26 = vpop.eup %2259  ;;  %1857 = vst [vmem:[%s2870_s3 + $0x68] sm:$0xff] %v1753_v10   ;;  %v1748_v17 = vpack.c.bf16 %v1063_v14, %v1062_v36  ;;  %v1068_v39 = vmul.f32 %v2258_v7, %v2749_v62 }
 0x159   :  { %v2262_v27 = vpop.eup %2261  ;;  %1873 = vst [vmem:[%s2870_s3 + $0xe8] sm:$0xff] %v1833_v8   ;;  %v1828_v54 = vpack.c.bf16 %v1095_v48, %v1094_v44  ;;  %v1100_v30 = vmul.f32 %v2260_v26, %v2753_v56 }
 0x15a   :  { %v2264_v35 = vpop.eup %2263  ;;  %1856 = vst [vmem:[%s2870_s3 + $0x60] sm:$0xff] %v1748_v17   ;;  %v1066_v53 = vmul.f32 %v2262_v27, %v2764_v15 }
 0x15b   :  { %v2266_v31 = vpop.eup %2265  ;;  %1872 = vst [vmem:[%s2870_s3 + $0xe0] sm:$0xff] %v1828_v54   ;;  %v1098_v42 = vmul.f32 %v2264_v35, %v2767_v18 }
 0x15c   :  { %v2268_v37 = vpop.eup %2267  ;;  %v1069_v22 = vmul.f32 %v2266_v31, %v2772_v41 }
 0x15d   :  { %v2270_v19 = vpop.eup %2269  ;;  %v1101_v4 = vmul.f32 %v2268_v37, %v2777_v23 }
 0x15e   :  { %v2272_v11 = vpop.eup %2271  ;;  %v1763_v12 = vpack.c.bf16 %v1069_v22, %v1068_v39  ;;  %v1067_v20 = vmul.f32 %v2270_v19, %v2788_v63 }
 0x15f   :  { %v1843_v6 = vpack.c.bf16 %v1101_v4, %v1100_v30  ;;  %v1099_v47 = vmul.f32 %v2272_v11, %v2795_v43 }
 0x160   :  { %1859 = vst [vmem:[%s2870_s3 + $0x78] sm:$0xff] %v1763_v12   ;;  %v1758_v62 = vpack.c.bf16 %v1067_v20, %v1066_v53 }
 0x161   :  { %1875 = vst [vmem:[%s2870_s3 + $0xf8] sm:$0xff] %v1843_v6   ;;  %v1838_v56 = vpack.c.bf16 %v1099_v47, %v1098_v42 }
 0x162   :  { %1858 = vst [vmem:[%s2870_s3 + $0x70] sm:$0xff] %v1758_v62  }
 0x163   :  { %1874 = vst [vmem:[%s2870_s3 + $0xf0] sm:$0xff] %v1838_v56  }

// kernel: effnetb2_forward.4
= control target key start
LH: loop header
LB: loop body
LE: loop exit
PB: predicated region body
PF: predicated region fallthrough
CT: control target
= control target key end

     0   :  { %s5441_s21 = smov 0   ;;  %s8489_s0 = inlined_call_operand.vmem [shape: bf16[2,256,128], index: 0, kind: input, shape index: {}]   ;;  %s8490_s1 = inlined_call_operand.vmem [shape: bf16[128,128], index: 1, kind: input, shape index: {}]   ;;  %s8491_s2 = inlined_call_operand.vmem [shape: f32[1,128], index: 2, kind: input, shape index: {}]   ;;  %s8492_s3 = inlined_call_operand.vmem [shape: bf16[9,128], index: 3, kind: input, shape index: {}]   ;;  %s8493_s4 = inlined_call_operand.vmem [shape: f32[1,128], index: 4, kind: input, shape index: {}]   ;;  %s8494_s5 = inlined_call_operand.vmem [shape: bf16[128,8], index: 5, kind: input, shape index: {}]   ;;  %s8495_s6 = inlined_call_operand.vmem [shape: f32[1,8], index: 6, kind: input, shape index: {}]   ;;  %s8496_s7 = inlined_call_operand.vmem [shape: bf16[8,128], index: 7, kind: input, shape index: {}]   ;;  %s8497_s8 = inlined_call_operand.vmem [shape: f32[1,128], index: 8, kind: input, shape index: {}]   ;;  %s8498_s9 = inlined_call_operand.vmem [shape: f32[1,128], index: 9, kind: input, shape index: {}]   ;;  %s8499_s10 = inlined_call_operand.vmem [shape: bf16[128,128], index: 10, kind: input, shape index: {}]   ;;  %s8500_s11 = inlined_call_operand.vmem [shape: f32[1,128], index: 11, kind: input, shape index: {}]   ;;  %s8501_s12 = inlined_call_operand.vmem [shape: bf16[2,256,128], index: 12, kind: output, shape index: {}]  }
   0x1 LB: > { %s4445_s22 = sadd.s32 4294967295, %s5371_s21   ;;  %p4449_p0 = scmp.ge.s32.totalorder %s5371_s21, 1  ;;  %s5371_s21 = sphi %s5441_s21, %s22_s21  }
   0x2   : > { %p362_p1 = scmp.lt.s32.totalorder %s5371_s21, 3 }
   0x4   : > { %p363_p2 = pnand %p4449_p0, %p362_p1 }
   0x6   : > { %366 = sbr.rel (%p363_p2) target bundleno = 1518 (0x5ee), region = 68 }
   0xb   : > { %v5027_v0 = vld [vmem:[%s8490_s1 + $0x38] sm:$0xff]   ;;  %p404_p3 = scmp.lt.s32.totalorder %s4445_s22, 1  ;;  %v5028_v1 = vld [vmem:[%s8490_s1 + $0x30] sm:$0xff]   ;;  %v5029_v2 = vld [vmem:[%s8490_s1 + $0x28] sm:$0xff]   ;;  %v5373_v24 = vmov 0   ;;  %vm1473_vm0 = vcmask 1043456  }
   0xc   : > { %4894 = vmatprep.subr.bf16.mxu0 %v5027_v0  ;;  %v5030_v3 = vld [vmem:[%s8490_s1 + $0x20] sm:$0xff]   ;;  %v5031_v5 = vld [vmem:[%s8490_s1 + $0x18] sm:$0xff]   ;;  %v5032_v6 = vld [vmem:[%s8490_s1 + $0x10] sm:$0xff]   ;;  %1005 = vst [vmem:[#allocation2 + $0x18] sm:$0xf] %v5373_v24  ;;  %vm1480_vm5 = vcmask 1040384  }
   0xd   : > { %s9157_s22 = smov (!%p404_p3, %s4445_s22), 1  ;;  %4895 = vmatpush3.bf16.msra.mxu0 %v5027_v0  ;;  %v5033_v7 = vld [vmem:[%s8490_s1 + $0x8] sm:$0xff]   ;;  %v5034_v8 = vld [vmem:[%s8490_s1] sm:$0xff]   ;;  %999 = vst [vmem:[#allocation2] sm:$0xf] %v5373_v24  ;;  %vm2004_vm8 = vcmask 1046528  }
   0xe   : > { %4896 = vmatprep.subr.bf16.mxu0 %v5028_v1  ;;  %s4630_s29 = sshll.u32 %s9157_s22, 7  ;;  %1000 = vst [vmem:[#allocation2 + $0x4] sm:$0xf] %v5373_v24  ;;  %1001 = vst [vmem:[#allocation2 + $0x8] sm:$0x1] %v5373_v24  ;;  %vm2773_vm9 = vcmask 1045504  }
   0xf   : > { %s5466_s14 = scalar_lea.vmem %s8489_s0, %s4630_s29  ;;  %1002 = vst [vmem:[#allocation2 + $0xc] sm:$0xf] %v5373_v24  ;;  %1003 = vst [vmem:[#allocation2 + $0x10] sm:$0xf] %v5373_v24  ;;  %v5502_v25 = vld [vmem:[%s8491_s2] ss:$0 sm:$0xff]  ;;  %s8426_s27 = scalar_lea.vmem %s8501_s12, %s4630_s29 }
  0x10   : > { %v415_v4 = vld [vmem:[%s5466_s14] sm:$0xff]   ;;  %v417_v9 = vld [vmem:[%s5466_s14 + $0x8] sm:$0xff]   ;;  %v419_v10 = vld [vmem:[%s5466_s14 + $0x10] sm:$0xff]   ;;  %1004 = vst [vmem:[#allocation2 + $0x14] sm:$0x1] %v5373_v24  ;;  %vm5375_vm10 = vmmov 0  }
  0x11   : > { %4897 = vmatpush3.bf16.msra.mxu0 %v5028_v1  ;;  %4910 = vmatprep.mubr.bf16.mxu0 %v415_v4  ;;  %v421_v11 = vld [vmem:[%s5466_s14 + $0x18] sm:$0xff]   ;;  %v423_v12 = vld [vmem:[%s5466_s14 + $0x20] sm:$0xff]   ;;  %v425_v13 = vld [vmem:[%s5466_s14 + $0x28] sm:$0xff]   ;;  %1006 = vst [vmem:[#allocation2 + $0x1c] sm:$0xf] %v5373_v24  ;;  %vm3826_vm11 = vcmask 64512  }
  0x12   : > { %4898 = vmatprep.subr.bf16.mxu0 %v5029_v2  ;;  %v427_v14 = vld [vmem:[%s5466_s14 + $0x30] sm:$0xff]   ;;  %v429_v15 = vld [vmem:[%s5466_s14 + $0x38] sm:$0xff]   ;;  %v431_v16 = vld [vmem:[%s5466_s14 + $0x40] sm:$0xff]   ;;  %1007 = vst [vmem:[#allocation2 + $0x20] sm:$0x1] %v5373_v24 }
  0x13   : > { %v433_v17 = vld [vmem:[%s5466_s14 + $0x48] sm:$0xff]   ;;  %v435_v18 = vld [vmem:[%s5466_s14 + $0x50] sm:$0xff]   ;;  %v437_v19 = vld [vmem:[%s5466_s14 + $0x58] sm:$0xff]   ;;  %1008 = vst [vmem:[#allocation2 + $0x24] sm:$0xf] %v5373_v24 }
  0x14   : > { %v439_v20 = vld [vmem:[%s5466_s14 + $0x60] sm:$0xff]   ;;  %v441_v21 = vld [vmem:[%s5466_s14 + $0x68] sm:$0xff]   ;;  %v443_v22 = vld [vmem:[%s5466_s14 + $0x70] sm:$0xff]   ;;  %1009 = vst [vmem:[#allocation2 + $0x28] sm:$0xf] %v5373_v24 }
  0x15   : > { %4899 = vmatpush3.bf16.msra.mxu0 %v5029_v2  ;;  %v445_v23 = vld [vmem:[%s5466_s14 + $0x78] sm:$0xff]   ;;  %1010 = vst [vmem:[#allocation2 + $0x2c] sm:$0x1] %v5373_v24  ;;  %1011 = vst [vmem:[#allocation2 + $0x30] sm:$0xf] %v5373_v24 }
  0x16   : > { %4900 = vmatprep.subr.bf16.mxu0 %v5030_v3  ;;  %1012 = vst [vmem:[#allocation2 + $0x34] sm:$0xf] %v5373_v24  ;;  %1013 = vst [vmem:[#allocation2 + $0x38] sm:$0x1] %v5373_v24  ;;  %vm1474_vm1 = vsmask.f32 7938 }
  0x17   : > { %1014 = vst [vmem:[#allocation2 + $0x3c] sm:$0xf] %v5373_v24  ;;  %1015 = vst [vmem:[#allocation2 + $0x40] sm:$0xf] %v5373_v24  ;;  %vm1149_vm2 = vsmask.f32 256 }
  0x18   : > { %1016 = vst [vmem:[#allocation2 + $0x44] sm:$0x1] %v5373_v24  ;;  %1017 = vst [vmem:[#allocation2 + $0x48] sm:$0xf] %v5373_v24  ;;  %vm1150_vm4 = vsmask.f32 4368 }
  0x19   : > { %4901 = vmatpush3.bf16.msra.mxu0 %v5030_v3  ;;  %1018 = vst [vmem:[#allocation2 + $0x4c] sm:$0xf] %v5373_v24  ;;  %1019 = vst [vmem:[#allocation2 + $0x50] sm:$0x1] %v5373_v24 }
  0x1a   : > { %4902 = vmatprep.subr.bf16.mxu0 %v5031_v5  ;;  %1020 = vst [vmem:[#allocation2 + $0x54] sm:$0xf] %v5373_v24  ;;  %1021 = vst [vmem:[#allocation2 + $0x58] sm:$0xf] %v5373_v24 }
  0x1b   : > { %1022 = vst [vmem:[#allocation2 + $0x5c] sm:$0x1] %v5373_v24  ;;  %1023 = vst [vmem:[#allocation2 + $0x60] sm:$0xf] %v5373_v24 }
  0x1c   : > { %1024 = vst [vmem:[#allocation2 + $0x64] sm:$0xf] %v5373_v24  ;;  %1025 = vst [vmem:[#allocation2 + $0x68] sm:$0x1] %v5373_v24 }
  0x1d   : > { %4903 = vmatpush3.bf16.msra.mxu0 %v5031_v5  ;;  %1026 = vst [vmem:[#allocation2 + $0x6c] sm:$0xf] %v5373_v24  ;;  %1027 = vst [vmem:[#allocation2 + $0x70] sm:$0xf] %v5373_v24 }
  0x1e   : > { %4904 = vmatprep.subr.bf16.mxu0 %v5032_v6  ;;  %1028 = vst [vmem:[#allocation2 + $0x74] sm:$0x1] %v5373_v24  ;;  %1029 = vst [vmem:[#allocation2 + $0x78] sm:$0xf] %v5373_v24 }
  0x1f   : > { %1030 = vst [vmem:[#allocation2 + $0x7c] sm:$0xf] %v5373_v24  ;;  %1031 = vst [vmem:[#allocation2 + $0x80] sm:$0x1] %v5373_v24 }
  0x20   : > { %1032 = vst [vmem:[#allocation2 + $0x84] sm:$0xf] %v5373_v24  ;;  %1033 = vst [vmem:[#allocation2 + $0x88] sm:$0xf] %v5373_v24 }
  0x21   : > { %4905 = vmatpush3.bf16.msra.mxu0 %v5032_v6  ;;  %1034 = vst [vmem:[#allocation2 + $0x8c] sm:$0x1] %v5373_v24  ;;  %1035 = vst [vmem:[#allocation2 + $0x90] sm:$0xf] %v5373_v24 }
  0x22   : > { %4906 = vmatprep.subr.bf16.mxu0 %v5033_v7  ;;  %1036 = vst [vmem:[#allocation2 + $0x94] sm:$0xf] %v5373_v24  ;;  %1037 = vst [vmem:[#allocation2 + $0x98] sm:$0x1] %v5373_v24 }
  0x23   : > { %1038 = vst [vmem:[#allocation2 + $0x9c] sm:$0xf] %v5373_v24  ;;  %1039 = vst [vmem:[#allocation2 + $0xa0] sm:$0xf] %v5373_v24 }
  0x24   : > { %1040 = vst [vmem:[#allocation2 + $0xa4] sm:$0x1] %v5373_v24  ;;  %1041 = vst [vmem:[#allocation2 + $0xa8] sm:$0xf] %v5373_v24 }
  0x25   : > { %4907 = vmatpush3.bf16.msra.mxu0 %v5033_v7  ;;  %1042 = vst [vmem:[#allocation2 + $0xac] sm:$0xf] %v5373_v24  ;;  %1043 = vst [vmem:[#allocation2 + $0xb0] sm:$0x1] %v5373_v24 }
  0x26   : > { %4908 = vmatprep.subr.bf16.mxu0 %v5034_v8  ;;  %1044 = vst [vmem:[#allocation2 + $0xb4] sm:$0xf] %v5373_v24  ;;  %1045 = vst [vmem:[#allocation2 + $0xb8] sm:$0xf] %v5373_v24 }
  0x27   : > { %1046 = vst [vmem:[#allocation2 + $0xbc] sm:$0x1] %v5373_v24  ;;  %1047 = vst [vmem:[#allocation2 + $0xc0] sm:$0xf] %v5373_v24 }
  0x28   : > { %1048 = vst [vmem:[#allocation2 + $0xc4] sm:$0xf] %v5373_v24  ;;  %1049 = vst [vmem:[#allocation2 + $0xc8] sm:$0x1] %v5373_v24 }
  0x29   : > { %4909 = vmatpush3.bf16.msra.mxu0 %v5034_v8  ;;  %1050 = vst [vmem:[#allocation2 + $0xcc] sm:$0xf] %v5373_v24  ;;  %1051 = vst [vmem:[#allocation2 + $0xd0] sm:$0xf] %v5373_v24 }
  0x2a   : > { %1052 = vst [vmem:[#allocation2 + $0xd4] sm:$0x1] %v5373_v24  ;;  %vm5528_vm3 = vmand %vm1473_vm0, %vm1474_vm1 }
  0x2b   : > { %vm5541_vm6 = vmor %vm1149_vm2, %vm1150_vm4 }
  0x2c   : > { %4911 = vmatmul.mubr.bf16.vlgmr.msra.gmra.mxu0 %v417_v9  ;;  %vm5547_vm7 = vmand %vm1480_vm5, %vm1149_vm2 }
  0x2d   : > { %4914 = vmatprep.mubr.bf16.mxu0 %v419_v10 }
  0x34   : > { %4915 = vmatmul.mubr.bf16.gmra.mxu0 %v421_v11 }
  0x35   : > { %4918 = vmatprep.mubr.bf16.mxu0 %v423_v12 }
  0x3c   : > { %4919 = vmatmul.mubr.bf16.gmra.mxu0 %v425_v13 }
  0x3d   : > { %4922 = vmatprep.mubr.bf16.mxu0 %v427_v14 }
  0x44   : > { %4923 = vmatmul.mubr.bf16.gmra.mxu0 %v429_v15 }
  0x45   : > { %4926 = vmatprep.mubr.bf16.mxu0 %v431_v16  ;;  %v8668_v16 = vmov 0 }
  0x46   : > { %v8669_v16 = vsel %vm5528_vm3, 4294967295, %v8668_v16 }
  0x47   : > { %8670 = vst [vmem:[#allocation3_spill] sm:$0xff] %v8669_v16 }
  0x4c   : > { %4927 = vmatmul.mubr.bf16.gmra.mxu0 %v433_v17  ;;  %v1485_v17 = vld [vmem:[#allocation2 + $0x18] sm:$0xf] }
  0x4d   : > { %4930 = vmatprep.mubr.bf16.mxu0 %v435_v18 }
  0x54   : > { %4931 = vmatmul.mubr.bf16.gmra.mxu0 %v437_v19 }
  0x55   : > { %4934 = vmatprep.mubr.bf16.mxu0 %v439_v20 }
  0x5c   : > { %4935 = vmatmul.mubr.bf16.gmra.mxu0 %v441_v21 }
  0x5d   : > { %4938 = vmatprep.mubr.bf16.mxu0 %v443_v22 }
  0x64   : > { %4939 = vmatmul.mubr.bf16.gmra.mxu0 %v445_v23 }
  0xec   : > { %v4912_v26 = vpop.f32.mrf.mxu0 }
  0xed   : > { %v657_v27 = vadd.f32 %v4912_v26, %v5502_v25 }
  0xee   : > { %v648_v28 = vpop.f32.mrf.mxu0 }
  0xef   : > { %v4481_v29 = vmul.f32 -1.442695, %v657_v27  ;;  %v649_v30 = vadd.f32 %v5502_v25, %v648_v28 }
  0xf0   : > { %v4913_v31 = vpop.f32.mrf.mxu0 }
  0xf1   : > { %5083 = vpow2.f32 %v4481_v29  ;;  %v4479_v32 = vmul.f32 -1.442695, %v649_v30  ;;  %v660_v33 = vadd.f32 %v4913_v31, %v5502_v25 }
  0xf2   : > { %v651_v34 = vpop.f32.mrf.mxu0 }
  0xf3   : > { %5085 = vpow2.f32 %v4479_v32  ;;  %v4482_v35 = vmul.f32 -1.442695, %v660_v33  ;;  %v5508_v36 = vadd.f32 %v5502_v25, %v651_v34  ;;  %v8671_v32 = vmov 0 }
  0xf4   : > { %v4916_v37 = vpop.f32.mrf.mxu0  ;;  %v8672_v32 = vsel %vm5541_vm6, 4294967295, %v8671_v32 }
  0xf5   : > { %5087 = vpow2.f32 %v4482_v35  ;;  %v4480_v38 = vmul.f32 -1.442695, %v5508_v36  ;;  %v5512_v39 = vadd.f32 %v4916_v37, %v5502_v25  ;;  %8673 = vst [vmem:[#allocation4_spill] sm:$0xff] %v8672_v32  ;;  %v8674_v37 = vmov 0 }
  0xf6   : > { %v664_v40 = vpop.f32.mrf.mxu0  ;;  %v8675_v37 = vsel %vm5547_vm7, 4294967295, %v8674_v37 }
  0xf7   : > { %5089 = vpow2.f32 %v4480_v38  ;;  %v4485_v41 = vmul.f32 -1.442695, %v5512_v39  ;;  %v5516_v42 = vadd.f32 %v5502_v25, %v664_v40  ;;  %8676 = vst [vmem:[#allocation5_spill] sm:$0xff] %v8675_v37  ;;  %v1489_v38 = vld [vmem:[#allocation2 + $0x20] sm:$0x1] }
  0xf8   : > { %v4917_v43 = vpop.f32.mrf.mxu0 }
  0xf9   : > { %5091 = vpow2.f32 %v4485_v41  ;;  %v4483_v44 = vmul.f32 -1.442695, %v5516_v42  ;;  %v5520_v45 = vadd.f32 %v4917_v43, %v5502_v25 }
  0xfa   : > { %v667_v61 = vpop.f32.mrf.mxu0 }
  0xfb   : > { %5093 = vpow2.f32 %v4483_v44  ;;  %v4486_v46 = vmul.f32 -1.442695, %v5520_v45  ;;  %v5524_v1 = vadd.f32 %v5502_v25, %v667_v61 }
  0xfc   : > { %v4920_v8 = vpop.f32.mrf.mxu0 }
  0xfd   : > { %5095 = vpow2.f32 %v4486_v46  ;;  %v4484_v10 = vmul.f32 -1.442695, %v5524_v1  ;;  %v5534_v19 = vadd.f32 %v4920_v8, %v5502_v25  ;;  %v1492_v8 = vld [vmem:[#allocation2 + $0x24] sm:$0xf] }
  0xfe   : > { %v5084_v47 = vpop.eup %5083 }
  0xff   : > { %v873_v48 = vadd.f32 1.0, %v5084_v47 }
 0x100   : > { %v5086_v49 = vpop.eup %5085 }
 0x101   : > { %5097 = vrcp.f32 %v873_v48  ;;  %v871_v50 = vadd.f32 1.0, %v5086_v49 }
 0x102   : > { %v5088_v51 = vpop.eup %5087 }
 0x103   : > { %5099 = vrcp.f32 %v871_v50  ;;  %v874_v52 = vadd.f32 1.0, %v5088_v51 }
 0x104   : > { %v5090_v53 = vpop.eup %5089 }
 0x105   : > { %5101 = vrcp.f32 %v874_v52  ;;  %v872_v54 = vadd.f32 1.0, %v5090_v53 }
 0x106   : > { %v5092_v55 = vpop.eup %5091 }
 0x107   : > { %5103 = vrcp.f32 %v872_v54  ;;  %v877_v56 = vadd.f32 1.0, %v5092_v55  ;;  %v1482_v54 = vld [vmem:[#allocation2 + $0x14] sm:$0x1] }
 0x108   : > { %v5094_v57 = vpop.eup %5093 }
 0x109   : > { %5105 = vrcp.f32 %v877_v56  ;;  %v875_v58 = vadd.f32 1.0, %v5094_v57  ;;  %v680_v56 = vpop.f32.mrf.mxu0 }
 0x10a   : > { %v5096_v59 = vpop.eup %5095 }
 0x10b   : > { %5107 = vrcp.f32 %v875_v58  ;;  %v878_v60 = vadd.f32 1.0, %v5096_v59 }
 0x10d   : > { %5109 = vrcp.f32 %v878_v60  ;;  %v1499_v60 = vld [vmem:[#allocation2 + $0x30] sm:$0xf] }
 0x10e   : > { %v5098_v62 = vpop.eup %5097  ;;  %5111 = vpow2.f32 %v4484_v10  ;;  %v4489_v10 = vmul.f32 -1.442695, %v5534_v19 }
 0x10f   : > { %v969_v63 = vmul.f32 %v5098_v62, %v657_v27  ;;  %v1476_v27 = vld [vmem:[#allocation2 + $0xc] sm:$0xf] }
 0x110   : > { %v5100_v0 = vpop.eup %5099  ;;  %5113 = vpow2.f32 %v4489_v10 }
 0x111   : > { %v4634_v2 = vpack.c.bf16 %v969_v63, %v969_v63  ;;  %v967_v3 = vmul.f32 %v5100_v0, %v649_v30 }
 0x112   : > { %v5102_v4 = vpop.eup %5101 }
 0x113   : > { %v1170_v5 = vshrl.u32 %v4634_v2, 16  ;;  %v4632_v6 = vpack.c.bf16 %v967_v3, %v967_v3  ;;  %v970_v7 = vmul.f32 %v5102_v4, %v660_v33  ;;  %v1173_v12 = vshll.u32 %v4634_v2, 16 }
 0x114   : > { %v5104_v9 = vpop.eup %5103  ;;  %v5564_v2 = vadd.f32 %v5502_v25, %v680_v56 }
 0x115   : > { %v1172_v11 = vrot.slane %v1170_v5, 7  ;;  %v1153_v13 = vshrl.u32 %v4632_v6, 16  ;;  %v4635_v14 = vpack.c.bf16 %v970_v7, %v970_v7  ;;  %v968_v18 = vmul.f32 %v5104_v9, %v5508_v36  ;;  %v1503_v9 = vld [vmem:[#allocation2 + $0x38] sm:$0x1] }
 0x116   : > { %v5106_v15 = vpop.eup %5105  ;;  %v1156_v22 = vshll.u32 %v4632_v6, 16 }
 0x117   : > { %v1175_v20 = vor.u32 %v1173_v12, %v1172_v11  ;;  %v1155_v21 = vrot.slane %v1153_v13, 7  ;;  %v1178_v23 = vshrl.u32 %v4635_v14, 16  ;;  %v1176_v26 = vrot.slane %v1172_v11, 4  ;;  %v4921_v11 = vpop.f32.mrf.mxu0 }
 0x118   : > { %v5108_v24 = vpop.eup %5107  ;;  %v4633_v28 = vpack.c.bf16 %v968_v18, %v968_v18  ;;  %v973_v29 = vmul.f32 %v5106_v15, %v5512_v39  ;;  %v1181_v34 = vshll.u32 %v4635_v14, 16 }
 0x119   : > { %v1486_v30 = vsel %vm5528_vm3, %v1175_v20, %v1485_v17  ;;  %v1158_v31 = vor.u32 %v1156_v22, %v1155_v21  ;;  %v1180_v33 = vrot.slane %v1178_v23, 7  ;;  %v1159_v36 = vrot.slane %v1155_v21, 4  ;;  %v683_v23 = vpop.f32.mrf.mxu0 }
 0x11a   : > { %v5110_v35 = vpop.eup %5109  ;;  %1487 = vst [vmem:[#allocation2 + $0x18] sm:$0xf] %v1486_v30  ;;  %v1161_v39 = vshrl.u32 %v4633_v28, 16  ;;  %v4638_v40 = vpack.c.bf16 %v973_v29, %v973_v29  ;;  %v971_v41 = vmul.f32 %v5108_v24, %v5516_v42  ;;  %v1164_v49 = vshll.u32 %v4633_v28, 16 }
 0x11b   : > { %v1477_v43 = vsel %vm5528_vm3, %v1158_v31, %v1476_v27  ;;  %v1183_v44 = vor.u32 %v1181_v34, %v1180_v33  ;;  %v1185_v46 = vrot.slane %v1180_v33, 4  ;;  %v974_v47 = vmul.f32 %v5110_v35, %v5520_v45  ;;  %v5112_v18 = vpop.eup %5111  ;;  %v1590_v31 = vld [vmem:[%s8492_s3] sm:$0xf]  ;;  %v1591_v34 = vld [vmem:[%s8492_s3 + $0x4] sm:$0x1] }
 0x11c   : > { %1478 = vst [vmem:[#allocation2 + $0xc] sm:$0xf] %v1477_v43  ;;  %v1163_v48 = vrot.slane %v1161_v39, 7  ;;  %v1204_v50 = vshrl.u32 %v4638_v40, 16  ;;  %v4636_v51 = vpack.c.bf16 %v971_v41, %v971_v41  ;;  %v1207_v42 = vshll.u32 %v4638_v40, 16 }
 0x11d   : > { %v1184_v52 = vsel %vm5541_vm6, %v1176_v26, %v1183_v44  ;;  %v1490_v53 = vsel %vm5547_vm7, %v1185_v46, %v1489_v38  ;;  %v4639_v55 = vpack.c.bf16 %v974_v47, %v974_v47  ;;  %v4487_v17 = vmul.f32 -1.442695, %v5564_v2  ;;  %v4924_v26 = vpop.f32.mrf.mxu0  ;;  %v4697_v38 = vld [vmem:[#allocation2] sm:$0xff]  }
 0x11e   : > { %1488 = vst [vmem:[#allocation2 + $0x1c] sm:$0xf] %v1184_v52  ;;  %1491 = vst [vmem:[#allocation2 + $0x20] sm:$0x1] %v1490_v53  ;;  %v1166_v57 = vor.u32 %v1164_v49, %v1163_v48  ;;  %v1168_v58 = vrot.slane %v1163_v48, 4  ;;  %v1206_v45 = vrot.slane %v1204_v50, 7  ;;  %v1662_v24 = vlaneseq  ;;  %v5114_v48 = vpop.eup %5113 }
 0x11f   : > { %v1187_v59 = vshrl.u32 %v4636_v51, 16  ;;  %v1212_v61 = vshrl.u32 %v4639_v55, 16  ;;  %v1190_v4 = vshll.u32 %v4636_v51, 16  ;;  %v1215_v6 = vshll.u32 %v4639_v55, 16  ;;  %v696_v33 = vpop.f32.mrf.mxu0  ;;  %v2639_v55 = vld [vmem:[#allocation2] sm:$0xe] }
 0x120   : > { %v1167_v62 = vsel %vm5541_vm6, %v1159_v36, %v1166_v57  ;;  %v1483_v63 = vsel %vm5547_vm7, %v1168_v58, %v1482_v54  ;;  %v1209_v0 = vor.u32 %v1207_v42, %v1206_v45  ;;  %v1210_v12 = vrot.slane %v1206_v45, 4  ;;  %v1870_v57 = vld [vmem:[#allocation2 + $0x8] sm:$0x1] }
 0x121   : > { %1479 = vst [vmem:[#allocation2 + $0x10] sm:$0xf] %v1167_v62  ;;  %1484 = vst [vmem:[#allocation2 + $0x14] sm:$0x1] %v1483_v63  ;;  %v5566_v3 = vrot.slane %v1187_v59, 7  ;;  %v1214_v5 = vrot.slane %v1212_v61, 7  ;;  %5115 = vpow2.f32 %v4487_v17  ;;  %v5580_v27 = vadd.f32 %v4921_v11, %v5502_v25  ;;  %v4925_v47 = vpop.f32.mrf.mxu0 }
 0x122   : > { %v1500_v7 = vsel %vm5528_vm3, %v1209_v0, %v1499_v60  ;;  %v5583_v28 = vadd.f32 %v5502_v25, %v683_v23  ;;  %v5585_v29 = vshrl.u32 %v1662_v24, 7  ;;  %v876_v30 = vadd.f32 1.0, %v5112_v18 }
 0x123   : > { %1501 = vst [vmem:[#allocation2 + $0x30] sm:$0xf] %v1500_v7  ;;  %v1192_v13 = vor.u32 %v1190_v4, %v5566_v3  ;;  %v1217_v14 = vor.u32 %v1215_v6, %v1214_v5  ;;  %v1219_v15 = vrot.slane %v1214_v5, 4  ;;  %v4490_v36 = vmul.f32 -1.442695, %v5580_v27  ;;  %v699_v45 = vpop.f32.mrf.mxu0 }
 0x124   : > { %v1906_v35 = vsub.s32 1, %v5585_v29  ;;  %v4488_v39 = vmul.f32 -1.442695, %v5583_v28  ;;  %v1592_v40 = vunpack.c.l.bf16 %v1590_v31  ;;  %5117 = vrcp.f32 %v876_v30 }
 0x125   : > { %v1493_v20 = vsel %vm5528_vm3, %v1192_v13, %v1492_v8  ;;  %v1218_v21 = vsel %vm5541_vm6, %v1210_v12, %v1217_v14  ;;  %v1504_v22 = vsel %vm5547_vm7, %v1219_v15, %v1503_v9  ;;  %v1593_v41 = vunpack.c.l.bf16 %v1591_v34  ;;  %v4928_v14 = vpop.f32.mrf.mxu0  ;;  %v1596_v15 = vld [vmem:[#allocation2 + $0xc] sm:$0xf] }
 0x126   : > { %1494 = vst [vmem:[#allocation2 + $0x24] sm:$0xf] %v1493_v20  ;;  %1502 = vst [vmem:[#allocation2 + $0x34] sm:$0xf] %v1218_v21  ;;  %v5597_v43 = vsub.s32 0, %v5585_v29  ;;  %v2675_v44 = vsub.s32 2, %v5585_v29  ;;  %v4698_v49 = vunpack.c.l.bf16 %v4697_v38  ;;  %v4699_v50 = vunpack.c.h.bf16 %v4697_v38 }
 0x127   : > { %1505 = vst [vmem:[#allocation2 + $0x38] sm:$0x1] %v1504_v22  ;;  %v2921_v46 = vsub.s32 5, %v5585_v29  ;;  %v5601_v51 = vrot.slane %v1592_v40, %v1906_v35  ;;  %5119 = vpow2.f32 %v4490_v36  ;;  %v1734_v52 = vsub.s32 3, %v5585_v29  ;;  %v4812_v38 = vld [vmem:[#allocation2 + $0x18] sm:$0xff]  }
 0x128   : > { %8677 = vst [vmem:[#allocation6_spill] sm:$0xff] %v5597_v43  ;;  %v2152_v53 = vsub.s32 4, %v5585_v29  ;;  %5121 = vpow2.f32 %v4488_v39  ;;  %v5606_v42 = vrot.slane %v1592_v40, %v5597_v43  ;;  %v5608_v56 = vrot.slane %v1592_v40, %v2675_v44  ;;  %v1597_v8 = vld [vmem:[#allocation2 + $0x10] sm:$0xf] }
 0x129   : > { %8678 = vst [vmem:[#allocation7_spill] sm:$0xff] %v5601_v51  ;;  %v881_v58 = vadd.f32 1.0, %v5114_v48  ;;  %v5610_v59 = vrot.slane %v1592_v40, %v2921_v46  ;;  %v5613_v60 = vrot.slane %v1593_v41, %v5597_v43  ;;  %v1908_v61 = vmul.f32 %v4698_v49, %v5601_v51 }
 0x12a   : > { %8679 = vst [vmem:[#allocation8_spill] sm:$0xff] %v5608_v56  ;;  %v5617_v62 = vmul.f32 %v4699_v50, %v5601_v51  ;;  %v5619_v63 = vrot.slane %v1592_v40, %v1734_v52  ;;  %v5621_v0 = vrot.slane %v1592_v40, %v2152_v53  ;;  %v2657_v4 = vunpack.c.l.bf16 %v2639_v55 }
 0x12b   : > { %8680 = vst [vmem:[#allocation9_spill] sm:$0xff] %v5610_v59  ;;  %8681 = vst [vmem:[#allocation10_spill] sm:$0xff] %v5613_v60  ;;  %v5624_v6 = vmul.f32 %v4698_v49, %v5606_v42  ;;  %v1804_v7 = vsub.s32 6, %v5585_v29  ;;  %v1888_v9 = vunpack.c.l.bf16 %v1870_v57  ;;  %v5628_v10 = vadd.f32 %v4924_v26, %v5502_v25  ;;  %v712_v57 = vpop.f32.mrf.mxu0 }
 0x12c   : > { %8682 = vst [vmem:[#allocation11_spill] sm:$0xff] %v5619_v63  ;;  %8683 = vst [vmem:[#allocation12_spill] sm:$0xff] %v5621_v0  ;;  %v1667_v11 = vmul.f32 %v4699_v50, %v5606_v42  ;;  %v2397_v12 = vsub.s32 7, %v5585_v29  ;;  %5123 = vrcp.f32 %v881_v58  ;;  %v5633_v13 = vadd.f32 %v5502_v25, %v696_v33 }
 0x12d   : > { %v2005_v17 = vrot.slane %v1908_v61, 1  ;;  %v2006_v18 = vrot.slane %v5617_v62, 1  ;;  %v5637_v20 = vmul.f32 %v4699_v50, %v5608_v56  ;;  %v5640_v21 = vadd.f32 %v4925_v47, %v5502_v25  ;;  %v1871_v50 = vld [vmem:[#allocation2 + $0x14] sm:$0x1]  ;;  %v2641_v62 = vld [vmem:[#allocation2 + $0x18] sm:$0xe] }
 0x12e   : > { %v5116_v54 = vpop.eup %5115  ;;  %8684 = vst [vmem:[#allocation13_spill] sm:$0xff] %v5633_v13  ;;  %v2677_v22 = vmul.f32 %v5608_v56, %v2657_v4  ;;  %v5643_v23 = vunpack.c.l.bf16 %v1597_v8  ;;  %v5646_v24 = vadd.f32 %v5502_v25, %v699_v45  ;;  %v1910_v26 = vmul.f32 %v5601_v51, %v1888_v9  ;;  %v1872_v8 = vld [vmem:[#allocation2 + $0x20] sm:$0x1] }
 0x12f   : > { %v879_v5 = vadd.f32 1.0, %v5116_v54  ;;  %8685 = vst [vmem:[#allocation14_spill] sm:$0xff] %v5640_v21  ;;  %v4493_v29 = vmul.f32 -1.442695, %v5628_v10  ;;  %v5651_v30 = vadd.f32 %v4928_v14, %v5502_v25  ;;  %v5653_v33 = vunpack.c.l.bf16 %v1596_v15 }
 0x130   : > { %8686 = vst [vmem:[#allocation15_spill] sm:$0xff] %v5646_v24  ;;  %v5655_v34 = vrot.slane %v1592_v40, %v1804_v7  ;;  %v4491_v35 = vmul.f32 -1.442695, %v5633_v13  ;;  %v2775_v36 = vrot.slane %v5637_v20, 2  ;;  %v5659_v39 = vrot.slane %v1592_v40, %v2397_v12 }
 0x131   : > { %5125 = vrcp.f32 %v879_v5  ;;  %8687 = vst [vmem:[#allocation16_spill] sm:$0xff] %v5651_v30  ;;  %v5118_v31 = vpop.eup %5117  ;;  %v2679_v41 = vmul.f32 %v5608_v56, %v1888_v9  ;;  %v4494_v44 = vmul.f32 -1.442695, %v5640_v21  ;;  %v5664_v47 = vsel %vm2004_vm8, %v2005_v17, %v2006_v18 }
 0x132   : > { %8688 = vst [vmem:[#allocation17_spill] sm:$0xff] %v5655_v34  ;;  %8689 = vst [vmem:[#allocation18_spill] sm:$0xff] %v5659_v39  ;;  %v2774_v48 = vrot.slane %v2677_v22, 2  ;;  %v1737_v49 = vmul.f32 %v5619_v63, %v5643_v23  ;;  %v4492_v52 = vmul.f32 -1.442695, %v5646_v24  ;;  %v2008_v54 = vrot.slane %v1910_v26, 1 }
 0x133   : > { %v972_v40 = vmul.f32 %v5118_v31, %v5524_v1  ;;  %5127 = vpow2.f32 %v4493_v29  ;;  %v4497_v55 = vmul.f32 -1.442695, %v5651_v30  ;;  %v1736_v58 = vmul.f32 %v5619_v63, %v5653_v33  ;;  %v2640_v26 = vld [vmem:[#allocation2 + $0xc] sm:$0xe] }
 0x134   : > { %v5120_v46 = vpop.eup %5119  ;;  %v5673_v45 = vunpack.c.l.bf16 %v4812_v38  ;;  %v5675_v61 = vunpack.c.h.bf16 %v4812_v38  ;;  %5129 = vpow2.f32 %v4491_v35  ;;  %v5677_v4 = vunpack.c.l.bf16 %v1871_v50 }
 0x135   : > { %v5122_v53 = vpop.eup %5121  ;;  %v2777_v5 = vrot.slane %v2679_v41, 2  ;;  %v882_v7 = vadd.f32 1.0, %v5120_v46  ;;  %5131 = vpow2.f32 %v4494_v44  ;;  %v1769_v1 = vadd.f32 %v1737_v49, %v1667_v11 }
 0x136   : > { %v880_v9 = vadd.f32 1.0, %v5122_v53  ;;  %5133 = vpow2.f32 %v4492_v52  ;;  %v5680_v12 = vadd.f32 %v5502_v25, %v712_v57  ;;  %v5683_v14 = vsel %vm2773_vm9, %v2774_v48, %v2775_v36 }
 0x137   : > { %v2009_v15 = vsel %vm2004_vm8, %v2006_v18, %v2008_v54  ;;  %v5686_v17 = vpack.c.bf16 %v972_v40, %v972_v40  ;;  %5135 = vpow2.f32 %v4497_v55  ;;  %v2659_v20 = vunpack.c.l.bf16 %v2641_v62 }
 0x138   : > { %8690 = vst [vmem:[#allocation19_spill] sm:$0xff] %v5680_v12  ;;  %v1768_v22 = vadd.f32 %v1736_v58, %v5624_v6  ;;  %v1806_v11 = vmul.f32 %v5673_v45, %v5655_v34  ;;  %v1807_v29 = vmul.f32 %v5675_v61, %v5655_v34  ;;  %v5693_v31 = vunpack.c.l.bf16 %v1872_v8 }
 0x139   : > { %v5124_v25 = vpop.eup %5123  ;;  %v2155_v35 = vmul.f32 %v5621_v0, %v5643_v23  ;;  %v2156_v18 = vmul.f32 %v5621_v0, %v5677_v4  ;;  %5137 = vrcp.f32 %v882_v7  ;;  %v5700_v6 = vsel %vm2773_vm9, %v2775_v36, %v2777_v5 }
 0x13a   : > { %v1839_v38 = vadd.f32 %v1807_v29, %v1769_v1  ;;  %5139 = vrcp.f32 %v880_v9  ;;  %v5703_v41 = vmul.f32 -1.442695, %v5680_v12  ;;  %v2154_v46 = vmul.f32 %v5621_v0, %v5653_v33 }
 0x13b   : > { %v2658_v48 = vunpack.c.l.bf16 %v2640_v26  ;;  %v1195_v49 = vshrl.u32 %v5686_v17, 16  ;;  %v1198_v50 = vshll.u32 %v5686_v17, 16  ;;  %v5710_v52 = vmul.f32 %v5608_v56, %v2659_v20 }
 0x13c   : > { %8691 = vst [vmem:[#allocation20_spill] sm:$0xff] %v5703_v41  ;;  %v5713_v53 = vmul.f32 %v5610_v59, %v2659_v20  ;;  %v1838_v36 = vadd.f32 %v1806_v11, %v1768_v22  ;;  %v977_v54 = vmul.f32 %v5124_v25, %v5534_v19  ;;  %v2401_v40 = vmul.f32 %v5659_v39, %v5693_v31 }
 0x13d   : > { %v2251_v55 = vrot.slane %v2155_v35, 1  ;;  %v2253_v57 = vrot.slane %v2156_v18, 1  ;;  %v2400_v58 = vmul.f32 %v5675_v61, %v5659_v39  ;;  %v5721_v62 = vmul.f32 %v5613_v60, %v2659_v20 }
 0x13e   : > { %v5126_v44 = vpop.eup %5125  ;;  %v5725_v5 = vmul.f32 %v5601_v51, %v5653_v33  ;;  %v2118_v7 = vadd.f32 %v2009_v15, %v1839_v38  ;;  %v2250_v1 = vrot.slane %v2154_v46, 1  ;;  %v5729_v19 = vmul.f32 %v5608_v56, %v2658_v48 }
 0x13f   : > { %v975_v8 = vmul.f32 %v5126_v44, %v5564_v2  ;;  %v5732_v9 = vmul.f32 %v5610_v59, %v2658_v48  ;;  %v2399_v17 = vmul.f32 %v5673_v45, %v5659_v39  ;;  %v2117_v15 = vadd.f32 %v5664_v47, %v1838_v36 }
 0x140   : > { %v5736_v22 = vpop.eup %5127  ;;  %v1193_v2 = vrot.slane %v5566_v3, 4  ;;  %v2498_v29 = vrot.slane %v2401_v40, 1  ;;  %v2252_v25 = vsel %vm2004_vm8, %v2250_v1, %v2251_v55  ;;  %v2254_v35 = vsel %vm2004_vm8, %v2251_v55, %v2253_v57 }
 0x141   : > { %v5742_v11 = vpop.eup %5129  ;;  %v2496_v18 = vrot.slane %v2400_v58, 1  ;;  %v1668_v46 = vmul.f32 %v5606_v42, %v5653_v33  ;;  %v1738_v47 = vmul.f32 %v5673_v45, %v5619_v63  ;;  %v2363_v48 = vadd.f32 %v2254_v35, %v2118_v7 }
 0x142   : > { %v5746_v38 = vpop.eup %5131  ;;  %v3019_v55 = vrot.slane %v5732_v9, 2  ;;  %v2495_v57 = vrot.slane %v2399_v17, 1  ;;  %v5762_v1 = vmul.f32 %v5673_v45, %v5606_v42  ;;  %v5766_v33 = vmul.f32 %v5673_v45, %v5601_v51 }
 0x143   : > { %v5753_v3 = vpop.eup %5133  ;;  %v5770_v7 = vmul.f32 %v5675_v61, %v5601_v51  ;;  %v2362_v35 = vadd.f32 %v2252_v25, %v2117_v15  ;;  %v2499_v40 = vsel %vm2004_vm8, %v2496_v18, %v2498_v29  ;;  %v2924_v9 = vmul.f32 %v5610_v59, %v5643_v23  ;;  %v1496_v25 = vld [vmem:[#allocation2 + $0x2c] sm:$0x1] }
 0x144   : > { %v5758_v58 = vpop.eup %5135  ;;  %v2925_v17 = vmul.f32 %v5610_v59, %v5677_v4  ;;  %v1197_v36 = vrot.slane %v1195_v49, 7  ;;  %v5779_v20 = vadd.f32 %v1738_v47, %v1668_v46  ;;  %v1916_v44 = vmul.f32 %v5601_v51, %v5693_v31 }
 0x145   : > { %8692 = vst [vmem:[#allocation21_spill] sm:$0xff] %v5758_v58  ;;  %v2157_v43 = vmul.f32 %v5673_v45, %v5621_v0  ;;  %v2608_v15 = vadd.f32 %v2499_v40, %v2363_v48  ;;  %v2158_v12 = vmul.f32 %v5675_v61, %v5621_v0  ;;  %v2497_v30 = vsel %vm2004_vm8, %v2495_v57, %v2496_v18 }
 0x146   : > { %v5777_v26 = vpop.eup %5137  ;;  %v1200_v49 = vor.u32 %v1198_v50, %v1197_v36  ;;  %v1202_v24 = vrot.slane %v1197_v36, 4  ;;  %v3170_v46 = vmul.f32 %v5613_v60, %v5693_v31  ;;  %v2607_v47 = vadd.f32 %v2497_v30, %v2362_v35 }
 0x147   : > { %v5785_v29 = vpop.eup %5139  ;;  %v3169_v21 = vmul.f32 %v5675_v61, %v5613_v60  ;;  %v4642_v13 = vpack.c.bf16 %v977_v54, %v977_v54  ;;  %v3020_v45 = vrot.slane %v2924_v9, 2  ;;  %v3022_v48 = vrot.slane %v2925_v17, 2 }
 0x148   : > { %v1201_v40 = vsel %vm5541_vm6, %v1193_v2, %v1200_v49  ;;  %v1497_v58 = vsel %vm5547_vm7, %v1202_v24, %v1496_v25  ;;  %v2159_v50 = vmul.f32 %v5621_v0, %v5693_v31  ;;  %v2887_v18 = vadd.f32 %v5700_v6, %v2608_v15 }
 0x149   : > { %1495 = vst [vmem:[#allocation2 + $0x28] sm:$0xf] %v1201_v40  ;;  %1498 = vst [vmem:[#allocation2 + $0x2c] sm:$0x1] %v1497_v58  ;;  %v1238_v30 = vshrl.u32 %v4642_v13, 16  ;;  %v4640_v36 = vpack.c.bf16 %v975_v8, %v975_v8  ;;  %v2018_v35 = vrot.slane %v1916_v44, 1  ;;  %v2886_v41 = vadd.f32 %v5683_v14, %v2607_v47 }
 0x14a   : > { %v2255_v9 = vrot.slane %v2157_v43, 1  ;;  %v2256_v17 = vrot.slane %v2158_v12, 1  ;;  %v1241_v49 = vshll.u32 %v4642_v13, 16  ;;  %v3267_v25 = vrot.slane %v3170_v46, 2  ;;  %v1513_v58 = vld [vmem:[#allocation2 + $0x48] sm:$0xf] }
 0x14b   : > { %v5803_v2 = vrot.slane %v1238_v30, 7  ;;  %v1221_v24 = vshrl.u32 %v4640_v36, 16  ;;  %v3023_v6 = vsel %vm2773_vm9, %v3020_v45, %v3022_v48  ;;  %v3265_v15 = vrot.slane %v3169_v21, 2  ;;  %v1506_v21 = vld [vmem:[#allocation2 + $0x3c] sm:$0xf] }
 0x14c   : > { %v3132_v40 = vadd.f32 %v3023_v6, %v2887_v18  ;;  %v1224_v54 = vshll.u32 %v4640_v36, 16  ;;  %v8693_v43 = vrot.slane %v5770_v7, 1  ;;  %v2258_v13 = vrot.slane %v2159_v50, 1 }
 0x14d   : > { %v1243_v8 = vor.u32 %v1241_v49, %v5803_v2  ;;  %v5808_v57 = vrot.slane %v1221_v24, 7  ;;  %v2684_v44 = vmul.f32 %v5675_v61, %v5608_v56  ;;  %v2685_v14 = vmul.f32 %v5608_v56, %v5693_v31  ;;  %v1600_v49 = vld [vmem:[#allocation2 + $0x24] sm:$0xf] }
 0x14e   : > { %v5813_v12 = vsel %vm2004_vm8, %v8693_v43, %v2018_v35  ;;  %v2927_v46 = vmul.f32 %v5675_v61, %v5610_v59  ;;  %v3021_v47 = vsel %vm2773_vm9, %v3019_v55, %v3020_v45  ;;  %v2928_v50 = vmul.f32 %v5610_v59, %v5693_v31 }
 0x14f   : > { %v1514_v48 = vsel %vm5528_vm3, %v1243_v8, %v1513_v58  ;;  %v1226_v18 = vor.u32 %v1224_v54, %v5808_v57  ;;  %v1912_v30 = vmul.f32 %v5601_v51, %v5643_v23  ;;  %v3131_v36 = vadd.f32 %v3021_v47, %v2886_v41 }
 0x150   : > { %v3268_v35 = vsel %vm2773_vm9, %v3265_v15, %v3267_v25  ;;  %1515 = vst [vmem:[#allocation2 + $0x48] sm:$0xf] %v1514_v48  ;;  %v5831_v24 = vsel %vm2004_vm8, %v2255_v9, %v2256_v17  ;;  %v1913_v55 = vmul.f32 %v5601_v51, %v5677_v4  ;;  %v5838_v31 = vsel %vm2004_vm8, %v2256_v17, %v2258_v13  ;;  %v2643_v25 = vld [vmem:[#allocation2 + $0x30] sm:$0xe] }
 0x151   : > { %v3377_v45 = vadd.f32 %v3268_v35, %v3132_v40  ;;  %v1507_v54 = vsel %vm5528_vm3, %v1226_v18, %v1506_v21  ;;  %v2785_v6 = vrot.slane %v2684_v44, 2  ;;  %v2787_v58 = vrot.slane %v2685_v14, 2  ;;  %v5852_v14 = vld [vmem:[%s8493_s4] ss:$0 sm:$0xff] }
 0x152   : > { %v2681_v41 = vmul.f32 %v5608_v56, %v5643_v23  ;;  %1508 = vst [vmem:[#allocation2 + $0x3c] sm:$0xf] %v1507_v54  ;;  %v3025_v8 = vrot.slane %v2927_v46, 2  ;;  %v2682_v9 = vmul.f32 %v5608_v56, %v5677_v4  ;;  %v8694_v43 = vrot.slane %v5721_v62, 2  ;;  %8695 = vst [vmem:[#allocation22_spill] sm:$0xff] %v5852_v14 }
 0x153   : > { %v1636_v47 = vunpack.c.l.bf16 %v1600_v49  ;;  %v3027_v21 = vrot.slane %v2928_v50, 2  ;;  %v1669_v17 = vmul.f32 %v5606_v42, %v5643_v23  ;;  %v2011_v13 = vrot.slane %v1912_v30, 1  ;;  %v2642_v50 = vld [vmem:[#allocation2 + $0x24] sm:$0xe] }
 0x154   : > { %v3266_v40 = vsel %vm2773_vm9, %v8694_v43, %v3265_v15  ;;  %v1739_v46 = vmul.f32 %v5675_v61, %v5619_v63  ;;  %v2013_v4 = vrot.slane %v1913_v55, 1  ;;  %v5857_v62 = vadd.f32 %v5852_v14, %v3377_v45 }
 0x155   : > { %v3376_v44 = vadd.f32 %v3266_v40, %v3131_v36  ;;  %v2661_v15 = vunpack.c.l.bf16 %v2643_v25  ;;  %v8696_v48 = vrot.slane %v5710_v52, 2  ;;  %v2780_v23 = vrot.slane %v2681_v41, 2 }
 0x156   : > { %v978_v30 = vmul.f32 %v5777_v26, %v5580_v27  ;;  %v976_v36 = vmul.f32 %v5785_v29, %v5583_v28  ;;  %v5869_v35 = vsel %vm2773_vm9, %v2785_v6, %v2787_v58  ;;  %v8697_v49 = vrot.slane %v5713_v53, 2 }
 0x157   : > { %v5862_v18 = vsel %vm2773_vm9, %v8696_v48, %v2785_v6  ;;  %v2782_v52 = vrot.slane %v2682_v9, 2  ;;  %v1808_v45 = vmul.f32 %v5655_v34, %v1636_v47  ;;  %v5878_v54 = vsel %vm2773_vm9, %v3025_v8, %v3027_v21  ;;  %v4813_v48 = vld [vmem:[#allocation2 + $0x30] sm:$0xff]  }
 0x158   : > { %v5874_v55 = vsel %vm2773_vm9, %v8697_v49, %v3025_v8  ;;  %v5880_v41 = vadd.f32 %v1739_v46, %v1669_v17  ;;  %v8698_v27 = vrot.slane %v5725_v5, 1  ;;  %v5886_v26 = vadd.f32 %v5852_v14, %v3376_v44 }
 0x159   : > { %v5889_v53 = vsel %vm2004_vm8, %v2011_v13, %v2013_v4  ;;  %v4545_v29 = vmul.f32 -1.442695, %v5857_v62  ;;  %v5893_v6 = vmul.f32 %v5608_v56, %v2661_v15  ;;  %v2660_v58 = vunpack.c.l.bf16 %v2642_v50 }
 0x15a   : > { %v2012_v28 = vsel %vm2004_vm8, %v8698_v27, %v2011_v13  ;;  %v8700_v25 = vrot.slane %v5729_v19, 2  ;;  %v5901_v5 = vmul.f32 %v5610_v59, %v2661_v15  ;;  %v4643_v9 = vpack.c.bf16 %v978_v30, %v978_v30 }
 0x15b   : > { %8699 = vst [vmem:[#allocation23_spill] sm:$0xff] %v5893_v6  ;;  %v4641_v43 = vpack.c.bf16 %v976_v36, %v976_v36  ;;  %v5904_v40 = vsel %vm2773_vm9, %v2780_v23, %v2782_v52  ;;  %v5907_v21 = vmul.f32 %v5613_v60, %v2661_v15  ;;  %v1672_v17 = vmul.f32 %v5606_v42, %v1636_v47  ;;  %v1874_v36 = vld [vmem:[#allocation2 + $0x38] sm:$0x1] }
 0x15c   : > { %v5898_v8 = vsel %vm2773_vm9, %v8700_v25, %v2780_v23  ;;  %8701 = vst [vmem:[#allocation24_spill] sm:$0xff] %v5901_v5  ;;  %v1840_v13 = vadd.f32 %v1808_v45, %v5779_v20  ;;  %v4544_v19 = vmul.f32 -1.442695, %v5886_v26  ;;  %v1740_v44 = vmul.f32 %v5619_v63, %v1636_v47 }
 0x15d   : > { %v5914_v46 = vmul.f32 %v5601_v51, %v1636_v47  ;;  %v5917_v4 = vmul.f32 %v5621_v0, %v1636_v47  ;;  %5141 = vpow2.f32 %v4545_v29  ;;  %v5921_v15 = vmul.f32 %v5659_v39, %v1636_v47 }
 0x15e   : > { %v5924_v50 = vmul.f32 %v5608_v56, %v2660_v58  ;;  %v5928_v30 = vmul.f32 %v5610_v59, %v2660_v58  ;;  %v1246_v49 = vshrl.u32 %v4643_v9, 16  ;;  %v1229_v52 = vshrl.u32 %v4641_v43, 16 }
 0x15f   : > { %8702 = vst [vmem:[#allocation25_spill] sm:$0xff] %v5914_v46  ;;  %v2119_v27 = vadd.f32 %v2012_v28, %v1840_v13  ;;  %v5932_v29 = vmul.f32 %v5613_v60, %v2660_v58  ;;  %v4706_v25 = vunpack.c.l.bf16 %v4813_v48  ;;  %5143 = vpow2.f32 %v4544_v19  ;;  %v1601_v28 = vld [vmem:[#allocation2 + $0x28] sm:$0xf] }
 0x160   : > { %8703 = vst [vmem:[#allocation26_spill] sm:$0xff] %v5928_v30  ;;  %v1772_v47 = vadd.f32 %v1740_v44, %v5762_v1  ;;  %v5939_v14 = vunpack.c.h.bf16 %v4813_v48  ;;  %v5941_v16 = vunpack.c.l.bf16 %v1874_v36  ;;  %v1248_v13 = vrot.slane %v1246_v49, 7  ;;  %v1517_v30 = vld [vmem:[#allocation2 + $0x50] sm:$0x1] }
 0x161   : > { %8704 = vst [vmem:[#allocation27_spill] sm:$0xff] %v5932_v29  ;;  %v1231_v45 = vrot.slane %v1229_v52, 7  ;;  %v885_v19 = vadd.f32 1.0, %v5736_v22  ;;  %v5946_v1 = vadd.f32 %v5831_v24, %v2119_v27  ;;  %v1742_v23 = vmul.f32 %v4706_v25, %v5619_v63 }
 0x162   : > { %v1810_v6 = vmul.f32 %v4706_v25, %v5655_v34  ;;  %v5952_v48 = vmul.f32 %v4706_v25, %v5606_v42  ;;  %v5954_v36 = vunpack.c.l.bf16 %v1601_v28  ;;  %v1249_v5 = vshll.u32 %v4643_v9, 16 }
 0x163   : > { %v1232_v58 = vshll.u32 %v4641_v43, 16  ;;  %v5957_v49 = vmul.f32 %v4706_v25, %v5601_v51  ;;  %v5961_v22 = vmul.f32 %v5939_v14, %v5601_v51  ;;  %v1922_v24 = vmul.f32 %v5601_v51, %v5941_v16 }
 0x164   : > { %8705 = vst [vmem:[#allocation28_spill] sm:$0xff] %v5952_v48  ;;  %v8706_v52 = vrot.slane %v5770_v7, 1  ;;  %v8707_v27 = vrot.slane %v5766_v33, 1  ;;  %v1251_v28 = vor.u32 %v1249_v5, %v1248_v13  ;;  %v1253_v20 = vrot.slane %v1248_v13, 4  ;;  %v1873_v7 = vld [vmem:[#allocation2 + $0x2c] sm:$0x1] }
 0x165   : > { %v1234_v9 = vor.u32 %v1232_v58, %v1231_v45  ;;  %5145 = vrcp.f32 %v885_v19  ;;  %v5970_v43 = vadd.f32 %v1742_v23, %v1672_v17  ;;  %v1842_v48 = vadd.f32 %v1810_v6, %v1772_v47  ;;  %v1510_v19 = vld [vmem:[#allocation2 + $0x44] sm:$0x1] }
 0x166   : > { %v2017_v44 = vsel %vm2004_vm8, %v8707_v27, %v8706_v52  ;;  %v5973_v29 = vmul.f32 %v4706_v25, %v5621_v0  ;;  %v5977_v46 = vmul.f32 %v5939_v14, %v5621_v0  ;;  %v1741_v33 = vmul.f32 %v5619_v63, %v5954_v36 }
 0x167   : > { %8708 = vst [vmem:[#allocation29_spill] sm:$0xff] %v5970_v43  ;;  %v1244_v5 = vrot.slane %v5803_v2, 4  ;;  %v1227_v58 = vrot.slane %v5808_v57, 4  ;;  %v1236_v13 = vrot.slane %v1231_v45, 4  ;;  %v2028_v23 = vrot.slane %v1922_v24, 1 }
 0x168   : > { %v2165_v47 = vmul.f32 %v5621_v0, %v5941_v16  ;;  %v1671_v27 = vmul.f32 %v5675_v61, %v5606_v42  ;;  %v1518_v57 = vsel %vm5547_vm7, %v1253_v20, %v1517_v30  ;;  %v2265_v45 = vrot.slane %v5973_v29, 1 }
 0x169   : > { %v1252_v43 = vsel %vm5541_vm6, %v1244_v5, %v1251_v28  ;;  %v1235_v2 = vsel %vm5541_vm6, %v1227_v58, %v1234_v9  ;;  %v2405_v24 = vmul.f32 %v4706_v25, %v5659_v39  ;;  %v1809_v17 = vmul.f32 %v5655_v34, %v5954_v36  ;;  %1519 = vst [vmem:[#allocation2 + $0x50] sm:$0x1] %v1518_v57 }
 0x16a   : > { %v5142_v52 = vpop.eup %5141  ;;  %v5999_v6 = vunpack.c.l.bf16 %v1873_v7  ;;  %1516 = vst [vmem:[#allocation2 + $0x4c] sm:$0xf] %v1252_v43  ;;  %1509 = vst [vmem:[#allocation2 + $0x40] sm:$0xf] %v1235_v2  ;;  %v6001_v61 = vadd.f32 %v2017_v44, %v1842_v48  ;;  %v2266_v28 = vrot.slane %v5977_v46, 1  ;;  %v1773_v20 = vadd.f32 %v1741_v33, %v1671_v27 }
 0x16b   : > { %v1511_v30 = vsel %vm5547_vm7, %v1236_v13, %v1510_v19  ;;  %v3544_v29 = vadd.f32 1.0, %v5142_v52  ;;  %v2268_v5 = vrot.slane %v2165_v47, 1  ;;  %v2406_v25 = vmul.f32 %v5939_v14, %v5659_v39 }
 0x16c   : > { %v5144_v9 = vpop.eup %5143  ;;  %v2407_v7 = vmul.f32 %v5659_v39, %v5941_v16  ;;  %1512 = vst [vmem:[#allocation2 + $0x44] sm:$0x1] %v1511_v30  ;;  %v8709_v43 = vrot.slane %v5961_v22, 1  ;;  %v6017_v46 = vmul.f32 %v5939_v14, %v5608_v56  ;;  %v2691_v48 = vmul.f32 %v5608_v56, %v5941_v16 }
 0x16d   : > { %v1811_v33 = vmul.f32 %v5939_v14, %v5655_v34  ;;  %v2505_v58 = vrot.slane %v2405_v24, 1  ;;  %v1841_v13 = vadd.f32 %v1809_v17, %v5880_v41  ;;  %v2161_v47 = vmul.f32 %v5621_v0, %v5954_v36 }
 0x16e   : > { %v6013_v44 = vsel %vm2004_vm8, %v8709_v43, %v2028_v23  ;;  %8711 = vst [vmem:[#allocation31_spill] sm:$0xff] %v6017_v46  ;;  %v2162_v23 = vmul.f32 %v5621_v0, %v5999_v6  ;;  %v3543_v19 = vadd.f32 1.0, %v5144_v9  ;;  %v6030_v52 = vmul.f32 %v5939_v14, %v5610_v59 }
 0x16f   : > { %8710 = vst [vmem:[#allocation30_spill] sm:$0xff] %v6013_v44  ;;  %v2934_v27 = vmul.f32 %v5610_v59, %v5941_v16  ;;  %v1843_v57 = vadd.f32 %v1811_v33, %v1773_v20  ;;  %5147 = vrcp.f32 %v3544_v29  ;;  %v2506_v2 = vrot.slane %v2406_v25, 1 }
 0x170   : > { %8712 = vst [vmem:[#allocation32_spill] sm:$0xff] %v6030_v52  ;;  %v2508_v24 = vrot.slane %v2407_v7, 1  ;;  %v3175_v41 = vmul.f32 %v5939_v14, %v5613_v60  ;;  %v2797_v30 = vrot.slane %v2691_v48, 2  ;;  %v2403_v9 = vmul.f32 %v5659_v39, %v5954_v36 }
 0x171   : > { %v2404_v43 = vmul.f32 %v5659_v39, %v5999_v6  ;;  %v3176_v37 = vmul.f32 %v5613_v60, %v5941_v16  ;;  %v2120_v20 = vadd.f32 %v5889_v53, %v1841_v13  ;;  %v2261_v29 = vrot.slane %v2161_v47, 1 }
 0x172   : > { %v5146_v44 = vpop.eup %5145  ;;  %v2263_v25 = vrot.slane %v2162_v23, 1  ;;  %5149 = vrcp.f32 %v3543_v19  ;;  %v8527_v7 = vrot.slane %v6030_v52, 2  ;;  %v3037_v33 = vrot.slane %v2934_v27, 2 }
 0x173   : > { %v2122_v48 = vadd.f32 %v5813_v12, %v1843_v57  ;;  %v6047_v17 = vsel %vm2004_vm8, %v2265_v45, %v2266_v28  ;;  %v6050_v32 = vsel %vm2004_vm8, %v2266_v28, %v2268_v5  ;;  %v2507_v39 = vsel %vm2004_vm8, %v2505_v58, %v2506_v2 }
 0x174   : > { %v3275_v0 = vrot.slane %v3175_v41, 2  ;;  %v2501_v16 = vrot.slane %v2403_v9, 1  ;;  %v2503_v34 = vrot.slane %v2404_v43, 1  ;;  %v981_v53 = vmul.f32 %v5146_v44, %v5628_v10  ;;  %v8719_v9 = vld [vmem:[#allocation21_spill] sm:$0xff] }
 0x175   : > { %v883_v13 = vadd.f32 1.0, %v5742_v11  ;;  %v2509_v47 = vsel %vm2004_vm8, %v2506_v2, %v2508_v24  ;;  %v8713_v23 = vrot.slane %v6017_v46, 2  ;;  %v2264_v45 = vsel %vm2004_vm8, %v2261_v29, %v2263_v25  ;;  %v8717_v2 = vld [vmem:[#allocation20_spill] sm:$0xff] }
 0x176   : > { %v2365_v28 = vadd.f32 %v5838_v31, %v2120_v20  ;;  %v6066_v5 = vsel %vm2773_vm9, %v8527_v7, %v3037_v33  ;;  %v3277_v58 = vrot.slane %v3176_v37, 2  ;;  %v2367_v10 = vadd.f32 %v2264_v45, %v2122_v48  ;;  %v4929_v33 = vpop.f32.mrf.mxu0  ;;  %v8748_v7 = vld [vmem:[#allocation18_spill] sm:$0xff] }
 0x177   : > { %v6059_v12 = vsel %vm2773_vm9, %v8713_v23, %v2797_v30  ;;  %v886_v11 = vadd.f32 1.0, %v5746_v38  ;;  %v8714_v44 = vrot.slane %v5907_v21, 2  ;;  %v8716_v27 = vrot.slane %v5917_v4, 1 }
 0x178   : > { %v884_v31 = vadd.f32 1.0, %v5753_v3  ;;  %5151 = vpow2.f32 %v8717_v2  ;;  %v8718_v24 = vrot.slane %v5921_v15, 1  ;;  %v2504_v41 = vsel %vm2004_vm8, %v2501_v16, %v2503_v34 }
 0x179   : > { %v6072_v19 = vsel %vm2773_vm9, %v8714_v44, %v3275_v0  ;;  %v2262_v57 = vsel %vm2004_vm8, %v8716_v27, %v2261_v29  ;;  %v4646_v38 = vpack.c.bf16 %v981_v53, %v981_v53  ;;  %5153 = vrcp.f32 %v883_v13 }
 0x17a   : > { %8715 = vst [vmem:[#allocation33_spill] sm:$0xff] %v6072_v19  ;;  %v2502_v37 = vsel %vm2004_vm8, %v8718_v24, %v2501_v16  ;;  %v2610_v21 = vadd.f32 %v2504_v41, %v2365_v28  ;;  %v6085_v30 = vmul.f32 %v5610_v59, %v5954_v36  ;;  %v2931_v4 = vmul.f32 %v5610_v59, %v5999_v6 }
 0x17b   : > { %v889_v3 = vadd.f32 1.0, %v8719_v9  ;;  %v3278_v43 = vsel %vm2773_vm9, %v3275_v0, %v3277_v58  ;;  %v6093_v15 = vmul.f32 %v5601_v51, %v5954_v36  ;;  %v2612_v20 = vadd.f32 %v2509_v47, %v2367_v10  ;;  %v2645_v58 = vld [vmem:[#allocation2 + $0x48] sm:$0xe] }
 0x17c   : > { %5155 = vrcp.f32 %v886_v11  ;;  %v1919_v34 = vmul.f32 %v5601_v51, %v5999_v6  ;;  %v2366_v29 = vadd.f32 %v2262_v57, %v6001_v61  ;;  %v2687_v25 = vmul.f32 %v5608_v56, %v5954_v36  ;;  %v5148_v48 = vpop.eup %5147 }
 0x17d   : > { %5157 = vrcp.f32 %v884_v31  ;;  %v2609_v16 = vadd.f32 %v2502_v37, %v5946_v1  ;;  %v3172_v0 = vmul.f32 %v5613_v60, %v5954_v36  ;;  %v3173_v53 = vmul.f32 %v5613_v60, %v5999_v6 }
 0x17e   : > { %v1272_v13 = vshrl.u32 %v4646_v38, 16  ;;  %v2889_v47 = vadd.f32 %v5904_v40, %v2610_v21  ;;  %v3030_v23 = vrot.slane %v6085_v30, 2  ;;  %v3032_v61 = vrot.slane %v2931_v4, 2  ;;  %v6120_v40 = vld [vmem:[%s8491_s2] ss:$0 sm:$0xff] }
 0x17f   : > { %5159 = vrcp.f32 %v889_v3  ;;  %v2688_v45 = vmul.f32 %v5608_v56, %v5999_v6  ;;  %v2891_v28 = vadd.f32 %v5869_v35, %v2612_v20  ;;  %v8720_v1 = vrot.slane %v5961_v22, 1  ;;  %v5150_v27 = vpop.eup %5149  ;;  %v1604_v3 = vld [vmem:[#allocation2 + $0x3c] sm:$0xf] }
 0x180   : > { %v8721_v10 = vrot.slane %v5957_v49, 1  ;;  %v6123_v44 = vadd.f32 %v6120_v40, %v4929_v33  ;;  %v6126_v6 = vmul.f32 %v5148_v48, %v5857_v62  ;;  %v2021_v35 = vrot.slane %v6093_v15, 1 }
 0x181   : > { %v2023_v22 = vrot.slane %v1919_v34, 1  ;;  %v2611_v57 = vadd.f32 %v2507_v39, %v2366_v29  ;;  %v2790_v49 = vrot.slane %v2687_v25, 2  ;;  %v3270_v31 = vrot.slane %v3172_v0, 2 }
 0x182   : > { %v6115_v11 = vsel %vm2004_vm8, %v8721_v10, %v8720_v1  ;;  %8722 = vst [vmem:[#allocation20_spill] sm:$0xff] %v6126_v6  ;;  %v3272_v2 = vrot.slane %v3173_v53, 2  ;;  %v6129_v24 = vrot.slane %v1272_v13, 7  ;;  %v2888_v37 = vadd.f32 %v5898_v8, %v2609_v16  ;;  %v1527_v53 = vld [vmem:[#allocation2 + $0x60] sm:$0xf] }
 0x183   : > { %v3033_v41 = vsel %vm2773_vm9, %v3030_v23, %v3032_v61  ;;  %v3134_v21 = vadd.f32 %v5878_v54, %v2889_v47  ;;  %v2663_v30 = vunpack.c.l.bf16 %v2645_v58  ;;  %v6135_v4 = vmul.f32 %v5150_v27, %v5886_v26  ;;  %v6171_v58 = vpop.f32.mrf.mxu0  ;;  %v8732_v27 = vld [vmem:[#allocation25_spill] sm:$0xff] }
 0x184   : > { %v2792_v62 = vrot.slane %v2688_v45, 2  ;;  %v3136_v9 = vadd.f32 %v3033_v41, %v2891_v28  ;;  %v1275_v15 = vshll.u32 %v4646_v38, 16  ;;  %v6138_v39 = vsel %vm2004_vm8, %v2021_v35, %v2023_v22 }
 0x185   : > { %8723 = vst [vmem:[#allocation21_spill] sm:$0xff] %v6135_v4  ;;  %v2890_v20 = vadd.f32 %v5862_v18, %v2611_v57  ;;  %v6143_v8 = vmul.f32 %v5939_v14, %v5606_v42  ;;  %v6147_v54 = vmul.f32 %v5939_v14, %v5619_v63  ;;  %v5152_v34 = vpop.eup %5151  ;;  %v6151_v26 = vadd.f32 %v6126_v6, %v6135_v4  ;;  %v1520_v6 = vld [vmem:[#allocation2 + $0x54] sm:$0xf] }
 0x186   : > { %v8725_v38 = vrot.slane %v5924_v50, 2  ;;  %v3273_v18 = vsel %vm2773_vm9, %v3270_v31, %v3272_v2  ;;  %v1277_v25 = vor.u32 %v1275_v15, %v6129_v24  ;;  %v5154_v33 = vpop.eup %5153  ;;  %v3133_v48 = vadd.f32 %v5874_v55, %v2888_v37  ;;  %v8728_v50 = vld [vmem:[#allocation26_spill] sm:$0xff]  ;;  %v8734_v37 = vld [vmem:[#allocation27_spill] sm:$0xff] }
 0x187   : > { %8724 = vst [vmem:[#allocation34_spill] sm:$0xff] %v6151_v26  ;;  %v3379_v16 = vadd.f32 %v3273_v18, %v3134_v21  ;;  %v6162_v14 = vmul.f32 %v5608_v56, %v2663_v30  ;;  %v1640_v0 = vunpack.c.l.bf16 %v1604_v3  ;;  %v6165_v13 = vsel %vm2773_vm9, %v2790_v49, %v2792_v62 }
 0x188   : > { %v6156_v29 = vsel %vm2773_vm9, %v8725_v38, %v2790_v49  ;;  %v8729_v47 = vrot.slane %v8728_v50, 2  ;;  %v3381_v45 = vadd.f32 %v3278_v43, %v3136_v9  ;;  %v4498_v28 = vmul.f32 -1.442695, %v6123_v44  ;;  %v8738_v9 = vld [vmem:[#allocation13_spill] sm:$0xff]  ;;  %v8742_v50 = vld [vmem:[#allocation14_spill] sm:$0xff] }
 0x189   : > { %8726 = vst [vmem:[#allocation35_spill] sm:$0xff] %v6156_v29  ;;  %8727 = vst [vmem:[#allocation36_spill] sm:$0xff] %v6162_v14  ;;  %v5156_v1 = vpop.eup %5155  ;;  %v6176_v10 = vmul.f32 %v5610_v59, %v2663_v30  ;;  %v8733_v22 = vrot.slane %v8732_v27, 1  ;;  %v887_v49 = vadd.f32 1.0, %v5152_v34  ;;  %v6187_v41 = vmul.f32 %v5613_v60, %v2663_v30  ;;  %v8744_v27 = vld [vmem:[#allocation17_spill] sm:$0xff] }
 0x18a   : > { %v3031_v61 = vsel %vm2773_vm9, %v8729_v47, %v3030_v23  ;;  %v5158_v2 = vpop.eup %5157  ;;  %v8735_v23 = vrot.slane %v8734_v37, 2  ;;  %v1528_v62 = vsel %vm5528_vm3, %v1277_v25, %v1527_v53  ;;  %v979_v3 = vmul.f32 %v5154_v33, %v8738_v9  ;;  %v6205_v33 = vpop.f32.mrf.mxu0  ;;  %v8743_v53 = vld [vmem:[#allocation15_spill] sm:$0xff] }
 0x18b   : > { %v6173_v55 = vadd.f32 %v3031_v61, %v2890_v20  ;;  %8731 = vst [vmem:[#allocation37_spill] sm:$0xff] %v6176_v10  ;;  %v6181_v57 = vsel %vm2004_vm8, %v8733_v22, %v2021_v35  ;;  %8736 = vst [vmem:[#allocation25_spill] sm:$0xff] %v6187_v41  ;;  %v8740_v20 = vld [vmem:[#allocation22_spill] sm:$0xff]  ;;  %v6199_v34 = vmul.f32 %v5606_v42, %v1640_v0  ;;  %5161 = vpow2.f32 %v4498_v28  ;;  %v2644_v28 = vld [vmem:[#allocation2 + $0x3c] sm:$0xe] }
 0x18c   : > { %v3271_v43 = vsel %vm2773_vm9, %v8735_v23, %v3270_v31  ;;  %v6195_v38 = vadd.f32 %v8740_v20, %v3379_v16  ;;  %1529 = vst [vmem:[#allocation2 + $0x60] sm:$0xf] %v1528_v62  ;;  %v5160_v31 = vpop.eup %5159  ;;  %v6202_v30 = vadd.f32 %v8740_v20, %v3381_v45  ;;  %v4644_v18 = vpack.c.bf16 %v979_v3, %v979_v3  ;;  %v8745_v62 = vld [vmem:[#allocation16_spill] sm:$0xff] }
 0x18d   : > { %8730 = vst [vmem:[#allocation26_spill] sm:$0xff] %v6173_v55  ;;  %v6192_v15 = vadd.f32 %v3271_v43, %v3133_v48  ;;  %v982_v25 = vmul.f32 %v5156_v1, %v8742_v50  ;;  %v1744_v16 = vmul.f32 %v5619_v63, %v1640_v0  ;;  %v980_v47 = vmul.f32 %v5158_v2, %v8743_v53  ;;  %v8746_v20 = vld [vmem:[#allocation12_spill] sm:$0xff]  ;;  %v728_v53 = vpop.f32.mrf.mxu0 }
 0x18e   : > { %8741 = vst [vmem:[#allocation3_spill] sm:$0xff] %v6202_v30  ;;  %5163 = vrcp.f32 %v887_v49  ;;  %v1812_v22 = vmul.f32 %v8744_v27, %v1640_v0  ;;  %v6213_v45 = vmul.f32 %v5601_v51, %v1640_v0  ;;  %v1255_v37 = vshrl.u32 %v4644_v18, 16  ;;  %v8747_v61 = vld [vmem:[#allocation28_spill] sm:$0xff] }
 0x18f   : > { %8739 = vst [vmem:[#allocation27_spill] sm:$0xff] %v6192_v15  ;;  %v4547_v1 = vmul.f32 -1.442695, %v6195_v38  ;;  %v4647_v23 = vpack.c.bf16 %v982_v25, %v982_v25  ;;  %v4645_v43 = vpack.c.bf16 %v980_v47, %v980_v47  ;;  %v985_v9 = vmul.f32 %v5160_v31, %v8745_v62  ;;  %v8749_v47 = vld [vmem:[#allocation29_spill] sm:$0xff]  ;;  %v4933_v19 = vpop.f32.mrf.mxu0 }
 0x190   : > { %v4549_v3 = vmul.f32 -1.442695, %v6202_v30  ;;  %v6219_v2 = vmul.f32 %v8746_v20, %v1640_v0  ;;  %v1257_v49 = vrot.slane %v1255_v37, 7  ;;  %v1258_v50 = vshll.u32 %v4644_v18, 16 }
 0x191   : > { %v6222_v48 = vadd.f32 %v1744_v16, %v8747_v61  ;;  %v6225_v35 = vmul.f32 %v8748_v7, %v1640_v0  ;;  %v1280_v4 = vshrl.u32 %v4647_v23, 16  ;;  %v1263_v25 = vshrl.u32 %v4645_v43, 16  ;;  %v1531_v16 = vld [vmem:[#allocation2 + $0x68] sm:$0x1] }
 0x192   : > { %v1844_v26 = vadd.f32 %v1812_v22, %v8749_v47  ;;  %v2662_v31 = vunpack.c.l.bf16 %v2644_v28  ;;  %v1260_v62 = vor.u32 %v1258_v50, %v1257_v49  ;;  %v4650_v30 = vpack.c.bf16 %v985_v9, %v985_v9  ;;  %v1524_v28 = vld [vmem:[#allocation2 + $0x5c] sm:$0x1]  ;;  %v1541_v47 = vld [vmem:[#allocation2 + $0x78] sm:$0xf] }
 0x193   : > { %5165 = vpow2.f32 %v4547_v1  ;;  %v1282_v41 = vrot.slane %v1280_v4, 7  ;;  %v1283_v15 = vshll.u32 %v4647_v23, 16  ;;  %v1265_v37 = vrot.slane %v1263_v25, 7 }
 0x194   : > { %5167 = vpow2.f32 %v4549_v3  ;;  %v1521_v18 = vsel %vm5528_vm3, %v1260_v62, %v1520_v6  ;;  %v1266_v61 = vshll.u32 %v4645_v43, 16  ;;  %v1306_v0 = vshrl.u32 %v4650_v30, 16  ;;  %v731_v62 = vpop.f32.mrf.mxu0 }
 0x195   : > { %v1278_v55 = vrot.slane %v6129_v24, 4  ;;  %v1261_v10 = vrot.slane %v1257_v49, 4  ;;  %1522 = vst [vmem:[#allocation2 + $0x54] sm:$0xf] %v1521_v18  ;;  %v1285_v22 = vor.u32 %v1283_v15, %v1282_v41  ;;  %v1309_v50 = vshll.u32 %v4650_v30, 16  ;;  %v4814_v15 = vld [vmem:[#allocation2 + $0x48] sm:$0xff]  }
 0x196   : > { %v1287_v9 = vrot.slane %v1282_v41, 4  ;;  %v1268_v1 = vor.u32 %v1266_v61, %v1265_v37  ;;  %v1270_v4 = vrot.slane %v1265_v37, 4  ;;  %v6231_v23 = vrot.slane %v1306_v0, 7  ;;  %v1876_v0 = vld [vmem:[#allocation2 + $0x50] sm:$0x1] }
 0x197   : > { %v2123_v3 = vadd.f32 %v6181_v57, %v1844_v26  ;;  %v6235_v6 = vmul.f32 %v5608_v56, %v2662_v31  ;;  %v1286_v25 = vsel %vm5541_vm6, %v1278_v55, %v1285_v22  ;;  %v6241_v24 = vadd.f32 %v6120_v40, %v6171_v58 }
 0x198   : > { %1530 = vst [vmem:[#allocation2 + $0x64] sm:$0xf] %v1286_v25  ;;  %v1532_v30 = vsel %vm5547_vm7, %v1287_v9, %v1531_v16  ;;  %v1269_v49 = vsel %vm5541_vm6, %v1261_v10, %v1268_v1  ;;  %v1525_v26 = vsel %vm5547_vm7, %v1270_v4, %v1524_v28  ;;  %v1311_v57 = vor.u32 %v1309_v50, %v6231_v23  ;;  %v5162_v55 = vpop.eup %5161 }
 0x199   : > { %8750 = vst [vmem:[#allocation13_spill] sm:$0xff] %v6235_v6  ;;  %v6253_v18 = vmul.f32 %v5610_v59, %v2662_v31  ;;  %1533 = vst [vmem:[#allocation2 + $0x68] sm:$0x1] %v1532_v30  ;;  %v6257_v10 = vadd.f32 %v6120_v40, %v6205_v33  ;;  %v6260_v61 = vmul.f32 %v5613_v60, %v2662_v31  ;;  %v4710_v1 = vunpack.c.l.bf16 %v4814_v15 }
 0x19a   : > { %1523 = vst [vmem:[#allocation2 + $0x58] sm:$0xf] %v1269_v49  ;;  %1526 = vst [vmem:[#allocation2 + $0x5c] sm:$0x1] %v1525_v26  ;;  %v1673_v22 = vmul.f32 %v5606_v42, %v5954_v36  ;;  %v1542_v28 = vsel %vm5528_vm3, %v1311_v57, %v1541_v47  ;;  %v6267_v50 = vadd.f32 %v6120_v40, %v728_v53  ;;  %v4496_v33 = vmul.f32 -1.442695, %v6241_v24  ;;  %v4936_v53 = vpop.f32.mrf.mxu0 }
 0x19b   : > { %8753 = vst [vmem:[#allocation22_spill] sm:$0xff] %v6253_v18  ;;  %v5164_v16 = vpop.eup %5163  ;;  %8754 = vst [vmem:[#allocation14_spill] sm:$0xff] %v6260_v61  ;;  %v6272_v4 = vadd.f32 %v6120_v40, %v4933_v19  ;;  %v6275_v31 = vadd.f32 %v6047_v17, %v2123_v3  ;;  %v890_v25 = vadd.f32 1.0, %v5162_v55  ;;  %v6279_v47 = vadd.f32 %v6120_v40, %v731_v62  ;;  %v8756_v26 = vld [vmem:[#allocation19_spill] sm:$0xff]  ;;  %v1605_v36 = vld [vmem:[#allocation2 + $0x40] sm:$0xf] }
 0x19c   : > { %1543 = vst [vmem:[#allocation2 + $0x78] sm:$0xf] %v1542_v28  ;;  %v6281_v30 = vunpack.c.h.bf16 %v4814_v15  ;;  %v6283_v49 = vunpack.c.l.bf16 %v1876_v0  ;;  %v983_v57 = vmul.f32 %v5164_v16, %v8756_v26  ;;  %v4501_v28 = vmul.f32 -1.442695, %v6257_v10 }
 0x19d   : > { %v6290_v3 = vadd.f32 %v6147_v54, %v1673_v22  ;;  %v4499_v55 = vmul.f32 -1.442695, %v6267_v50  ;;  %v1814_v62 = vmul.f32 %v4710_v1, %v8744_v27  ;;  %5169 = vpow2.f32 %v4496_v33 }
 0x19e   : > { %8755 = vst [vmem:[#allocation15_spill] sm:$0xff] %v6281_v30  ;;  %v4502_v15 = vmul.f32 -1.442695, %v6272_v4  ;;  %v6296_v0 = vadd.f32 %v6120_v40, %v4936_v53  ;;  %v1746_v26 = vmul.f32 %v4710_v1, %v5619_v63  ;;  %v6300_v19 = vmul.f32 %v4710_v1, %v5601_v51 }
 0x19f   : > { %5171 = vrcp.f32 %v890_v25  ;;  %v4500_v54 = vmul.f32 -1.442695, %v6279_v47  ;;  %v6305_v17 = vmul.f32 %v6281_v30, %v5601_v51  ;;  %v1928_v33 = vmul.f32 %v5601_v51, %v6283_v49 }
 0x1a0   : > { %8757 = vst [vmem:[#allocation16_spill] sm:$0xff] %v6296_v0  ;;  %v5166_v16 = vpop.eup %5165  ;;  %v4648_v37 = vpack.c.bf16 %v983_v57, %v983_v57  ;;  %5173 = vpow2.f32 %v4501_v28  ;;  %v2169_v53 = vmul.f32 %v4710_v1, %v8746_v20  ;;  %v2170_v9 = vmul.f32 %v6281_v30, %v8746_v20 }
 0x1a1   : > { %v5168_v22 = vpop.eup %5167  ;;  %v6312_v58 = vunpack.c.l.bf16 %v1605_v36  ;;  %5175 = vpow2.f32 %v4499_v55  ;;  %v6315_v25 = vmul.f32 %v4710_v1, %v5606_v42  ;;  %v1846_v61 = vadd.f32 %v1814_v62, %v6222_v48 }
 0x1a2   : > { %5177 = vpow2.f32 %v4502_v15  ;;  %v4505_v18 = vmul.f32 -1.442695, %v6296_v0  ;;  %v6320_v52 = vadd.f32 %v1746_v26, %v6199_v34  ;;  %v2171_v28 = vmul.f32 %v8746_v20, %v6283_v49 }
 0x1a3   : > { %8758 = vst [vmem:[#allocation28_spill] sm:$0xff] %v6315_v25  ;;  %5179 = vpow2.f32 %v4500_v54  ;;  %v3546_v36 = vadd.f32 1.0, %v5166_v16  ;;  %v8540_v55 = vrot.slane %v6305_v17, 1  ;;  %v2038_v29 = vrot.slane %v1928_v33, 1  ;;  %v1875_v54 = vld [vmem:[#allocation2 + $0x44] sm:$0x1] }
 0x1a4   : > { %8759 = vst [vmem:[#allocation29_spill] sm:$0xff] %v6320_v52  ;;  %v1289_v14 = vshrl.u32 %v4648_v37, 16  ;;  %v3548_v6 = vadd.f32 1.0, %v5168_v22  ;;  %v2275_v46 = vrot.slane %v2169_v53, 1  ;;  %v2276_v48 = vrot.slane %v2170_v9, 1 }
 0x1a5   : > { %v2411_v62 = vmul.f32 %v4710_v1, %v8748_v7  ;;  %v6328_v15 = vadd.f32 %v6115_v11, %v1846_v61  ;;  %v2412_v34 = vmul.f32 %v6281_v30, %v8748_v7  ;;  %v1745_v26 = vmul.f32 %v5619_v63, %v6312_v58  ;;  %v6344_v61 = vpop.f32.mrf.mxu0 }
 0x1a6   : > { %5181 = vpow2.f32 %v4505_v18  ;;  %v2413_v16 = vmul.f32 %v8748_v7, %v6283_v49  ;;  %v6338_v22 = vmul.f32 %v6281_v30, %v5613_v60  ;;  %v3182_v9 = vmul.f32 %v5613_v60, %v6283_v49 }
 0x1a7   : > { %8760 = vst [vmem:[#allocation4_spill] sm:$0xff] %v6328_v15  ;;  %v1813_v11 = vmul.f32 %v8744_v27, %v6312_v58  ;;  %5183 = vrcp.f32 %v3546_v36  ;;  %v6349_v18 = vsel %vm2004_vm8, %v8540_v55, %v2038_v29  ;;  %v2278_v1 = vrot.slane %v2171_v28, 1 }
 0x1a8   : > { %8761 = vst [vmem:[#allocation5_spill] sm:$0xff] %v6338_v22  ;;  %8762 = vst [vmem:[#allocation19_spill] sm:$0xff] %v6349_v18  ;;  %v6351_v33 = vrot.slane %v1289_v14, 7  ;;  %5185 = vrcp.f32 %v3548_v6  ;;  %v6354_v53 = vsel %vm2004_vm8, %v2275_v46, %v2276_v48  ;;  %v2515_v57 = vrot.slane %v2411_v62, 1  ;;  %v6365_v46 = vpop.f32.mrf.mxu0  ;;  %v1534_v14 = vld [vmem:[#allocation2 + $0x6c] sm:$0xf] }
 0x1a9   : > { %8763 = vst [vmem:[#allocation38_spill] sm:$0xff] %v6354_v53  ;;  %v6356_v15 = vunpack.c.l.bf16 %v1875_v54  ;;  %v2516_v25 = vrot.slane %v2412_v34, 1  ;;  %v6360_v52 = vmul.f32 %v5608_v56, %v6283_v49  ;;  %v1777_v36 = vadd.f32 %v1745_v26, %v6143_v8 }
 0x1aa   : > { %v1292_v0 = vshll.u32 %v4648_v37, 16  ;;  %v5170_v29 = vpop.eup %5169  ;;  %v2518_v55 = vrot.slane %v2413_v16, 1  ;;  %v3287_v28 = vrot.slane %v3182_v9, 2  ;;  %v1845_v6 = vadd.f32 %v1813_v11, %v6290_v3 }
 0x1ab   : > { %8764 = vst [vmem:[#allocation39_spill] sm:$0xff] %v6360_v52  ;;  %v1815_v34 = vmul.f32 %v6281_v30, %v8744_v27  ;;  %v6371_v54 = vmul.f32 %v5601_v51, %v6312_v58  ;;  %v6375_v8 = vmul.f32 %v8746_v20, %v6312_v58  ;;  %v6379_v16 = vsel %vm2004_vm8, %v2276_v48, %v2278_v1 }
 0x1ac   : > { %v5172_v62 = vpop.eup %5171  ;;  %v1294_v37 = vor.u32 %v1292_v0, %v6351_v33  ;;  %8765 = vst [vmem:[#allocation40_spill] sm:$0xff] %v6379_v16  ;;  %v6383_v3 = vmul.f32 %v5610_v59, %v6283_v49  ;;  %v1925_v9 = vmul.f32 %v5601_v51, %v6356_v15  ;;  %v6389_v11 = vmul.f32 %v8748_v7, %v6312_v58 }
 0x1ad   : > { %v5174_v26 = vpop.eup %5173  ;;  %v6392_v53 = vsel %vm2004_vm8, %v2515_v57, %v2516_v25  ;;  %v1847_v48 = vadd.f32 %v1815_v34, %v1777_v36  ;;  %v888_v1 = vadd.f32 1.0, %v5170_v29  ;;  %v6396_v49 = vsel %vm2004_vm8, %v2516_v25, %v2518_v55  ;;  %v747_v57 = vpop.f32.mrf.mxu0  ;;  %v8771_v34 = vld [vmem:[#allocation30_spill] sm:$0xff] }
 0x1ae   : > { %8766 = vst [vmem:[#allocation41_spill] sm:$0xff] %v6383_v3  ;;  %v5176_v18 = vpop.eup %5175  ;;  %8767 = vst [vmem:[#allocation42_spill] sm:$0xff] %v6392_v53  ;;  %v8768_v27 = vrot.slane %v6338_v22, 2  ;;  %v2124_v30 = vadd.f32 %v6138_v39, %v1845_v6  ;;  %v6406_v63 = vmul.f32 %v5608_v56, %v6312_v58  ;;  %v2168_v29 = vmul.f32 %v8746_v20, %v6356_v15 }
 0x1af   : > { %v5178_v16 = vpop.eup %5177  ;;  %v2271_v25 = vrot.slane %v6375_v8, 1  ;;  %v1535_v55 = vsel %vm5528_vm3, %v1294_v37, %v1534_v14  ;;  %v2410_v39 = vmul.f32 %v8748_v7, %v6356_v15  ;;  %v986_v6 = vmul.f32 %v5172_v62, %v6123_v44  ;;  %v4940_v37 = vpop.f32.mrf.mxu0 }
 0x1b0   : > { %v6401_v51 = vsel %vm2773_vm9, %v8768_v27, %v3287_v28  ;;  %8770 = vst [vmem:[#allocation44_spill] sm:$0xff] %v6406_v63  ;;  %v5180_v53 = vpop.eup %5179  ;;  %v2033_v27 = vrot.slane %v1925_v9, 1  ;;  %v2511_v28 = vrot.slane %v6389_v11, 1  ;;  %1536 = vst [vmem:[#allocation2 + $0x6c] sm:$0xf] %v1535_v55  ;;  %v2126_v0 = vadd.f32 %v8771_v34, %v1847_v48 }
 0x1b1   : > { %8769 = vst [vmem:[#allocation43_spill] sm:$0xff] %v6401_v51  ;;  %5187 = vrcp.f32 %v888_v1  ;;  %v893_v36 = vadd.f32 1.0, %v5174_v26  ;;  %v891_v51 = vadd.f32 1.0, %v5176_v18  ;;  %v2369_v8 = vadd.f32 %v6050_v32, %v2124_v30 }
 0x1b2   : > { %v4651_v52 = vpack.c.bf16 %v986_v6, %v986_v6  ;;  %v894_v20 = vadd.f32 1.0, %v5178_v16  ;;  %v892_v14 = vadd.f32 1.0, %v5180_v53  ;;  %v8772_v9 = vrot.slane %v6219_v2, 1  ;;  %v5051_v2 = vld [vmem:[%s8494_s5 + $0x38] sm:$0xff]  }
 0x1b3   : > { %v5182_v22 = vpop.eup %5181  ;;  %v2273_v11 = vrot.slane %v2168_v29, 1  ;;  %v6427_v44 = vmul.f32 %v5608_v56, %v6356_v15  ;;  %5189 = vrcp.f32 %v893_v36  ;;  %v8774_v18 = vrot.slane %v6225_v35, 1  ;;  %v1552_v29 = vld [vmem:[#allocation2 + $0x8c] sm:$0x1] }
 0x1b4   : > { %v6423_v7 = vsel %vm2004_vm8, %v8772_v9, %v2271_v25  ;;  %v5184_v62 = vpop.eup %5183  ;;  %v2513_v30 = vrot.slane %v2410_v39, 1  ;;  %v1314_v26 = vshrl.u32 %v4651_v52, 16  ;;  %5191 = vrcp.f32 %v891_v51  ;;  %v760_v51 = vpop.f32.mrf.mxu0 }
 0x1b5   : > { %8773 = vst [vmem:[#allocation30_spill] sm:$0xff] %v6423_v7  ;;  %v2512_v32 = vsel %vm2004_vm8, %v8774_v18, %v2511_v28  ;;  %v6435_v53 = vpop.eup %5185  ;;  %v8776_v16 = vrot.slane %v6371_v54, 1  ;;  %5193 = vrcp.f32 %v894_v20  ;;  %v897_v1 = vadd.f32 1.0, %v5182_v22 }
 0x1b6   : > { %8775 = vst [vmem:[#allocation45_spill] sm:$0xff] %v6435_v53  ;;  %v6444_v35 = vadd.f32 %v6120_v40, %v6344_v61  ;;  %v1316_v36 = vrot.slane %v1314_v26, 7  ;;  %5195 = vrcp.f32 %v892_v14  ;;  %v6448_v55 = vadd.f32 %v2512_v32, %v6275_v31  ;;  %v4941_v26 = vpop.f32.mrf.mxu0 }
 0x1b7   : > { %v6440_v48 = vsel %vm2004_vm8, %v8776_v16, %v2033_v27  ;;  %v6452_v39 = vmul.f32 %v5610_v59, %v6312_v58  ;;  %v6456_v20 = vadd.f32 %v6120_v40, %v6365_v46  ;;  %v5374_v22 = vmov 0.0   ;;  %v5052_v46 = vld [vmem:[%s8494_s5 + $0x30] sm:$0xff]  }
 0x1b8   : > { %8777 = vst [vmem:[#allocation46_spill] sm:$0xff] %v6448_v55  ;;  %4942 = vmatprep.subr.bf16.mxu0 %v5374_v22  ;;  %4958 = vmatprep.mubr.msk.bf16.mxu0 %vm5375_vm10, %v5374_v22  ;;  %v8554_v61 = vrot.slane %v6406_v63, 2  ;;  %v2937_v31 = vmul.f32 %v5610_v59, %v6356_v15  ;;  %v1317_v27 = vshll.u32 %v4651_v52, 16  ;;  %v6464_v6 = vadd.f32 %v6120_v40, %v747_v57 }
 0x1b9   : > { %8778 = vst [vmem:[#allocation47_spill] sm:$0xff] %v6452_v39  ;;  %4943 = vmatpush3.bf16.msra.mxu0 %v5051_v2  ;;  %4962 = vmatprep.subr.bf16.mxu1 %v5374_v22  ;;  %v2274_v34 = vsel %vm2004_vm8, %v2271_v25, %v2273_v11  ;;  %v2514_v14 = vsel %vm2004_vm8, %v2511_v28, %v2513_v30  ;;  %v2802_v9 = vrot.slane %v6427_v44, 2  ;;  %5197 = vrcp.f32 %v897_v1  ;;  %v1545_v28 = vld [vmem:[#allocation2 + $0x80] sm:$0x1] }
 0x1ba   : > { %4944 = vmatprep.subr.bf16.mxu0 %v5374_v22  ;;  %4964 = vmatprep.mubr.msk.bf16.mxu1 %vm5375_vm10, %v5374_v22  ;;  %v1319_v52 = vor.u32 %v1317_v27, %v1316_v36  ;;  %v1321_v57 = vrot.slane %v1316_v36, 4  ;;  %v4503_v18 = vmul.f32 -1.442695, %v6444_v35  ;;  %v6477_v32 = vadd.f32 %v6120_v40, %v4940_v37  ;;  %v5053_v37 = vld [vmem:[%s8494_s5 + $0x28] sm:$0xff]  }
 0x1bb   : > { %v2371_v2 = vadd.f32 %v2274_v34, %v2126_v0  ;;  %v2614_v16 = vadd.f32 %v2514_v14, %v2369_v8  ;;  %v8553_v25 = vrot.slane %v6452_v39, 2  ;;  %v4506_v11 = vmul.f32 -1.442695, %v6456_v20 }
 0x1bc   : > { %v3042_v44 = vrot.slane %v2937_v31, 2  ;;  %v1312_v30 = vrot.slane %v6231_v23, 4  ;;  %v4504_v1 = vmul.f32 -1.442695, %v6464_v6  ;;  %v6484_v36 = vadd.f32 %v6120_v40, %v760_v51 }
 0x1bd   : > { %4945 = vmatpush3.bf16.msra.mxu0 %v5052_v46  ;;  %v6490_v0 = vmul.f32 %v5184_v62, %v6195_v38  ;;  %v6494_v8 = vmul.f32 %v5613_v60, %v6312_v58  ;;  %v3179_v23 = vmul.f32 %v5613_v60, %v6356_v15  ;;  %v6499_v31 = vadd.f32 %v6120_v40, %v4941_v26 }
 0x1be   : > { %4946 = vmatprep.subr.bf16.mxu0 %v5374_v22  ;;  %v5188_v51 = vpop.eup %5187  ;;  %v1320_v27 = vsel %vm5541_vm6, %v1312_v30, %v1319_v52  ;;  %v1546_v38 = vsel %vm5547_vm7, %v1321_v57, %v1545_v28  ;;  %5199 = vpow2.f32 %v4503_v18  ;;  %v4509_v62 = vmul.f32 -1.442695, %v6477_v32 }
 0x1bf   : > { %8779 = vst [vmem:[#allocation48_spill] sm:$0xff] %v6490_v0  ;;  %8780 = vst [vmem:[#allocation49_spill] sm:$0xff] %v6494_v8  ;;  %v2616_v46 = vadd.f32 %v6396_v49, %v2371_v2  ;;  %v6511_v15 = vsel %vm2773_vm9, %v8554_v61, %v2802_v9  ;;  %v984_v34 = vmul.f32 %v5188_v51, %v6241_v24  ;;  %5201 = vpow2.f32 %v4506_v11  ;;  %v5054_v9 = vld [vmem:[%s8494_s5 + $0x20] sm:$0xff]  }
 0x1c0   : > { %8781 = vst [vmem:[#allocation50_spill] sm:$0xff] %v6511_v15  ;;  %1544 = vst [vmem:[#allocation2 + $0x7c] sm:$0xf] %v1320_v27  ;;  %v5190_v14 = vpop.eup %5189  ;;  %v2893_v52 = vadd.f32 %v6165_v13, %v2614_v16  ;;  %v3043_v57 = vsel %vm2773_vm9, %v8553_v25, %v3042_v44  ;;  %5203 = vpow2.f32 %v4504_v1  ;;  %v4507_v49 = vmul.f32 -1.442695, %v6484_v36 }
 0x1c1   : > { %1547 = vst [vmem:[#allocation2 + $0x80] sm:$0x1] %v1546_v38  ;;  %4947 = vmatpush3.bf16.msra.mxu0 %v5053_v37  ;;  %v5192_v18 = vpop.eup %5191  ;;  %v8552_v26 = vrot.slane %v6494_v8, 2  ;;  %v4649_v24 = vpack.c.bf16 %v984_v34, %v984_v34  ;;  %v989_v2 = vmul.f32 %v5190_v14, %v6257_v10  ;;  %v4510_v13 = vmul.f32 -1.442695, %v6499_v31 }
 0x1c2   : > { %4948 = vmatprep.subr.bf16.mxu0 %v5374_v22  ;;  %v5194_v16 = vpop.eup %5193  ;;  %v3282_v28 = vrot.slane %v3179_v23, 2  ;;  %v8782_v11 = vrot.slane %v6371_v54, 1  ;;  %v8783_v44 = vrot.slane %v6213_v45, 1  ;;  %v987_v1 = vmul.f32 %v5192_v18, %v6267_v50  ;;  %v2647_v34 = vld [vmem:[#allocation2 + $0x60] sm:$0xe]  ;;  %v5055_v45 = vld [vmem:[%s8494_s5 + $0x18] sm:$0xff]  }
 0x1c3   : > { %5205 = vpow2.f32 %v4509_v62  ;;  %v5196_v37 = vpop.eup %5195  ;;  %v2895_v51 = vadd.f32 %v6059_v12, %v2616_v46  ;;  %v1297_v10 = vshrl.u32 %v4649_v24, 16  ;;  %v4654_v27 = vpack.c.bf16 %v989_v2, %v989_v2 }
 0x1c4   : > { %v6531_v30 = vsel %vm2004_vm8, %v8783_v44, %v8782_v11  ;;  %v990_v38 = vmul.f32 %v5194_v16, %v6272_v4  ;;  %v1300_v14 = vshll.u32 %v4649_v24, 16  ;;  %v4652_v23 = vpack.c.bf16 %v987_v1, %v987_v1  ;;  %v1538_v16 = vld [vmem:[#allocation2 + $0x74] sm:$0x1] }
 0x1c5   : > { %v988_v54 = vmul.f32 %v5196_v37, %v6279_v47  ;;  %5207 = vpow2.f32 %v4507_v49  ;;  %4949 = vmatpush3.bf16.msra.mxu0 %v5054_v9  ;;  %v1299_v50 = vrot.slane %v1297_v10, 7  ;;  %v1340_v62 = vshrl.u32 %v4654_v27, 16  ;;  %v8786_v10 = vld [vmem:[#allocation11_spill] sm:$0xff] }
 0x1c6   : > { %v4655_v18 = vpack.c.bf16 %v990_v38, %v990_v38  ;;  %5209 = vpow2.f32 %v4510_v13  ;;  %4950 = vmatprep.subr.bf16.mxu0 %v5374_v22  ;;  %v5198_v12 = vpop.eup %5197  ;;  %v3138_v4 = vadd.f32 %v6066_v5, %v2893_v52  ;;  %v3283_v46 = vsel %vm2773_vm9, %v8552_v26, %v3282_v28  ;;  %v5056_v52 = vld [vmem:[%s8494_s5 + $0x10] sm:$0xff]  }
 0x1c7   : > { %v1677_v47 = vmul.f32 %v5606_v42, %v6312_v58  ;;  %v1323_v49 = vshrl.u32 %v4652_v23, 16  ;;  %v6547_v9 = vunpack.c.l.bf16 %v2647_v34  ;;  %v1295_v24 = vrot.slane %v6351_v33, 4  ;;  %v1608_v28 = vld [vmem:[#allocation2 + $0x54] sm:$0xf]  ;;  %v1555_v34 = vld [vmem:[#allocation2 + $0x90] sm:$0xf] }
 0x1c8   : > { %v1302_v2 = vor.u32 %v1300_v14, %v1299_v50  ;;  %v1343_v13 = vshll.u32 %v4654_v27, 16  ;;  %v1304_v11 = vrot.slane %v1299_v50, 4  ;;  %v1342_v44 = vrot.slane %v1340_v62, 7  ;;  %v8787_v27 = vld [vmem:[#allocation15_spill] sm:$0xff]  ;;  %v8788_v50 = vld [vmem:[#allocation16_spill] sm:$0xff] }
 0x1c9   : > { %v6550_v1 = vrot.slane %v1323_v49, 7  ;;  %v1348_v5 = vshrl.u32 %v4655_v18, 16  ;;  %4951 = vmatpush3.bf16.msra.mxu0 %v5055_v45  ;;  %v8784_v58 = vrot.slane %v6305_v17, 1  ;;  %v8785_v37 = vrot.slane %v6300_v19, 1 }
 0x1ca   : > { %v1747_v38 = vmul.f32 %v8787_v27, %v8786_v10  ;;  %v4653_v14 = vpack.c.bf16 %v988_v54, %v988_v54  ;;  %v993_v62 = vmul.f32 %v5198_v12, %v8788_v50  ;;  %4952 = vmatprep.subr.bf16.mxu0 %v5374_v22  ;;  %v1303_v45 = vsel %vm5541_vm6, %v1295_v24, %v1302_v2  ;;  %v1548_v50 = vld [vmem:[#allocation2 + $0x84] sm:$0xf] }
 0x1cb   : > { %v6560_v33 = vsel %vm2004_vm8, %v8785_v37, %v8784_v58  ;;  %v1539_v17 = vsel %vm5547_vm7, %v1304_v11, %v1538_v16  ;;  %v1345_v49 = vor.u32 %v1343_v13, %v1342_v44  ;;  %v1326_v19 = vshll.u32 %v4652_v23, 16  ;;  %v5200_v26 = vpop.eup %5199  ;;  %1537 = vst [vmem:[#allocation2 + $0x70] sm:$0xf] %v1303_v45  ;;  %v1559_v13 = vld [vmem:[#allocation2 + $0x98] sm:$0x1] }
 0x1cc   : > { %v6570_v58 = vadd.f32 %v3043_v57, %v2895_v51  ;;  %v6572_v37 = vadd.f32 %v3283_v46, %v3138_v4  ;;  %v6576_v54 = vmul.f32 %v5608_v56, %v6547_v9  ;;  %v6578_v12 = vadd.f32 %v1747_v38, %v1677_v47  ;;  %1540 = vst [vmem:[#allocation2 + $0x74] sm:$0x1] %v1539_v17  ;;  %v5202_v24 = vpop.eup %5201  ;;  %v5057_v4 = vld [vmem:[%s8494_s5 + $0x8] sm:$0xff]  }
 0x1cd   : > { %v6580_v2 = vunpack.c.l.bf16 %v1608_v28  ;;  %v1556_v23 = vsel %vm5528_vm3, %v1345_v49, %v1555_v34  ;;  %v1328_v57 = vor.u32 %v1326_v19, %v6550_v1  ;;  %v1350_v51 = vrot.slane %v1348_v5, 7  ;;  %4953 = vmatpush3.bf16.msra.mxu0 %v5056_v52  ;;  %v5204_v46 = vpop.eup %5203 }
 0x1ce   : > { %8789 = vst [vmem:[#allocation11_spill] sm:$0xff] %v6570_v58  ;;  %8790 = vst [vmem:[#allocation16_spill] sm:$0xff] %v6572_v37  ;;  %v1346_v47 = vrot.slane %v1342_v44, 4  ;;  %v1351_v16 = vshll.u32 %v4655_v18, 16  ;;  %v1331_v11 = vshrl.u32 %v4653_v14, 16  ;;  %v4658_v38 = vpack.c.bf16 %v993_v62, %v993_v62  ;;  %4954 = vmatprep.subr.bf16.mxu0 %v5374_v22 }
 0x1cf   : > { %8791 = vst [vmem:[#allocation51_spill] sm:$0xff] %v6576_v54  ;;  %1557 = vst [vmem:[#allocation2 + $0x90] sm:$0xf] %v1556_v23  ;;  %v1549_v28 = vsel %vm5528_vm3, %v1328_v57, %v1548_v50  ;;  %v1355_v34 = vrot.slane %v1350_v51, 4  ;;  %v895_v45 = vadd.f32 1.0, %v5200_v26  ;;  %v898_v5 = vadd.f32 1.0, %v5202_v24 }
 0x1d0   : > { %v5206_v52 = vpop.eup %5205  ;;  %1550 = vst [vmem:[#allocation2 + $0x84] sm:$0xf] %v1549_v28  ;;  %v1353_v17 = vor.u32 %v1351_v16, %v1350_v51  ;;  %v1333_v49 = vrot.slane %v1331_v11, 7  ;;  %v1334_v19 = vshll.u32 %v4653_v14, 16  ;;  %v1374_v44 = vshrl.u32 %v4658_v38, 16  ;;  %v5058_v26 = vld [vmem:[%s8494_s5] sm:$0xff]  }
 0x1d1   : > { %v2646_v23 = vld [vmem:[#allocation2 + $0x54] sm:$0xe]  ;;  %v1329_v18 = vrot.slane %v6550_v1, 4  ;;  %v1560_v62 = vsel %vm5547_vm7, %v1355_v34, %v1559_v13  ;;  %5211 = vrcp.f32 %v895_v45  ;;  %v896_v25 = vadd.f32 1.0, %v5204_v46  ;;  %4955 = vmatpush3.bf16.msra.mxu0 %v5057_v4  ;;  %v763_v1 = vpop.f32.mrf.mxu0  ;;  %v8793_v11 = vld [vmem:[#allocation17_spill] sm:$0xff] }
 0x1d2   : > { %v5208_v50 = vpop.eup %5207  ;;  %v1354_v24 = vsel %vm5541_vm6, %v1346_v47, %v1353_v17  ;;  %1561 = vst [vmem:[#allocation2 + $0x98] sm:$0x1] %v1560_v62  ;;  %v1336_v14 = vor.u32 %v1334_v19, %v1333_v49  ;;  %v1338_v57 = vrot.slane %v1333_v49, 4  ;;  %v6599_v51 = vrot.slane %v1374_v44, 7  ;;  %4956 = vmatprep.subr.bf16.mxu0 %v5374_v22  ;;  %v1569_v22 = vld [vmem:[#allocation2 + $0xa8] sm:$0xf] }
 0x1d3   : > { %v5210_v16 = vpop.eup %5209  ;;  %v6604_v4 = vmul.f32 %v5610_v59, %v6547_v9  ;;  %1558 = vst [vmem:[#allocation2 + $0x94] sm:$0xf] %v1354_v24  ;;  %v1377_v46 = vshll.u32 %v4658_v38, 16  ;;  %5213 = vrcp.f32 %v898_v5  ;;  %v901_v13 = vadd.f32 1.0, %v5206_v52  ;;  %v4815_v17 = vld [vmem:[#allocation2 + $0x60] sm:$0xff]   ;;  %v8799_v24 = vld [vmem:[#allocation18_spill] sm:$0xff] }
 0x1d4   : > { %v1816_v47 = vmul.f32 %v8793_v11, %v6580_v2  ;;  %v2664_v28 = vunpack.c.l.bf16 %v2646_v23  ;;  %v1337_v34 = vsel %vm5541_vm6, %v1329_v18, %v1336_v14  ;;  %v1553_v45 = vsel %vm5547_vm7, %v1338_v57, %v1552_v29  ;;  %v8795_v23 = vld [vmem:[#allocation7_spill] sm:$0xff] }
 0x1d5   : > { %8792 = vst [vmem:[#allocation52_spill] sm:$0xff] %v6604_v4  ;;  %1551 = vst [vmem:[#allocation2 + $0x88] sm:$0xf] %v1337_v34  ;;  %v1379_v49 = vor.u32 %v1377_v46, %v6599_v51  ;;  %5215 = vrcp.f32 %v896_v25  ;;  %v899_v38 = vadd.f32 1.0, %v5208_v50  ;;  %v6614_v5 = vadd.f32 %v6120_v40, %v763_v1  ;;  %4957 = vmatpush3.bf16.msra.mxu0 %v5058_v26  ;;  %v8796_v25 = vld [vmem:[#allocation12_spill] sm:$0xff]  ;;  %v8798_v50 = vld [vmem:[#allocation29_spill] sm:$0xff] }
 0x1d6   : > { %1554 = vst [vmem:[#allocation2 + $0x8c] sm:$0x1] %v1553_v45  ;;  %v6619_v19 = vmul.f32 %v5613_v60, %v6547_v9  ;;  %v1748_v29 = vmul.f32 %v8786_v10, %v6580_v2  ;;  %v902_v44 = vadd.f32 1.0, %v5210_v16  ;;  %v6625_v18 = vmul.f32 %v8795_v23, %v6580_v2  ;;  %v1878_v40 = vld [vmem:[#allocation2 + $0x68] sm:$0x1] }
 0x1d7   : > { %v6629_v62 = vmul.f32 %v8796_v25, %v6580_v2  ;;  %v1570_v26 = vsel %vm5528_vm3, %v1379_v49, %v1569_v22  ;;  %5217 = vrcp.f32 %v901_v13  ;;  %v1848_v9 = vadd.f32 %v1816_v47, %v8798_v50  ;;  %v8805_v49 = vld [vmem:[#allocation28_spill] sm:$0xff]  ;;  %v1609_v52 = vld [vmem:[#allocation2 + $0x58] sm:$0xf]  ;;  %v1877_v34 = vld [vmem:[#allocation2 + $0x5c] sm:$0x1] }
 0x1d8   : > { %8794 = vst [vmem:[#allocation17_spill] sm:$0xff] %v6619_v19  ;;  %v6636_v14 = vmul.f32 %v8799_v24, %v6580_v2  ;;  %v6639_v57 = vmul.f32 %v5608_v56, %v2664_v28  ;;  %v4714_v1 = vunpack.c.l.bf16 %v4815_v17  ;;  %1571 = vst [vmem:[#allocation2 + $0xa8] sm:$0xf] %v1570_v26  ;;  %v6642_v16 = vmul.f32 %v5610_v59, %v2664_v28  ;;  %v8809_v50 = vld [vmem:[#allocation38_spill] sm:$0xff] }
 0x1d9   : > { %8797 = vst [vmem:[#allocation7_spill] sm:$0xff] %v6629_v62  ;;  %v6645_v46 = vmul.f32 %v5613_v60, %v2664_v28  ;;  %5219 = vrcp.f32 %v899_v38  ;;  %v4508_v13 = vmul.f32 -1.442695, %v6614_v5  ;;  %v6650_v45 = vunpack.c.l.bf16 %v1878_v40 }
 0x1da   : > { %8800 = vst [vmem:[#allocation29_spill] sm:$0xff] %v6636_v14  ;;  %8801 = vst [vmem:[#allocation53_spill] sm:$0xff] %v6639_v57  ;;  %5221 = vrcp.f32 %v902_v44  ;;  %v1680_v22 = vmul.f32 %v5606_v42, %v6580_v2  ;;  %v1780_v26 = vadd.f32 %v1748_v29, %v8805_v49  ;;  %v2127_v38 = vadd.f32 %v6531_v30, %v1848_v9  ;;  %v2649_v44 = vld [vmem:[#allocation2 + $0x78] sm:$0xe] }
 0x1db   : > { %8802 = vst [vmem:[#allocation54_spill] sm:$0xff] %v6642_v16  ;;  %8803 = vst [vmem:[#allocation55_spill] sm:$0xff] %v6645_v46  ;;  %v1818_v40 = vmul.f32 %v4714_v1, %v8793_v11  ;;  %v1750_v29 = vmul.f32 %v4714_v1, %v8786_v10  ;;  %5223 = vpow2.f32 %v4508_v13  ;;  %v6664_v28 = vunpack.c.h.bf16 %v4815_v17 }
 0x1dc   : > { %8804 = vst [vmem:[#allocation56_spill] sm:$0xff] %v6650_v45  ;;  %v6667_v30 = vmul.f32 %v4714_v1, %v8795_v23  ;;  %v6671_v9 = vmul.f32 %v8795_v23, %v6650_v45  ;;  %v6673_v47 = vunpack.c.l.bf16 %v1609_v52  ;;  %v6676_v61 = vmul.f32 %v4714_v1, %v8796_v25 }
 0x1dd   : > { %8806 = vst [vmem:[#allocation28_spill] sm:$0xff] %v6664_v28  ;;  %v6678_v53 = vunpack.c.l.bf16 %v1877_v34  ;;  %v6680_v2 = vunpack.c.l.bf16 %v2649_v44  ;;  %v6684_v0 = vadd.f32 %v8809_v50, %v2127_v38  ;;  %v1850_v19 = vadd.f32 %v1818_v40, %v1780_v26 }
 0x1de   : > { %v5212_v49 = vpop.eup %5211  ;;  %8807 = vst [vmem:[#allocation57_spill] sm:$0xff] %v6673_v47  ;;  %8808 = vst [vmem:[#allocation58_spill] sm:$0xff] %v6676_v61  ;;  %v6688_v58 = vmul.f32 %v8796_v25, %v6650_v45  ;;  %v6691_v52 = vmul.f32 %v4714_v1, %v8799_v24  ;;  %v6694_v46 = vmul.f32 %v4714_v1, %v5606_v42 }
 0x1df   : > { %v991_v13 = vmul.f32 %v5212_v49, %v6444_v35  ;;  %8810 = vst [vmem:[#allocation38_spill] sm:$0xff] %v6684_v0  ;;  %v6696_v34 = vadd.f32 %v1750_v29, %v1680_v22  ;;  %v6703_v38 = vmul.f32 %v6664_v28, %v8799_v24  ;;  %v1817_v40 = vmul.f32 %v8793_v11, %v6673_v47 }
 0x1e0   : > { %v5214_v17 = vpop.eup %5213  ;;  %8811 = vst [vmem:[#allocation59_spill] sm:$0xff] %v6688_v58  ;;  %v6715_v26 = vmul.f32 %v8799_v24, %v6650_v45  ;;  %v6778_v21 = vmul.f32 %v5608_v56, %v6678_v53 }
 0x1e1   : > { %v4656_v44 = vpack.c.bf16 %v991_v13, %v991_v13  ;;  %v994_v35 = vmul.f32 %v5214_v17, %v6456_v20  ;;  %8812 = vst [vmem:[#allocation60_spill] sm:$0xff] %v6703_v38  ;;  %v6710_v20 = vadd.f32 %v6560_v33, %v1850_v19  ;;  %v1380_v33 = vrot.slane %v6599_v51, 4  ;;  %v1562_v19 = vld [vmem:[#allocation2 + $0x9c] sm:$0xf] }
 0x1e2   : > { %v5216_v49 = vpop.eup %5215  ;;  %8814 = vst [vmem:[#allocation62_spill] sm:$0xff] %v6715_v26  ;;  %8819 = vst [vmem:[#allocation67_spill] sm:$0xff] %v6778_v21 }
 0x1e3   : > { %v1357_v37 = vshrl.u32 %v4656_v44, 16  ;;  %v4659_v22 = vpack.c.bf16 %v994_v35, %v994_v35  ;;  %v992_v29 = vmul.f32 %v5216_v49, %v6464_v6  ;;  %8813 = vst [vmem:[#allocation61_spill] sm:$0xff] %v6710_v20  ;;  %v1360_v4 = vshll.u32 %v4656_v44, 16  ;;  %v1573_v44 = vld [vmem:[#allocation2 + $0xb0] sm:$0x1] }
 0x1e4   : > { %v5218_v13 = vpop.eup %5217  ;;  %v1849_v35 = vadd.f32 %v1817_v40, %v6578_v12  ;;  %v6721_v6 = vmul.f32 %v8796_v25, %v6673_v47 }
 0x1e5   : > { %v1359_v8 = vrot.slane %v1357_v37, 7  ;;  %v1382_v16 = vshrl.u32 %v4659_v22, 16  ;;  %v4657_v1 = vpack.c.bf16 %v992_v29, %v992_v29  ;;  %v997_v49 = vmul.f32 %v5218_v13, %v6477_v32 }
 0x1e6   : > { %v5220_v3 = vpop.eup %5219  ;;  %8815 = vst [vmem:[#allocation63_spill] sm:$0xff] %v6721_v6  ;;  %v1385_v50 = vshll.u32 %v4659_v22, 16 }
 0x1e7   : > { %v5222_v17 = vpop.eup %5221  ;;  %v1362_v39 = vor.u32 %v1360_v4, %v1359_v8  ;;  %v1384_v15 = vrot.slane %v1382_v16, 7  ;;  %v1365_v37 = vshrl.u32 %v4657_v1, 16  ;;  %v1368_v55 = vshll.u32 %v4657_v1, 16  ;;  %v1566_v4 = vld [vmem:[#allocation2 + $0xa4] sm:$0x1] }
 0x1e8   : > { %v4662_v29 = vpack.c.bf16 %v997_v49, %v997_v49  ;;  %v995_v54 = vmul.f32 %v5220_v3, %v6484_v36  ;;  %v998_v12 = vmul.f32 %v5222_v17, %v6499_v31  ;;  %v5224_v0 = vpop.eup %5223  ;;  %v1363_v32 = vrot.slane %v1359_v8, 4 }
 0x1e9   : > { %v1563_v40 = vsel %vm5528_vm3, %v1362_v39, %v1562_v19  ;;  %v1387_v57 = vor.u32 %v1385_v50, %v1384_v15  ;;  %v1389_v51 = vrot.slane %v1384_v15, 4  ;;  %v1367_v63 = vrot.slane %v1365_v37, 7  ;;  %v1583_v19 = vld [vmem:[#allocation2 + $0xc0] sm:$0xf] }
 0x1ea   : > { %1564 = vst [vmem:[#allocation2 + $0x9c] sm:$0xf] %v1563_v40  ;;  %v1408_v16 = vshrl.u32 %v4662_v29, 16  ;;  %v4660_v22 = vpack.c.bf16 %v995_v54, %v995_v54  ;;  %v4663_v13 = vpack.c.bf16 %v998_v12, %v998_v12  ;;  %v1411_v15 = vshll.u32 %v4662_v29, 16  ;;  %v1576_v40 = vld [vmem:[#allocation2 + $0xb4] sm:$0xf] }
 0x1eb   : > { %v1388_v1 = vsel %vm5541_vm6, %v1380_v33, %v1387_v57  ;;  %v1574_v3 = vsel %vm5547_vm7, %v1389_v51, %v1573_v44  ;;  %v1370_v36 = vor.u32 %v1368_v55, %v1367_v63  ;;  %v1372_v31 = vrot.slane %v1367_v63, 4 }
 0x1ec   : > { %1572 = vst [vmem:[#allocation2 + $0xac] sm:$0xf] %v1388_v1  ;;  %1575 = vst [vmem:[#allocation2 + $0xb0] sm:$0x1] %v1574_v3  ;;  %v1410_v39 = vrot.slane %v1408_v16, 7  ;;  %v1391_v50 = vshrl.u32 %v4660_v22, 16  ;;  %v2174_v44 = vmul.f32 %v8796_v25, %v6678_v53  ;;  %v6743_v29 = vmul.f32 %v8799_v24, %v6673_v47 }
 0x1ed   : > { %v1416_v17 = vshrl.u32 %v4663_v13, 16  ;;  %v1371_v8 = vsel %vm5541_vm6, %v1363_v32, %v1370_v36  ;;  %v1567_v54 = vsel %vm5547_vm7, %v1372_v31, %v1566_v4  ;;  %v1394_v49 = vshll.u32 %v4660_v22, 16  ;;  %v1587_v16 = vld [vmem:[#allocation2 + $0xc8] sm:$0x1] }
 0x1ee   : > { %v900_v57 = vadd.f32 1.0, %v5224_v0  ;;  %1565 = vst [vmem:[#allocation2 + $0xa0] sm:$0xf] %v1371_v8  ;;  %1568 = vst [vmem:[#allocation2 + $0xa4] sm:$0x1] %v1567_v54  ;;  %v1413_v33 = vor.u32 %v1411_v15, %v1410_v39  ;;  %v6737_v55 = vrot.slane %v1391_v50, 7  ;;  %v2416_v12 = vmul.f32 %v8799_v24, %v6678_v53 }
 0x1ef   : > { %v1418_v63 = vrot.slane %v1416_v17, 7  ;;  %v1419_v37 = vshll.u32 %v4663_v13, 16  ;;  %8816 = vst [vmem:[#allocation64_spill] sm:$0xff] %v6743_v29  ;;  %v1414_v0 = vrot.slane %v1410_v39, 4  ;;  %v8566_v22 = vrot.slane %v6703_v38, 1 }
 0x1f0   : > { %5225 = vrcp.f32 %v900_v57  ;;  %v1584_v51 = vsel %vm5528_vm3, %v1413_v33, %v1583_v19  ;;  %v1396_v32 = vor.u32 %v1394_v49, %v6737_v55  ;;  %v6753_v13 = vmul.f32 %v5610_v59, %v6650_v45  ;;  %v1612_v39 = vld [vmem:[#allocation2 + $0x6c] sm:$0xf]  ;;  %v8821_v57 = vld [vmem:[#allocation40_spill] sm:$0xff] }
 0x1f1   : > { %v1421_v4 = vor.u32 %v1419_v37, %v1418_v63  ;;  %v2128_v1 = vadd.f32 %v6440_v48, %v1849_v35  ;;  %1585 = vst [vmem:[#allocation2 + $0xc0] sm:$0xf] %v1584_v51  ;;  %v1423_v3 = vrot.slane %v1418_v63, 4  ;;  %v6758_v36 = vmul.f32 %v5613_v60, %v6650_v45 }
 0x1f2   : > { %8817 = vst [vmem:[#allocation65_spill] sm:$0xff] %v6753_v13  ;;  %v6762_v31 = vmul.f32 %v8795_v23, %v6678_v53  ;;  %v1577_v15 = vsel %vm5528_vm3, %v1396_v32, %v1576_v40  ;;  %v8568_v17 = vrot.slane %v6721_v6, 1  ;;  %v2283_v48 = vrot.slane %v2174_v44, 1 }
 0x1f3   : > { %8818 = vst [vmem:[#allocation66_spill] sm:$0xff] %v6758_v36  ;;  %v1422_v50 = vsel %vm5541_vm6, %v1414_v0, %v1421_v4  ;;  %v6771_v35 = vmul.f32 %v8795_v23, %v6673_v47  ;;  %1578 = vst [vmem:[#allocation2 + $0xb4] sm:$0xf] %v1577_v15  ;;  %v1588_v8 = vsel %vm5547_vm7, %v1423_v3, %v1587_v16  ;;  %v8567_v54 = vrot.slane %v6743_v29, 1  ;;  %v1881_v29 = vld [vmem:[#allocation2 + $0x8c] sm:$0x1] }
 0x1f4   : > { %1586 = vst [vmem:[#allocation2 + $0xc4] sm:$0xf] %v1422_v50  ;;  %v2523_v19 = vrot.slane %v2416_v12, 1  ;;  %v6782_v49 = vmul.f32 %v5610_v59, %v6678_v53  ;;  %1589 = vst [vmem:[#allocation2 + $0xc8] sm:$0x1] %v1588_v8  ;;  %v2373_v33 = vadd.f32 %v8821_v57, %v2128_v1  ;;  %v6787_v63 = vmul.f32 %v5613_v60, %v6678_v53  ;;  %v6841_v8 = vld [vmem:[#allocation2 + $0xcc] sm:$0xff]  }
 0x1f5   : > { %v6791_v37 = vmul.f32 %v5608_v56, %v6680_v2  ;;  %v1648_v44 = vunpack.c.l.bf16 %v1612_v39  ;;  %v2648_v12 = vld [vmem:[#allocation2 + $0x6c] sm:$0xe]  ;;  %v8824_v40 = vrot.slane %v6691_v52, 1  ;;  %v6803_v32 = vmul.f32 %v5610_v59, %v6680_v2  ;;  %8832 = vst [vmem:[#allocation76_spill] sm:$0xff] %v6841_v8 }
 0x1f6   : > { %8820 = vst [vmem:[#allocation68_spill] sm:$0xff] %v6782_v49  ;;  %8822 = vst [vmem:[#allocation40_spill] sm:$0xff] %v6787_v63  ;;  %v6807_v53 = vmul.f32 %v5613_v60, %v6680_v2  ;;  %v6814_v52 = vsel %vm2004_vm8, %v8568_v17, %v2283_v48  ;;  %v8569_v1 = vrot.slane %v6771_v35, 1  ;;  %v2524_v3 = vsel %vm2004_vm8, %v8567_v54, %v2523_v19  ;;  %v2650_v63 = vld [vmem:[#allocation2 + $0x84] sm:$0xe] }
 0x1f7   : > { %8823 = vst [vmem:[#allocation69_spill] sm:$0xff] %v6791_v37  ;;  %v6798_v0 = vsel %vm2004_vm8, %v8824_v40, %v8566_v22  ;;  %8826 = vst [vmem:[#allocation71_spill] sm:$0xff] %v6803_v32  ;;  %v2666_v15 = vunpack.c.l.bf16 %v2648_v12  ;;  %v6822_v50 = vadd.f32 %v2524_v3, %v2373_v33  ;;  %v1820_v48 = vmul.f32 %v8793_v11, %v1648_v44  ;;  %v1879_v32 = vld [vmem:[#allocation2 + $0x74] sm:$0x1]  ;;  %v2651_v37 = vld [vmem:[#allocation2 + $0x90] sm:$0xe] }
 0x1f8   : > { %8825 = vst [vmem:[#allocation70_spill] sm:$0xff] %v6798_v0  ;;  %8827 = vst [vmem:[#allocation72_spill] sm:$0xff] %v6807_v53  ;;  %v1752_v22 = vmul.f32 %v8786_v10, %v1648_v44  ;;  %v6831_v19 = vmul.f32 %v8795_v23, %v1648_v44  ;;  %v8830_v33 = vrot.slane %v6625_v18, 1  ;;  %v6839_v3 = vmul.f32 %v8796_v25, %v1648_v44  ;;  %v4816_v18 = vld [vmem:[#allocation2 + $0x78] sm:$0xff]  }
 0x1f9   : > { %8828 = vst [vmem:[#allocation73_spill] sm:$0xff] %v6814_v52  ;;  %8829 = vst [vmem:[#allocation74_spill] sm:$0xff] %v6822_v50  ;;  %v1679_v40 = vmul.f32 %v8787_v27, %v5606_v42  ;;  %v1681_v4 = vmul.f32 %v5606_v42, %v6673_v47  ;;  %v6848_v57 = vmul.f32 %v8799_v24, %v1648_v44 }
 0x1fa   : > { %v2042_v12 = vsel %vm2004_vm8, %v8830_v33, %v8569_v1  ;;  %8831 = vst [vmem:[#allocation75_spill] sm:$0xff] %v6839_v3  ;;  %v6851_v39 = vmul.f32 %v5608_v56, %v2666_v15  ;;  %v6855_v33 = vmul.f32 %v6664_v28, %v5606_v42  ;;  %v1749_v51 = vmul.f32 %v8786_v10, %v6673_v47 }
 0x1fb   : > { %8833 = vst [vmem:[#allocation77_spill] sm:$0xff] %v6848_v57  ;;  %v1852_v54 = vadd.f32 %v1820_v48, %v6696_v34  ;;  %v6861_v17 = vmul.f32 %v5610_v59, %v2666_v15  ;;  %v6864_v1 = vmul.f32 %v5613_v60, %v2666_v15  ;;  %v6868_v53 = vmul.f32 %v5606_v42, %v1648_v44  ;;  %v1880_v48 = vld [vmem:[#allocation2 + $0x80] sm:$0x1]  ;;  %v1616_v57 = vld [vmem:[#allocation2 + $0x84] sm:$0xf] }
 0x1fc   : > { %8834 = vst [vmem:[#allocation78_spill] sm:$0xff] %v6851_v39  ;;  %v1784_v36 = vadd.f32 %v1752_v22, %v6694_v46  ;;  %v6874_v34 = vunpack.c.l.bf16 %v4816_v18  ;;  %v6877_v15 = vunpack.c.h.bf16 %v6841_v8  ;;  %v1751_v46 = vmul.f32 %v6664_v28, %v8786_v10 }
 0x1fd   : > { %v5226_v2 = vpop.eup %5225  ;;  %8835 = vst [vmem:[#allocation79_spill] sm:$0xff] %v6861_v17  ;;  %8836 = vst [vmem:[#allocation80_spill] sm:$0xff] %v6864_v1  ;;  %v1781_v22 = vadd.f32 %v1749_v51, %v1679_v40  ;;  %v1819_v44 = vmul.f32 %v6664_v28, %v8793_v11  ;;  %v1613_v40 = vld [vmem:[#allocation2 + $0x70] sm:$0xf]  ;;  %v1580_v1 = vld [vmem:[#allocation2 + $0xbc] sm:$0x1]  ;;  %v6919_v47 = vunpack.c.h.bf16 %v4816_v18  ;;  %v6949_v41 = vunpack.c.l.bf16 %v1616_v57 }
 0x1fe   : > { %v996_v16 = vmul.f32 %v5226_v2, %v6614_v5  ;;  %8837 = vst [vmem:[#allocation81_spill] sm:$0xff] %v6877_v15  ;;  %v6883_v2 = vadd.f32 %v2042_v12, %v1852_v54  ;;  %v6889_v21 = vadd.f32 %v1751_v46, %v1681_v4  ;;  %v8840_v5 = vunpack.c.l.bf16 %v6841_v8 }
 0x1ff   : > { %v1822_v54 = vmul.f32 %v6874_v34, %v8793_v11  ;;  %v6906_v4 = vmul.f32 %v6874_v34, %v8796_v25  ;;  %v6910_v46 = vmul.f32 %v6874_v34, %v8799_v24  ;;  %v6914_v17 = vadd.f32 %v1819_v44, %v1781_v22  ;;  %8846 = vst [vmem:[#allocation89_spill] sm:$0xff] %v6919_v47  ;;  %v1617_v44 = vld [vmem:[#allocation2 + $0x88] sm:$0xf] }
 0x200   : > { %v4661_v13 = vpack.c.bf16 %v996_v16, %v996_v16  ;;  %8838 = vst [vmem:[#allocation82_spill] sm:$0xff] %v6883_v2  ;;  %v6887_v16 = vunpack.c.l.bf16 %v1880_v48  ;;  %v6896_v51 = vmul.f32 %v8793_v11, %v8840_v5  ;;  %v6902_v48 = vmul.f32 %v8793_v11, %v6877_v15  ;;  %8852 = vst [vmem:[#allocation95_spill] sm:$0xff] %v6949_v41 }
 0x201   : > { %8842 = vst [vmem:[#allocation85_spill] sm:$0xff] %v6906_v4  ;;  %8843 = vst [vmem:[#allocation86_spill] sm:$0xff] %v6910_v46  ;;  %v6912_v5 = vunpack.c.l.bf16 %v1879_v32  ;;  %v1754_v27 = vmul.f32 %v6874_v34, %v8786_v10  ;;  %v6927_v32 = vunpack.c.l.bf16 %v1613_v40  ;;  %v6929_v22 = vadd.f32 %v1822_v54, %v1784_v36  ;;  %v4817_v36 = vld [vmem:[#allocation2 + $0x90] sm:$0xff]  }
 0x202   : > { %v1399_v50 = vshrl.u32 %v4661_v13, 16  ;;  %8839 = vst [vmem:[#allocation83_spill] sm:$0xff] %v6887_v16  ;;  %v1402_v49 = vshll.u32 %v4661_v13, 16  ;;  %8841 = vst [vmem:[#allocation84_spill] sm:$0xff] %v6902_v48  ;;  %v1397_v13 = vrot.slane %v6737_v55, 4  ;;  %v6925_v0 = vmul.f32 %v8799_v24, %v6887_v16 }
 0x203   : > { %8844 = vst [vmem:[#allocation87_spill] sm:$0xff] %v6912_v5  ;;  %8848 = vst [vmem:[#allocation91_spill] sm:$0xff] %v6927_v32  ;;  %v6939_v38 = vmul.f32 %v8796_v25, %v6912_v5  ;;  %v6943_v40 = vmul.f32 %v8799_v24, %v6912_v5  ;;  %v1685_v54 = vmul.f32 %v5606_v42, %v6927_v32  ;;  %v7003_v15 = vunpack.c.l.bf16 %v1881_v29  ;;  %v1621_v24 = vld [vmem:[#allocation2 + $0xa0] sm:$0xf] }
 0x204   : > { %v1401_v12 = vrot.slane %v1399_v50, 7  ;;  %v6916_v50 = vunpack.c.l.bf16 %v2651_v37  ;;  %8847 = vst [vmem:[#allocation90_spill] sm:$0xff] %v6925_v0  ;;  %v2668_v37 = vunpack.c.l.bf16 %v2650_v63  ;;  %v1686_v63 = vmul.f32 %v6874_v34, %v5606_v42  ;;  %v4818_v0 = vld [vmem:[#allocation2 + $0xa8] sm:$0xff]  }
 0x205   : > { %8849 = vst [vmem:[#allocation92_spill] sm:$0xff] %v6939_v38  ;;  %8850 = vst [vmem:[#allocation93_spill] sm:$0xff] %v6943_v40  ;;  %v1753_v57 = vmul.f32 %v8786_v10, %v6927_v32 }
 0x206   : > { %8845 = vst [vmem:[#allocation88_spill] sm:$0xff] %v6916_v50  ;;  %v1404_v39 = vor.u32 %v1402_v49, %v1401_v12  ;;  %v1406_v45 = vrot.slane %v1401_v12, 4  ;;  %v6947_v43 = vmul.f32 %v5613_v60, %v6916_v50  ;;  %v6974_v12 = vunpack.c.l.bf16 %v4817_v36  ;;  %8861 = vst [vmem:[#allocation104_spill] sm:$0xff] %v7003_v15 }
 0x207   : > { %v6980_v46 = vmul.f32 %v5610_v59, %v6916_v50  ;;  %v1620_v50 = vld [vmem:[#allocation2 + $0x9c] sm:$0xf] }
 0x208   : > { %v1405_v55 = vsel %vm5541_vm6, %v1397_v13, %v1404_v39  ;;  %v1581_v49 = vsel %vm5547_vm7, %v1406_v45, %v1580_v1  ;;  %8851 = vst [vmem:[#allocation94_spill] sm:$0xff] %v6947_v43  ;;  %v6951_v45 = vunpack.c.l.bf16 %v1617_v44  ;;  %v6957_v1 = vmul.f32 %v8795_v23, %v6912_v5  ;;  %v1882_v39 = vld [vmem:[#allocation2 + $0x98] sm:$0x1]  ;;  %8857 = vst [vmem:[#allocation100_spill] sm:$0xff] %v6974_v12 }
 0x209   : > { %1579 = vst [vmem:[#allocation2 + $0xb8] sm:$0xf] %v1405_v55  ;;  %1582 = vst [vmem:[#allocation2 + $0xbc] sm:$0x1] %v1581_v49  ;;  %v1687_v13 = vmul.f32 %v6919_v47, %v5606_v42  ;;  %v6966_v44 = vmul.f32 %v5608_v56, %v2668_v37  ;;  %v6969_v55 = vmul.f32 %v5610_v59, %v2668_v37  ;;  %v6985_v14 = vunpack.c.l.bf16 %v1882_v39 }
 0x20a   : > { %8853 = vst [vmem:[#allocation96_spill] sm:$0xff] %v6951_v45  ;;  %v6972_v49 = vmul.f32 %v5613_v60, %v2668_v37  ;;  %8858 = vst [vmem:[#allocation101_spill] sm:$0xff] %v6980_v46  ;;  %v1755_v56 = vmul.f32 %v6919_v47, %v8786_v10  ;;  %v1756_v37 = vmul.f32 %v8786_v10, %v6949_v41  ;;  %v6993_v60 = vunpack.c.h.bf16 %v4817_v36 }
 0x20b   : > { %8854 = vst [vmem:[#allocation97_spill] sm:$0xff] %v6966_v44  ;;  %8855 = vst [vmem:[#allocation98_spill] sm:$0xff] %v6969_v55  ;;  %v1757_v18 = vmul.f32 %v8786_v10, %v6951_v45  ;;  %v1824_v5 = vmul.f32 %v8793_v11, %v6949_v41  ;;  %v1688_v46 = vmul.f32 %v5606_v42, %v6949_v41 }
 0x20c   : > { %8856 = vst [vmem:[#allocation99_spill] sm:$0xff] %v6972_v49  ;;  %8859 = vst [vmem:[#allocation102_spill] sm:$0xff] %v6985_v14  ;;  %v1785_v59 = vadd.f32 %v1753_v57, %v6855_v33  ;;  %v1758_v40 = vmul.f32 %v6974_v12, %v8786_v10  ;;  %v1689_v36 = vmul.f32 %v5606_v42, %v6951_v45  ;;  %v7015_v49 = vunpack.c.l.bf16 %v1620_v50  ;;  %v2652_v50 = vld [vmem:[#allocation2 + $0x9c] sm:$0xe] }
 0x20d   : > { %8860 = vst [vmem:[#allocation103_spill] sm:$0xff] %v6993_v60  ;;  %v1690_v8 = vmul.f32 %v6974_v12, %v5606_v42  ;;  %v1821_v33 = vmul.f32 %v8793_v11, %v6927_v32  ;;  %v1788_v57 = vadd.f32 %v1756_v37, %v1686_v63  ;;  %v1789_v39 = vadd.f32 %v1757_v18, %v1687_v13 }
 0x20e   : > { %v1825_v43 = vmul.f32 %v8793_v11, %v6951_v45  ;;  %v1826_v26 = vmul.f32 %v6974_v12, %v8793_v11  ;;  %8862 = vst [vmem:[#allocation105_spill] sm:$0xff] %v7015_v49  ;;  %v1759_v29 = vmul.f32 %v6993_v60, %v8786_v10  ;;  %v1786_v55 = vadd.f32 %v1754_v27, %v6868_v53 }
 0x20f   : > { %v1823_v44 = vmul.f32 %v6919_v47, %v8793_v11  ;;  %v1691_v18 = vmul.f32 %v6993_v60, %v5606_v42  ;;  %v1787_v63 = vadd.f32 %v1755_v56, %v1685_v54  ;;  %v1790_v13 = vadd.f32 %v1758_v40, %v1688_v46  ;;  %v1884_v40 = vld [vmem:[#allocation2 + $0xb0] sm:$0x1] }
 0x210   : > { %v1827_v37 = vmul.f32 %v6993_v60, %v8793_v11  ;;  %v1791_v2 = vadd.f32 %v1759_v29, %v1689_v36  ;;  %v7027_v52 = vadd.f32 %v1821_v33, %v6889_v21  ;;  %v7031_v27 = vadd.f32 %v1824_v5, %v1786_v55  ;;  %v1624_v21 = vld [vmem:[#allocation2 + $0xb4] sm:$0xf]  ;;  %v1883_v36 = vld [vmem:[#allocation2 + $0xa4] sm:$0x1] }
 0x211   : > { %v7029_v20 = vadd.f32 %v1823_v44, %v1785_v59  ;;  %v7033_v53 = vadd.f32 %v1825_v43, %v1787_v63  ;;  %v7035_v7 = vadd.f32 %v1826_v26, %v1788_v57  ;;  %v7041_v56 = vmul.f32 %v6664_v28, %v8795_v23  ;;  %v4819_v59 = vld [vmem:[#allocation2 + $0xc0] sm:$0xff]  }
 0x212   : > { %v7037_v4 = vadd.f32 %v1827_v37, %v1789_v39  ;;  %v7043_v46 = vunpack.c.l.bf16 %v4818_v0  ;;  %v7045_v54 = vunpack.c.l.bf16 %v1621_v24  ;;  %v1760_v5 = vmul.f32 %v8786_v10, %v7015_v49 }
 0x213   : > { %v7051_v26 = vmul.f32 %v8795_v23, %v6927_v32  ;;  %v7053_v43 = vunpack.c.l.bf16 %v2652_v50  ;;  %v7057_v44 = vmul.f32 %v6874_v34, %v8795_v23  ;;  %v7061_v55 = vmul.f32 %v6919_v47, %v8795_v23 }
 0x214   : > { %8863 = vst [vmem:[#allocation106_spill] sm:$0xff] %v7037_v4  ;;  %8864 = vst [vmem:[#allocation107_spill] sm:$0xff] %v7043_v46  ;;  %v7065_v24 = vmul.f32 %v8795_v23, %v6887_v16  ;;  %v7067_v39 = vunpack.c.h.bf16 %v4818_v0  ;;  %v7071_v33 = vmul.f32 %v8795_v23, %v6949_v41  ;;  %v7075_v57 = vmul.f32 %v8795_v23, %v6951_v45 }
 0x215   : > { %8865 = vst [vmem:[#allocation108_spill] sm:$0xff] %v7045_v54  ;;  %8866 = vst [vmem:[#allocation109_spill] sm:$0xff] %v7053_v43  ;;  %v7079_v34 = vmul.f32 %v8795_v23, %v7003_v15  ;;  %v7081_v29 = vunpack.c.l.bf16 %v1884_v40  ;;  %v7083_v63 = vunpack.c.l.bf16 %v1624_v21  ;;  %v7085_v37 = vunpack.c.l.bf16 %v4819_v59 }
 0x216   : > { %8867 = vst [vmem:[#allocation110_spill] sm:$0xff] %v7067_v39  ;;  %v1828_v0 = vmul.f32 %v8793_v11, %v7015_v49  ;;  %v1761_v50 = vmul.f32 %v8786_v10, %v7045_v54  ;;  %v1762_v43 = vmul.f32 %v7043_v46, %v8786_v10  ;;  %v1792_v38 = vadd.f32 %v1760_v5, %v1690_v8 }
 0x217   : > { %8868 = vst [vmem:[#allocation111_spill] sm:$0xff] %v7081_v29  ;;  %8869 = vst [vmem:[#allocation112_spill] sm:$0xff] %v7083_v63  ;;  %v1830_v3 = vmul.f32 %v7043_v46, %v8793_v11  ;;  %v7095_v58 = vunpack.c.l.bf16 %v1883_v36  ;;  %v1692_v40 = vmul.f32 %v5606_v42, %v7015_v49  ;;  %v7101_v21 = vmul.f32 %v6974_v12, %v8795_v23 }
 0x218   : > { %8870 = vst [vmem:[#allocation113_spill] sm:$0xff] %v7085_v37  ;;  %v7105_v61 = vmul.f32 %v6993_v60, %v8795_v23  ;;  %v1693_v62 = vmul.f32 %v5606_v42, %v7045_v54  ;;  %v1694_v8 = vmul.f32 %v7043_v46, %v5606_v42  ;;  %v7113_v5 = vmul.f32 %v7067_v39, %v5606_v42 }
 0x219   : > { %8871 = vst [vmem:[#allocation114_spill] sm:$0xff] %v7095_v58  ;;  %v1829_v36 = vmul.f32 %v8793_v11, %v7045_v54  ;;  %v1763_v6 = vmul.f32 %v7067_v39, %v8786_v10  ;;  %v1764_v48 = vmul.f32 %v8786_v10, %v7083_v63  ;;  %v1766_v60 = vmul.f32 %v7085_v37, %v8786_v10 }
 0x21a   : > { %8872 = vst [vmem:[#allocation115_spill] sm:$0xff] %v7113_v5  ;;  %v1831_v12 = vmul.f32 %v7067_v39, %v8793_v11  ;;  %v1793_v15 = vadd.f32 %v1761_v50, %v1691_v18  ;;  %v1794_v45 = vadd.f32 %v1762_v43, %v1692_v40  ;;  %v7125_v41 = vadd.f32 %v1828_v0, %v1790_v13 }
 0x21b   : > { %v7127_v16 = vadd.f32 %v1830_v3, %v1792_v38  ;;  %v7129_v47 = vunpack.c.h.bf16 %v4819_v59  ;;  %v1696_v32 = vmul.f32 %v5606_v42, %v7083_v63  ;;  %v1832_v28 = vmul.f32 %v8793_v11, %v7083_v63 }
 0x21c   : > { %v1946_v25 = vmul.f32 %v8795_v23, %v6985_v14  ;;  %v7137_v5 = vadd.f32 %v1763_v6, %v1693_v62  ;;  %v7139_v4 = vadd.f32 %v1829_v36, %v1791_v2  ;;  %v1947_v18 = vmul.f32 %v8795_v23, %v7015_v49 }
 0x21d   : > { %8873 = vst [vmem:[#allocation116_spill] sm:$0xff] %v7129_v47  ;;  %v1948_v38 = vmul.f32 %v8795_v23, %v7045_v54  ;;  %v1796_v3 = vadd.f32 %v1764_v48, %v1694_v8  ;;  %v1798_v13 = vadd.f32 %v1766_v60, %v1696_v32  ;;  %v1834_v59 = vmul.f32 %v7085_v37, %v8793_v11 }
 0x21e   : > { %v2046_v43 = vrot.slane %v7041_v56, 1  ;;  %v7148_v0 = vadd.f32 %v1831_v12, %v1793_v15  ;;  %v1949_v62 = vmul.f32 %v8795_v23, %v7095_v58  ;;  %v1950_v6 = vmul.f32 %v7043_v46, %v8795_v23 }
 0x21f   : > { %v1951_v2 = vmul.f32 %v7067_v39, %v8795_v23  ;;  %v7158_v48 = vmul.f32 %v7129_v47, %v8786_v10  ;;  %v7162_v60 = vmul.f32 %v7129_v47, %v8793_v11  ;;  %v1864_v32 = vadd.f32 %v1832_v28, %v1794_v45 }
 0x220   : > { %v1952_v15 = vmul.f32 %v8795_v23, %v7081_v29  ;;  %v7168_v12 = vmul.f32 %v8795_v23, %v7083_v63  ;;  %v8874_v56 = vrot.slane %v6762_v31, 1  ;;  %v8875_v50 = vrot.slane %v6771_v35, 1 }
 0x221   : > { %v2051_v8 = vrot.slane %v7051_v26, 1  ;;  %v2053_v36 = vrot.slane %v6957_v1, 1  ;;  %v1866_v47 = vadd.f32 %v1834_v59, %v1796_v3  ;;  %v7178_v28 = vadd.f32 %v6896_v51, %v1798_v13  ;;  %v1625_v3 = vld [vmem:[#allocation2 + $0xb8] sm:$0xf] }
 0x222   : > { %v2044_v40 = vsel %vm2004_vm8, %v8875_v50, %v8874_v56  ;;  %v8877_v45 = vrot.slane %v6667_v30, 1  ;;  %v8878_v63 = vrot.slane %v6671_v9, 1  ;;  %v2055_v35 = vrot.slane %v7057_v44, 1  ;;  %v1885_v50 = vld [vmem:[#allocation2 + $0xbc] sm:$0x1] }
 0x223   : > { %8876 = vst [vmem:[#allocation117_spill] sm:$0xff] %v7178_v28  ;;  %v2056_v56 = vrot.slane %v7061_v55, 1  ;;  %v2058_v26 = vrot.slane %v7065_v24, 1  ;;  %v2061_v1 = vrot.slane %v7075_v57, 1  ;;  %v2063_v51 = vrot.slane %v7079_v34, 1 }
 0x224   : > { %v2047_v37 = vsel %vm2004_vm8, %v8877_v45, %v2046_v43  ;;  %v2049_v31 = vsel %vm2004_vm8, %v2046_v43, %v8878_v63  ;;  %v2065_v13 = vrot.slane %v7101_v21, 1  ;;  %v2066_v30 = vrot.slane %v7105_v61, 1 }
 0x225   : > { %v2068_v59 = vrot.slane %v1946_v25, 1  ;;  %v8879_v9 = vrot.slane %v6831_v19, 1  ;;  %v2054_v44 = vsel %vm2004_vm8, %v2051_v8, %v2053_v36  ;;  %v2071_v43 = vrot.slane %v1948_v38, 1  ;;  %v8882_v36 = vld [vmem:[#allocation19_spill] sm:$0xff] }
 0x226   : > { %v2073_v55 = vrot.slane %v1949_v62, 1  ;;  %v2060_v24 = vrot.slane %v7071_v33, 1  ;;  %v2075_v57 = vrot.slane %v1950_v6, 1  ;;  %v2076_v45 = vrot.slane %v1951_v2, 1 }
 0x227   : > { %v2052_v63 = vsel %vm2004_vm8, %v8879_v9, %v2051_v8  ;;  %v2078_v28 = vrot.slane %v1952_v15, 1  ;;  %v7198_v34 = vunpack.c.l.bf16 %v1625_v3  ;;  %v2057_v21 = vsel %vm2004_vm8, %v2055_v35, %v2056_v56 }
 0x228   : > { %v2059_v61 = vsel %vm2004_vm8, %v2056_v56, %v2058_v26  ;;  %v2070_v25 = vrot.slane %v1947_v18, 1  ;;  %v2062_v19 = vsel %vm2004_vm8, %v2060_v24, %v2061_v1  ;;  %v2064_v9 = vsel %vm2004_vm8, %v2061_v1, %v2063_v51 }
 0x229   : > { %8880 = vst [vmem:[#allocation118_spill] sm:$0xff] %v7198_v34  ;;  %v2067_v38 = vsel %vm2004_vm8, %v2065_v13, %v2066_v30  ;;  %v2069_v62 = vsel %vm2004_vm8, %v2066_v30, %v2068_v59  ;;  %v7206_v8 = vunpack.c.l.bf16 %v1885_v50  ;;  %v2074_v6 = vsel %vm2004_vm8, %v2071_v43, %v2073_v55  ;;  %v8890_v50 = vld [vmem:[#allocation83_spill] sm:$0xff] }
 0x22a   : > { %v2072_v33 = vsel %vm2004_vm8, %v2070_v25, %v2071_v43  ;;  %v2080_v2 = vrot.slane %v7168_v12, 1  ;;  %v2077_v15 = vsel %vm2004_vm8, %v2075_v57, %v2076_v45  ;;  %v2079_v18 = vsel %vm2004_vm8, %v2076_v45, %v2078_v28  ;;  %v8888_v43 = vld [vmem:[#allocation91_spill] sm:$0xff]  ;;  %v8892_v45 = vld [vmem:[#allocation96_spill] sm:$0xff] }
 0x22b   : > { %8881 = vst [vmem:[#allocation119_spill] sm:$0xff] %v7206_v8  ;;  %v7215_v35 = vadd.f32 %v8882_v36, %v6914_v17  ;;  %v7218_v56 = vadd.f32 %v2044_v40, %v7027_v52  ;;  %v1765_v26 = vmul.f32 %v8786_v10, %v7198_v34  ;;  %v1954_v1 = vmul.f32 %v8795_v23, %v7198_v34  ;;  %v1886_v17 = vld [vmem:[#allocation2 + $0xc8] sm:$0x1]  ;;  %v8891_v57 = vld [vmem:[#allocation95_spill] sm:$0xff] }
 0x22c   : > { %v7225_v3 = vadd.f32 %v2047_v37, %v6929_v22  ;;  %v7228_v12 = vadd.f32 %v2049_v31, %v7029_v20  ;;  %v1697_v28 = vmul.f32 %v5606_v42, %v7198_v34  ;;  %v7233_v51 = vadd.f32 %v2052_v63, %v7031_v27  ;;  %v8883_v37 = vld [vmem:[#allocation106_spill] sm:$0xff]  ;;  %v8886_v63 = vld [vmem:[#allocation12_spill] sm:$0xff] }
 0x22d   : > { %v7236_v52 = vadd.f32 %v2054_v44, %v7033_v53  ;;  %v7239_v10 = vadd.f32 %v2057_v21, %v7035_v7  ;;  %v1955_v22 = vmul.f32 %v8795_v23, %v7206_v8  ;;  %v7244_v40 = vadd.f32 %v2059_v61, %v8883_v37  ;;  %v8884_v23 = vld [vmem:[#allocation115_spill] sm:$0xff]  ;;  %v8887_v44 = vld [vmem:[#allocation28_spill] sm:$0xff] }
 0x22e   : > { %v7247_v20 = vadd.f32 %v2062_v19, %v7125_v41  ;;  %v7250_v42 = vadd.f32 %v2064_v9, %v7139_v4  ;;  %v1833_v27 = vmul.f32 %v8793_v11, %v7198_v34  ;;  %v7255_v53 = vadd.f32 %v2067_v38, %v7127_v16  ;;  %v8893_v61 = vld [vmem:[#allocation104_spill] sm:$0xff]  ;;  %v8895_v38 = vld [vmem:[#allocation103_spill] sm:$0xff] }
 0x22f   : > { %v7258_v7 = vadd.f32 %v2069_v62, %v7148_v0  ;;  %v7260_v31 = vadd.f32 %v2072_v33, %v1864_v32  ;;  %v1797_v13 = vadd.f32 %v1765_v26, %v8884_v23  ;;  %v2081_v30 = vrot.slane %v1954_v1, 1  ;;  %v8889_v0 = vld [vmem:[#allocation89_spill] sm:$0xff]  ;;  %v8894_v19 = vld [vmem:[#allocation100_spill] sm:$0xff] }
 0x230   : > { %v7263_v59 = vadd.f32 %v2077_v15, %v1866_v47  ;;  %v7265_v41 = vunpack.c.l.bf16 %v1886_v17  ;;  %v1799_v4 = vadd.f32 %v7158_v48, %v1697_v28  ;;  %v2176_v11 = vmul.f32 %v8887_v44, %v8886_v63 }
 0x231   : > { %v2179_v16 = vmul.f32 %v8886_v63, %v8888_v43  ;;  %v2182_v55 = vmul.f32 %v8889_v0, %v8886_v63  ;;  %v2083_v32 = vrot.slane %v1955_v22, 1  ;;  %v2183_v24 = vmul.f32 %v8886_v63, %v8890_v50 }
 0x232   : > { %8885 = vst [vmem:[#allocation19_spill] sm:$0xff] %v7265_v41  ;;  %v2184_v47 = vmul.f32 %v8886_v63, %v8891_v57  ;;  %v2185_v21 = vmul.f32 %v8886_v63, %v8892_v45  ;;  %v1865_v48 = vadd.f32 %v1833_v27, %v7137_v5  ;;  %v2186_v25 = vmul.f32 %v8886_v63, %v8893_v61  ;;  %v8896_v5 = vld [vmem:[#allocation84_spill] sm:$0xff] }
 0x233   : > { %v2187_v9 = vmul.f32 %v8894_v19, %v8886_v63  ;;  %v2188_v62 = vmul.f32 %v8895_v38, %v8886_v63  ;;  %v1867_v33 = vadd.f32 %v7162_v60, %v1797_v13  ;;  %v2082_v15 = vsel %vm2004_vm8, %v2080_v2, %v2081_v30  ;;  %v8897_v13 = vld [vmem:[#allocation117_spill] sm:$0xff] }
 0x234   : > { %v2189_v36 = vmul.f32 %v8886_v63, %v6985_v14  ;;  %v2190_v26 = vmul.f32 %v8886_v63, %v7015_v49  ;;  %v1869_v1 = vadd.f32 %v8896_v5, %v1799_v4  ;;  %v2191_v28 = vmul.f32 %v8886_v63, %v7045_v54  ;;  %v8898_v5 = vld [vmem:[#allocation112_spill] sm:$0xff]  ;;  %v8909_v49 = vld [vmem:[#allocation75_spill] sm:$0xff] }
 0x235   : > { %v2192_v17 = vmul.f32 %v8886_v63, %v7095_v58  ;;  %v2193_v22 = vmul.f32 %v7043_v46, %v8886_v63  ;;  %v2084_v60 = vsel %vm2004_vm8, %v2081_v30, %v2083_v32  ;;  %v2194_v2 = vmul.f32 %v7067_v39, %v8886_v63 }
 0x236   : > { %v2195_v37 = vmul.f32 %v8886_v63, %v7081_v29  ;;  %v2286_v27 = vrot.slane %v2176_v11, 1  ;;  %v7305_v23 = vadd.f32 %v2074_v6, %v1865_v48  ;;  %v7308_v4 = vadd.f32 %v2082_v15, %v8897_v13  ;;  %v8899_v11 = vld [vmem:[#allocation113_spill] sm:$0xff]  ;;  %v8900_v15 = vld [vmem:[#allocation116_spill] sm:$0xff]  ;;  %v8907_v29 = vld [vmem:[#allocation59_spill] sm:$0xff] }
 0x237   : > { %v2196_v50 = vmul.f32 %v8886_v63, %v8898_v5  ;;  %v2291_v44 = vrot.slane %v2179_v16, 1  ;;  %v7312_v58 = vadd.f32 %v2079_v18, %v1867_v33  ;;  %v2197_v30 = vmul.f32 %v8886_v63, %v7198_v34  ;;  %v8901_v16 = vld [vmem:[#allocation63_spill] sm:$0xff] }
 0x238   : > { %v2296_v32 = vrot.slane %v2182_v55, 1  ;;  %v2298_v39 = vrot.slane %v2183_v24, 1  ;;  %v7316_v46 = vadd.f32 %v2084_v60, %v1869_v1  ;;  %v2198_v6 = vmul.f32 %v8886_v63, %v7206_v8  ;;  %v8903_v5 = vld [vmem:[#allocation7_spill] sm:$0xff]  ;;  %v8905_v24 = vld [vmem:[#allocation58_spill] sm:$0xff] }
 0x239   : > { %v2199_v48 = vmul.f32 %v8899_v11, %v8886_v63  ;;  %v2200_v13 = vmul.f32 %v8900_v15, %v8886_v63  ;;  %v2201_v18 = vmul.f32 %v8886_v63, %v7265_v41  ;;  %v8902_v33 = vrot.slane %v8901_v16, 1  ;;  %v8911_v16 = vld [vmem:[#allocation92_spill] sm:$0xff] }
 0x23a   : > { %v8904_v34 = vrot.slane %v8903_v5, 1  ;;  %v8906_v1 = vrot.slane %v8905_v24, 1  ;;  %v2300_v8 = vrot.slane %v2184_v47, 1  ;;  %v8908_v54 = vrot.slane %v8907_v29, 1 }
 0x23b   : > { %v8910_v15 = vrot.slane %v8909_v49, 1  ;;  %v2301_v63 = vrot.slane %v2185_v21, 1  ;;  %v2303_v41 = vrot.slane %v2186_v25, 1  ;;  %v8912_v38 = vrot.slane %v8911_v16, 1 }
 0x23c   : > { %v2282_v55 = vsel %vm2004_vm8, %v8904_v34, %v8902_v33  ;;  %v2287_v60 = vsel %vm2004_vm8, %v8906_v1, %v2286_v27  ;;  %v2289_v11 = vsel %vm2004_vm8, %v2286_v27, %v8908_v54  ;;  %v8913_v34 = vld [vmem:[#allocation85_spill] sm:$0xff]  ;;  %v2299_v47 = vsel %vm2004_vm8, %v2296_v32, %v2298_v39 }
 0x23d   : > { %v2292_v14 = vsel %vm2004_vm8, %v8910_v15, %v2291_v44  ;;  %v2294_v5 = vsel %vm2004_vm8, %v2291_v44, %v8912_v38  ;;  %v8914_v33 = vrot.slane %v8913_v34, 1  ;;  %v2305_v1 = vrot.slane %v2187_v9, 1 }
 0x23e   : > { %v2306_v29 = vrot.slane %v2188_v62, 1  ;;  %v2308_v19 = vrot.slane %v2189_v36, 1  ;;  %v2311_v54 = vrot.slane %v2191_v28, 1  ;;  %v2313_v27 = vrot.slane %v2192_v17, 1 }
 0x23f   : > { %v2297_v24 = vsel %vm2004_vm8, %v8914_v33, %v2296_v32  ;;  %v2315_v49 = vrot.slane %v2193_v22, 1  ;;  %v2316_v61 = vrot.slane %v2194_v2, 1  ;;  %v2318_v15 = vrot.slane %v2195_v37, 1  ;;  %v8915_v22 = vld [vmem:[#allocation4_spill] sm:$0xff]  ;;  %v8917_v37 = vld [vmem:[#allocation61_spill] sm:$0xff] }
 0x240   : > { %v2321_v21 = vrot.slane %v2197_v30, 1  ;;  %v2310_v25 = vrot.slane %v2190_v26, 1  ;;  %v2323_v45 = vrot.slane %v2198_v6, 1  ;;  %v2325_v16 = vrot.slane %v2199_v48, 1  ;;  %v8918_v30 = vld [vmem:[#allocation73_spill] sm:$0xff] }
 0x241   : > { %v2326_v57 = vrot.slane %v2200_v13, 1  ;;  %v2302_v44 = vsel %vm2004_vm8, %v2300_v8, %v2301_v63  ;;  %v2304_v38 = vsel %vm2004_vm8, %v2301_v63, %v2303_v41  ;;  %v2320_v34 = vrot.slane %v2196_v50, 1  ;;  %v8916_v8 = vld [vmem:[#allocation30_spill] sm:$0xff]  ;;  %v8925_v63 = vld [vmem:[#allocation95_spill] sm:$0xff] }
 0x242   : > { %v2328_v33 = vrot.slane %v2201_v18, 1  ;;  %v2307_v39 = vsel %vm2004_vm8, %v2305_v1, %v2306_v29  ;;  %v2309_v9 = vsel %vm2004_vm8, %v2306_v29, %v2308_v19  ;;  %v2312_v62 = vsel %vm2004_vm8, %v2310_v25, %v2311_v54  ;;  %v8929_v1 = vld [vmem:[#allocation103_spill] sm:$0xff] }
 0x243   : > { %v2314_v36 = vsel %vm2004_vm8, %v2311_v54, %v2313_v27  ;;  %v2317_v28 = vsel %vm2004_vm8, %v2315_v49, %v2316_v61  ;;  %v2319_v26 = vsel %vm2004_vm8, %v2316_v61, %v2318_v15  ;;  %v2322_v17 = vsel %vm2004_vm8, %v2320_v34, %v2321_v21  ;;  %v8919_v61 = vld [vmem:[#allocation82_spill] sm:$0xff]  ;;  %v8931_v49 = vld [vmem:[#allocation105_spill] sm:$0xff] }
 0x244   : > { %v7358_v2 = vadd.f32 %v8916_v8, %v8915_v22  ;;  %v2324_v41 = vsel %vm2004_vm8, %v2321_v21, %v2323_v45  ;;  %v2327_v50 = vsel %vm2004_vm8, %v2325_v16, %v2326_v57  ;;  %v7363_v19 = vadd.f32 %v2282_v55, %v8917_v37  ;;  %v8930_v54 = vld [vmem:[#allocation102_spill] sm:$0xff]  ;;  %v8932_v21 = vld [vmem:[#allocation108_spill] sm:$0xff]  ;;  %v8939_v8 = vld [vmem:[#allocation119_spill] sm:$0xff] }
 0x245   : > { %v7367_v32 = vadd.f32 %v8918_v30, %v7215_v35  ;;  %v2329_v6 = vsel %vm2004_vm8, %v2326_v57, %v2328_v33  ;;  %v7371_v48 = vadd.f32 %v2287_v60, %v8919_v61  ;;  %v7374_v13 = vadd.f32 %v2289_v11, %v7218_v56  ;;  %v7391_v60 = vld [vmem:[#allocation2 + $0xd4] sm:$0x1] }
 0x246   : > { %v7377_v18 = vadd.f32 %v2292_v14, %v7225_v3  ;;  %v7380_v45 = vadd.f32 %v2294_v5, %v7228_v12  ;;  %v7383_v55 = vadd.f32 %v2297_v24, %v7233_v51  ;;  %v7386_v35 = vadd.f32 %v2299_v47, %v7236_v52  ;;  %8920 = vst [vmem:[#allocation106_spill] sm:$0xff] %v7391_v60  ;;  %v8926_v5 = vld [vmem:[#allocation96_spill] sm:$0xff]  ;;  %v8933_v16 = vld [vmem:[#allocation114_spill] sm:$0xff] }
 0x247   : > { %v7389_v57 = vadd.f32 %v2302_v44, %v7239_v10  ;;  %v7394_v56 = vadd.f32 %v2304_v38, %v7244_v40  ;;  %v7397_v14 = vadd.f32 %v2307_v39, %v7247_v20  ;;  %v7400_v3 = vadd.f32 %v2309_v9, %v7250_v42  ;;  %v8927_v24 = vld [vmem:[#allocation104_spill] sm:$0xff]  ;;  %v8934_v38 = vld [vmem:[#allocation107_spill] sm:$0xff]  ;;  %v8935_v33 = vld [vmem:[#allocation110_spill] sm:$0xff] }
 0x248   : > { %v7403_v12 = vadd.f32 %v2312_v62, %v7255_v53  ;;  %v7406_v51 = vadd.f32 %v2314_v36, %v7258_v7  ;;  %v7409_v52 = vadd.f32 %v2317_v28, %v7260_v31  ;;  %v7412_v10 = vadd.f32 %v2319_v26, %v7305_v23  ;;  %v8924_v7 = vld [vmem:[#allocation18_spill] sm:$0xff]  ;;  %v8936_v9 = vld [vmem:[#allocation111_spill] sm:$0xff]  ;;  %v8937_v36 = vld [vmem:[#allocation112_spill] sm:$0xff] }
 0x249   : > { %v7415_v40 = vadd.f32 %v2322_v17, %v7263_v59  ;;  %v7418_v20 = vadd.f32 %v2324_v41, %v7312_v58  ;;  %v7421_v42 = vadd.f32 %v2327_v50, %v7308_v4  ;;  %v7424_v53 = vadd.f32 %v2329_v6, %v7316_v46  ;;  %v8928_v46 = vld [vmem:[#allocation100_spill] sm:$0xff]  ;;  %v8938_v17 = vld [vmem:[#allocation118_spill] sm:$0xff]  ;;  %v8941_v6 = vld [vmem:[#allocation113_spill] sm:$0xff] }
 0x24a   : > { %v2421_v11 = vmul.f32 %v8924_v7, %v8888_v43  ;;  %v2424_v23 = vmul.f32 %v8889_v0, %v8924_v7  ;;  %v2426_v59 = vmul.f32 %v8924_v7, %v8925_v63  ;;  %v2427_v58 = vmul.f32 %v8924_v7, %v8926_v5  ;;  %v8940_v37 = vld [vmem:[#allocation90_spill] sm:$0xff]  ;;  %v8942_v63 = vld [vmem:[#allocation116_spill] sm:$0xff]  ;;  %v8958_v0 = vld [vmem:[#allocation93_spill] sm:$0xff] }
 0x24b   : > { %8921 = vst [vmem:[#allocation115_spill] sm:$0xff] %v7418_v20  ;;  %8922 = vst [vmem:[#allocation12_spill] sm:$0xff] %v7421_v42  ;;  %v2428_v4 = vmul.f32 %v8924_v7, %v8927_v24  ;;  %v2429_v47 = vmul.f32 %v8928_v46, %v8924_v7  ;;  %v2430_v29 = vmul.f32 %v8929_v1, %v8924_v7  ;;  %v2538_v30 = vrot.slane %v8940_v37, 1 }
 0x24c   : > { %8923 = vst [vmem:[#allocation84_spill] sm:$0xff] %v7424_v53  ;;  %v2431_v27 = vmul.f32 %v8924_v7, %v8930_v54  ;;  %v2432_v15 = vmul.f32 %v8924_v7, %v8931_v49  ;;  %v2433_v25 = vmul.f32 %v8924_v7, %v8932_v21  ;;  %v2434_v44 = vmul.f32 %v8924_v7, %v8933_v16  ;;  %v8943_v49 = vld [vmem:[#allocation19_spill] sm:$0xff]  ;;  %v8950_v16 = vld [vmem:[#allocation29_spill] sm:$0xff]  ;;  %v8952_v54 = vld [vmem:[#allocation62_spill] sm:$0xff] }
 0x24d   : > { %v2435_v34 = vmul.f32 %v8934_v38, %v8924_v7  ;;  %v2436_v39 = vmul.f32 %v8935_v33, %v8924_v7  ;;  %v2437_v62 = vmul.f32 %v8924_v7, %v8936_v9  ;;  %v2438_v28 = vmul.f32 %v8924_v7, %v8937_v36  ;;  %v8946_v9 = vld [vmem:[#allocation81_spill] sm:$0xff]  ;;  %v8948_v33 = vld [vmem:[#allocation64_spill] sm:$0xff] }
 0x24e   : > { %v2531_v26 = vrot.slane %v2421_v11, 1  ;;  %v2439_v22 = vmul.f32 %v8924_v7, %v8938_v17  ;;  %v2440_v41 = vmul.f32 %v8924_v7, %v8939_v8  ;;  %v2536_v50 = vrot.slane %v2424_v23, 1  ;;  %v8944_v11 = vld [vmem:[#allocation76_spill] sm:$0xff] }
 0x24f   : > { %v2441_v61 = vmul.f32 %v8941_v6, %v8924_v7  ;;  %v2442_v46 = vmul.f32 %v8942_v63, %v8924_v7  ;;  %v2443_v38 = vmul.f32 %v8924_v7, %v8943_v49  ;;  %v2541_v36 = vrot.slane %v2427_v58, 1  ;;  %v8954_v58 = vld [vmem:[#allocation60_spill] sm:$0xff] }
 0x250   : > { %v8945_v31 = vunpack.c.l.bf16 %v8944_v11  ;;  %v2445_v8 = vmul.f32 %v8924_v7, %v8946_v9  ;;  %v8947_v23 = vunpack.c.l.bf16 %v7391_v60  ;;  %v8949_v6 = vrot.slane %v8948_v33, 1 }
 0x251   : > { %v8951_v21 = vrot.slane %v8950_v16, 1  ;;  %v8953_v49 = vrot.slane %v8952_v54, 1  ;;  %v8955_v1 = vrot.slane %v8954_v58, 1  ;;  %v2540_v5 = vrot.slane %v2426_v59, 1 }
 0x252   : > { %v2444_v17 = vmul.f32 %v8924_v7, %v8945_v31  ;;  %v2446_v37 = vmul.f32 %v8924_v7, %v8947_v23  ;;  %v8956_v31 = vld [vmem:[#allocation77_spill] sm:$0xff]  ;;  %v2543_v60 = vrot.slane %v2428_v4, 1  ;;  %v8959_v7 = vrot.slane %v8958_v0, 1  ;;  %v8960_v23 = vld [vmem:[#allocation86_spill] sm:$0xff] }
 0x253   : > { %v2522_v63 = vsel %vm2004_vm8, %v8951_v21, %v8949_v6  ;;  %v2529_v11 = vsel %vm2004_vm8, %v8955_v1, %v8953_v49  ;;  %v8957_v24 = vrot.slane %v8956_v31, 1  ;;  %v8961_v16 = vrot.slane %v8960_v23, 1 }
 0x254   : > { %v2534_v33 = vsel %vm2004_vm8, %v2531_v26, %v8959_v7  ;;  %v2539_v54 = vsel %vm2004_vm8, %v2536_v50, %v2538_v30  ;;  %v2545_v6 = vrot.slane %v2429_v47, 1  ;;  %v2542_v58 = vsel %vm2004_vm8, %v2540_v5, %v2541_v36 }
 0x255   : > { %v2532_v9 = vsel %vm2004_vm8, %v8957_v24, %v2531_v26  ;;  %v2537_v21 = vsel %vm2004_vm8, %v8961_v16, %v2536_v50  ;;  %v2546_v1 = vrot.slane %v2430_v29, 1  ;;  %v2548_v49 = vrot.slane %v2431_v27, 1 }
 0x256   : > { %v2551_v31 = vrot.slane %v2433_v25, 1  ;;  %v2553_v43 = vrot.slane %v2434_v44, 1  ;;  %v2555_v24 = vrot.slane %v2435_v34, 1  ;;  %v2556_v59 = vrot.slane %v2436_v39, 1 }
 0x257   : > { %v2558_v4 = vrot.slane %v2437_v62, 1  ;;  %v2561_v53 = vrot.slane %v2439_v22, 1  ;;  %v2563_v0 = vrot.slane %v2440_v41, 1  ;;  %v2565_v42 = vrot.slane %v2441_v61, 1  ;;  %v8962_v22 = vld [vmem:[#allocation42_spill] sm:$0xff] }
 0x258   : > { %v2566_v26 = vrot.slane %v2442_v46, 1  ;;  %v2550_v7 = vrot.slane %v2432_v15, 1  ;;  %v2568_v23 = vrot.slane %v2443_v38, 1  ;;  %v2570_v20 = vrot.slane %v2444_v17, 1  ;;  %v8963_v41 = vld [vmem:[#allocation38_spill] sm:$0xff] }
 0x259   : > { %v2571_v16 = vrot.slane %v2445_v8, 1  ;;  %v2544_v50 = vsel %vm2004_vm8, %v2541_v36, %v2543_v60  ;;  %v2547_v47 = vsel %vm2004_vm8, %v2545_v6, %v2546_v1  ;;  %v2560_v5 = vrot.slane %v2438_v28, 1  ;;  %v8964_v61 = vld [vmem:[#allocation70_spill] sm:$0xff]  ;;  %v8965_v36 = vld [vmem:[#allocation115_spill] sm:$0xff]  ;;  %v8974_v6 = vld [vmem:[#allocation57_spill] sm:$0xff] }
 0x25a   : > { %v2573_v29 = vrot.slane %v2446_v37, 1  ;;  %v2549_v27 = vsel %vm2004_vm8, %v2546_v1, %v2548_v49  ;;  %v2552_v25 = vsel %vm2004_vm8, %v2550_v7, %v2551_v31  ;;  %v2554_v44 = vsel %vm2004_vm8, %v2551_v31, %v2553_v43  ;;  %v8976_v49 = vld [vmem:[#allocation56_spill] sm:$0xff] }
 0x25b   : > { %v2557_v34 = vsel %vm2004_vm8, %v2555_v24, %v2556_v59  ;;  %v2559_v39 = vsel %vm2004_vm8, %v2556_v59, %v2558_v4  ;;  %v2562_v15 = vsel %vm2004_vm8, %v2560_v5, %v2561_v53  ;;  %v2564_v62 = vsel %vm2004_vm8, %v2561_v53, %v2563_v0  ;;  %v8977_v24 = vld [vmem:[#allocation91_spill] sm:$0xff]  ;;  %v8982_v5 = vld [vmem:[#allocation104_spill] sm:$0xff] }
 0x25c   : > { %v2567_v60 = vsel %vm2004_vm8, %v2565_v42, %v2566_v26  ;;  %v2569_v17 = vsel %vm2004_vm8, %v2566_v26, %v2568_v23  ;;  %v2572_v28 = vsel %vm2004_vm8, %v2570_v20, %v2571_v16  ;;  %v7511_v8 = vadd.f32 %v8962_v22, %v7358_v2  ;;  %v8978_v4 = vld [vmem:[#allocation87_spill] sm:$0xff]  ;;  %v8979_v26 = vld [vmem:[#allocation89_spill] sm:$0xff]  ;;  %v8988_v22 = vld [vmem:[#allocation114_spill] sm:$0xff] }
 0x25d   : > { %v7514_v43 = vadd.f32 %v2522_v63, %v8963_v41  ;;  %v2574_v30 = vsel %vm2004_vm8, %v2571_v16, %v2573_v29  ;;  %v7519_v46 = vadd.f32 %v8964_v61, %v7363_v19  ;;  %v7522_v53 = vadd.f32 %v2529_v11, %v7367_v32  ;;  %v8980_v23 = vld [vmem:[#allocation83_spill] sm:$0xff] }
 0x25e   : > { %v7525_v42 = vadd.f32 %v2532_v9, %v7371_v48  ;;  %v7528_v20 = vadd.f32 %v2534_v33, %v7374_v13  ;;  %v7531_v2 = vadd.f32 %v2537_v21, %v7377_v18  ;;  %v7534_v63 = vadd.f32 %v2539_v54, %v7380_v45  ;;  %v2653_v18 = vld [vmem:[#allocation2 + $0xa8] sm:$0xe]  ;;  %v2654_v9 = vld [vmem:[#allocation2 + $0xb4] sm:$0xe]  ;;  %v8973_v54 = vld [vmem:[#allocation15_spill] sm:$0xff] }
 0x25f   : > { %v7537_v38 = vadd.f32 %v2542_v58, %v7383_v55  ;;  %v7540_v19 = vadd.f32 %v2544_v50, %v7386_v35  ;;  %v7543_v32 = vadd.f32 %v2547_v47, %v7389_v57  ;;  %v7546_v48 = vadd.f32 %v2549_v27, %v7394_v56  ;;  %v8975_v58 = vld [vmem:[#allocation28_spill] sm:$0xff] }
 0x260   : > { %v7549_v13 = vadd.f32 %v2552_v25, %v7397_v14  ;;  %v7552_v45 = vadd.f32 %v2554_v44, %v7400_v3  ;;  %v7555_v55 = vadd.f32 %v2557_v34, %v7403_v12  ;;  %v7558_v35 = vadd.f32 %v2559_v39, %v7406_v51  ;;  %v8966_v3 = vld [vmem:[#allocation12_spill] sm:$0xff]  ;;  %v8984_v44 = vld [vmem:[#allocation103_spill] sm:$0xff]  ;;  %v8985_v39 = vld [vmem:[#allocation102_spill] sm:$0xff] }
 0x261   : > { %v7561_v57 = vadd.f32 %v2562_v15, %v7409_v52  ;;  %v7564_v56 = vadd.f32 %v2564_v62, %v7412_v10  ;;  %v7567_v14 = vadd.f32 %v2567_v60, %v7415_v40  ;;  %v7570_v37 = vadd.f32 %v2569_v17, %v8965_v36  ;;  %v8968_v12 = vld [vmem:[#allocation84_spill] sm:$0xff]  ;;  %v8986_v62 = vld [vmem:[#allocation109_spill] sm:$0xff] }
 0x262   : > { %v7573_v11 = vadd.f32 %v2572_v28, %v8966_v3  ;;  %v7576_v33 = vadd.f32 %v2574_v30, %v8968_v12  ;;  %v7578_v51 = vunpack.c.l.bf16 %v2653_v18  ;;  %v7580_v21 = vunpack.c.l.bf16 %v2654_v9  ;;  %v8972_v52 = vld [vmem:[#allocation8_spill] sm:$0xff]  ;;  %v8989_v18 = vld [vmem:[#allocation110_spill] sm:$0xff]  ;;  %v8990_v12 = vld [vmem:[#allocation111_spill] sm:$0xff] }
 0x263   : > { %v2696_v10 = vmul.f32 %v8973_v54, %v8972_v52  ;;  %v2699_v40 = vmul.f32 %v8972_v52, %v8974_v6  ;;  %v2702_v1 = vmul.f32 %v8975_v58, %v8972_v52  ;;  %v2703_v31 = vmul.f32 %v8972_v52, %v8976_v49  ;;  %v8981_v50 = vld [vmem:[#allocation96_spill] sm:$0xff] }
 0x264   : > { %8967 = vst [vmem:[#allocation117_spill] sm:$0xff] %v7573_v11  ;;  %8969 = vst [vmem:[#allocation63_spill] sm:$0xff] %v7576_v33  ;;  %v2705_v59 = vmul.f32 %v8972_v52, %v8977_v24  ;;  %v2706_v0 = vmul.f32 %v8972_v52, %v8978_v4  ;;  %v2708_v7 = vmul.f32 %v8979_v26, %v8972_v52  ;;  %v8983_v27 = vld [vmem:[#allocation88_spill] sm:$0xff]  ;;  %v8999_v26 = vld [vmem:[#allocation13_spill] sm:$0xff] }
 0x265   : > { %8970 = vst [vmem:[#allocation7_spill] sm:$0xff] %v7578_v51  ;;  %8971 = vst [vmem:[#allocation58_spill] sm:$0xff] %v7580_v21  ;;  %v2709_v16 = vmul.f32 %v8972_v52, %v8980_v23  ;;  %v2711_v47 = vmul.f32 %v8972_v52, %v8981_v50  ;;  %v2712_v29 = vmul.f32 %v8972_v52, %v8982_v5  ;;  %v8987_v17 = vld [vmem:[#allocation108_spill] sm:$0xff]  ;;  %v2805_v30 = vrot.slane %v2696_v10, 2  ;;  %v8992_v10 = vld [vmem:[#allocation119_spill] sm:$0xff] }
 0x266   : > { %v2713_v25 = vmul.f32 %v8972_v52, %v8983_v27  ;;  %v2714_v34 = vmul.f32 %v8984_v44, %v8972_v52  ;;  %v2715_v15 = vmul.f32 %v8972_v52, %v8985_v39  ;;  %v2716_v60 = vmul.f32 %v8972_v52, %v8986_v62  ;;  %v8991_v39 = vld [vmem:[#allocation118_spill] sm:$0xff]  ;;  %v8995_v50 = vld [vmem:[#allocation23_spill] sm:$0xff]  ;;  %v8997_v23 = vld [vmem:[#allocation44_spill] sm:$0xff] }
 0x267   : > { %v2717_v28 = vmul.f32 %v8972_v52, %v8987_v17  ;;  %v2718_v41 = vmul.f32 %v8972_v52, %v8988_v22  ;;  %v2719_v61 = vmul.f32 %v8972_v52, %v7578_v51  ;;  %v2720_v9 = vmul.f32 %v8989_v18, %v8972_v52  ;;  %v8993_v51 = vld [vmem:[#allocation31_spill] sm:$0xff] }
 0x268   : > { %v2810_v36 = vrot.slane %v2699_v40, 2  ;;  %v2815_v3 = vrot.slane %v2702_v1, 2  ;;  %v2721_v49 = vmul.f32 %v8972_v52, %v8990_v12  ;;  %v2722_v27 = vmul.f32 %v8972_v52, %v7580_v21 }
 0x269   : > { %v2817_v62 = vrot.slane %v2703_v31, 2  ;;  %v2820_v17 = vrot.slane %v2705_v59, 2  ;;  %v2723_v22 = vmul.f32 %v8972_v52, %v8991_v39  ;;  %v2724_v44 = vmul.f32 %v8972_v52, %v8992_v10  ;;  %v9001_v59 = vld [vmem:[#allocation36_spill] sm:$0xff]  ;;  %v9003_v52 = vld [vmem:[#allocation39_spill] sm:$0xff] }
 0x26a   : > { %v8994_v5 = vrot.slane %v8993_v51, 2  ;;  %v8996_v18 = vrot.slane %v8995_v50, 2  ;;  %v2822_v1 = vrot.slane %v2706_v0, 2  ;;  %v8998_v12 = vrot.slane %v8997_v23, 2  ;;  %v9005_v50 = vld [vmem:[#allocation53_spill] sm:$0xff] }
 0x26b   : > { %v9000_v4 = vrot.slane %v8999_v26, 2  ;;  %v9002_v21 = vrot.slane %v9001_v59, 2  ;;  %v2825_v24 = vrot.slane %v2708_v7, 2  ;;  %v2827_v58 = vrot.slane %v2709_v16, 2  ;;  %v9011_v7 = vld [vmem:[#allocation78_spill] sm:$0xff] }
 0x26c   : > { %v2796_v40 = vsel %vm2773_vm9, %v8996_v18, %v8994_v5  ;;  %v9004_v10 = vrot.slane %v9003_v52, 2  ;;  %v9006_v6 = vrot.slane %v9005_v50, 2  ;;  %v9007_v5 = vld [vmem:[#allocation67_spill] sm:$0xff]  ;;  %v9012_v16 = vrot.slane %v9011_v7, 2 }
 0x26d   : > { %v2801_v31 = vsel %vm2773_vm9, %v9000_v4, %v8998_v12  ;;  %v2806_v39 = vsel %vm2773_vm9, %v9002_v21, %v2805_v30  ;;  %v9008_v23 = vrot.slane %v9007_v5, 2  ;;  %v9009_v18 = vld [vmem:[#allocation51_spill] sm:$0xff]  ;;  %v2818_v21 = vsel %vm2773_vm9, %v2815_v3, %v2817_v62  ;;  %v9013_v5 = vld [vmem:[#allocation69_spill] sm:$0xff] }
 0x26e   : > { %v2808_v51 = vsel %vm2773_vm9, %v2805_v30, %v9004_v10  ;;  %v2811_v0 = vsel %vm2773_vm9, %v9006_v6, %v2810_v36  ;;  %v9010_v4 = vrot.slane %v9009_v18, 2  ;;  %v2821_v59 = vsel %vm2773_vm9, %v9012_v16, %v2820_v17  ;;  %v9015_v16 = vld [vmem:[#allocation97_spill] sm:$0xff] }
 0x26f   : > { %v2813_v26 = vsel %vm2773_vm9, %v2810_v36, %v9008_v23  ;;  %v2830_v52 = vrot.slane %v2711_v47, 2  ;;  %v2832_v30 = vrot.slane %v2712_v29, 2  ;;  %v2823_v10 = vsel %vm2773_vm9, %v2820_v17, %v2822_v1 }
 0x270   : > { %v2816_v12 = vsel %vm2773_vm9, %v9010_v4, %v2815_v3  ;;  %v2835_v50 = vrot.slane %v2714_v34, 2  ;;  %v2837_v6 = vrot.slane %v2715_v15, 2  ;;  %v2840_v54 = vrot.slane %v2717_v28, 2 }
 0x271   : > { %v9014_v33 = vrot.slane %v9013_v5, 2  ;;  %v2842_v23 = vrot.slane %v2718_v41, 2  ;;  %v2845_v18 = vrot.slane %v2720_v9, 2  ;;  %v2847_v4 = vrot.slane %v2721_v49, 2 }
 0x272   : > { %v2828_v62 = vsel %vm2773_vm9, %v2825_v24, %v2827_v58  ;;  %v2834_v3 = vrot.slane %v2713_v25, 2  ;;  %v2839_v7 = vrot.slane %v2716_v60, 2  ;;  %v2850_v11 = vrot.slane %v2723_v22, 2  ;;  %v9017_v60 = vld [vmem:[#allocation46_spill] sm:$0xff]  ;;  %v9018_v22 = vld [vmem:[#allocation35_spill] sm:$0xff] }
 0x273   : > { %v2826_v36 = vsel %vm2773_vm9, %v9014_v33, %v2825_v24  ;;  %v9016_v47 = vrot.slane %v9015_v16, 2  ;;  %v2833_v34 = vsel %vm2773_vm9, %v2830_v52, %v2832_v30  ;;  %v2844_v15 = vrot.slane %v2719_v61, 2  ;;  %v9040_v16 = vld [vmem:[#allocation116_spill] sm:$0xff] }
 0x274   : > { %v2852_v17 = vrot.slane %v2724_v44, 2  ;;  %v2836_v28 = vsel %vm2773_vm9, %v2834_v3, %v2835_v50  ;;  %v2838_v33 = vsel %vm2773_vm9, %v2835_v50, %v2837_v6  ;;  %v2841_v41 = vsel %vm2773_vm9, %v2839_v7, %v2840_v54  ;;  %v9039_v3 = vld [vmem:[#allocation96_spill] sm:$0xff] }
 0x275   : > { %v2831_v29 = vsel %vm2773_vm9, %v9016_v47, %v2830_v52  ;;  %v2849_v9 = vrot.slane %v2722_v27, 2  ;;  %v2843_v58 = vsel %vm2773_vm9, %v2840_v54, %v2842_v23  ;;  %v2846_v24 = vsel %vm2773_vm9, %v2844_v15, %v2845_v18  ;;  %v9019_v52 = vld [vmem:[#allocation74_spill] sm:$0xff]  ;;  %v9037_v23 = vld [vmem:[#allocation89_spill] sm:$0xff]  ;;  %v9042_v15 = vld [vmem:[#allocation104_spill] sm:$0xff] }
 0x276   : > { %v2848_v25 = vsel %vm2773_vm9, %v2845_v18, %v2847_v4  ;;  %v7672_v49 = vadd.f32 %v9018_v22, %v9017_v60  ;;  %v7676_v44 = vadd.f32 %v2796_v40, %v7511_v8  ;;  %v7679_v1 = vadd.f32 %v2801_v31, %v7514_v43  ;;  %v9020_v27 = vld [vmem:[#allocation50_spill] sm:$0xff]  ;;  %v9038_v4 = vld [vmem:[#allocation83_spill] sm:$0xff] }
 0x277   : > { %v2851_v61 = vsel %vm2773_vm9, %v2849_v9, %v2850_v11  ;;  %v7683_v30 = vadd.f32 %v9020_v27, %v9019_v52  ;;  %v2853_v54 = vsel %vm2773_vm9, %v2850_v11, %v2852_v17  ;;  %v7687_v50 = vadd.f32 %v2806_v39, %v7519_v46  ;;  %v7707_v46 = vld [vmem:[#allocation2 + $0xc0] sm:$0xe]  ;;  %v9047_v22 = vld [vmem:[#allocation114_spill] sm:$0xff]  ;;  %v9048_v52 = vld [vmem:[#allocation81_spill] sm:$0xff] }
 0x278   : > { %v7690_v6 = vadd.f32 %v2808_v51, %v7522_v53  ;;  %v7693_v5 = vadd.f32 %v2811_v0, %v7525_v42  ;;  %v7696_v8 = vadd.f32 %v2813_v26, %v7528_v20  ;;  %v7699_v43 = vadd.f32 %v2816_v12, %v7531_v2  ;;  %9021 = vst [vmem:[#allocation59_spill] sm:$0xff] %v7707_v46  ;;  %v9031_v0 = vld [vmem:[#allocation9_spill] sm:$0xff]  ;;  %v9032_v26 = vld [vmem:[#allocation15_spill] sm:$0xff]  ;;  %v9049_v27 = vld [vmem:[#allocation10_spill] sm:$0xff] }
 0x279   : > { %v7702_v40 = vadd.f32 %v2818_v21, %v7534_v63  ;;  %v7705_v11 = vadd.f32 %v2821_v59, %v7537_v38  ;;  %v7710_v53 = vadd.f32 %v2823_v10, %v7540_v19  ;;  %v7713_v42 = vadd.f32 %v2826_v36, %v7543_v32  ;;  %v9033_v12 = vld [vmem:[#allocation57_spill] sm:$0xff]  ;;  %v9034_v21 = vld [vmem:[#allocation28_spill] sm:$0xff]  ;;  %v9035_v59 = vld [vmem:[#allocation91_spill] sm:$0xff] }
 0x27a   : > { %v7716_v20 = vadd.f32 %v2828_v62, %v7546_v48  ;;  %v7719_v2 = vadd.f32 %v2831_v29, %v7549_v13  ;;  %v7722_v63 = vadd.f32 %v2833_v34, %v7552_v45  ;;  %v7725_v38 = vadd.f32 %v2836_v28, %v7555_v55  ;;  %v9028_v45 = vld [vmem:[#allocation117_spill] sm:$0xff]  ;;  %v9030_v55 = vld [vmem:[#allocation63_spill] sm:$0xff] }
 0x27b   : > { %v7728_v39 = vadd.f32 %v2838_v33, %v7558_v35  ;;  %v7731_v19 = vadd.f32 %v2841_v41, %v7561_v57  ;;  %v7734_v32 = vadd.f32 %v2843_v58, %v7564_v56  ;;  %v7737_v48 = vadd.f32 %v2846_v24, %v7567_v14  ;;  %v9036_v10 = vld [vmem:[#allocation87_spill] sm:$0xff]  ;;  %v9044_v41 = vld [vmem:[#allocation102_spill] sm:$0xff]  ;;  %v9045_v58 = vld [vmem:[#allocation109_spill] sm:$0xff] }
 0x27c   : > { %9022 = vst [vmem:[#allocation75_spill] sm:$0xff] %v7725_v38  ;;  %v7740_v13 = vadd.f32 %v2848_v25, %v7570_v37  ;;  %v7743_v31 = vadd.f32 %v2851_v61, %v9028_v45  ;;  %v2917_v51 = vadd.f32 %v2853_v54, %v9030_v55  ;;  %v2939_v57 = vmul.f32 %v9032_v26, %v9031_v0  ;;  %v9041_v29 = vld [vmem:[#allocation19_spill] sm:$0xff]  ;;  %v9046_v25 = vld [vmem:[#allocation108_spill] sm:$0xff]  ;;  %v9050_v45 = vld [vmem:[#allocation106_spill] sm:$0xff] }
 0x27d   : > { %9023 = vst [vmem:[#allocation92_spill] sm:$0xff] %v7728_v39  ;;  %9024 = vst [vmem:[#allocation85_spill] sm:$0xff] %v7731_v19  ;;  %v2942_v56 = vmul.f32 %v9031_v0, %v9033_v12  ;;  %v2945_v14 = vmul.f32 %v9034_v21, %v9031_v0  ;;  %v2948_v37 = vmul.f32 %v9031_v0, %v9035_v59  ;;  %v9043_v28 = vld [vmem:[#allocation103_spill] sm:$0xff]  ;;  %v9051_v55 = vunpack.c.l.bf16 %v9050_v45  ;;  %v9066_v19 = vld [vmem:[#allocation22_spill] sm:$0xff] }
 0x27e   : > { %9025 = vst [vmem:[#allocation4_spill] sm:$0xff] %v7734_v32  ;;  %9026 = vst [vmem:[#allocation30_spill] sm:$0xff] %v7737_v48  ;;  %v2949_v36 = vmul.f32 %v9031_v0, %v9036_v10  ;;  %v2951_v18 = vmul.f32 %v9037_v23, %v9031_v0  ;;  %v2952_v62 = vmul.f32 %v9031_v0, %v9038_v4  ;;  %v9052_v35 = vld [vmem:[#allocation7_spill] sm:$0xff]  ;;  %v9062_v48 = vld [vmem:[#allocation24_spill] sm:$0xff] }
 0x27f   : > { %9027 = vst [vmem:[#allocation61_spill] sm:$0xff] %v7740_v13  ;;  %9029 = vst [vmem:[#allocation73_spill] sm:$0xff] %v7743_v31  ;;  %v2954_v7 = vmul.f32 %v9031_v0, %v9039_v3  ;;  %v7765_v47 = vmul.f32 %v9040_v16, %v9031_v0  ;;  %v2970_v34 = vmul.f32 %v9031_v0, %v9041_v29  ;;  %v9053_v16 = vld [vmem:[#allocation110_spill] sm:$0xff]  ;;  %v3045_v3 = vrot.slane %v2939_v57, 2  ;;  %v9064_v32 = vld [vmem:[#allocation47_spill] sm:$0xff] }
 0x280   : > { %v2955_v17 = vmul.f32 %v9031_v0, %v9042_v15  ;;  %v2957_v33 = vmul.f32 %v9043_v28, %v9031_v0  ;;  %v2958_v9 = vmul.f32 %v9031_v0, %v9044_v41  ;;  %v2959_v24 = vmul.f32 %v9031_v0, %v9045_v58  ;;  %v9054_v41 = vld [vmem:[#allocation111_spill] sm:$0xff]  ;;  %v9055_v28 = vld [vmem:[#allocation58_spill] sm:$0xff] }
 0x281   : > { %v2960_v60 = vmul.f32 %v9031_v0, %v9046_v25  ;;  %v2961_v61 = vmul.f32 %v9031_v0, %v9047_v22  ;;  %v7783_v54 = vmul.f32 %v9049_v27, %v9048_v52  ;;  %v3215_v26 = vmul.f32 %v9049_v27, %v9051_v55  ;;  %v9056_v15 = vld [vmem:[#allocation118_spill] sm:$0xff]  ;;  %v9057_v55 = vld [vmem:[#allocation119_spill] sm:$0xff] }
 0x282   : > { %v2962_v29 = vmul.f32 %v9031_v0, %v9052_v35  ;;  %v2963_v58 = vmul.f32 %v9053_v16, %v9031_v0  ;;  %v2964_v25 = vmul.f32 %v9031_v0, %v9054_v41  ;;  %v2965_v22 = vmul.f32 %v9031_v0, %v9055_v28  ;;  %v9059_v41 = vld [vmem:[#allocation65_spill] sm:$0xff] }
 0x283   : > { %v2966_v52 = vmul.f32 %v9031_v0, %v9056_v15  ;;  %v3095_v45 = vrot.slane %v7765_v47, 2  ;;  %v3097_v4 = vrot.slane %v2970_v34, 2  ;;  %v2967_v23 = vmul.f32 %v9031_v0, %v9057_v55  ;;  %v9060_v15 = vld [vmem:[#allocation32_spill] sm:$0xff]  ;;  %v9070_v28 = vld [vmem:[#allocation41_spill] sm:$0xff] }
 0x284   : > { %v9058_v35 = vunpack.c.l.bf16 %v7707_v46  ;;  %v3050_v10 = vrot.slane %v2942_v56, 2  ;;  %v3055_v59 = vrot.slane %v2945_v14, 2  ;;  %v3057_v21 = vrot.slane %v9059_v41, 2  ;;  %v9068_v14 = vld [vmem:[#allocation37_spill] sm:$0xff] }
 0x285   : > { %v3060_v31 = vrot.slane %v2948_v37, 2  ;;  %v3342_v13 = vrot.slane %v3215_v26, 2  ;;  %v9061_v57 = vrot.slane %v9060_v15, 2  ;;  %v9063_v47 = vrot.slane %v9062_v48, 2 }
 0x286   : > { %v2968_v16 = vmul.f32 %v9031_v0, %v9058_v35  ;;  %v9065_v55 = vrot.slane %v9064_v32, 2  ;;  %v9067_v46 = vrot.slane %v9066_v19, 2  ;;  %v3062_v0 = vrot.slane %v2949_v36, 2  ;;  %v9074_v19 = vld [vmem:[#allocation68_spill] sm:$0xff] }
 0x287   : > { %v3036_v34 = vsel %vm2773_vm9, %v9063_v47, %v9061_v57  ;;  %v3065_v56 = vrot.slane %v2951_v18, 2  ;;  %v9069_v41 = vrot.slane %v9068_v14, 2  ;;  %v9071_v26 = vrot.slane %v9070_v28, 2  ;;  %v9072_v57 = vld [vmem:[#allocation54_spill] sm:$0xff]  ;;  %v9076_v36 = vld [vmem:[#allocation52_spill] sm:$0xff] }
 0x288   : > { %v3041_v35 = vsel %vm2773_vm9, %v9067_v46, %v9065_v55  ;;  %v3067_v39 = vrot.slane %v2952_v62, 2  ;;  %v3098_v48 = vsel %vm2773_vm9, %v3095_v45, %v3097_v4  ;;  %v9073_v47 = vrot.slane %v9072_v57, 2 }
 0x289   : > { %v3046_v37 = vsel %vm2773_vm9, %v9069_v41, %v3045_v3  ;;  %v3048_v15 = vsel %vm2773_vm9, %v3045_v3, %v9071_v26  ;;  %v9075_v38 = vrot.slane %v9074_v19, 2  ;;  %v9077_v18 = vrot.slane %v9076_v36, 2  ;;  %v9078_v41 = vld [vmem:[#allocation79_spill] sm:$0xff] }
 0x28a   : > { %v3051_v32 = vsel %vm2773_vm9, %v9073_v47, %v3050_v10  ;;  %v3162_v14 = vadd.f32 %v3098_v48, %v2917_v51  ;;  %v3058_v28 = vsel %vm2773_vm9, %v3055_v59, %v3057_v21  ;;  %v9079_v3 = vrot.slane %v9078_v41, 2  ;;  %v9081_v19 = vld [vmem:[#allocation71_spill] sm:$0xff]  ;;  %v9083_v51 = vld [vmem:[#allocation101_spill] sm:$0xff] }
 0x28b   : > { %v3053_v46 = vsel %vm2773_vm9, %v3050_v10, %v9075_v38  ;;  %v3056_v55 = vsel %vm2773_vm9, %v9077_v18, %v3055_v59  ;;  %v3070_v4 = vrot.slane %v2954_v7, 2  ;;  %v9080_v26 = vrot.slane %v7783_v54, 2 }
 0x28c   : > { %v3061_v62 = vsel %vm2773_vm9, %v9079_v3, %v3060_v31  ;;  %v3063_v47 = vsel %vm2773_vm9, %v3060_v31, %v3062_v0  ;;  %v9082_v38 = vrot.slane %v9081_v19, 2  ;;  %v3072_v36 = vrot.slane %v2955_v17, 2 }
 0x28d   : > { %v3343_v57 = vsel %vm2773_vm9, %v9080_v26, %v3342_v13  ;;  %v3075_v18 = vrot.slane %v2957_v33, 2  ;;  %v3074_v48 = vrot.slane %v9083_v51, 2  ;;  %v3077_v21 = vrot.slane %v2958_v9, 2  ;;  %v9084_v26 = vld [vmem:[#allocation98_spill] sm:$0xff]  ;;  %v9097_v51 = vld [vmem:[#allocation85_spill] sm:$0xff] }
 0x28e   : > { %v3066_v10 = vsel %vm2773_vm9, %v9082_v38, %v3065_v56  ;;  %v3080_v59 = vrot.slane %v2960_v60, 2  ;;  %v3082_v41 = vrot.slane %v2961_v61, 2  ;;  %v3085_v27 = vrot.slane %v2963_v58, 2 }
 0x28f   : > { %v3087_v3 = vrot.slane %v2964_v25, 2  ;;  %v3090_v7 = vrot.slane %v2966_v52, 2  ;;  %v7844_v12 = vadd.f32 %v3343_v57, %v3162_v14  ;;  %v3068_v13 = vsel %vm2773_vm9, %v3065_v56, %v3067_v39 }
 0x290   : > { %v9085_v31 = vrot.slane %v9084_v26, 2  ;;  %v3079_v19 = vrot.slane %v2959_v24, 2  ;;  %v3092_v38 = vrot.slane %v2967_v23, 2  ;;  %v3073_v17 = vsel %vm2773_vm9, %v3070_v4, %v3072_v36  ;;  %v9101_v26 = vld [vmem:[#allocation73_spill] sm:$0xff] }
 0x291   : > { %v3076_v33 = vsel %vm2773_vm9, %v3074_v48, %v3075_v18  ;;  %v3084_v9 = vrot.slane %v2962_v29, 2  ;;  %v3089_v60 = vrot.slane %v2965_v22, 2  ;;  %v3078_v58 = vsel %vm2773_vm9, %v3075_v18, %v3077_v21  ;;  %v9098_v21 = vld [vmem:[#allocation4_spill] sm:$0xff] }
 0x292   : > { %v3071_v0 = vsel %vm2773_vm9, %v9085_v31, %v3070_v4  ;;  %v3081_v25 = vsel %vm2773_vm9, %v3079_v19, %v3080_v59  ;;  %v3083_v61 = vsel %vm2773_vm9, %v3080_v59, %v3082_v41  ;;  %v3094_v52 = vrot.slane %v2968_v16, 2  ;;  %v9099_v41 = vld [vmem:[#allocation30_spill] sm:$0xff]  ;;  %v9102_v19 = vld [vmem:[#allocation28_spill] sm:$0xff] }
 0x293   : > { %v3086_v39 = vsel %vm2773_vm9, %v3084_v9, %v3085_v27  ;;  %v3088_v56 = vsel %vm2773_vm9, %v3085_v27, %v3087_v3  ;;  %v3091_v24 = vsel %vm2773_vm9, %v3089_v60, %v3090_v7  ;;  %v3137_v23 = vadd.f32 %v3036_v34, %v7672_v49  ;;  %v9104_v60 = vld [vmem:[#allocation87_spill] sm:$0xff] }
 0x294   : > { %v3093_v14 = vsel %vm2773_vm9, %v3090_v7, %v3092_v38  ;;  %v3096_v29 = vsel %vm2773_vm9, %v3094_v52, %v3095_v45  ;;  %v3139_v22 = vadd.f32 %v3041_v35, %v7676_v44  ;;  %v3141_v4 = vadd.f32 %v3046_v37, %v7679_v1  ;;  %v9088_v35 = vld [vmem:[#allocation57_spill] sm:$0xff] }
 0x295   : > { %v3142_v57 = vadd.f32 %v3048_v15, %v7683_v30  ;;  %v7865_v16 = vadd.f32 %v3051_v32, %v7687_v50  ;;  %v7868_v36 = vadd.f32 %v3053_v46, %v7690_v6  ;;  %v7871_v27 = vadd.f32 %v3056_v55, %v7693_v5  ;;  %v9086_v5 = vld [vmem:[#allocation26_spill] sm:$0xff]  ;;  %v9090_v15 = vld [vmem:[#allocation49_spill] sm:$0xff]  ;;  %v9094_v55 = vld [vmem:[#allocation75_spill] sm:$0xff] }
 0x296   : > { %v7874_v49 = vadd.f32 %v3058_v28, %v7696_v8  ;;  %v7877_v45 = vadd.f32 %v3061_v62, %v7699_v43  ;;  %v7880_v44 = vadd.f32 %v3063_v47, %v7702_v40  ;;  %v7883_v1 = vadd.f32 %v3066_v10, %v7705_v11  ;;  %v9087_v8 = vld [vmem:[#allocation33_spill] sm:$0xff]  ;;  %v9092_v32 = vld [vmem:[#allocation14_spill] sm:$0xff]  ;;  %v9095_v62 = vld [vmem:[#allocation92_spill] sm:$0xff] }
 0x297   : > { %v7886_v30 = vadd.f32 %v3068_v13, %v7710_v53  ;;  %v7889_v50 = vadd.f32 %v3071_v0, %v7713_v42  ;;  %v7892_v6 = vadd.f32 %v3073_v17, %v7716_v20  ;;  %v3380_v34 = vadd.f32 %v9087_v8, %v9086_v5  ;;  %v7896_v43 = vld [vmem:[#allocation2 + $0xcc] sm:$0xe]  ;;  %v9089_v53 = vld [vmem:[#allocation10_spill] sm:$0xff]  ;;  %v9096_v10 = vld [vmem:[#allocation27_spill] sm:$0xff] }
 0x298   : > { %v7899_v40 = vadd.f32 %v3076_v33, %v7719_v2  ;;  %v7902_v11 = vadd.f32 %v3078_v58, %v7722_v63  ;;  %v3184_v37 = vmul.f32 %v9089_v53, %v9088_v35  ;;  %v9091_v42 = vrot.slane %v9090_v15, 2  ;;  %v7920_v63 = vld [vmem:[%s8493_s4] ss:$0 sm:$0xff]  ;;  %v9100_v7 = vld [vmem:[#allocation61_spill] sm:$0xff]  ;;  %v9103_v33 = vld [vmem:[#allocation91_spill] sm:$0xff] }
 0x299   : > { %v9093_v46 = vrot.slane %v9092_v32, 2  ;;  %v7912_v28 = vadd.f32 %v3081_v25, %v9094_v55  ;;  %v7915_v47 = vadd.f32 %v3083_v61, %v9095_v62  ;;  %v7924_v18 = vadd.f32 %v7920_v63, %v9096_v10  ;;  %v9105_v25 = vld [vmem:[#allocation89_spill] sm:$0xff]  ;;  %v9108_v5 = vld [vmem:[#allocation104_spill] sm:$0xff] }
 0x29a   : > { %v7927_v48 = vadd.f32 %v3086_v39, %v9097_v51  ;;  %v7930_v59 = vadd.f32 %v3088_v56, %v9098_v21  ;;  %v7933_v3 = vadd.f32 %v3091_v24, %v9099_v41  ;;  %v7936_v13 = vadd.f32 %v3093_v14, %v9100_v7  ;;  %v9106_v39 = vld [vmem:[#allocation83_spill] sm:$0xff]  ;;  %v9107_v24 = vld [vmem:[#allocation96_spill] sm:$0xff]  ;;  %v9115_v62 = vld [vmem:[#allocation109_spill] sm:$0xff] }
 0x29b   : > { %v3281_v20 = vsel %vm2773_vm9, %v9093_v46, %v9091_v42  ;;  %v7939_v31 = vadd.f32 %v3096_v29, %v9101_v26  ;;  %v3187_v38 = vmul.f32 %v9102_v19, %v9089_v53  ;;  %v7945_v17 = vadd.f32 %v7920_v63, %v3380_v34  ;;  %v9109_v34 = vld [vmem:[#allocation103_spill] sm:$0xff]  ;;  %v9111_v42 = vld [vmem:[#allocation5_spill] sm:$0xff]  ;;  %v9116_v51 = vld [vmem:[#allocation16_spill] sm:$0xff] }
 0x29c   : > { %v3382_v2 = vadd.f32 %v3281_v20, %v3137_v23  ;;  %v3190_v9 = vmul.f32 %v9089_v53, %v9103_v33  ;;  %v3191_v58 = vmul.f32 %v9089_v53, %v9104_v60  ;;  %v7953_v61 = vmul.f32 %v9105_v25, %v9089_v53  ;;  %v9113_v46 = vld [vmem:[#allocation25_spill] sm:$0xff]  ;;  %v9117_v7 = vld [vmem:[#allocation108_spill] sm:$0xff]  ;;  %v9118_v19 = vld [vmem:[#allocation114_spill] sm:$0xff] }
 0x29d   : > { %v3290_v52 = vrot.slane %v3184_v37, 2  ;;  %v7957_v56 = vmul.f32 %v9089_v53, %v9106_v39  ;;  %v7961_v23 = vmul.f32 %v9089_v53, %v9107_v24  ;;  %v4546_v29 = vmul.f32 -1.442695, %v7924_v18  ;;  %v9110_v37 = vld [vmem:[#allocation102_spill] sm:$0xff]  ;;  %v9119_v60 = vld [vmem:[#allocation55_spill] sm:$0xff] }
 0x29e   : > { %v7964_v14 = vadd.f32 %v7920_v63, %v3382_v2  ;;  %v7969_v8 = vmul.f32 %v9089_v53, %v9108_v5  ;;  %v7973_v35 = vmul.f32 %v9109_v34, %v9089_v53  ;;  %v7977_v15 = vmul.f32 %v9089_v53, %v9110_v37  ;;  %v9121_v24 = vld [vmem:[#allocation11_spill] sm:$0xff] }
 0x29f   : > { %v9112_v32 = vrot.slane %v9111_v42, 2  ;;  %v9114_v20 = vrot.slane %v9113_v46, 2  ;;  %v7986_v2 = vmul.f32 %v9089_v53, %v9115_v62  ;;  %v7990_v21 = vadd.f32 %v7920_v63, %v9116_v51  ;;  %v9125_v62 = vld [vmem:[#allocation40_spill] sm:$0xff] }
 0x2a0   : > { %v4548_v41 = vmul.f32 -1.442695, %v7945_v17  ;;  %v7995_v26 = vmul.f32 %v9089_v53, %v9117_v7  ;;  %v7999_v33 = vmul.f32 %v9089_v53, %v9118_v19  ;;  %v9120_v25 = vrot.slane %v9119_v60, 2 }
 0x2a1   : > { %v3286_v55 = vsel %vm2773_vm9, %v9114_v20, %v9112_v32  ;;  %v3295_v34 = vrot.slane %v3187_v38, 2  ;;  %5227 = vpow2.f32 %v4546_v29  ;;  %v4550_v42 = vmul.f32 -1.442695, %v7964_v14  ;;  %v9123_v32 = vld [vmem:[#allocation7_spill] sm:$0xff]  ;;  %v9124_v20 = vld [vmem:[#allocation110_spill] sm:$0xff] }
 0x2a2   : > { %v3384_v10 = vadd.f32 %v3286_v55, %v3139_v22  ;;  %v3291_v39 = vsel %vm2773_vm9, %v9120_v25, %v3290_v52  ;;  %v9122_v22 = vld [vmem:[#allocation43_spill] sm:$0xff]  ;;  %v8009_v46 = vmul.f32 %v9089_v53, %v9123_v32  ;;  %v8013_v55 = vmul.f32 %v9124_v20, %v9089_v53 }
 0x2a3   : > { %v3385_v5 = vadd.f32 %v9122_v22, %v9121_v24  ;;  %v3386_v37 = vadd.f32 %v3291_v39, %v3141_v4  ;;  %v9126_v51 = vrot.slane %v9125_v62, 2  ;;  %v3300_v19 = vrot.slane %v3190_v9, 2  ;;  %v9127_v29 = vld [vmem:[#allocation111_spill] sm:$0xff]  ;;  %v9128_v39 = vld [vmem:[#allocation58_spill] sm:$0xff]  ;;  %v9130_v9 = vld [vmem:[#allocation17_spill] sm:$0xff] }
 0x2a4   : > { %v8019_v38 = vadd.f32 %v7920_v63, %v3384_v10  ;;  %5229 = vpow2.f32 %v4548_v41  ;;  %v4551_v4 = vmul.f32 -1.442695, %v7990_v21  ;;  %v8024_v25 = vmul.f32 %v9089_v53, %v9127_v29  ;;  %v9129_v22 = vld [vmem:[#allocation118_spill] sm:$0xff]  ;;  %v9132_v62 = vld [vmem:[#allocation119_spill] sm:$0xff] }
 0x2a5   : > { %v3293_v7 = vsel %vm2773_vm9, %v3290_v52, %v9126_v51  ;;  %v8028_v24 = vmul.f32 %v9089_v53, %v9128_v39  ;;  %v8032_v32 = vmul.f32 %v9089_v53, %v9129_v22  ;;  %v9131_v52 = vrot.slane %v9130_v9, 2  ;;  %v9135_v22 = vld [vmem:[#allocation80_spill] sm:$0xff] }
 0x2a6   : > { %v3387_v60 = vadd.f32 %v3293_v7, %v3142_v57  ;;  %v8035_v57 = vadd.f32 %v7920_v63, %v3385_v5  ;;  %v3302_v41 = vrot.slane %v3191_v58, 2  ;;  %v8041_v20 = vadd.f32 %v7920_v63, %v3386_v37  ;;  %v9133_v7 = vld [vmem:[#allocation66_spill] sm:$0xff] }
 0x2a7   : > { %v3296_v10 = vsel %vm2773_vm9, %v9131_v52, %v3295_v34  ;;  %5231 = vpow2.f32 %v4550_v42  ;;  %v8045_v51 = vmul.f32 %v9089_v53, %v9132_v62  ;;  %v9134_v29 = vrot.slane %v9133_v7, 2  ;;  %v9137_v52 = vld [vmem:[#allocation59_spill] sm:$0xff] }
 0x2a8   : > { %v9136_v5 = vrot.slane %v9135_v22, 2  ;;  %v3388_v9 = vadd.f32 %v3296_v10, %v7865_v16  ;;  %v8056_v37 = vadd.f32 %v7920_v63, %v3387_v60  ;;  %5233 = vpow2.f32 %v4551_v4  ;;  %v9139_v10 = vld [vmem:[#allocation116_spill] sm:$0xff] }
 0x2a9   : > { %v3298_v39 = vsel %vm2773_vm9, %v3295_v34, %v9134_v29  ;;  %v4552_v42 = vmul.f32 -1.442695, %v8019_v38  ;;  %v9138_v62 = vunpack.c.l.bf16 %v9137_v52  ;;  %v3305_v34 = vrot.slane %v7953_v61, 2 }
 0x2aa   : > { %v3301_v0 = vsel %vm2773_vm9, %v9136_v5, %v3300_v19  ;;  %v3389_v58 = vadd.f32 %v3298_v39, %v7868_v36  ;;  %v4553_v22 = vmul.f32 -1.442695, %v8035_v57  ;;  %v3303_v16 = vsel %vm2773_vm9, %v3300_v19, %v3302_v41  ;;  %v9140_v5 = vld [vmem:[#allocation19_spill] sm:$0xff]  ;;  %v9142_v41 = vld [vmem:[#allocation72_spill] sm:$0xff] }
 0x2ab   : > { %v8062_v7 = vmul.f32 %v9089_v53, %v9138_v62  ;;  %v3390_v29 = vadd.f32 %v3301_v0, %v7871_v27  ;;  %v3307_v36 = vrot.slane %v7957_v56, 2  ;;  %v3310_v60 = vrot.slane %v7961_v23, 2 }
 0x2ac   : > { %v4554_v4 = vmul.f32 -1.442695, %v8041_v20  ;;  %v8073_v39 = vmul.f32 %v9139_v10, %v9089_v53  ;;  %v8077_v52 = vmul.f32 %v9089_v53, %v9140_v5  ;;  %v3391_v27 = vadd.f32 %v3303_v16, %v7874_v49 }
 0x2ad   : > { %v8081_v0 = vadd.f32 %v7920_v63, %v3388_v9  ;;  %v9141_v61 = vunpack.c.l.bf16 %v7896_v43  ;;  %v8089_v23 = vadd.f32 %v7920_v63, %v3389_v58  ;;  %5235 = vpow2.f32 %v4552_v42 }
 0x2ae   : > { %v4555_v19 = vmul.f32 -1.442695, %v8056_v37  ;;  %v9143_v62 = vrot.slane %v9142_v41, 2  ;;  %v3312_v49 = vrot.slane %v7969_v8, 2  ;;  %v8097_v9 = vadd.f32 %v7920_v63, %v3390_v29  ;;  %v5228_v5 = vpop.eup %5227 }
 0x2af   : > { %v8086_v56 = vmul.f32 %v9089_v53, %v9141_v61  ;;  %5237 = vpow2.f32 %v4553_v22  ;;  %v3308_v43 = vsel %vm2773_vm9, %v3305_v34, %v3307_v36  ;;  %v9144_v53 = vld [vmem:[#allocation99_spill] sm:$0xff]  ;;  %v3315_v42 = vrot.slane %v7973_v35, 2 }
 0x2b0   : > { %v3306_v10 = vsel %vm2773_vm9, %v9143_v62, %v3305_v34  ;;  %v9145_v16 = vrot.slane %v9144_v53, 2  ;;  %5239 = vpow2.f32 %v4554_v4  ;;  %v3317_v61 = vrot.slane %v7977_v15, 2 }
 0x2b1   : > { %v3392_v41 = vadd.f32 %v3306_v10, %v7877_v45  ;;  %v8107_v8 = vadd.f32 %v7920_v63, %v3391_v27  ;;  %v4556_v29 = vmul.f32 -1.442695, %v8081_v0  ;;  %v3319_v22 = vrot.slane %v7986_v2, 2  ;;  %v5230_v62 = vpop.eup %5229 }
 0x2b2   : > { %v3311_v58 = vsel %vm2773_vm9, %v9145_v16, %v3310_v60  ;;  %v3320_v34 = vrot.slane %v7995_v26, 2  ;;  %5241 = vpow2.f32 %v4555_v19  ;;  %v4557_v36 = vmul.f32 -1.442695, %v8089_v23 }
 0x2b3   : > { %v3313_v35 = vsel %vm2773_vm9, %v3310_v60, %v3312_v49  ;;  %v3322_v4 = vrot.slane %v7999_v33, 2  ;;  %v3393_v15 = vadd.f32 %v3308_v43, %v7880_v44  ;;  %v4558_v45 = vmul.f32 -1.442695, %v8097_v9  ;;  %v9146_v60 = vld [vmem:[#allocation94_spill] sm:$0xff] }
 0x2b4   : > { %v3324_v27 = vrot.slane %v8009_v46, 2  ;;  %v3325_v10 = vrot.slane %v8013_v55, 2  ;;  %v3394_v2 = vadd.f32 %v3311_v58, %v7883_v1  ;;  %v3545_v53 = vadd.f32 1.0, %v5228_v5  ;;  %v5232_v26 = vpop.eup %5231 }
 0x2b5   : > { %v3395_v19 = vadd.f32 %v3313_v35, %v7886_v30  ;;  %v8122_v16 = vadd.f32 %v7920_v63, %v3392_v41  ;;  %5243 = vpow2.f32 %v4556_v29  ;;  %v4559_v33 = vmul.f32 -1.442695, %v8107_v8  ;;  %v5234_v43 = vpop.eup %5233 }
 0x2b6   : > { %v9147_v44 = vrot.slane %v9146_v60, 2  ;;  %v3318_v46 = vsel %vm2773_vm9, %v3315_v42, %v3317_v61  ;;  %5245 = vpow2.f32 %v4557_v36  ;;  %v3547_v55 = vadd.f32 1.0, %v5230_v62 }
 0x2b7   : > { %v3321_v1 = vsel %vm2773_vm9, %v3319_v22, %v3320_v34  ;;  %v3327_v58 = vrot.slane %v8024_v25, 2  ;;  %v8132_v30 = vadd.f32 %v7920_v63, %v3393_v15  ;;  %5247 = vpow2.f32 %v4558_v45 }
 0x2b8   : > { %v3316_v49 = vsel %vm2773_vm9, %v9147_v44, %v3315_v42  ;;  %v3323_v5 = vsel %vm2773_vm9, %v3320_v34, %v3322_v4  ;;  %v8136_v41 = vadd.f32 %v7920_v63, %v3394_v2  ;;  %v3549_v29 = vadd.f32 1.0, %v5232_v26 }
 0x2b9   : > { %5249 = vrcp.f32 %v3545_v53  ;;  %v3396_v42 = vadd.f32 %v3316_v49, %v7889_v50  ;;  %v8140_v61 = vadd.f32 %v7920_v63, %v3395_v19  ;;  %v4560_v22 = vmul.f32 -1.442695, %v8122_v16 }
 0x2ba   : > { %5251 = vpow2.f32 %v4559_v33  ;;  %v3326_v25 = vsel %vm2773_vm9, %v3324_v27, %v3325_v10  ;;  %v3329_v36 = vrot.slane %v8028_v24, 2  ;;  %v3550_v62 = vadd.f32 1.0, %v5234_v43  ;;  %v5236_v34 = vpop.eup %5235 }
 0x2bb   : > { %5253 = vrcp.f32 %v3547_v55  ;;  %v3328_v35 = vsel %vm2773_vm9, %v3325_v10, %v3327_v58  ;;  %v3330_v4 = vrot.slane %v8032_v32, 2  ;;  %v3397_v15 = vadd.f32 %v3318_v46, %v7892_v6 }
 0x2bc   : > { %v4561_v50 = vmul.f32 -1.442695, %v8132_v30  ;;  %v5238_v45 = vpop.eup %5237  ;;  %v3332_v2 = vrot.slane %v8045_v51, 2  ;;  %v3398_v53 = vadd.f32 %v3321_v1, %v7899_v40  ;;  %v4562_v27 = vmul.f32 -1.442695, %v8136_v41 }
 0x2bd   : > { %5255 = vrcp.f32 %v3549_v29  ;;  %v5240_v24 = vpop.eup %5239  ;;  %v3399_v26 = vadd.f32 %v3323_v5, %v7902_v11  ;;  %v8154_v19 = vadd.f32 %v7920_v63, %v3396_v42  ;;  %v4563_v32 = vmul.f32 -1.442695, %v8140_v61 }
 0x2be   : > { %5257 = vpow2.f32 %v4560_v22  ;;  %v3334_v6 = vrot.slane %v8062_v7, 2  ;;  %v3335_v10 = vrot.slane %v8073_v39, 2  ;;  %v3551_v33 = vadd.f32 1.0, %v5236_v34 }
 0x2bf   : > { %5259 = vrcp.f32 %v3550_v62  ;;  %v5242_v51 = vpop.eup %5241  ;;  %v3331_v40 = vsel %vm2773_vm9, %v3329_v36, %v3330_v4  ;;  %v8161_v60 = vadd.f32 %v7920_v63, %v3397_v15  ;;  %v3552_v11 = vadd.f32 1.0, %v5238_v45 }
 0x2c0   : > { %5261 = vpow2.f32 %v4561_v50  ;;  %v3337_v44 = vrot.slane %v8077_v52, 2  ;;  %v8165_v49 = vadd.f32 %v7920_v63, %v3398_v53  ;;  %v3553_v46 = vadd.f32 1.0, %v5240_v24 }
 0x2c1   : > { %5263 = vpow2.f32 %v4562_v27  ;;  %v3400_v7 = vadd.f32 %v3326_v25, %v7912_v28  ;;  %v8169_v39 = vadd.f32 %v7920_v63, %v3399_v26  ;;  %v4564_v55 = vmul.f32 -1.442695, %v8154_v19  ;;  %v9149_v26 = vld [vmem:[#allocation34_spill] sm:$0xff] }
 0x2c2   : > { %5265 = vpow2.f32 %v4563_v32  ;;  %v5244_v43 = vpop.eup %5243  ;;  %v3333_v1 = vsel %vm2773_vm9, %v3330_v4, %v3332_v2  ;;  %v3339_v58 = vrot.slane %v8086_v56, 2  ;;  %v3554_v5 = vadd.f32 1.0, %v5242_v51 }
 0x2c3   : > { %5267 = vrcp.f32 %v3551_v33  ;;  %v5246_v52 = vpop.eup %5245  ;;  %v3336_v29 = vsel %vm2773_vm9, %v3334_v6, %v3335_v10  ;;  %v3401_v42 = vadd.f32 %v3328_v35, %v7915_v47  ;;  %v4565_v28 = vmul.f32 -1.442695, %v8161_v60 }
 0x2c4   : > { %5269 = vrcp.f32 %v3552_v11  ;;  %v5248_v22 = vpop.eup %5247  ;;  %v3338_v25 = vsel %vm2773_vm9, %v3335_v10, %v3337_v44  ;;  %v3402_v36 = vadd.f32 %v3331_v40, %v7927_v48  ;;  %v4566_v62 = vmul.f32 -1.442695, %v8165_v49  ;;  %v9150_v11 = vld [vmem:[#allocation48_spill] sm:$0xff] }
 0x2c5   : > { %5271 = vrcp.f32 %v3553_v46  ;;  %v3403_v56 = vadd.f32 %v3333_v1, %v7930_v59  ;;  %v8182_v4 = vadd.f32 %v7920_v63, %v3400_v7  ;;  %v4567_v47 = vmul.f32 -1.442695, %v8169_v39 }
 0x2c6   : > { %v5250_v34 = vpop.eup %5249  ;;  %5273 = vpow2.f32 %v4564_v55  ;;  %v9148_v15 = vrot.slane %v7783_v54, 2  ;;  %v3555_v45 = vadd.f32 1.0, %v5244_v43  ;;  %v3404_v53 = vadd.f32 %v3336_v29, %v7933_v3  ;;  %v9152_v43 = vld [vmem:[#allocation45_spill] sm:$0xff] }
 0x2c7   : > { %v5252_v35 = vpop.eup %5251  ;;  %5275 = vrcp.f32 %v3554_v5  ;;  %v8189_v48 = vmul.f32 %v5250_v34, %v7924_v18  ;;  %v8193_v59 = vadd.f32 %v7920_v63, %v3401_v42  ;;  %v3556_v27 = vadd.f32 1.0, %v5246_v52 }
 0x2c8   : > { %v3341_v50 = vsel %vm2773_vm9, %v3339_v58, %v9148_v15  ;;  %v5254_v2 = vpop.eup %5253  ;;  %5277 = vpow2.f32 %v4565_v28  ;;  %v8196_v24 = vadd.f32 %v7920_v63, %v3402_v36  ;;  %v3557_v54 = vadd.f32 1.0, %v5248_v22 }
 0x2c9   : > { %5279 = vpow2.f32 %v4566_v62  ;;  %v3672_v32 = vadd.f32 %v9149_v26, %v8189_v48  ;;  %v3405_v18 = vadd.f32 %v3338_v25, %v7936_v13  ;;  %v8202_v10 = vadd.f32 %v7920_v63, %v3403_v56  ;;  %v9151_v13 = vld [vmem:[#allocation3_spill] sm:$0xff] }
 0x2ca   : > { %v5256_v6 = vpop.eup %5255  ;;  %5281 = vpow2.f32 %v4567_v47  ;;  %v4568_v3 = vmul.f32 -1.442695, %v8182_v4  ;;  %v3558_v51 = vadd.f32 1.0, %v5252_v35  ;;  %v8206_v40 = vmul.f32 %v5254_v2, %v7945_v17 }
 0x2cb   : > { %v5258_v33 = vpop.eup %5257  ;;  %5283 = vrcp.f32 %v3555_v45  ;;  %v3673_v44 = vadd.f32 %v3672_v32, %v9150_v11  ;;  %v3406_v7 = vadd.f32 %v3341_v50, %v7939_v31  ;;  %v4569_v55 = vmul.f32 -1.442695, %v8193_v59 }
 0x2cc   : > { %v5260_v46 = vpop.eup %5259  ;;  %5285 = vrcp.f32 %v3556_v27  ;;  %v8213_v1 = vmul.f32 %v9152_v43, %v9151_v13  ;;  %v4570_v5 = vmul.f32 -1.442695, %v8196_v24  ;;  %v8217_v52 = vmul.f32 %v5256_v6, %v7964_v14 }
 0x2cd   : > { %v5262_v58 = vpop.eup %5261  ;;  %5287 = vrcp.f32 %v3557_v54  ;;  %v3674_v17 = vadd.f32 %v3673_v44, %v8206_v40  ;;  %v8221_v42 = vadd.f32 %v7920_v63, %v3404_v53  ;;  %v4571_v31 = vmul.f32 -1.442695, %v8202_v10 }
 0x2ce   : > { %v5264_v29 = vpop.eup %5263  ;;  %5289 = vpow2.f32 %v4568_v3  ;;  %v3559_v22 = vadd.f32 1.0, %v5258_v33  ;;  %v8225_v25 = vmul.f32 %v5260_v46, %v7990_v21  ;;  %v8229_v14 = vadd.f32 %v7920_v63, %v3405_v18 }
 0x2cf   : > { %v5266_v28 = vpop.eup %5265  ;;  %5291 = vrcp.f32 %v3558_v51  ;;  %v3675_v36 = vadd.f32 %v3674_v17, %v8213_v1  ;;  %v8232_v34 = vadd.f32 %v7920_v63, %v3406_v7  ;;  %v3560_v56 = vadd.f32 1.0, %v5262_v58 }
 0x2d0   : > { %v5268_v62 = vpop.eup %5267  ;;  %5293 = vpow2.f32 %v4569_v55  ;;  %v3561_v35 = vadd.f32 1.0, %v5264_v29  ;;  %v8237_v21 = vadd.f32 %v7920_v63, %v7844_v12  ;;  %v4572_v45 = vmul.f32 -1.442695, %v8221_v42 }
 0x2d1   : > { %v5270_v47 = vpop.eup %5269  ;;  %5295 = vpow2.f32 %v4570_v5  ;;  %v3676_v15 = vadd.f32 %v3675_v36, %v8217_v52  ;;  %v3562_v53 = vadd.f32 1.0, %v5266_v28  ;;  %v8241_v27 = vmul.f32 %v5268_v62, %v8019_v38 }
 0x2d2   : > { %v5272_v50 = vpop.eup %5271  ;;  %5297 = vpow2.f32 %v4571_v31  ;;  %v4573_v32 = vmul.f32 -1.442695, %v8229_v14  ;;  %v4574_v6 = vmul.f32 -1.442695, %v8232_v34  ;;  %v8247_v12 = vmul.f32 %v5270_v47, %v8035_v57 }
 0x2d3   : > { %v5274_v2 = vpop.eup %5273  ;;  %5299 = vrcp.f32 %v3559_v22  ;;  %v3677_v54 = vadd.f32 %v3676_v15, %v8225_v25  ;;  %v8250_v63 = vmul.f32 %v5272_v50, %v8041_v20  ;;  %v4575_v33 = vmul.f32 -1.442695, %v8237_v21 }
 0x2d4   : > { %v5276_v26 = vpop.eup %5275  ;;  %5301 = vrcp.f32 %v3560_v56  ;;  %v3563_v44 = vadd.f32 1.0, %v5274_v2 }
 0x2d5   : > { %v5278_v18 = vpop.eup %5277  ;;  %5303 = vrcp.f32 %v3561_v35  ;;  %v3678_v3 = vadd.f32 %v3677_v54, %v8241_v27  ;;  %v8255_v46 = vmul.f32 %v5276_v26, %v8056_v37 }
 0x2d6   : > { %v5280_v38 = vpop.eup %5279  ;;  %5305 = vpow2.f32 %v4572_v45  ;;  %v3564_v57 = vadd.f32 1.0, %v5278_v18 }
 0x2d7   : > { %v5282_v51 = vpop.eup %5281  ;;  %5307 = vrcp.f32 %v3562_v53  ;;  %v3679_v7 = vadd.f32 %v3678_v3, %v8247_v12  ;;  %v3565_v20 = vadd.f32 1.0, %v5280_v38 }
 0x2d8   : > { %v5284_v55 = vpop.eup %5283  ;;  %5309 = vpow2.f32 %v4573_v32  ;;  %v3566_v17 = vadd.f32 1.0, %v5282_v51 }
 0x2d9   : > { %v5286_v13 = vpop.eup %5285  ;;  %5311 = vpow2.f32 %v4574_v6  ;;  %v3680_v43 = vadd.f32 %v3679_v7, %v8250_v63  ;;  %v8260_v29 = vmul.f32 %v5284_v55, %v8081_v0 }
 0x2da   : > { %v5288_v58 = vpop.eup %5287  ;;  %5313 = vpow2.f32 %v4575_v33  ;;  %v8264_v22 = vmul.f32 %v5286_v13, %v8089_v23 }
 0x2db   : > { %v5290_v5 = vpop.eup %5289  ;;  %5315 = vrcp.f32 %v3563_v44  ;;  %v3681_v37 = vadd.f32 %v3680_v43, %v8255_v46  ;;  %v8267_v36 = vmul.f32 %v5288_v58, %v8097_v9 }
 0x2dc   : > { %v5292_v31 = vpop.eup %5291  ;;  %5317 = vrcp.f32 %v3564_v57  ;;  %v3567_v35 = vadd.f32 1.0, %v5290_v5 }
 0x2dd   : > { %v5294_v28 = vpop.eup %5293  ;;  %5319 = vrcp.f32 %v3565_v20  ;;  %v3682_v62 = vadd.f32 %v3681_v37, %v8260_v29  ;;  %v8271_v0 = vmul.f32 %v5292_v31, %v8107_v8 }
 0x2de   : > { %v5296_v56 = vpop.eup %5295  ;;  %5321 = vrcp.f32 %v3566_v17  ;;  %v3568_v45 = vadd.f32 1.0, %v5294_v28 }
 0x2df   : > { %v5298_v47 = vpop.eup %5297  ;;  %v3683_v15 = vadd.f32 %v3682_v62, %v8264_v22  ;;  %v3569_v53 = vadd.f32 1.0, %v5296_v56  ;;  %5323 = vrcp.f32 %v3567_v35 }
 0x2e0   : > { %v5300_v50 = vpop.eup %5299  ;;  %v3570_v26 = vadd.f32 1.0, %v5298_v47  ;;  %5325 = vrcp.f32 %v3568_v45 }
 0x2e1   : > { %v5302_v2 = vpop.eup %5301  ;;  %v3684_v23 = vadd.f32 %v3683_v15, %v8267_v36  ;;  %v8276_v32 = vmul.f32 %v5300_v50, %v8122_v16  ;;  %5327 = vrcp.f32 %v3569_v53 }
 0x2e2   : > { %v5304_v54 = vpop.eup %5303  ;;  %v8280_v3 = vmul.f32 %v5302_v2, %v8132_v30  ;;  %5329 = vrcp.f32 %v3570_v26 }
 0x2e3   : > { %v5306_v9 = vpop.eup %5305  ;;  %v3685_v6 = vadd.f32 %v3684_v23, %v8271_v0  ;;  %v8283_v38 = vmul.f32 %v5304_v54, %v8136_v41 }
 0x2e4   : > { %v5308_v18 = vpop.eup %5307  ;;  %v3571_v7 = vadd.f32 1.0, %v5306_v9 }
 0x2e5   : > { %v5310_v8 = vpop.eup %5309  ;;  %v3686_v33 = vadd.f32 %v3685_v6, %v8276_v32  ;;  %v8287_v16 = vmul.f32 %v5308_v18, %v8140_v61 }
 0x2e6   : > { %v5312_v51 = vpop.eup %5311  ;;  %v3572_v20 = vadd.f32 1.0, %v5310_v8  ;;  %5331 = vrcp.f32 %v3571_v7 }
 0x2e7   : > { %v5314_v44 = vpop.eup %5313  ;;  %v3687_v55 = vadd.f32 %v3686_v33, %v8280_v3  ;;  %v3573_v58 = vadd.f32 1.0, %v5312_v51 }
 0x2e8   : > { %v5316_v57 = vpop.eup %5315  ;;  %v3574_v37 = vadd.f32 1.0, %v5314_v44  ;;  %5333 = vrcp.f32 %v3572_v20 }
 0x2e9   : > { %v5318_v13 = vpop.eup %5317  ;;  %v3688_v30 = vadd.f32 %v3687_v55, %v8283_v38  ;;  %v8292_v41 = vmul.f32 %v5316_v57, %v8154_v19  ;;  %5335 = vrcp.f32 %v3573_v58  ;;  %v3727_v58 = vld [vmem:[%s8495_s6] sm:$0x1] }
 0x2ea   : > { %v5320_v43 = vpop.eup %5319  ;;  %v8296_v61 = vmul.f32 %v5318_v13, %v8161_v60  ;;  %5337 = vrcp.f32 %v3574_v37 }
 0x2eb   : > { %v3689_v5 = vadd.f32 %v3688_v30, %v8287_v16  ;;  %v5322_v17 = vpop.eup %5321  ;;  %v8299_v31 = vmul.f32 %v5320_v43, %v8165_v49 }
 0x2ec   : > { %v8303_v62 = vmul.f32 %v5322_v17, %v8169_v39  ;;  %v5324_v56 = vpop.eup %5323 }
 0x2ed   : > { %v3690_v28 = vadd.f32 %v3689_v5, %v8292_v41  ;;  %v5326_v47 = vpop.eup %5325  ;;  %v8308_v60 = vmul.f32 %v5324_v56, %v8182_v4 }
 0x2ee   : > { %v5328_v15 = vpop.eup %5327  ;;  %v8312_v45 = vmul.f32 %v5326_v47, %v8193_v59 }
 0x2ef   : > { %v3691_v19 = vadd.f32 %v3690_v28, %v8296_v61  ;;  %v5330_v50 = vpop.eup %5329  ;;  %v8315_v39 = vmul.f32 %v5328_v15, %v8196_v24 }
 0x2f0   : > { %v8319_v53 = vmul.f32 %v5330_v50, %v8202_v10 }
 0x2f1   : > { %v3692_v35 = vadd.f32 %v3691_v19, %v8299_v31 }
 0x2f3   : > { %v3693_v49 = vadd.f32 %v3692_v35, %v8303_v62  ;;  %v5332_v54 = vpop.eup %5331 }
 0x2f4   : > { %v8324_v26 = vmul.f32 %v5332_v54, %v8221_v42  ;;  %v5061_v54 = vld [vmem:[%s8499_s10 + $0x28] sm:$0xff]  }
 0x2f5   : > { %v3694_v2 = vadd.f32 %v3693_v49, %v8308_v60  ;;  %v5334_v9 = vpop.eup %5333 }
 0x2f6   : > { %v5336_v6 = vpop.eup %5335  ;;  %v8328_v24 = vmul.f32 %v5334_v9, %v8229_v14  ;;  %v5063_v9 = vld [vmem:[%s8499_s10 + $0x18] sm:$0xff]  }
 0x2f7   : > { %v3695_v23 = vadd.f32 %v3694_v2, %v8312_v45  ;;  %v5338_v8 = vpop.eup %5337  ;;  %v8332_v10 = vmul.f32 %v5336_v6, %v8232_v34  ;;  %v3824_v34 = vld [vmem:[%s8496_s7] sm:$0xf]  ;;  %v5059_v2 = vld [vmem:[%s8499_s10 + $0x38] sm:$0xff]   ;;  %v5065_v6 = vld [vmem:[%s8499_s10 + $0x8] sm:$0xff]  }
 0x2f8   : > { %v8336_v51 = vmul.f32 %v5338_v8, %v8237_v21  ;;  %v3832_v21 = vsel %vm1473_vm0, %v3824_v34, 0  ;;  %v3825_v8 = vld [vmem:[%s8497_s8] sm:$0x1]  ;;  %v9153_v34 = vld [vmem:[#allocation6_spill] sm:$0xff] }
 0x2f9   : > { %v3696_v4 = vadd.f32 %v3695_v23, %v8315_v39  ;;  %4963 = vmatpush3.bf16.msra.mxu1 %v3832_v21  ;;  %v5060_v23 = vld [vmem:[%s8499_s10 + $0x30] sm:$0xff]  }
 0x2fa   : > { %4968 = vmatprep.subr.bf16.mxu1 %v5059_v2 }
 0x2fb   : > { %v3697_v59 = vadd.f32 %v3696_v4, %v8319_v53  ;;  %v5062_v4 = vld [vmem:[%s8499_s10 + $0x20] sm:$0xff]  }
 0x2fd   : > { %v3698_v18 = vadd.f32 %v3697_v59, %v8324_v26  ;;  %v5064_v59 = vld [vmem:[%s8499_s10 + $0x10] sm:$0xff]  }
 0x2ff   : > { %v3699_v33 = vadd.f32 %v3698_v18, %v8328_v24  ;;  %v5066_v18 = vld [vmem:[%s8499_s10] sm:$0xff]  }
 0x301   : > { %v3700_v42 = vadd.f32 %v3699_v33, %v8332_v10 }
 0x303   : > { %v3701_v44 = vadd.f32 %v3700_v42, %v8336_v51 }
 0x305   : > { %v3702_v7 = vrot.slane %v3701_v44, 4 }
 0x307   : > { %v3703_v55 = vadd.f32 %v3702_v7, %v3701_v44 }
 0x309   : > { %v3704_v57 = vrot.slane %v3703_v55, 2 }
 0x30b   : > { %v3705_v14 = vadd.f32 %v3704_v57, %v3703_v55 }
 0x30d   : > { %v3706_v13 = vrot.slane %v3705_v14, 1 }
 0x30f   : > { %v3707_v20 = vadd.f32 %v3706_v13, %v3705_v14 }
 0x311   : > { %v3709_v30 = vmul.f32 0.00390625, %v3707_v20  ;;  %v3880_v20 = vld [vmem:[%s8498_s9] sm:$0x1] }
 0x313   : > { %v3710_v43 = vpack.c.bf16 %v3709_v30, %v3709_v30 }
 0x315   : > { %4959 = vmatmul.mubr.bf16.vlgmr.msra.gmra.mxu0 %v3710_v43 }
 0x3d5   : > { %v3810_v5 = vpop.f32.mrf.mxu0 }
 0x3d6   : > { %v3811_v17 = vadd.f32 %v3810_v5, %v3727_v58  ;;  %v9154_v58 = vld [vmem:[#allocation21_spill] sm:$0xff] }
 0x3d7   : > { %v4960_v37 = vpop.f32.mrf.mxu0 }
 0x3d8   : > { %v4584_v28 = vmul.f32 -1.442695, %v3811_v17 }
 0x3d9   : > { %v3813_v19 = vpop.f32.mrf.mxu0 }
 0x3da   : > { %5339 = vpow2.f32 %v4584_v28 }
 0x3db   : > { %v4961_v56 = vpop.f32.mrf.mxu0 }
 0x3e7   : > { %v5340_v47 = vpop.eup %5339 }
 0x3e8   : > { %v3819_v35 = vadd.f32 1.0, %v5340_v47 }
 0x3ea   : > { %5341 = vrcp.f32 %v3819_v35 }
 0x3f7   : > { %v5342_v15 = vpop.eup %5341 }
 0x3f8   : > { %v3822_v49 = vmul.f32 %v5342_v15, %v3811_v17  ;;  %v9155_v17 = vld [vmem:[#allocation20_spill] sm:$0xff] }
 0x3fa   : > { %v3823_v50 = vpack.c.bf16 %v3822_v49, %v3822_v49 }
 0x3fc   : > { %4965 = vmatmul.mubr.msk.bf16.vlgmr.msra.gmra.mxu1 %vm3826_vm11, %v3823_v50 }
 0x3fd   : > { %4969 = vmatpush3.bf16.msra.mxu1 %v5059_v2 }
 0x3fe   : > { %4970 = vmatprep.subr.bf16.mxu1 %v5060_v23 }
 0x401   : > { %4971 = vmatpush3.bf16.msra.mxu1 %v5060_v23 }
 0x402   : > { %4972 = vmatprep.subr.bf16.mxu1 %v5061_v54 }
 0x405   : > { %4973 = vmatpush3.bf16.msra.mxu1 %v5061_v54 }
 0x406   : > { %4974 = vmatprep.subr.bf16.mxu1 %v5062_v4 }
 0x409   : > { %4975 = vmatpush3.bf16.msra.mxu1 %v5062_v4 }
 0x40a   : > { %4976 = vmatprep.subr.bf16.mxu1 %v5063_v9 }
 0x40d   : > { %4977 = vmatpush3.bf16.msra.mxu1 %v5063_v9 }
 0x40e   : > { %4978 = vmatprep.subr.bf16.mxu1 %v5064_v59 }
 0x411   : > { %4979 = vmatpush3.bf16.msra.mxu1 %v5064_v59 }
 0x412   : > { %4980 = vmatprep.subr.bf16.mxu1 %v5065_v6 }
 0x415   : > { %4981 = vmatpush3.bf16.msra.mxu1 %v5065_v6 }
 0x416   : > { %4982 = vmatprep.subr.bf16.mxu1 %v5066_v18 }
 0x419   : > { %4983 = vmatpush3.bf16.msra.mxu1 %v5066_v18 }
 0x4bc   : > { %v3868_v33 = vpop.f32.mrf.mxu1 }
 0x4bd   : > { %v3869_v42 = vadd.f32 %v3868_v33, %v3825_v8 }
 0x4be   : > { %v4966_v44 = vpop.f32.mrf.mxu1 }
 0x4bf   : > { %v4586_v7 = vmul.f32 -1.442695, %v3869_v42 }
 0x4c0   : > { %v3871_v55 = vpop.f32.mrf.mxu1 }
 0x4c1   : > { %5343 = vpow2.f32 %v4586_v7 }
 0x4c2   : > { %v4967_v57 = vpop.f32.mrf.mxu1 }
 0x4ce   : > { %v5344_v14 = vpop.eup %5343 }
 0x4cf   : > { %v3877_v13 = vadd.f32 1.0, %v5344_v14 }
 0x4d1   : > { %5345 = vrcp.f32 %v3877_v13 }
 0x4de   : > { %v5346_v30 = vpop.eup %5345 }
 0x4df   : > { %v3881_v43 = vmul.f32 %v5346_v30, %v3880_v20  ;;  %v5350_v30 = vld [vmem:[%s5466_s14] sm:$0xff]  }
 0x4e1   : > { %v3885_v21 = vrot.slane %v3881_v43, %v9153_v34  ;;  %v4167_v43 = vunpack.c.h.bf16 %v5350_v30 }
 0x4e3   : > { %v3886_v5 = vmul.f32 %v3885_v21, %v9154_v58  ;;  %v3887_v37 = vmul.f32 %v3885_v21, %v9155_v17  ;;  %v3888_v28 = vmul.f32 %v3885_v21, %v8189_v48  ;;  %v3889_v19 = vmul.f32 %v3885_v21, %v9150_v11 }
 0x4e4   : > { %v3890_v56 = vmul.f32 %v3885_v21, %v8206_v40  ;;  %v3891_v47 = vmul.f32 %v3885_v21, %v8213_v1  ;;  %v3892_v50 = vmul.f32 %v3885_v21, %v8217_v52  ;;  %v3893_v2 = vmul.f32 %v3885_v21, %v8225_v25 }
 0x4e5   : > { %v3918_v35 = vpack.c.bf16 %v3887_v37, %v3886_v5  ;;  %v3919_v15 = vpack.c.bf16 %v3889_v19, %v3888_v28  ;;  %v3894_v23 = vmul.f32 %v3885_v21, %v8241_v27  ;;  %v3895_v48 = vmul.f32 %v3885_v21, %v8247_v12 }
 0x4e6   : > { %v3920_v49 = vpack.c.bf16 %v3891_v47, %v3890_v56  ;;  %v3921_v54 = vpack.c.bf16 %v3893_v2, %v3892_v50  ;;  %v3896_v40 = vmul.f32 %v3885_v21, %v8250_v63  ;;  %v3897_v1 = vmul.f32 %v3885_v21, %v8255_v46 }
 0x4e7   : > { %4984 = vmatprep.mubr.bf16.mxu1 %v3918_v35  ;;  %v3922_v11 = vpack.c.bf16 %v3895_v48, %v3894_v23  ;;  %v3898_v4 = vmul.f32 %v3885_v21, %v8260_v29  ;;  %v3899_v9 = vmul.f32 %v3885_v21, %v8264_v22  ;;  %v3900_v25 = vmul.f32 %v3885_v21, %v8267_v36 }
 0x4e8   : > { %4985 = vmatmul.mubr.bf16.vlgmr.msra.gmra.mxu1 %v3919_v15  ;;  %v3923_v59 = vpack.c.bf16 %v3897_v1, %v3896_v40  ;;  %v3901_v27 = vmul.f32 %v3885_v21, %v8271_v0  ;;  %v3902_v12 = vmul.f32 %v3885_v21, %v8276_v32  ;;  %v3903_v6 = vmul.f32 %v3885_v21, %v8280_v3 }
 0x4e9   : > { %4988 = vmatprep.mubr.bf16.mxu1 %v3920_v49  ;;  %v3924_v52 = vpack.c.bf16 %v3899_v9, %v3898_v4  ;;  %v3904_v46 = vmul.f32 %v3885_v21, %v8283_v38  ;;  %v3905_v29 = vmul.f32 %v3885_v21, %v8287_v16  ;;  %v3906_v22 = vmul.f32 %v3885_v21, %v8292_v41  ;;  %v5351_v49 = vld [vmem:[%s5466_s14 + $0x18] sm:$0xff]  }
 0x4ea   : > { %v3925_v18 = vpack.c.bf16 %v3901_v27, %v3900_v25  ;;  %v3926_v63 = vpack.c.bf16 %v3903_v6, %v3902_v12  ;;  %v3907_v8 = vmul.f32 %v3885_v21, %v8296_v61  ;;  %v3908_v0 = vmul.f32 %v3885_v21, %v8299_v31 }
 0x4eb   : > { %v3927_v33 = vpack.c.bf16 %v3905_v29, %v3904_v46  ;;  %v3909_v32 = vmul.f32 %v3885_v21, %v8303_v62  ;;  %v3910_v3 = vmul.f32 %v3885_v21, %v8308_v60  ;;  %v3911_v42 = vmul.f32 %v3885_v21, %v8312_v45  ;;  %v5353_v29 = vld [vmem:[%s5466_s14 + $0x28] sm:$0xff]  }
 0x4ec   : > { %v3928_v36 = vpack.c.bf16 %v3907_v8, %v3906_v22  ;;  %v3912_v16 = vmul.f32 %v3885_v21, %v8315_v39  ;;  %v3913_v41 = vmul.f32 %v3885_v21, %v8319_v53  ;;  %v3914_v61 = vmul.f32 %v3885_v21, %v8324_v26  ;;  %v8413_v39 = vld [vmem:[%s8500_s11] ss:$0 sm:$0xff] }
 0x4ed   : > { %v3929_v44 = vpack.c.bf16 %v3909_v32, %v3908_v0  ;;  %v3930_v38 = vpack.c.bf16 %v3911_v42, %v3910_v3  ;;  %v3915_v7 = vmul.f32 %v3885_v21, %v8328_v24  ;;  %v3916_v60 = vmul.f32 %v3885_v21, %v8332_v10  ;;  %v5349_v24 = vld [vmem:[%s5466_s14 + $0x8] sm:$0xff]   ;;  %v5354_v0 = vld [vmem:[%s5466_s14 + $0x20] sm:$0xff]  }
 0x4ee   : > { %v3931_v31 = vpack.c.bf16 %v3913_v41, %v3912_v16  ;;  %v3917_v45 = vmul.f32 %v3885_v21, %v8336_v51  ;;  %v4168_v14 = vunpack.c.l.bf16 %v5349_v24  ;;  %v4169_v13 = vunpack.c.h.bf16 %v5349_v24 }
 0x4ef   : > { %v3932_v62 = vpack.c.bf16 %v3915_v7, %v3914_v61  ;;  %v4166_v10 = vunpack.c.l.bf16 %v5350_v30  ;;  %v4172_v50 = vunpack.c.l.bf16 %v5351_v49  ;;  %v4173_v2 = vunpack.c.h.bf16 %v5351_v49 }
 0x4f0   : > { %4989 = vmatmul.mubr.bf16.gmra.mxu1 %v3921_v54  ;;  %v3933_v55 = vpack.c.bf16 %v3917_v45, %v3916_v60  ;;  %v5352_v54 = vld [vmem:[%s5466_s14 + $0x10] sm:$0xff]   ;;  %v4176_v22 = vunpack.c.l.bf16 %v5353_v29  ;;  %v4177_v8 = vunpack.c.h.bf16 %v5353_v29  ;;  %v4174_v32 = vunpack.c.l.bf16 %v5354_v0 }
 0x4f1   : > { %4992 = vmatprep.mubr.bf16.mxu1 %v3922_v11  ;;  %v4170_v11 = vunpack.c.l.bf16 %v5352_v54  ;;  %v4171_v1 = vunpack.c.h.bf16 %v5352_v54  ;;  %v4175_v42 = vunpack.c.h.bf16 %v5354_v0 }
 0x4f8   : > { %4993 = vmatmul.mubr.bf16.gmra.mxu1 %v3923_v59 }
 0x4f9   : > { %4996 = vmatprep.mubr.bf16.mxu1 %v3924_v52 }
 0x500   : > { %4997 = vmatmul.mubr.bf16.gmra.mxu1 %v3925_v18 }
 0x501   : > { %5000 = vmatprep.mubr.bf16.mxu1 %v3926_v63 }
 0x508   : > { %5001 = vmatmul.mubr.bf16.gmra.mxu1 %v3927_v33 }
 0x509   : > { %5004 = vmatprep.mubr.bf16.mxu1 %v3928_v36 }
 0x510   : > { %5005 = vmatmul.mubr.bf16.gmra.mxu1 %v3929_v44 }
 0x511   : > { %5008 = vmatprep.mubr.bf16.mxu1 %v3930_v38 }
 0x518   : > { %5009 = vmatmul.mubr.bf16.gmra.mxu1 %v3931_v31 }
 0x519   : > { %5012 = vmatprep.mubr.bf16.mxu1 %v3932_v62 }
 0x520   : > { %5013 = vmatmul.mubr.bf16.gmra.mxu1 %v3933_v55 }
 0x5a8   : > { %v4986_v57 = vpop.f32.mrf.mxu1 }
 0x5a9   : > { %v4048_v26 = vadd.f32 %v4986_v57, %v8413_v39  ;;  %v5355_v57 = vld [vmem:[%s5466_s14 + $0x38] sm:$0xff]  }
 0x5aa   : > { %v4039_v53 = vpop.f32.mrf.mxu1 }
 0x5ab   : > { %v4040_v51 = vadd.f32 %v8413_v39, %v4039_v53  ;;  %v4200_v58 = vadd.f32 %v4168_v14, %v4048_v26  ;;  %v4180_v53 = vunpack.c.l.bf16 %v5355_v57  ;;  %v4181_v26 = vunpack.c.h.bf16 %v5355_v57 }
 0x5ac   : > { %v4987_v20 = vpop.f32.mrf.mxu1 }
 0x5ad   : > { %v4051_v34 = vadd.f32 %v4987_v20, %v8413_v39  ;;  %v4198_v28 = vadd.f32 %v4166_v10, %v4040_v51 }
 0x5ae   : > { %v4042_v21 = vpop.f32.mrf.mxu1 }
 0x5af   : > { %v4201_v5 = vadd.f32 %v4169_v13, %v4051_v34  ;;  %v4043_v17 = vadd.f32 %v8413_v39, %v4042_v21  ;;  %v5356_v13 = vld [vmem:[%s5466_s14 + $0x30] sm:$0xff]  }
 0x5b0   : > { %v4990_v37 = vpop.f32.mrf.mxu1  ;;  %v4178_v20 = vunpack.c.l.bf16 %v5356_v13  ;;  %v4179_v10 = vunpack.c.h.bf16 %v5356_v13 }
 0x5b1   : > { %v4740_v19 = vpack.c.bf16 %v4201_v5, %v4200_v58  ;;  %v4199_v56 = vadd.f32 %v4167_v43, %v4043_v17  ;;  %v4064_v15 = vadd.f32 %v4990_v37, %v8413_v39 }
 0x5b2   : > { %v4055_v47 = vpop.f32.mrf.mxu1 }
 0x5b3   : > { %4820 = vst [vmem:[%s8426_s27 + $0x8] sm:$0xff] %v4740_v19   ;;  %v4735_v35 = vpack.c.bf16 %v4199_v56, %v4198_v28  ;;  %v4056_v48 = vadd.f32 %v8413_v39, %v4055_v47  ;;  %v4204_v9 = vadd.f32 %v4172_v50, %v4064_v15  ;;  %v5357_v47 = vld [vmem:[%s5466_s14 + $0x48] sm:$0xff]  }
 0x5b4   : > { %v4991_v23 = vpop.f32.mrf.mxu1  ;;  %v4185_v15 = vunpack.c.h.bf16 %v5357_v47 }
 0x5b5   : > { %4736 = vst [vmem:[%s8426_s27] sm:$0xff] %v4735_v35   ;;  %v4067_v40 = vadd.f32 %v4991_v23, %v8413_v39  ;;  %v4202_v27 = vadd.f32 %v4170_v11, %v4056_v48  ;;  %v4184_v35 = vunpack.c.l.bf16 %v5357_v47 }
 0x5b6   : > { %v4058_v4 = vpop.f32.mrf.mxu1 }
 0x5b7   : > { %v4205_v59 = vadd.f32 %v4173_v2, %v4067_v40  ;;  %v4059_v52 = vadd.f32 %v8413_v39, %v4058_v4  ;;  %v5358_v2 = vld [vmem:[%s5466_s14 + $0x40] sm:$0xff]  }
 0x5b8   : > { %v4994_v25 = vpop.f32.mrf.mxu1  ;;  %v4182_v23 = vunpack.c.l.bf16 %v5358_v2  ;;  %v4183_v54 = vunpack.c.h.bf16 %v5358_v2 }
 0x5b9   : > { %v4750_v12 = vpack.c.bf16 %v4205_v59, %v4204_v9  ;;  %v4203_v6 = vadd.f32 %v4171_v1, %v4059_v52  ;;  %v4080_v46 = vadd.f32 %v4994_v25, %v8413_v39 }
 0x5ba   : > { %v4071_v18 = vpop.f32.mrf.mxu1 }
 0x5bb   : > { %4822 = vst [vmem:[%s8426_s27 + $0x18] sm:$0xff] %v4750_v12   ;;  %v4745_v63 = vpack.c.bf16 %v4203_v6, %v4202_v27  ;;  %v4072_v36 = vadd.f32 %v8413_v39, %v4071_v18  ;;  %v4208_v38 = vadd.f32 %v4176_v22, %v4080_v46  ;;  %v5359_v18 = vld [vmem:[%s5466_s14 + $0x58] sm:$0xff]  }
 0x5bc   : > { %v4995_v33 = vpop.f32.mrf.mxu1  ;;  %v4189_v46 = vunpack.c.h.bf16 %v5359_v18 }
 0x5bd   : > { %4821 = vst [vmem:[%s8426_s27 + $0x10] sm:$0xff] %v4745_v63   ;;  %v4083_v3 = vadd.f32 %v4995_v33, %v8413_v39  ;;  %v4206_v7 = vadd.f32 %v4174_v32, %v4072_v36  ;;  %v4188_v63 = vunpack.c.l.bf16 %v5359_v18 }
 0x5be   : > { %v4074_v44 = vpop.f32.mrf.mxu1 }
 0x5bf   : > { %v4209_v16 = vadd.f32 %v4177_v8, %v4083_v3  ;;  %v4075_v41 = vadd.f32 %v8413_v39, %v4074_v44  ;;  %v5360_v8 = vld [vmem:[%s5466_s14 + $0x50] sm:$0xff]  }
 0x5c0   : > { %v4998_v61 = vpop.f32.mrf.mxu1  ;;  %v4186_v33 = vunpack.c.l.bf16 %v5360_v8  ;;  %v4187_v0 = vunpack.c.h.bf16 %v5360_v8 }
 0x5c1   : > { %v4760_v31 = vpack.c.bf16 %v4209_v16, %v4208_v38  ;;  %v4207_v62 = vadd.f32 %v4175_v42, %v4075_v41  ;;  %v4096_v55 = vadd.f32 %v4998_v61, %v8413_v39 }
 0x5c2   : > { %v4087_v60 = vpop.f32.mrf.mxu1 }
 0x5c3   : > { %4824 = vst [vmem:[%s8426_s27 + $0x28] sm:$0xff] %v4760_v31   ;;  %v4755_v45 = vpack.c.bf16 %v4207_v62, %v4206_v7  ;;  %v4088_v14 = vadd.f32 %v8413_v39, %v4087_v60  ;;  %v4212_v51 = vadd.f32 %v4180_v53, %v4096_v55  ;;  %v5361_v60 = vld [vmem:[%s5466_s14 + $0x68] sm:$0xff]  }
 0x5c4   : > { %v4999_v24 = vpop.f32.mrf.mxu1  ;;  %v4193_v55 = vunpack.c.h.bf16 %v5361_v60 }
 0x5c5   : > { %4823 = vst [vmem:[%s8426_s27 + $0x20] sm:$0xff] %v4755_v45   ;;  %v4099_v30 = vadd.f32 %v4999_v24, %v8413_v39  ;;  %v4210_v5 = vadd.f32 %v4178_v20, %v4088_v14  ;;  %v4192_v45 = vunpack.c.l.bf16 %v5361_v60 }
 0x5c6   : > { %v4090_v43 = vpop.f32.mrf.mxu1 }
 0x5c7   : > { %v4213_v34 = vadd.f32 %v4181_v26, %v4099_v30  ;;  %v4091_v21 = vadd.f32 %v8413_v39, %v4090_v43  ;;  %v5362_v26 = vld [vmem:[%s5466_s14 + $0x60] sm:$0xff]  }
 0x5c8   : > { %v5002_v58 = vpop.f32.mrf.mxu1  ;;  %v4190_v24 = vunpack.c.l.bf16 %v5362_v26  ;;  %v4191_v13 = vunpack.c.h.bf16 %v5362_v26 }
 0x5c9   : > { %v4770_v17 = vpack.c.bf16 %v4213_v34, %v4212_v51  ;;  %v4211_v37 = vadd.f32 %v4179_v10, %v4091_v21  ;;  %v4112_v56 = vadd.f32 %v5002_v58, %v8413_v39 }
 0x5ca   : > { %v4103_v28 = vpop.f32.mrf.mxu1 }
 0x5cb   : > { %4826 = vst [vmem:[%s8426_s27 + $0x38] sm:$0xff] %v4770_v17   ;;  %v4765_v19 = vpack.c.bf16 %v4211_v37, %v4210_v5  ;;  %v4104_v50 = vadd.f32 %v8413_v39, %v4103_v28  ;;  %v4216_v40 = vadd.f32 %v4184_v35, %v4112_v56  ;;  %v5363_v28 = vld [vmem:[%s5466_s14 + $0x78] sm:$0xff]  }
 0x5cc   : > { %v5003_v49 = vpop.f32.mrf.mxu1  ;;  %v4197_v56 = vunpack.c.h.bf16 %v5363_v28 }
 0x5cd   : > { %4825 = vst [vmem:[%s8426_s27 + $0x30] sm:$0xff] %v4765_v19   ;;  %v4115_v48 = vadd.f32 %v5003_v49, %v8413_v39  ;;  %v4214_v59 = vadd.f32 %v4182_v23, %v4104_v50  ;;  %v4196_v19 = vunpack.c.l.bf16 %v5363_v28 }
 0x5ce   : > { %v4106_v11 = vpop.f32.mrf.mxu1 }
 0x5cf   : > { %v4217_v1 = vadd.f32 %v4185_v15, %v4115_v48  ;;  %v4107_v4 = vadd.f32 %v8413_v39, %v4106_v11  ;;  %v5364_v15 = vld [vmem:[%s5466_s14 + $0x70] sm:$0xff]  }
 0x5d0   : > { %v5006_v9 = vpop.f32.mrf.mxu1  ;;  %v4194_v49 = vunpack.c.l.bf16 %v5364_v15  ;;  %v4195_v2 = vunpack.c.h.bf16 %v5364_v15 }
 0x5d1   : > { %v4780_v52 = vpack.c.bf16 %v4217_v1, %v4216_v40  ;;  %v4215_v25 = vadd.f32 %v4183_v54, %v4107_v4  ;;  %v4128_v6 = vadd.f32 %v5006_v9, %v8413_v39 }
 0x5d2   : > { %v4119_v27 = vpop.f32.mrf.mxu1 }
 0x5d3   : > { %4828 = vst [vmem:[%s8426_s27 + $0x48] sm:$0xff] %v4780_v52   ;;  %v4775_v12 = vpack.c.bf16 %v4215_v25, %v4214_v59  ;;  %v4120_v22 = vadd.f32 %v8413_v39, %v4119_v27  ;;  %v4220_v3 = vadd.f32 %v4188_v63, %v4128_v6 }
 0x5d4   : > { %v5007_v29 = vpop.f32.mrf.mxu1 }
 0x5d5   : > { %4827 = vst [vmem:[%s8426_s27 + $0x40] sm:$0xff] %v4775_v12   ;;  %v4131_v36 = vadd.f32 %v5007_v29, %v8413_v39  ;;  %v4218_v16 = vadd.f32 %v4186_v33, %v4120_v22 }
 0x5d6   : > { %v4122_v32 = vpop.f32.mrf.mxu1 }
 0x5d7   : > { %v4221_v42 = vadd.f32 %v4189_v46, %v4131_v36  ;;  %v4123_v44 = vadd.f32 %v8413_v39, %v4122_v32 }
 0x5d8   : > { %v5010_v38 = vpop.f32.mrf.mxu1 }
 0x5d9   : > { %v4790_v41 = vpack.c.bf16 %v4221_v42, %v4220_v3  ;;  %v4219_v61 = vadd.f32 %v4187_v0, %v4123_v44  ;;  %v4144_v62 = vadd.f32 %v5010_v38, %v8413_v39 }
 0x5da   : > { %v4135_v7 = vpop.f32.mrf.mxu1 }
 0x5db   : > { %4830 = vst [vmem:[%s8426_s27 + $0x58] sm:$0xff] %v4790_v41   ;;  %v4785_v31 = vpack.c.bf16 %v4219_v61, %v4218_v16  ;;  %v4136_v53 = vadd.f32 %v8413_v39, %v4135_v7  ;;  %v4224_v30 = vadd.f32 %v4192_v45, %v4144_v62 }
 0x5dc   : > { %v5011_v57 = vpop.f32.mrf.mxu1 }
 0x5dd   : > { %4829 = vst [vmem:[%s8426_s27 + $0x50] sm:$0xff] %v4785_v31   ;;  %v4147_v14 = vadd.f32 %v5011_v57, %v8413_v39  ;;  %v4222_v34 = vadd.f32 %v4190_v24, %v4136_v53 }
 0x5de   : > { %v4138_v20 = vpop.f32.mrf.mxu1 }
 0x5df   : > { %v4225_v10 = vadd.f32 %v4193_v55, %v4147_v14  ;;  %v4139_v43 = vadd.f32 %v8413_v39, %v4138_v20 }
 0x5e0   : > { %v5014_v51 = vpop.f32.mrf.mxu1 }
 0x5e1   : > { %v4800_v21 = vpack.c.bf16 %v4225_v10, %v4224_v30  ;;  %v4223_v58 = vadd.f32 %v4191_v13, %v4139_v43  ;;  %v4160_v37 = vadd.f32 %v5014_v51, %v8413_v39 }
 0x5e2   : > { %v4151_v5 = vpop.f32.mrf.mxu1 }
 0x5e3   : > { %4832 = vst [vmem:[%s8426_s27 + $0x68] sm:$0xff] %v4800_v21   ;;  %v4795_v17 = vpack.c.bf16 %v4223_v58, %v4222_v34  ;;  %v4152_v35 = vadd.f32 %v8413_v39, %v4151_v5  ;;  %v4228_v48 = vadd.f32 %v4196_v19, %v4160_v37 }
 0x5e4   : > { %v5015_v47 = vpop.f32.mrf.mxu1 }
 0x5e5   : > { %4831 = vst [vmem:[%s8426_s27 + $0x60] sm:$0xff] %v4795_v17   ;;  %v4163_v50 = vadd.f32 %v5015_v47, %v8413_v39  ;;  %v4226_v40 = vadd.f32 %v4194_v49, %v4152_v35 }
 0x5e6   : > { %v4154_v23 = vpop.f32.mrf.mxu1 }
 0x5e7   : > { %v4229_v54 = vadd.f32 %v4197_v56, %v4163_v50  ;;  %v4155_v11 = vadd.f32 %v8413_v39, %v4154_v23 }
 0x5e9   : > { %v4810_v1 = vpack.c.bf16 %v4229_v54, %v4228_v48  ;;  %v4227_v4 = vadd.f32 %v4195_v2, %v4155_v11 }
 0x5eb   : > { %4834 = vst [vmem:[%s8426_s27 + $0x78] sm:$0xff] %v4810_v1   ;;  %v4805_v9 = vpack.c.bf16 %v4227_v4, %v4226_v40 }
 0x5ed   : > { %4833 = vst [vmem:[%s8426_s27 + $0x70] sm:$0xff] %v4805_v9  }
 0x5ee PF: > { %s22_s21 = sadd.s32 1, %s5371_s21  }
 0x5ef   : > { %p19_p4 = scmp.ge.s32.totalorder %s22_s21, 4  }
 0x5f1   :  { %21 = sbr.rel (!%p19_p4) target bundleno = 1 (0x1), region = 99 }

</bundles_post_ra>
